<compile_context>
chip_gen: v5e
topology: v5e:2x2
jax: 0.10.0
libtpu: 0.0.40
codegen_flags: <defaults>
</compile_context>

<pallas_src>
import functools

import jax
import jax.numpy as jnp
from jax import lax
from jax.experimental import pallas as pl
from jax.experimental.pallas import tpu as pltpu

C = 128            # internal (lane-dense) channel width
K9 = 9 * C         # im2col contraction depth (3x3 taps x 128 channels)
_EPS = 1e-5
_CHANNELS = [(3, 128), (128, 64), (64, 32), (32, 16), (16, 3)]


# ----------------------------------------------------------------------------
# Fused kernel: whole network for one batch element, resident in VMEM.
# ----------------------------------------------------------------------------
def fused_cnn_kernel(x_ref, w_ref, s_ref, b_ref, o_ref,
                     p1, p2, p3, p4, p5, col_ref, *, H0, W0):
    # x_ref : (1, H0, W0, 3)   NHWC input block
    # w_ref : (5, 9*C, C)      per-layer im2col weights (zero-padded to 128 ch)
    # s_ref : (5, 1, C)        folded BN scale  (0 on padded channels)
    # b_ref : (5, 1, C)        folded BN shift  (0 on padded channels)
    # o_ref : (1, H2*W2, C)    flat lane-dense output, only channels [0, 3) used
    # p1..p5: (H+2, W+2, C)    zero-padded activation scratch per layer input
    # col_ref: (H0*W0, 9*C)    im2col staging buffer, reused by every layer
    H1, W1 = H0 // 2, W0 // 2
    H2, W2 = H1 // 2, W1 // 2

    def conv_bn_relu(p_ref, layer, H, W):
        M = H * W
        # im2col: pack the 9 shifted windows into lane-aligned 128-wide blocks.
        for ky in range(3):
            for kx in range(3):
                t = ky * 3 + kx
                win = p_ref[ky:ky + H, kx:kx + W, :]               # (H, W, C)
                col_ref[0:M, t * C:(t + 1) * C] = win.reshape(M, C)
        acc = jnp.dot(col_ref[0:M, :], w_ref[layer],
                      preferred_element_type=jnp.float32)          # (M, C)
        # folded BatchNorm (eval mode) + ReLU, applied to the f32 accumulator
        return jnp.maximum(acc * s_ref[layer] + b_ref[layer], 0.0)

    def maxpool2x2(y_flat, H, W):
        y = y_flat.reshape(H, W, C)
        y = y.reshape(H // 2, 2, W, C).max(axis=1)
        y = y.reshape(H // 2, W // 2, 2, C).max(axis=2)
        return y                                                   # (H//2, W//2, C)

    # Zero the padded buffers: conv borders and unused lanes stay exactly 0.
    p1[...] = jnp.zeros_like(p1)
    p2[...] = jnp.zeros_like(p2)
    p3[...] = jnp.zeros_like(p3)
    p4[...] = jnp.zeros_like(p4)
    p5[...] = jnp.zeros_like(p5)

    # Place the (H0, W0, 3) NHWC input into the first 3 lanes of p1's interior.
    p1[1:H0 + 1, 1:W0 + 1, 0:x_ref.shape[3]] = x_ref[0]

    # layer 1: conv(3->128) + bn + relu, 2x2 max-pool
    y = conv_bn_relu(p1, 0, H0, W0)
    p2[1:H1 + 1, 1:W1 + 1, :] = maxpool2x2(y, H0, W0)

    # layer 2: conv(128->64) + bn + relu, 2x2 max-pool
    y = conv_bn_relu(p2, 1, H1, W1)
    p3[1:H2 + 1, 1:W2 + 1, :] = maxpool2x2(y, H1, W1)

    # layer 3: conv(64->32) + bn + relu
    y = conv_bn_relu(p3, 2, H2, W2)
    p4[1:H2 + 1, 1:W2 + 1, :] = y.reshape(H2, W2, C)

    # layer 4: conv(32->16) + bn + relu
    y = conv_bn_relu(p4, 3, H2, W2)
    p5[1:H2 + 1, 1:W2 + 1, :] = y.reshape(H2, W2, C)

    # layer 5: conv(16->3) + bn + relu -> lane-dense (H2*W2, 128) store
    y = conv_bn_relu(p5, 4, H2, W2)
    o_ref[0] = y.astype(o_ref.dtype)


# ----------------------------------------------------------------------------
# Wrapper: single pallas_call for the whole forward pass.
# ----------------------------------------------------------------------------
def cnn_forward(x_nchw, packed):
    """x_nchw: (N, 3, H, W) f32.  Returns (N, 3, H//4, W//4) f32 (NCHW)."""
    w, s, b = packed
    N, cin, H0, W0 = x_nchw.shape
    H1, W1 = H0 // 2, W0 // 2
    H2, W2 = H1 // 2, W1 // 2

    x_nhwc = jnp.transpose(x_nchw, (0, 2, 3, 1))       # tiny boundary transpose

    kernel = functools.partial(fused_cnn_kernel, H0=H0, W0=W0)
    out_flat = pl.pallas_call(
        kernel,
        out_shape=jax.ShapeDtypeStruct((N, H2 * W2, C), jnp.float32),
        grid_spec=pltpu.PrefetchScalarGridSpec(
            num_scalar_prefetch=0,
            grid=(N,),
            in_specs=[
                pl.BlockSpec((1, H0, W0, cin), lambda n: (n, 0, 0, 0)),
                pl.BlockSpec((5, K9, C), lambda n: (0, 0, 0)),
                pl.BlockSpec((5, 1, C), lambda n: (0, 0, 0)),
                pl.BlockSpec((5, 1, C), lambda n: (0, 0, 0)),
            ],
            out_specs=pl.BlockSpec((1, H2 * W2, C), lambda n: (n, 0, 0)),
            scratch_shapes=[
                pltpu.VMEM((H0 + 2, W0 + 2, C), jnp.float32),   # p1
                pltpu.VMEM((H1 + 2, W1 + 2, C), jnp.float32),   # p2
                pltpu.VMEM((H2 + 2, W2 + 2, C), jnp.float32),   # p3
                pltpu.VMEM((H2 + 2, W2 + 2, C), jnp.float32),   # p4
                pltpu.VMEM((H2 + 2, W2 + 2, C), jnp.float32),   # p5
                pltpu.VMEM((H0 * W0, K9), jnp.float32),         # col (im2col)
            ]),
        compiler_params=pltpu.CompilerParams(
            dimension_semantics=("parallel",),
            vmem_limit_bytes=32 * 1024 * 1024),
    )(x_nhwc, w, s, b)

    out = out_flat.reshape(N, H2, W2, C)[..., :3]      # drop padded channels
    return jnp.transpose(out, (0, 3, 1, 2))            # NHWC -> NCHW


# ----------------------------------------------------------------------------
# Parameter construction (deterministic, synthetic) with eval-mode BN folding,
# plus packing (channel padding to 128 + im2col weight layout).
# ----------------------------------------------------------------------------
def make_params(key):
    params = []
    for (cin, cout) in _CHANNELS:
        key, k1, k2, k3, k4, k5, k6 = jax.random.split(key, 7)
        w_pt = jax.random.normal(k1, (cout, cin, 3, 3), jnp.float32) * 0.1
        conv_b = jax.random.normal(k2, (cout,), jnp.float32) * 0.1
        gamma = 1.0 + 0.1 * jax.random.normal(k3, (cout,), jnp.float32)
        beta = 0.1 * jax.random.normal(k4, (cout,), jnp.float32)
        run_mean = 0.1 * jax.random.normal(k5, (cout,), jnp.float32)
        run_var = jnp.abs(jax.random.normal(k6, (cout,), jnp.float32)) + 0.5

        scale = gamma / jnp.sqrt(run_var + _EPS)
        bias = beta + scale * (conv_b - run_mean)
        w_hwio = jnp.transpose(w_pt, (2, 3, 1, 0))      # (3, 3, Cin, Cout)
        params.append((w_hwio, scale, bias))
    return params


def pack_params(params):
    ws, ss, bs = [], [], []
    for (w_hwio, scale, bias) in params:
        _, _, cin, cout = w_hwio.shape
        wp = jnp.zeros((3, 3, C, C), jnp.float32).at[:, :, :cin, :cout].set(w_hwio)
        ws.append(wp.reshape(K9, C))                    # rows ordered (ky, kx, cin)
        ss.append(jnp.zeros((C,), jnp.float32).at[:cout].set(scale))
        bs.append(jnp.zeros((C,), jnp.float32).at[:cout].set(bias))
    return (jnp.stack(ws),                               # (5, 9*128, 128)
            jnp.stack(ss)[:, None, :],                   # (5, 1, 128)
            jnp.stack(bs)[:, None, :])                   # (5, 1, 128)


# Pure-JAX reference (same folded-BN semantics) for the correctness check.
def cnn_forward_ref(x_nchw, params):
    x = jnp.transpose(x_nchw, (0, 2, 3, 1))
    for i, (w, scale, bias) in enumerate(params):
        y = lax.conv_general_dilated(
            x, w, window_strides=(1, 1), padding="SAME",
            dimension_numbers=("NHWC", "HWIO", "NHWC"))
        y = jnp.maximum(y * scale + bias, 0.0)
        if i < 2:  # pool1, pool2
            y = lax.reduce_window(y, -jnp.inf, lax.max,
                                  (1, 2, 2, 1), (1, 2, 2, 1), "VALID")
        x = y
    return jnp.transpose(x, (0, 3, 1, 2))


if __name__ == "__main__":
    key = jax.random.PRNGKey(0)
    kx, kp = jax.random.split(key)

    # PyTorch-style NCHW input: batch=2, channels=3, 16x16 spatial.
    x = jax.random.normal(kx, (2, 3, 16, 16), jnp.float32)
    params = make_params(kp)
    packed = pack_params(params)

    out = jax.block_until_ready(cnn_forward(x, packed))
    ref = jax.block_until_ready(cnn_forward_ref(x, params))

    assert out.shape == (2, 3, 4, 4), out.shape
    assert jnp.allclose(out, ref, atol=1e-3, rtol=1e-3), (
        float(jnp.max(jnp.abs(out - ref))))

    print("KERNEL_OK")
</pallas_src>

<mosaic_0001>
module attributes {stable_mosaic.version = 11 : i64} {
  func.func @fused_cnn_kernel(%arg0: i32, %arg1: memref<1x16x16x3xf32, #tpu.memory_space<vmem>>, %arg2: memref<5x1152x128xf32, #tpu.memory_space<vmem>>, %arg3: memref<5x1x128xf32, #tpu.memory_space<vmem>>, %arg4: memref<5x1x128xf32, #tpu.memory_space<vmem>>, %arg5: memref<1x16x128xf32, #tpu.memory_space<vmem>>, %arg6: memref<18x18x128xf32, #tpu.memory_space<vmem>>, %arg7: memref<10x10x128xf32, #tpu.memory_space<vmem>>, %arg8: memref<6x6x128xf32, #tpu.memory_space<vmem>>, %arg9: memref<6x6x128xf32, #tpu.memory_space<vmem>>, %arg10: memref<6x6x128xf32, #tpu.memory_space<vmem>>, %arg11: memref<256x1152xf32, #tpu.memory_space<vmem>>) attributes {dimension_semantics = [#tpu.dimension_semantics<parallel>], iteration_bounds = array<i64: 2>, scalar_prefetch = 0 : i64, scratch_operands = 6 : i64, tpu.core_type = #tpu.core_type<tc>, window_params = [{transform_indices = @transform_0, window_bounds = array<i64: 1, 16, 16, 3>}, {pipeline_mode = #tpu.pipeline_mode<synchronous>, transform_indices = @transform_1, window_bounds = array<i64: 5, 1152, 128>}, {pipeline_mode = #tpu.pipeline_mode<synchronous>, transform_indices = @transform_2, window_bounds = array<i64: 5, 1, 128>}, {pipeline_mode = #tpu.pipeline_mode<synchronous>, transform_indices = @transform_3, window_bounds = array<i64: 5, 1, 128>}, {transform_indices = @transform_4, window_bounds = array<i64: 1, 16, 128>}]} {
    %cst = arith.constant 0.000000e+00 : f32
    %0 = vector.broadcast %cst : f32 to vector<18x18x128xf32>
    %c0 = arith.constant 0 : index
    %c0_0 = arith.constant 0 : index
    %c0_1 = arith.constant 0 : index
    %1 = vector.load %arg6[%c0, %c0_0, %c0_1] : memref<18x18x128xf32, #tpu.memory_space<vmem>>, vector<18x18x128xf32>
    tpu.vector_store %arg6[%c0, %c0_0, %c0_1], %0 {strides = array<i32>} : memref<18x18x128xf32, #tpu.memory_space<vmem>>, vector<18x18x128xf32>,
    %cst_2 = arith.constant 0.000000e+00 : f32
    %2 = vector.broadcast %cst_2 : f32 to vector<10x10x128xf32>
    %c0_3 = arith.constant 0 : index
    %c0_4 = arith.constant 0 : index
    %c0_5 = arith.constant 0 : index
    %3 = vector.load %arg7[%c0_3, %c0_4, %c0_5] : memref<10x10x128xf32, #tpu.memory_space<vmem>>, vector<10x10x128xf32>
    tpu.vector_store %arg7[%c0_3, %c0_4, %c0_5], %2 {strides = array<i32>} : memref<10x10x128xf32, #tpu.memory_space<vmem>>, vector<10x10x128xf32>,
    %cst_6 = arith.constant 0.000000e+00 : f32
    %4 = vector.broadcast %cst_6 : f32 to vector<6x6x128xf32>
    %c0_7 = arith.constant 0 : index
    %c0_8 = arith.constant 0 : index
    %c0_9 = arith.constant 0 : index
    %5 = vector.load %arg8[%c0_7, %c0_8, %c0_9] : memref<6x6x128xf32, #tpu.memory_space<vmem>>, vector<6x6x128xf32>
    tpu.vector_store %arg8[%c0_7, %c0_8, %c0_9], %4 {strides = array<i32>} : memref<6x6x128xf32, #tpu.memory_space<vmem>>, vector<6x6x128xf32>,
    %cst_10 = arith.constant 0.000000e+00 : f32
    %6 = vector.broadcast %cst_10 : f32 to vector<6x6x128xf32>
    %c0_11 = arith.constant 0 : index
    %c0_12 = arith.constant 0 : index
    %c0_13 = arith.constant 0 : index
    %7 = vector.load %arg9[%c0_11, %c0_12, %c0_13] : memref<6x6x128xf32, #tpu.memory_space<vmem>>, vector<6x6x128xf32>
    tpu.vector_store %arg9[%c0_11, %c0_12, %c0_13], %6 {strides = array<i32>} : memref<6x6x128xf32, #tpu.memory_space<vmem>>, vector<6x6x128xf32>,
    %cst_14 = arith.constant 0.000000e+00 : f32
    %8 = vector.broadcast %cst_14 : f32 to vector<6x6x128xf32>
    %c0_15 = arith.constant 0 : index
    %c0_16 = arith.constant 0 : index
    %c0_17 = arith.constant 0 : index
    %9 = vector.load %arg10[%c0_15, %c0_16, %c0_17] : memref<6x6x128xf32, #tpu.memory_space<vmem>>, vector<6x6x128xf32>
    tpu.vector_store %arg10[%c0_15, %c0_16, %c0_17], %8 {strides = array<i32>} : memref<6x6x128xf32, #tpu.memory_space<vmem>>, vector<6x6x128xf32>,
    %c0_18 = arith.constant 0 : index
    %c0_19 = arith.constant 0 : index
    %c0_20 = arith.constant 0 : index
    %c0_21 = arith.constant 0 : index
    %10 = vector.load %arg1[%c0_18, %c0_19, %c0_20, %c0_21] : memref<1x16x16x3xf32, #tpu.memory_space<vmem>>, vector<1x16x16x3xf32>
    %11 = vector.shape_cast %10 : vector<1x16x16x3xf32> to vector<16x16x3xf32>
    %c1 = arith.constant 1 : index
    %c1_22 = arith.constant 1 : index
    %c0_23 = arith.constant 0 : index
    %12 = vector.load %arg6[%c1, %c1_22, %c0_23] : memref<18x18x128xf32, #tpu.memory_space<vmem>>, vector<16x16x3xf32>
    tpu.vector_store %arg6[%c1, %c1_22, %c0_23], %11 {strides = array<i32>} : memref<18x18x128xf32, #tpu.memory_space<vmem>>, vector<16x16x3xf32>,
    %c0_24 = arith.constant 0 : index
    %c0_25 = arith.constant 0 : index
    %c0_26 = arith.constant 0 : index
    %13 = vector.load %arg6[%c0_24, %c0_25, %c0_26] : memref<18x18x128xf32, #tpu.memory_space<vmem>>, vector<16x16x128xf32>
    %14 = vector.shape_cast %13 : vector<16x16x128xf32> to vector<256x128xf32>
    %c0_27 = arith.constant 0 : index
    %c0_28 = arith.constant 0 : index
    %15 = vector.load %arg11[%c0_27, %c0_28] : memref<256x1152xf32, #tpu.memory_space<vmem>>, vector<256x128xf32>
    tpu.vector_store %arg11[%c0_27, %c0_28], %14 {strides = array<i32>} : memref<256x1152xf32, #tpu.memory_space<vmem>>, vector<256x128xf32>,
    %c0_29 = arith.constant 0 : index
    %c1_30 = arith.constant 1 : index
    %c0_31 = arith.constant 0 : index
    %16 = vector.load %arg6[%c0_29, %c1_30, %c0_31] : memref<18x18x128xf32, #tpu.memory_space<vmem>>, vector<16x16x128xf32>
    %17 = vector.shape_cast %16 : vector<16x16x128xf32> to vector<256x128xf32>
    %c0_32 = arith.constant 0 : index
    %c128 = arith.constant 128 : index
    %18 = vector.load %arg11[%c0_32, %c128] : memref<256x1152xf32, #tpu.memory_space<vmem>>, vector<256x128xf32>
    tpu.vector_store %arg11[%c0_32, %c128], %17 {strides = array<i32>} : memref<256x1152xf32, #tpu.memory_space<vmem>>, vector<256x128xf32>,
    %c0_33 = arith.constant 0 : index
    %c2 = arith.constant 2 : index
    %c0_34 = arith.constant 0 : index
    %19 = vector.load %arg6[%c0_33, %c2, %c0_34] : memref<18x18x128xf32, #tpu.memory_space<vmem>>, vector<16x16x128xf32>
    %20 = vector.shape_cast %19 : vector<16x16x128xf32> to vector<256x128xf32>
    %c0_35 = arith.constant 0 : index
    %c256 = arith.constant 256 : index
    %21 = vector.load %arg11[%c0_35, %c256] : memref<256x1152xf32, #tpu.memory_space<vmem>>, vector<256x128xf32>
    tpu.vector_store %arg11[%c0_35, %c256], %20 {strides = array<i32>} : memref<256x1152xf32, #tpu.memory_space<vmem>>, vector<256x128xf32>,
    %c1_36 = arith.constant 1 : index
    %c0_37 = arith.constant 0 : index
    %c0_38 = arith.constant 0 : index
    %22 = vector.load %arg6[%c1_36, %c0_37, %c0_38] : memref<18x18x128xf32, #tpu.memory_space<vmem>>, vector<16x16x128xf32>
    %23 = vector.shape_cast %22 : vector<16x16x128xf32> to vector<256x128xf32>
    %c0_39 = arith.constant 0 : index
    %c384 = arith.constant 384 : index
    %24 = vector.load %arg11[%c0_39, %c384] : memref<256x1152xf32, #tpu.memory_space<vmem>>, vector<256x128xf32>
    tpu.vector_store %arg11[%c0_39, %c384], %23 {strides = array<i32>} : memref<256x1152xf32, #tpu.memory_space<vmem>>, vector<256x128xf32>,
    %c1_40 = arith.constant 1 : index
    %c1_41 = arith.constant 1 : index
    %c0_42 = arith.constant 0 : index
    %25 = vector.load %arg6[%c1_40, %c1_41, %c0_42] : memref<18x18x128xf32, #tpu.memory_space<vmem>>, vector<16x16x128xf32>
    %26 = vector.shape_cast %25 : vector<16x16x128xf32> to vector<256x128xf32>
    %c0_43 = arith.constant 0 : index
    %c512 = arith.constant 512 : index
    %27 = vector.load %arg11[%c0_43, %c512] : memref<256x1152xf32, #tpu.memory_space<vmem>>, vector<256x128xf32>
    tpu.vector_store %arg11[%c0_43, %c512], %26 {strides = array<i32>} : memref<256x1152xf32, #tpu.memory_space<vmem>>, vector<256x128xf32>,
    %c1_44 = arith.constant 1 : index
    %c2_45 = arith.constant 2 : index
    %c0_46 = arith.constant 0 : index
    %28 = vector.load %arg6[%c1_44, %c2_45, %c0_46] : memref<18x18x128xf32, #tpu.memory_space<vmem>>, vector<16x16x128xf32>
    %29 = vector.shape_cast %28 : vector<16x16x128xf32> to vector<256x128xf32>
    %c0_47 = arith.constant 0 : index
    %c640 = arith.constant 640 : index
    %30 = vector.load %arg11[%c0_47, %c640] : memref<256x1152xf32, #tpu.memory_space<vmem>>, vector<256x128xf32>
    tpu.vector_store %arg11[%c0_47, %c640], %29 {strides = array<i32>} : memref<256x1152xf32, #tpu.memory_space<vmem>>, vector<256x128xf32>,
    %c2_48 = arith.constant 2 : index
    %c0_49 = arith.constant 0 : index
    %c0_50 = arith.constant 0 : index
    %31 = vector.load %arg6[%c2_48, %c0_49, %c0_50] : memref<18x18x128xf32, #tpu.memory_space<vmem>>, vector<16x16x128xf32>
    %32 = vector.shape_cast %31 : vector<16x16x128xf32> to vector<256x128xf32>
    %c0_51 = arith.constant 0 : index
    %c768 = arith.constant 768 : index
    %33 = vector.load %arg11[%c0_51, %c768] : memref<256x1152xf32, #tpu.memory_space<vmem>>, vector<256x128xf32>
    tpu.vector_store %arg11[%c0_51, %c768], %32 {strides = array<i32>} : memref<256x1152xf32, #tpu.memory_space<vmem>>, vector<256x128xf32>,
    %c2_52 = arith.constant 2 : index
    %c1_53 = arith.constant 1 : index
    %c0_54 = arith.constant 0 : index
    %34 = vector.load %arg6[%c2_52, %c1_53, %c0_54] : memref<18x18x128xf32, #tpu.memory_space<vmem>>, vector<16x16x128xf32>
    %35 = vector.shape_cast %34 : vector<16x16x128xf32> to vector<256x128xf32>
    %c0_55 = arith.constant 0 : index
    %c896 = arith.constant 896 : index
    %36 = vector.load %arg11[%c0_55, %c896] : memref<256x1152xf32, #tpu.memory_space<vmem>>, vector<256x128xf32>
    tpu.vector_store %arg11[%c0_55, %c896], %35 {strides = array<i32>} : memref<256x1152xf32, #tpu.memory_space<vmem>>, vector<256x128xf32>,
    %c2_56 = arith.constant 2 : index
    %c2_57 = arith.constant 2 : index
    %c0_58 = arith.constant 0 : index
    %37 = vector.load %arg6[%c2_56, %c2_57, %c0_58] : memref<18x18x128xf32, #tpu.memory_space<vmem>>, vector<16x16x128xf32>
    %38 = vector.shape_cast %37 : vector<16x16x128xf32> to vector<256x128xf32>
    %c0_59 = arith.constant 0 : index
    %c1024 = arith.constant 1024 : index
    %39 = vector.load %arg11[%c0_59, %c1024] : memref<256x1152xf32, #tpu.memory_space<vmem>>, vector<256x128xf32>
    tpu.vector_store %arg11[%c0_59, %c1024], %38 {strides = array<i32>} : memref<256x1152xf32, #tpu.memory_space<vmem>>, vector<256x128xf32>,
    %c0_60 = arith.constant 0 : index
    %c0_61 = arith.constant 0 : index
    %40 = vector.load %arg11[%c0_60, %c0_61] : memref<256x1152xf32, #tpu.memory_space<vmem>>, vector<256x1152xf32>
    %c0_62 = arith.constant 0 : index
    %c0_63 = arith.constant 0 : index
    %c0_64 = arith.constant 0 : index
    %41 = vector.load %arg2[%c0_62, %c0_63, %c0_64] : memref<5x1152x128xf32, #tpu.memory_space<vmem>>, vector<1x1152x128xf32>
    %42 = vector.shape_cast %41 : vector<1x1152x128xf32> to vector<1152x128xf32>
    %cst_65 = arith.constant dense<0.000000e+00> : vector<256x128xf32>
    %43 = tpu.matmul %40, %42, %cst_65 {dimension_numbers = #tpu.dot_dimension_numbers<[1], [0], [0], [1], [0, 0, 1, 1], [], []>} : vector<256x1152xf32>, vector<1152x128xf32>, vector<256x128xf32> -> vector<256x128xf32>
    %c0_66 = arith.constant 0 : index
    %c0_67 = arith.constant 0 : index
    %c0_68 = arith.constant 0 : index
    %44 = vector.load %arg3[%c0_66, %c0_67, %c0_68] : memref<5x1x128xf32, #tpu.memory_space<vmem>>, vector<1x1x128xf32>
    %45 = vector.shape_cast %44 : vector<1x1x128xf32> to vector<1x128xf32>
    %46 = vector.broadcast %45 : vector<1x128xf32> to vector<256x128xf32>
    %47 = arith.mulf %43, %46 : vector<256x128xf32>
    %c0_69 = arith.constant 0 : index
    %c0_70 = arith.constant 0 : index
    %c0_71 = arith.constant 0 : index
    %48 = vector.load %arg4[%c0_69, %c0_70, %c0_71] : memref<5x1x128xf32, #tpu.memory_space<vmem>>, vector<1x1x128xf32>
    %49 = vector.shape_cast %48 : vector<1x1x128xf32> to vector<1x128xf32>
    %50 = vector.broadcast %49 : vector<1x128xf32> to vector<256x128xf32>
    %51 = arith.addf %47, %50 : vector<256x128xf32>
    %cst_72 = arith.constant 0.000000e+00 : f32
    %52 = vector.broadcast %cst_72 : f32 to vector<256x128xf32>
    %53 = arith.maximumf %51, %52 : vector<256x128xf32>
    %54 = vector.shape_cast %53 : vector<256x128xf32> to vector<16x16x128xf32>
    %55 = vector.shape_cast %54 : vector<16x16x128xf32> to vector<8x2x16x128xf32>
    %cst_73 = arith.constant dense<0xFF800000> : vector<8x16x128xf32>
    %56 = vector.multi_reduction <maximumf>, %55, %cst_73 [1] : vector<8x2x16x128xf32> to vector<8x16x128xf32>
    %57 = vector.shape_cast %56 : vector<8x16x128xf32> to vector<8x8x2x128xf32>
    %cst_74 = arith.constant dense<0xFF800000> : vector<8x8x128xf32>
    %58 = vector.multi_reduction <maximumf>, %57, %cst_74 [2] : vector<8x8x2x128xf32> to vector<8x8x128xf32>
    %c1_75 = arith.constant 1 : index
    %c1_76 = arith.constant 1 : index
    %c0_77 = arith.constant 0 : index
    %59 = vector.load %arg7[%c1_75, %c1_76, %c0_77] : memref<10x10x128xf32, #tpu.memory_space<vmem>>, vector<8x8x128xf32>
    tpu.vector_store %arg7[%c1_75, %c1_76, %c0_77], %58 {strides = array<i32>} : memref<10x10x128xf32, #tpu.memory_space<vmem>>, vector<8x8x128xf32>,
    %c0_78 = arith.constant 0 : index
    %c0_79 = arith.constant 0 : index
    %c0_80 = arith.constant 0 : index
    %60 = vector.load %arg7[%c0_78, %c0_79, %c0_80] : memref<10x10x128xf32, #tpu.memory_space<vmem>>, vector<8x8x128xf32>
    %61 = vector.shape_cast %60 : vector<8x8x128xf32> to vector<64x128xf32>
    %c0_81 = arith.constant 0 : index
    %c0_82 = arith.constant 0 : index
    %62 = vector.load %arg11[%c0_81, %c0_82] : memref<256x1152xf32, #tpu.memory_space<vmem>>, vector<64x128xf32>
    tpu.vector_store %arg11[%c0_81, %c0_82], %61 {strides = array<i32>} : memref<256x1152xf32, #tpu.memory_space<vmem>>, vector<64x128xf32>,
    %c0_83 = arith.constant 0 : index
    %c1_84 = arith.constant 1 : index
    %c0_85 = arith.constant 0 : index
    %63 = vector.load %arg7[%c0_83, %c1_84, %c0_85] : memref<10x10x128xf32, #tpu.memory_space<vmem>>, vector<8x8x128xf32>
    %64 = vector.shape_cast %63 : vector<8x8x128xf32> to vector<64x128xf32>
    %c0_86 = arith.constant 0 : index
    %c128_87 = arith.constant 128 : index
    %65 = vector.load %arg11[%c0_86, %c128_87] : memref<256x1152xf32, #tpu.memory_space<vmem>>, vector<64x128xf32>
    tpu.vector_store %arg11[%c0_86, %c128_87], %64 {strides = array<i32>} : memref<256x1152xf32, #tpu.memory_space<vmem>>, vector<64x128xf32>,
    %c0_88 = arith.constant 0 : index
    %c2_89 = arith.constant 2 : index
    %c0_90 = arith.constant 0 : index
    %66 = vector.load %arg7[%c0_88, %c2_89, %c0_90] : memref<10x10x128xf32, #tpu.memory_space<vmem>>, vector<8x8x128xf32>
    %67 = vector.shape_cast %66 : vector<8x8x128xf32> to vector<64x128xf32>
    %c0_91 = arith.constant 0 : index
    %c256_92 = arith.constant 256 : index
    %68 = vector.load %arg11[%c0_91, %c256_92] : memref<256x1152xf32, #tpu.memory_space<vmem>>, vector<64x128xf32>
    tpu.vector_store %arg11[%c0_91, %c256_92], %67 {strides = array<i32>} : memref<256x1152xf32, #tpu.memory_space<vmem>>, vector<64x128xf32>,
    %c1_93 = arith.constant 1 : index
    %c0_94 = arith.constant 0 : index
    %c0_95 = arith.constant 0 : index
    %69 = vector.load %arg7[%c1_93, %c0_94, %c0_95] : memref<10x10x128xf32, #tpu.memory_space<vmem>>, vector<8x8x128xf32>
    %70 = vector.shape_cast %69 : vector<8x8x128xf32> to vector<64x128xf32>
    %c0_96 = arith.constant 0 : index
    %c384_97 = arith.constant 384 : index
    %71 = vector.load %arg11[%c0_96, %c384_97] : memref<256x1152xf32, #tpu.memory_space<vmem>>, vector<64x128xf32>
    tpu.vector_store %arg11[%c0_96, %c384_97], %70 {strides = array<i32>} : memref<256x1152xf32, #tpu.memory_space<vmem>>, vector<64x128xf32>,
    %c1_98 = arith.constant 1 : index
    %c1_99 = arith.constant 1 : index
    %c0_100 = arith.constant 0 : index
    %72 = vector.load %arg7[%c1_98, %c1_99, %c0_100] : memref<10x10x128xf32, #tpu.memory_space<vmem>>, vector<8x8x128xf32>
    %73 = vector.shape_cast %72 : vector<8x8x128xf32> to vector<64x128xf32>
    %c0_101 = arith.constant 0 : index
    %c512_102 = arith.constant 512 : index
    %74 = vector.load %arg11[%c0_101, %c512_102] : memref<256x1152xf32, #tpu.memory_space<vmem>>, vector<64x128xf32>
    tpu.vector_store %arg11[%c0_101, %c512_102], %73 {strides = array<i32>} : memref<256x1152xf32, #tpu.memory_space<vmem>>, vector<64x128xf32>,
    %c1_103 = arith.constant 1 : index
    %c2_104 = arith.constant 2 : index
    %c0_105 = arith.constant 0 : index
    %75 = vector.load %arg7[%c1_103, %c2_104, %c0_105] : memref<10x10x128xf32, #tpu.memory_space<vmem>>, vector<8x8x128xf32>
    %76 = vector.shape_cast %75 : vector<8x8x128xf32> to vector<64x128xf32>
    %c0_106 = arith.constant 0 : index
    %c640_107 = arith.constant 640 : index
    %77 = vector.load %arg11[%c0_106, %c640_107] : memref<256x1152xf32, #tpu.memory_space<vmem>>, vector<64x128xf32>
    tpu.vector_store %arg11[%c0_106, %c640_107], %76 {strides = array<i32>} : memref<256x1152xf32, #tpu.memory_space<vmem>>, vector<64x128xf32>,
    %c2_108 = arith.constant 2 : index
    %c0_109 = arith.constant 0 : index
    %c0_110 = arith.constant 0 : index
    %78 = vector.load %arg7[%c2_108, %c0_109, %c0_110] : memref<10x10x128xf32, #tpu.memory_space<vmem>>, vector<8x8x128xf32>
    %79 = vector.shape_cast %78 : vector<8x8x128xf32> to vector<64x128xf32>
    %c0_111 = arith.constant 0 : index
    %c768_112 = arith.constant 768 : index
    %80 = vector.load %arg11[%c0_111, %c768_112] : memref<256x1152xf32, #tpu.memory_space<vmem>>, vector<64x128xf32>
    tpu.vector_store %arg11[%c0_111, %c768_112], %79 {strides = array<i32>} : memref<256x1152xf32, #tpu.memory_space<vmem>>, vector<64x128xf32>,
    %c2_113 = arith.constant 2 : index
    %c1_114 = arith.constant 1 : index
    %c0_115 = arith.constant 0 : index
    %81 = vector.load %arg7[%c2_113, %c1_114, %c0_115] : memref<10x10x128xf32, #tpu.memory_space<vmem>>, vector<8x8x128xf32>
    %82 = vector.shape_cast %81 : vector<8x8x128xf32> to vector<64x128xf32>
    %c0_116 = arith.constant 0 : index
    %c896_117 = arith.constant 896 : index
    %83 = vector.load %arg11[%c0_116, %c896_117] : memref<256x1152xf32, #tpu.memory_space<vmem>>, vector<64x128xf32>
    tpu.vector_store %arg11[%c0_116, %c896_117], %82 {strides = array<i32>} : memref<256x1152xf32, #tpu.memory_space<vmem>>, vector<64x128xf32>,
    %c2_118 = arith.constant 2 : index
    %c2_119 = arith.constant 2 : index
    %c0_120 = arith.constant 0 : index
    %84 = vector.load %arg7[%c2_118, %c2_119, %c0_120] : memref<10x10x128xf32, #tpu.memory_space<vmem>>, vector<8x8x128xf32>
    %85 = vector.shape_cast %84 : vector<8x8x128xf32> to vector<64x128xf32>
    %c0_121 = arith.constant 0 : index
    %c1024_122 = arith.constant 1024 : index
    %86 = vector.load %arg11[%c0_121, %c1024_122] : memref<256x1152xf32, #tpu.memory_space<vmem>>, vector<64x128xf32>
    tpu.vector_store %arg11[%c0_121, %c1024_122], %85 {strides = array<i32>} : memref<256x1152xf32, #tpu.memory_space<vmem>>, vector<64x128xf32>,
    %c0_123 = arith.constant 0 : index
    %c0_124 = arith.constant 0 : index
    %87 = vector.load %arg11[%c0_123, %c0_124] : memref<256x1152xf32, #tpu.memory_space<vmem>>, vector<64x1152xf32>
    %c1_125 = arith.constant 1 : index
    %c0_126 = arith.constant 0 : index
    %c0_127 = arith.constant 0 : index
    %88 = vector.load %arg2[%c1_125, %c0_126, %c0_127] : memref<5x1152x128xf32, #tpu.memory_space<vmem>>, vector<1x1152x128xf32>
    %89 = vector.shape_cast %88 : vector<1x1152x128xf32> to vector<1152x128xf32>
    %cst_128 = arith.constant dense<0.000000e+00> : vector<64x128xf32>
    %90 = tpu.matmul %87, %89, %cst_128 {dimension_numbers = #tpu.dot_dimension_numbers<[1], [0], [0], [1], [0, 0, 1, 1], [], []>} : vector<64x1152xf32>, vector<1152x128xf32>, vector<64x128xf32> -> vector<64x128xf32>
    %c1_129 = arith.constant 1 : index
    %c0_130 = arith.constant 0 : index
    %c0_131 = arith.constant 0 : index
    %91 = vector.load %arg3[%c1_129, %c0_130, %c0_131] : memref<5x1x128xf32, #tpu.memory_space<vmem>>, vector<1x1x128xf32>
    %92 = vector.shape_cast %91 : vector<1x1x128xf32> to vector<1x128xf32>
    %93 = vector.broadcast %92 : vector<1x128xf32> to vector<64x128xf32>
    %94 = arith.mulf %90, %93 : vector<64x128xf32>
    %c1_132 = arith.constant 1 : index
    %c0_133 = arith.constant 0 : index
    %c0_134 = arith.constant 0 : index
    %95 = vector.load %arg4[%c1_132, %c0_133, %c0_134] : memref<5x1x128xf32, #tpu.memory_space<vmem>>, vector<1x1x128xf32>
    %96 = vector.shape_cast %95 : vector<1x1x128xf32> to vector<1x128xf32>
    %97 = vector.broadcast %96 : vector<1x128xf32> to vector<64x128xf32>
    %98 = arith.addf %94, %97 : vector<64x128xf32>
    %cst_135 = arith.constant 0.000000e+00 : f32
    %99 = vector.broadcast %cst_135 : f32 to vector<64x128xf32>
    %100 = arith.maximumf %98, %99 : vector<64x128xf32>
    %101 = vector.shape_cast %100 : vector<64x128xf32> to vector<8x8x128xf32>
    %102 = vector.shape_cast %101 : vector<8x8x128xf32> to vector<4x2x8x128xf32>
    %cst_136 = arith.constant dense<0xFF800000> : vector<4x8x128xf32>
    %103 = vector.multi_reduction <maximumf>, %102, %cst_136 [1] : vector<4x2x8x128xf32> to vector<4x8x128xf32>
    %104 = vector.shape_cast %103 : vector<4x8x128xf32> to vector<4x4x2x128xf32>
    %cst_137 = arith.constant dense<0xFF800000> : vector<4x4x128xf32>
    %105 = vector.multi_reduction <maximumf>, %104, %cst_137 [2] : vector<4x4x2x128xf32> to vector<4x4x128xf32>
    %c1_138 = arith.constant 1 : index
    %c1_139 = arith.constant 1 : index
    %c0_140 = arith.constant 0 : index
    %106 = vector.load %arg8[%c1_138, %c1_139, %c0_140] : memref<6x6x128xf32, #tpu.memory_space<vmem>>, vector<4x4x128xf32>
    tpu.vector_store %arg8[%c1_138, %c1_139, %c0_140], %105 {strides = array<i32>} : memref<6x6x128xf32, #tpu.memory_space<vmem>>, vector<4x4x128xf32>,
    %c0_141 = arith.constant 0 : index
    %c0_142 = arith.constant 0 : index
    %c0_143 = arith.constant 0 : index
    %107 = vector.load %arg8[%c0_141, %c0_142, %c0_143] : memref<6x6x128xf32, #tpu.memory_space<vmem>>, vector<4x4x128xf32>
    %108 = vector.shape_cast %107 : vector<4x4x128xf32> to vector<16x128xf32>
    %c0_144 = arith.constant 0 : index
    %c0_145 = arith.constant 0 : index
    %109 = vector.load %arg11[%c0_144, %c0_145] : memref<256x1152xf32, #tpu.memory_space<vmem>>, vector<16x128xf32>
    tpu.vector_store %arg11[%c0_144, %c0_145], %108 {strides = array<i32>} : memref<256x1152xf32, #tpu.memory_space<vmem>>, vector<16x128xf32>,
    %c0_146 = arith.constant 0 : index
    %c1_147 = arith.constant 1 : index
    %c0_148 = arith.constant 0 : index
    %110 = vector.load %arg8[%c0_146, %c1_147, %c0_148] : memref<6x6x128xf32, #tpu.memory_space<vmem>>, vector<4x4x128xf32>
    %111 = vector.shape_cast %110 : vector<4x4x128xf32> to vector<16x128xf32>
    %c0_149 = arith.constant 0 : index
    %c128_150 = arith.constant 128 : index
    %112 = vector.load %arg11[%c0_149, %c128_150] : memref<256x1152xf32, #tpu.memory_space<vmem>>, vector<16x128xf32>
    tpu.vector_store %arg11[%c0_149, %c128_150], %111 {strides = array<i32>} : memref<256x1152xf32, #tpu.memory_space<vmem>>, vector<16x128xf32>,
    %c0_151 = arith.constant 0 : index
    %c2_152 = arith.constant 2 : index
    %c0_153 = arith.constant 0 : index
    %113 = vector.load %arg8[%c0_151, %c2_152, %c0_153] : memref<6x6x128xf32, #tpu.memory_space<vmem>>, vector<4x4x128xf32>
    %114 = vector.shape_cast %113 : vector<4x4x128xf32> to vector<16x128xf32>
    %c0_154 = arith.constant 0 : index
    %c256_155 = arith.constant 256 : index
    %115 = vector.load %arg11[%c0_154, %c256_155] : memref<256x1152xf32, #tpu.memory_space<vmem>>, vector<16x128xf32>
    tpu.vector_store %arg11[%c0_154, %c256_155], %114 {strides = array<i32>} : memref<256x1152xf32, #tpu.memory_space<vmem>>, vector<16x128xf32>,
    %c1_156 = arith.constant 1 : index
    %c0_157 = arith.constant 0 : index
    %c0_158 = arith.constant 0 : index
    %116 = vector.load %arg8[%c1_156, %c0_157, %c0_158] : memref<6x6x128xf32, #tpu.memory_space<vmem>>, vector<4x4x128xf32>
    %117 = vector.shape_cast %116 : vector<4x4x128xf32> to vector<16x128xf32>
    %c0_159 = arith.constant 0 : index
    %c384_160 = arith.constant 384 : index
    %118 = vector.load %arg11[%c0_159, %c384_160] : memref<256x1152xf32, #tpu.memory_space<vmem>>, vector<16x128xf32>
    tpu.vector_store %arg11[%c0_159, %c384_160], %117 {strides = array<i32>} : memref<256x1152xf32, #tpu.memory_space<vmem>>, vector<16x128xf32>,
    %c1_161 = arith.constant 1 : index
    %c1_162 = arith.constant 1 : index
    %c0_163 = arith.constant 0 : index
    %119 = vector.load %arg8[%c1_161, %c1_162, %c0_163] : memref<6x6x128xf32, #tpu.memory_space<vmem>>, vector<4x4x128xf32>
    %120 = vector.shape_cast %119 : vector<4x4x128xf32> to vector<16x128xf32>
    %c0_164 = arith.constant 0 : index
    %c512_165 = arith.constant 512 : index
    %121 = vector.load %arg11[%c0_164, %c512_165] : memref<256x1152xf32, #tpu.memory_space<vmem>>, vector<16x128xf32>
    tpu.vector_store %arg11[%c0_164, %c512_165], %120 {strides = array<i32>} : memref<256x1152xf32, #tpu.memory_space<vmem>>, vector<16x128xf32>,
    %c1_166 = arith.constant 1 : index
    %c2_167 = arith.constant 2 : index
    %c0_168 = arith.constant 0 : index
    %122 = vector.load %arg8[%c1_166, %c2_167, %c0_168] : memref<6x6x128xf32, #tpu.memory_space<vmem>>, vector<4x4x128xf32>
    %123 = vector.shape_cast %122 : vector<4x4x128xf32> to vector<16x128xf32>
    %c0_169 = arith.constant 0 : index
    %c640_170 = arith.constant 640 : index
    %124 = vector.load %arg11[%c0_169, %c640_170] : memref<256x1152xf32, #tpu.memory_space<vmem>>, vector<16x128xf32>
    tpu.vector_store %arg11[%c0_169, %c640_170], %123 {strides = array<i32>} : memref<256x1152xf32, #tpu.memory_space<vmem>>, vector<16x128xf32>,
    %c2_171 = arith.constant 2 : index
    %c0_172 = arith.constant 0 : index
    %c0_173 = arith.constant 0 : index
    %125 = vector.load %arg8[%c2_171, %c0_172, %c0_173] : memref<6x6x128xf32, #tpu.memory_space<vmem>>, vector<4x4x128xf32>
    %126 = vector.shape_cast %125 : vector<4x4x128xf32> to vector<16x128xf32>
    %c0_174 = arith.constant 0 : index
    %c768_175 = arith.constant 768 : index
    %127 = vector.load %arg11[%c0_174, %c768_175] : memref<256x1152xf32, #tpu.memory_space<vmem>>, vector<16x128xf32>
    tpu.vector_store %arg11[%c0_174, %c768_175], %126 {strides = array<i32>} : memref<256x1152xf32, #tpu.memory_space<vmem>>, vector<16x128xf32>,
    %c2_176 = arith.constant 2 : index
    %c1_177 = arith.constant 1 : index
    %c0_178 = arith.constant 0 : index
    %128 = vector.load %arg8[%c2_176, %c1_177, %c0_178] : memref<6x6x128xf32, #tpu.memory_space<vmem>>, vector<4x4x128xf32>
    %129 = vector.shape_cast %128 : vector<4x4x128xf32> to vector<16x128xf32>
    %c0_179 = arith.constant 0 : index
    %c896_180 = arith.constant 896 : index
    %130 = vector.load %arg11[%c0_179, %c896_180] : memref<256x1152xf32, #tpu.memory_space<vmem>>, vector<16x128xf32>
    tpu.vector_store %arg11[%c0_179, %c896_180], %129 {strides = array<i32>} : memref<256x1152xf32, #tpu.memory_space<vmem>>, vector<16x128xf32>,
    %c2_181 = arith.constant 2 : index
    %c2_182 = arith.constant 2 : index
    %c0_183 = arith.constant 0 : index
    %131 = vector.load %arg8[%c2_181, %c2_182, %c0_183] : memref<6x6x128xf32, #tpu.memory_space<vmem>>, vector<4x4x128xf32>
    %132 = vector.shape_cast %131 : vector<4x4x128xf32> to vector<16x128xf32>
    %c0_184 = arith.constant 0 : index
    %c1024_185 = arith.constant 1024 : index
    %133 = vector.load %arg11[%c0_184, %c1024_185] : memref<256x1152xf32, #tpu.memory_space<vmem>>, vector<16x128xf32>
    tpu.vector_store %arg11[%c0_184, %c1024_185], %132 {strides = array<i32>} : memref<256x1152xf32, #tpu.memory_space<vmem>>, vector<16x128xf32>,
    %c0_186 = arith.constant 0 : index
    %c0_187 = arith.constant 0 : index
    %134 = vector.load %arg11[%c0_186, %c0_187] : memref<256x1152xf32, #tpu.memory_space<vmem>>, vector<16x1152xf32>
    %c2_188 = arith.constant 2 : index
    %c0_189 = arith.constant 0 : index
    %c0_190 = arith.constant 0 : index
    %135 = vector.load %arg2[%c2_188, %c0_189, %c0_190] : memref<5x1152x128xf32, #tpu.memory_space<vmem>>, vector<1x1152x128xf32>
    %136 = vector.shape_cast %135 : vector<1x1152x128xf32> to vector<1152x128xf32>
    %cst_191 = arith.constant dense<0.000000e+00> : vector<16x128xf32>
    %137 = tpu.matmul %134, %136, %cst_191 {dimension_numbers = #tpu.dot_dimension_numbers<[1], [0], [0], [1], [0, 0, 1, 1], [], []>} : vector<16x1152xf32>, vector<1152x128xf32>, vector<16x128xf32> -> vector<16x128xf32>
    %c2_192 = arith.constant 2 : index
    %c0_193 = arith.constant 0 : index
    %c0_194 = arith.constant 0 : index
    %138 = vector.load %arg3[%c2_192, %c0_193, %c0_194] : memref<5x1x128xf32, #tpu.memory_space<vmem>>, vector<1x1x128xf32>
    %139 = vector.shape_cast %138 : vector<1x1x128xf32> to vector<1x128xf32>
    %140 = vector.broadcast %139 : vector<1x128xf32> to vector<16x128xf32>
    %141 = arith.mulf %137, %140 : vector<16x128xf32>
    %c2_195 = arith.constant 2 : index
    %c0_196 = arith.constant 0 : index
    %c0_197 = arith.constant 0 : index
    %142 = vector.load %arg4[%c2_195, %c0_196, %c0_197] : memref<5x1x128xf32, #tpu.memory_space<vmem>>, vector<1x1x128xf32>
    %143 = vector.shape_cast %142 : vector<1x1x128xf32> to vector<1x128xf32>
    %144 = vector.broadcast %143 : vector<1x128xf32> to vector<16x128xf32>
    %145 = arith.addf %141, %144 : vector<16x128xf32>
    %cst_198 = arith.constant 0.000000e+00 : f32
    %146 = vector.broadcast %cst_198 : f32 to vector<16x128xf32>
    %147 = arith.maximumf %145, %146 : vector<16x128xf32>
    %148 = vector.shape_cast %147 : vector<16x128xf32> to vector<4x4x128xf32>
    %c1_199 = arith.constant 1 : index
    %c1_200 = arith.constant 1 : index
    %c0_201 = arith.constant 0 : index
    %149 = vector.load %arg9[%c1_199, %c1_200, %c0_201] : memref<6x6x128xf32, #tpu.memory_space<vmem>>, vector<4x4x128xf32>
    tpu.vector_store %arg9[%c1_199, %c1_200, %c0_201], %148 {strides = array<i32>} : memref<6x6x128xf32, #tpu.memory_space<vmem>>, vector<4x4x128xf32>,
    %c0_202 = arith.constant 0 : index
    %c0_203 = arith.constant 0 : index
    %c0_204 = arith.constant 0 : index
    %150 = vector.load %arg9[%c0_202, %c0_203, %c0_204] : memref<6x6x128xf32, #tpu.memory_space<vmem>>, vector<4x4x128xf32>
    %151 = vector.shape_cast %150 : vector<4x4x128xf32> to vector<16x128xf32>
    %c0_205 = arith.constant 0 : index
    %c0_206 = arith.constant 0 : index
    %152 = vector.load %arg11[%c0_205, %c0_206] : memref<256x1152xf32, #tpu.memory_space<vmem>>, vector<16x128xf32>
    tpu.vector_store %arg11[%c0_205, %c0_206], %151 {strides = array<i32>} : memref<256x1152xf32, #tpu.memory_space<vmem>>, vector<16x128xf32>,
    %c0_207 = arith.constant 0 : index
    %c1_208 = arith.constant 1 : index
    %c0_209 = arith.constant 0 : index
    %153 = vector.load %arg9[%c0_207, %c1_208, %c0_209] : memref<6x6x128xf32, #tpu.memory_space<vmem>>, vector<4x4x128xf32>
    %154 = vector.shape_cast %153 : vector<4x4x128xf32> to vector<16x128xf32>
    %c0_210 = arith.constant 0 : index
    %c128_211 = arith.constant 128 : index
    %155 = vector.load %arg11[%c0_210, %c128_211] : memref<256x1152xf32, #tpu.memory_space<vmem>>, vector<16x128xf32>
    tpu.vector_store %arg11[%c0_210, %c128_211], %154 {strides = array<i32>} : memref<256x1152xf32, #tpu.memory_space<vmem>>, vector<16x128xf32>,
    %c0_212 = arith.constant 0 : index
    %c2_213 = arith.constant 2 : index
    %c0_214 = arith.constant 0 : index
    %156 = vector.load %arg9[%c0_212, %c2_213, %c0_214] : memref<6x6x128xf32, #tpu.memory_space<vmem>>, vector<4x4x128xf32>
    %157 = vector.shape_cast %156 : vector<4x4x128xf32> to vector<16x128xf32>
    %c0_215 = arith.constant 0 : index
    %c256_216 = arith.constant 256 : index
    %158 = vector.load %arg11[%c0_215, %c256_216] : memref<256x1152xf32, #tpu.memory_space<vmem>>, vector<16x128xf32>
    tpu.vector_store %arg11[%c0_215, %c256_216], %157 {strides = array<i32>} : memref<256x1152xf32, #tpu.memory_space<vmem>>, vector<16x128xf32>,
    %c1_217 = arith.constant 1 : index
    %c0_218 = arith.constant 0 : index
    %c0_219 = arith.constant 0 : index
    %159 = vector.load %arg9[%c1_217, %c0_218, %c0_219] : memref<6x6x128xf32, #tpu.memory_space<vmem>>, vector<4x4x128xf32>
    %160 = vector.shape_cast %159 : vector<4x4x128xf32> to vector<16x128xf32>
    %c0_220 = arith.constant 0 : index
    %c384_221 = arith.constant 384 : index
    %161 = vector.load %arg11[%c0_220, %c384_221] : memref<256x1152xf32, #tpu.memory_space<vmem>>, vector<16x128xf32>
    tpu.vector_store %arg11[%c0_220, %c384_221], %160 {strides = array<i32>} : memref<256x1152xf32, #tpu.memory_space<vmem>>, vector<16x128xf32>,
    %c1_222 = arith.constant 1 : index
    %c1_223 = arith.constant 1 : index
    %c0_224 = arith.constant 0 : index
    %162 = vector.load %arg9[%c1_222, %c1_223, %c0_224] : memref<6x6x128xf32, #tpu.memory_space<vmem>>, vector<4x4x128xf32>
    %163 = vector.shape_cast %162 : vector<4x4x128xf32> to vector<16x128xf32>
    %c0_225 = arith.constant 0 : index
    %c512_226 = arith.constant 512 : index
    %164 = vector.load %arg11[%c0_225, %c512_226] : memref<256x1152xf32, #tpu.memory_space<vmem>>, vector<16x128xf32>
    tpu.vector_store %arg11[%c0_225, %c512_226], %163 {strides = array<i32>} : memref<256x1152xf32, #tpu.memory_space<vmem>>, vector<16x128xf32>,
    %c1_227 = arith.constant 1 : index
    %c2_228 = arith.constant 2 : index
    %c0_229 = arith.constant 0 : index
    %165 = vector.load %arg9[%c1_227, %c2_228, %c0_229] : memref<6x6x128xf32, #tpu.memory_space<vmem>>, vector<4x4x128xf32>
    %166 = vector.shape_cast %165 : vector<4x4x128xf32> to vector<16x128xf32>
    %c0_230 = arith.constant 0 : index
    %c640_231 = arith.constant 640 : index
    %167 = vector.load %arg11[%c0_230, %c640_231] : memref<256x1152xf32, #tpu.memory_space<vmem>>, vector<16x128xf32>
    tpu.vector_store %arg11[%c0_230, %c640_231], %166 {strides = array<i32>} : memref<256x1152xf32, #tpu.memory_space<vmem>>, vector<16x128xf32>,
    %c2_232 = arith.constant 2 : index
    %c0_233 = arith.constant 0 : index
    %c0_234 = arith.constant 0 : index
    %168 = vector.load %arg9[%c2_232, %c0_233, %c0_234] : memref<6x6x128xf32, #tpu.memory_space<vmem>>, vector<4x4x128xf32>
    %169 = vector.shape_cast %168 : vector<4x4x128xf32> to vector<16x128xf32>
    %c0_235 = arith.constant 0 : index
    %c768_236 = arith.constant 768 : index
    %170 = vector.load %arg11[%c0_235, %c768_236] : memref<256x1152xf32, #tpu.memory_space<vmem>>, vector<16x128xf32>
    tpu.vector_store %arg11[%c0_235, %c768_236], %169 {strides = array<i32>} : memref<256x1152xf32, #tpu.memory_space<vmem>>, vector<16x128xf32>,
    %c2_237 = arith.constant 2 : index
    %c1_238 = arith.constant 1 : index
    %c0_239 = arith.constant 0 : index
    %171 = vector.load %arg9[%c2_237, %c1_238, %c0_239] : memref<6x6x128xf32, #tpu.memory_space<vmem>>, vector<4x4x128xf32>
    %172 = vector.shape_cast %171 : vector<4x4x128xf32> to vector<16x128xf32>
    %c0_240 = arith.constant 0 : index
    %c896_241 = arith.constant 896 : index
    %173 = vector.load %arg11[%c0_240, %c896_241] : memref<256x1152xf32, #tpu.memory_space<vmem>>, vector<16x128xf32>
    tpu.vector_store %arg11[%c0_240, %c896_241], %172 {strides = array<i32>} : memref<256x1152xf32, #tpu.memory_space<vmem>>, vector<16x128xf32>,
    %c2_242 = arith.constant 2 : index
    %c2_243 = arith.constant 2 : index
    %c0_244 = arith.constant 0 : index
    %174 = vector.load %arg9[%c2_242, %c2_243, %c0_244] : memref<6x6x128xf32, #tpu.memory_space<vmem>>, vector<4x4x128xf32>
    %175 = vector.shape_cast %174 : vector<4x4x128xf32> to vector<16x128xf32>
    %c0_245 = arith.constant 0 : index
    %c1024_246 = arith.constant 1024 : index
    %176 = vector.load %arg11[%c0_245, %c1024_246] : memref<256x1152xf32, #tpu.memory_space<vmem>>, vector<16x128xf32>
    tpu.vector_store %arg11[%c0_245, %c1024_246], %175 {strides = array<i32>} : memref<256x1152xf32, #tpu.memory_space<vmem>>, vector<16x128xf32>,
    %c0_247 = arith.constant 0 : index
    %c0_248 = arith.constant 0 : index
    %177 = vector.load %arg11[%c0_247, %c0_248] : memref<256x1152xf32, #tpu.memory_space<vmem>>, vector<16x1152xf32>
    %c3 = arith.constant 3 : index
    %c0_249 = arith.constant 0 : index
    %c0_250 = arith.constant 0 : index
    %178 = vector.load %arg2[%c3, %c0_249, %c0_250] : memref<5x1152x128xf32, #tpu.memory_space<vmem>>, vector<1x1152x128xf32>
    %179 = vector.shape_cast %178 : vector<1x1152x128xf32> to vector<1152x128xf32>
    %cst_251 = arith.constant dense<0.000000e+00> : vector<16x128xf32>
    %180 = tpu.matmul %177, %179, %cst_251 {dimension_numbers = #tpu.dot_dimension_numbers<[1], [0], [0], [1], [0, 0, 1, 1], [], []>} : vector<16x1152xf32>, vector<1152x128xf32>, vector<16x128xf32> -> vector<16x128xf32>
    %c3_252 = arith.constant 3 : index
    %c0_253 = arith.constant 0 : index
    %c0_254 = arith.constant 0 : index
    %181 = vector.load %arg3[%c3_252, %c0_253, %c0_254] : memref<5x1x128xf32, #tpu.memory_space<vmem>>, vector<1x1x128xf32>
    %182 = vector.shape_cast %181 : vector<1x1x128xf32> to vector<1x128xf32>
    %183 = vector.broadcast %182 : vector<1x128xf32> to vector<16x128xf32>
    %184 = arith.mulf %180, %183 : vector<16x128xf32>
    %c3_255 = arith.constant 3 : index
    %c0_256 = arith.constant 0 : index
    %c0_257 = arith.constant 0 : index
    %185 = vector.load %arg4[%c3_255, %c0_256, %c0_257] : memref<5x1x128xf32, #tpu.memory_space<vmem>>, vector<1x1x128xf32>
    %186 = vector.shape_cast %185 : vector<1x1x128xf32> to vector<1x128xf32>
    %187 = vector.broadcast %186 : vector<1x128xf32> to vector<16x128xf32>
    %188 = arith.addf %184, %187 : vector<16x128xf32>
    %cst_258 = arith.constant 0.000000e+00 : f32
    %189 = vector.broadcast %cst_258 : f32 to vector<16x128xf32>
    %190 = arith.maximumf %188, %189 : vector<16x128xf32>
    %191 = vector.shape_cast %190 : vector<16x128xf32> to vector<4x4x128xf32>
    %c1_259 = arith.constant 1 : index
    %c1_260 = arith.constant 1 : index
    %c0_261 = arith.constant 0 : index
    %192 = vector.load %arg10[%c1_259, %c1_260, %c0_261] : memref<6x6x128xf32, #tpu.memory_space<vmem>>, vector<4x4x128xf32>
    tpu.vector_store %arg10[%c1_259, %c1_260, %c0_261], %191 {strides = array<i32>} : memref<6x6x128xf32, #tpu.memory_space<vmem>>, vector<4x4x128xf32>,
    %c0_262 = arith.constant 0 : index
    %c0_263 = arith.constant 0 : index
    %c0_264 = arith.constant 0 : index
    %193 = vector.load %arg10[%c0_262, %c0_263, %c0_264] : memref<6x6x128xf32, #tpu.memory_space<vmem>>, vector<4x4x128xf32>
    %194 = vector.shape_cast %193 : vector<4x4x128xf32> to vector<16x128xf32>
    %c0_265 = arith.constant 0 : index
    %c0_266 = arith.constant 0 : index
    %195 = vector.load %arg11[%c0_265, %c0_266] : memref<256x1152xf32, #tpu.memory_space<vmem>>, vector<16x128xf32>
    tpu.vector_store %arg11[%c0_265, %c0_266], %194 {strides = array<i32>} : memref<256x1152xf32, #tpu.memory_space<vmem>>, vector<16x128xf32>,
    %c0_267 = arith.constant 0 : index
    %c1_268 = arith.constant 1 : index
    %c0_269 = arith.constant 0 : index
    %196 = vector.load %arg10[%c0_267, %c1_268, %c0_269] : memref<6x6x128xf32, #tpu.memory_space<vmem>>, vector<4x4x128xf32>
    %197 = vector.shape_cast %196 : vector<4x4x128xf32> to vector<16x128xf32>
    %c0_270 = arith.constant 0 : index
    %c128_271 = arith.constant 128 : index
    %198 = vector.load %arg11[%c0_270, %c128_271] : memref<256x1152xf32, #tpu.memory_space<vmem>>, vector<16x128xf32>
    tpu.vector_store %arg11[%c0_270, %c128_271], %197 {strides = array<i32>} : memref<256x1152xf32, #tpu.memory_space<vmem>>, vector<16x128xf32>,
    %c0_272 = arith.constant 0 : index
    %c2_273 = arith.constant 2 : index
    %c0_274 = arith.constant 0 : index
    %199 = vector.load %arg10[%c0_272, %c2_273, %c0_274] : memref<6x6x128xf32, #tpu.memory_space<vmem>>, vector<4x4x128xf32>
    %200 = vector.shape_cast %199 : vector<4x4x128xf32> to vector<16x128xf32>
    %c0_275 = arith.constant 0 : index
    %c256_276 = arith.constant 256 : index
    %201 = vector.load %arg11[%c0_275, %c256_276] : memref<256x1152xf32, #tpu.memory_space<vmem>>, vector<16x128xf32>
    tpu.vector_store %arg11[%c0_275, %c256_276], %200 {strides = array<i32>} : memref<256x1152xf32, #tpu.memory_space<vmem>>, vector<16x128xf32>,
    %c1_277 = arith.constant 1 : index
    %c0_278 = arith.constant 0 : index
    %c0_279 = arith.constant 0 : index
    %202 = vector.load %arg10[%c1_277, %c0_278, %c0_279] : memref<6x6x128xf32, #tpu.memory_space<vmem>>, vector<4x4x128xf32>
    %203 = vector.shape_cast %202 : vector<4x4x128xf32> to vector<16x128xf32>
    %c0_280 = arith.constant 0 : index
    %c384_281 = arith.constant 384 : index
    %204 = vector.load %arg11[%c0_280, %c384_281] : memref<256x1152xf32, #tpu.memory_space<vmem>>, vector<16x128xf32>
    tpu.vector_store %arg11[%c0_280, %c384_281], %203 {strides = array<i32>} : memref<256x1152xf32, #tpu.memory_space<vmem>>, vector<16x128xf32>,
    %c1_282 = arith.constant 1 : index
    %c1_283 = arith.constant 1 : index
    %c0_284 = arith.constant 0 : index
    %205 = vector.load %arg10[%c1_282, %c1_283, %c0_284] : memref<6x6x128xf32, #tpu.memory_space<vmem>>, vector<4x4x128xf32>
    %206 = vector.shape_cast %205 : vector<4x4x128xf32> to vector<16x128xf32>
    %c0_285 = arith.constant 0 : index
    %c512_286 = arith.constant 512 : index
    %207 = vector.load %arg11[%c0_285, %c512_286] : memref<256x1152xf32, #tpu.memory_space<vmem>>, vector<16x128xf32>
    tpu.vector_store %arg11[%c0_285, %c512_286], %206 {strides = array<i32>} : memref<256x1152xf32, #tpu.memory_space<vmem>>, vector<16x128xf32>,
    %c1_287 = arith.constant 1 : index
    %c2_288 = arith.constant 2 : index
    %c0_289 = arith.constant 0 : index
    %208 = vector.load %arg10[%c1_287, %c2_288, %c0_289] : memref<6x6x128xf32, #tpu.memory_space<vmem>>, vector<4x4x128xf32>
    %209 = vector.shape_cast %208 : vector<4x4x128xf32> to vector<16x128xf32>
    %c0_290 = arith.constant 0 : index
    %c640_291 = arith.constant 640 : index
    %210 = vector.load %arg11[%c0_290, %c640_291] : memref<256x1152xf32, #tpu.memory_space<vmem>>, vector<16x128xf32>
    tpu.vector_store %arg11[%c0_290, %c640_291], %209 {strides = array<i32>} : memref<256x1152xf32, #tpu.memory_space<vmem>>, vector<16x128xf32>,
    %c2_292 = arith.constant 2 : index
    %c0_293 = arith.constant 0 : index
    %c0_294 = arith.constant 0 : index
    %211 = vector.load %arg10[%c2_292, %c0_293, %c0_294] : memref<6x6x128xf32, #tpu.memory_space<vmem>>, vector<4x4x128xf32>
    %212 = vector.shape_cast %211 : vector<4x4x128xf32> to vector<16x128xf32>
    %c0_295 = arith.constant 0 : index
    %c768_296 = arith.constant 768 : index
    %213 = vector.load %arg11[%c0_295, %c768_296] : memref<256x1152xf32, #tpu.memory_space<vmem>>, vector<16x128xf32>
    tpu.vector_store %arg11[%c0_295, %c768_296], %212 {strides = array<i32>} : memref<256x1152xf32, #tpu.memory_space<vmem>>, vector<16x128xf32>,
    %c2_297 = arith.constant 2 : index
    %c1_298 = arith.constant 1 : index
    %c0_299 = arith.constant 0 : index
    %214 = vector.load %arg10[%c2_297, %c1_298, %c0_299] : memref<6x6x128xf32, #tpu.memory_space<vmem>>, vector<4x4x128xf32>
    %215 = vector.shape_cast %214 : vector<4x4x128xf32> to vector<16x128xf32>
    %c0_300 = arith.constant 0 : index
    %c896_301 = arith.constant 896 : index
    %216 = vector.load %arg11[%c0_300, %c896_301] : memref<256x1152xf32, #tpu.memory_space<vmem>>, vector<16x128xf32>
    tpu.vector_store %arg11[%c0_300, %c896_301], %215 {strides = array<i32>} : memref<256x1152xf32, #tpu.memory_space<vmem>>, vector<16x128xf32>,
    %c2_302 = arith.constant 2 : index
    %c2_303 = arith.constant 2 : index
    %c0_304 = arith.constant 0 : index
    %217 = vector.load %arg10[%c2_302, %c2_303, %c0_304] : memref<6x6x128xf32, #tpu.memory_space<vmem>>, vector<4x4x128xf32>
    %218 = vector.shape_cast %217 : vector<4x4x128xf32> to vector<16x128xf32>
    %c0_305 = arith.constant 0 : index
    %c1024_306 = arith.constant 1024 : index
    %219 = vector.load %arg11[%c0_305, %c1024_306] : memref<256x1152xf32, #tpu.memory_space<vmem>>, vector<16x128xf32>
    tpu.vector_store %arg11[%c0_305, %c1024_306], %218 {strides = array<i32>} : memref<256x1152xf32, #tpu.memory_space<vmem>>, vector<16x128xf32>,
    %c0_307 = arith.constant 0 : index
    %c0_308 = arith.constant 0 : index
    %220 = vector.load %arg11[%c0_307, %c0_308] : memref<256x1152xf32, #tpu.memory_space<vmem>>, vector<16x1152xf32>
    %c4 = arith.constant 4 : index
    %c0_309 = arith.constant 0 : index
    %c0_310 = arith.constant 0 : index
    %221 = vector.load %arg2[%c4, %c0_309, %c0_310] : memref<5x1152x128xf32, #tpu.memory_space<vmem>>, vector<1x1152x128xf32>
    %222 = vector.shape_cast %221 : vector<1x1152x128xf32> to vector<1152x128xf32>
    %cst_311 = arith.constant dense<0.000000e+00> : vector<16x128xf32>
    %223 = tpu.matmul %220, %222, %cst_311 {dimension_numbers = #tpu.dot_dimension_numbers<[1], [0], [0], [1], [0, 0, 1, 1], [], []>} : vector<16x1152xf32>, vector<1152x128xf32>, vector<16x128xf32> -> vector<16x128xf32>
    %c4_312 = arith.constant 4 : index
    %c0_313 = arith.constant 0 : index
    %c0_314 = arith.constant 0 : index
    %224 = vector.load %arg3[%c4_312, %c0_313, %c0_314] : memref<5x1x128xf32, #tpu.memory_space<vmem>>, vector<1x1x128xf32>
    %225 = vector.shape_cast %224 : vector<1x1x128xf32> to vector<1x128xf32>
    %226 = vector.broadcast %225 : vector<1x128xf32> to vector<16x128xf32>
    %227 = arith.mulf %223, %226 : vector<16x128xf32>
    %c4_315 = arith.constant 4 : index
    %c0_316 = arith.constant 0 : index
    %c0_317 = arith.constant 0 : index
    %228 = vector.load %arg4[%c4_315, %c0_316, %c0_317] : memref<5x1x128xf32, #tpu.memory_space<vmem>>, vector<1x1x128xf32>
    %229 = vector.shape_cast %228 : vector<1x1x128xf32> to vector<1x128xf32>
    %230 = vector.broadcast %229 : vector<1x128xf32> to vector<16x128xf32>
    %231 = arith.addf %227, %230 : vector<16x128xf32>
    %cst_318 = arith.constant 0.000000e+00 : f32
    %232 = vector.broadcast %cst_318 : f32 to vector<16x128xf32>
    %233 = arith.maximumf %231, %232 : vector<16x128xf32>
    %c0_319 = arith.constant 0 : index
    %c0_320 = arith.constant 0 : index
    %c0_321 = arith.constant 0 : index
    %234 = vector.load %arg5[%c0_319, %c0_320, %c0_321] : memref<1x16x128xf32, #tpu.memory_space<vmem>>, vector<1x16x128xf32>
    %235 = vector.shape_cast %234 : vector<1x16x128xf32> to vector<16x128xf32>
    %236 = vector.shape_cast %233 : vector<16x128xf32> to vector<1x16x128xf32>
    tpu.vector_store %arg5[%c0_319, %c0_320, %c0_321], %236 {strides = array<i32>} : memref<1x16x128xf32, #tpu.memory_space<vmem>>, vector<1x16x128xf32>,
    return
  }
  func.func @transform_0(%arg0: i32) -> (i32, i32, i32, i32) {
    %c0_i32 = arith.constant 0 : i32
    %c0_i32_0 = arith.constant 0 : i32
    %c0_i32_1 = arith.constant 0 : i32
    %c0_i32_2 = arith.constant 0 : i32
    return %arg0, %c0_i32, %c0_i32_0, %c0_i32_1 : i32, i32, i32, i32
  }
  func.func @transform_1(%arg0: i32) -> (i32, i32, i32) {
    %c0_i32 = arith.constant 0 : i32
    %c0_i32_0 = arith.constant 0 : i32
    %c0_i32_1 = arith.constant 0 : i32
    %c0_i32_2 = arith.constant 0 : i32
    return %c0_i32, %c0_i32_0, %c0_i32_1 : i32, i32, i32
  }
  func.func @transform_2(%arg0: i32) -> (i32, i32, i32) {
    %c0_i32 = arith.constant 0 : i32
    %c0_i32_0 = arith.constant 0 : i32
    %c0_i32_1 = arith.constant 0 : i32
    %c0_i32_2 = arith.constant 0 : i32
    return %c0_i32, %c0_i32_0, %c0_i32_1 : i32, i32, i32
  }
  func.func @transform_3(%arg0: i32) -> (i32, i32, i32) {
    %c0_i32 = arith.constant 0 : i32
    %c0_i32_0 = arith.constant 0 : i32
    %c0_i32_1 = arith.constant 0 : i32
    %c0_i32_2 = arith.constant 0 : i32
    return %c0_i32, %c0_i32_0, %c0_i32_1 : i32, i32, i32
  }
  func.func @transform_4(%arg0: i32) -> (i32, i32, i32) {
    %c0_i32 = arith.constant 0 : i32
    %c0_i32_0 = arith.constant 0 : i32
    %c0_i32_1 = arith.constant 0 : i32
    return %arg0, %c0_i32, %c0_i32_0 : i32, i32, i32
  }
}

</mosaic_0001>

<bundles_post_ra>
// kernel: tpu_custom_call.1
= control target key start
LH: loop header
LB: loop body
LE: loop exit
PB: predicated region body
PF: predicated region fallthrough
CT: control target
= control target key end

     0   :  { %9 = vsyncpa [#allocation9], 0  ;;  %s7654_s0 = inlined_call_operand.vmem [shape: f32[2,16,16,3], index: 0, kind: input, shape index: {}]   ;;  %s7655_s1 = inlined_call_operand.hbm [shape: f32[5,1152,128], index: 1, kind: input, shape index: {}]   ;;  %s7656_s2 = inlined_call_operand.hbm [shape: f32[5,1,128], index: 2, kind: input, shape index: {}]   ;;  %s7657_s3 = inlined_call_operand.hbm [shape: f32[5,1,128], index: 3, kind: input, shape index: {}]   ;;  %s7658_s4 = inlined_call_operand.hbm [shape: f32[2,16,128], index: 4, kind: output, shape index: {}]  }
   0x1   :  { %10 = vsyncpa [#allocation12], 0 }
   0x2   :  { %11 = vsyncpa [#allocation10], 0 }
   0x3   :  { %13 = vsyncpa [#allocation10 + $0x1], 0  ;;  %s6393_s15 = smov 0   ;;  %s6395_s16 = smov 0  }
   0x4   :  { %s6397_s17 = smov 0   ;;  %s6399_s18 = smov 0  }
   0x5 LB: > { %s6414_s19 = sadd.s32 4294967295, %s6356_s18   ;;  %s6062_s20 = sadd.s32 4294967294, %s6356_s18   ;;  %s6356_s18 = sphi %s6399_s18, %s7730_s18   ;;  %s6352_s17 = sphi %s6397_s17, %s7729_s17   ;;  %s6348_s16 = sphi %s6395_s16, %s7728_s16   ;;  %s6344_s15 = sphi %s6393_s15, %s7727_s15  }
   0x6   : > { %s6418_s21 = sadd.s32 1, %s6356_s18   ;;  %s115_s22 = sadd.s32 1, %s6352_s17 }
   0x7   : > { %s112_s23 = ssub.s32 %s6356_s18, %s6418_s21  ;;  %p125_p0 = scmp.ne.s32.totalorder %s6352_s17, %s6348_s16 }
   0x8   : > { %p113_p1 = scmp.eq.s32.totalorder %s112_s23, 0  ;;  %p126_p2 = scmp.eq.s32.totalorder %s6414_s19, 1 }
   0x9   : > { %p131_p3 = scmp.ne.s32.totalorder %s6348_s16, %s6344_s15  ;;  %p132_p4 = scmp.eq.s32.totalorder %s6062_s20, 1 }
   0xa   : > { %s6429_s24 = scalar_select %p113_p1, %s6352_s17, %s115_s22  }
   0xb   : > { %p6431_p5 = por %p126_p2, %p125_p0  ;;  %p6435_p6 = por %p132_p4, %p131_p3 }
   0xc   : > { %p6063_p7 = scmp.ge.s32.totalorder %s6356_s18, 1  ;;  %p139_p8 = scmp.lt.s32.totalorder %s6356_s18, 3 }
   0xd   : > { %p6126_p9 = scmp.eq.s32.totalorder %s6414_s19, 0  ;;  %s164_s30 = sshll.u32 %s7656_s2, 4  ;;  %s165_s30 = int_to_ptr.hbm [resolvable:$true] %s164_s30 }
   0xe   : > { %p6442_p10 = pnand %p6063_p7, %p139_p8  ;;  %s6358_s5 = smov [#allocation11]  }
   0xf   : > { %s166_s6 = sshll.u32 %s6358_s5, 4  ;;  %s150_s10 = sshll.u32 %s7655_s1, 4  ;;  %s167_s6 = int_to_ptr.vmem [resolvable:$true] %s166_s6  ;;  %s151_s10 = int_to_ptr.hbm [resolvable:$true] %s150_s10 }
  0x10   : > { %p6112_p11 = pneg %p6442_p10  ;;  %s6359_s11 = smov 16  }
  0x11   : > { %s6360_s12 = smov 1   ;;  %s6361_s13 = smov [#allocation8]  }
  0x12   : > { %p6453_p12 = pnand %p6126_p9, %p6112_p11  ;;  %s152_s14 = sshll.u32 %s6361_s13, 4  ;;  %s153_s14 = int_to_ptr.vmem [resolvable:$true] %s152_s14 }
  0x13   : > { %s6362_s20 = smov 128   ;;  %s6363_s22 = smov 8  }
  0x14   : > { %6118 = dma.hbm_to_vmem [thread:$0]  (!%p6453_p12), %s165_s30, 80, %s167_s6, [#allocation12], %s6359_s11, %s6359_s11, %s6360_s12  }
  0x15   : > { %6115 = dma.hbm_to_vmem [thread:$0]  (!%p6453_p12), %s151_s10, 92160, %s153_s14, [#allocation9], %s6362_s20, %s6362_s20, %s6363_s22  }
  0x16   : > { %s178_s29 = sshll.u32 %s7657_s3, 4  ;;  %s6364_s5 = smov [#allocation13]   ;;  %s179_s29 = int_to_ptr.hbm [resolvable:$true] %s178_s29 }
  0x17   : > { %s180_s8 = sshll.u32 %s6364_s5, 4  ;;  %204 = sbr.rel (%p6442_p10) target bundleno = 1964 (0x7ac), region = 36  ;;  %s181_s8 = int_to_ptr.vmem [resolvable:$true] %s180_s8 }
  0x18   : > { %6121 = dma.hbm_to_vmem [thread:$0]  (!%p6453_p12), %s179_s29, 80, %s181_s8, [#allocation12], %s6359_s11, %s6359_s11, %s6360_s12  }
  0x1c   : > { %6331 = dma.done.wait (%p6126_p9), [#allocation9], 92160  }
  0x1d   : > { %6333 = vsyncadd (%p6126_p9), [#allocation9], 4294875136 }
  0x1e   : > { %6335 = dma.done.wait (%p6126_p9), [#allocation12], 160  }
  0x1f   : > { %6337 = vsyncadd (%p6126_p9), [#allocation12], 4294967136  ;;  %v6365_v0 = vmov 0.0   ;;  %v1284_v1 = vld [vmem:[#allocation8 + $0x78] sm:$0xff]  ;;  %v1283_v4 = vld [vmem:[#allocation8 + $0x70] sm:$0xff]  ;;  %p241_p13 = scmp.lt.s32.totalorder %s6414_s19, 1 }
  0x20   : > { %246 = vst [vmem:[#allocation2] sm:$0xff] %v6365_v0  ;;  %v1300_v2 = vld [vmem:[#allocation8 + $0xf8] sm:$0xff]  ;;  %1413 = vmatpush.msra.mxu0 %v1284_v1  ;;  %v1299_v5 = vld [vmem:[#allocation8 + $0xf0] sm:$0xff]  ;;  %v1282_v8 = vld [vmem:[#allocation8 + $0x68] sm:$0xff]  ;;  %vm371_vm0 = vcmask 23552   ;;  %vm2662_vm1 = vcmask 1041408  }
  0x21   : > { %247 = vst [vmem:[#allocation2 + $0x8] sm:$0xff] %v6365_v0  ;;  %v1316_v3 = vld [vmem:[#allocation8 + $0x178] sm:$0xff]  ;;  %1526 = vmatpush.msra.mxu1 %v1300_v2  ;;  %v1315_v6 = vld [vmem:[#allocation8 + $0x170] sm:$0xff]  ;;  %v1298_v9 = vld [vmem:[#allocation8 + $0xe8] sm:$0xff]  ;;  %s242_s27 = scalar_select %p241_p13, %s6414_s19, 1  ;;  %vm3175_vm2 = vcmask 1041409  }
  0x22   : > { %248 = vst [vmem:[#allocation2 + $0x10] sm:$0x3] %v6365_v0  ;;  %1639 = vmatpush.msra.mxu2 %v1316_v3  ;;  %v1332_v7 = vld [vmem:[#allocation8 + $0x1f8] sm:$0xff]  ;;  %1414 = vmatpush.msra.mxu0 %v1283_v4  ;;  %v1314_v10 = vld [vmem:[#allocation8 + $0x168] sm:$0xff]  ;;  %v1331_v11 = vld [vmem:[#allocation8 + $0x1f0] sm:$0xff]  ;;  %vm3177_vm3 = vcmask 1042434  }
  0x23   : > { %249 = vst [vmem:[#allocation2 + $0x18] sm:$0xff] %v6365_v0  ;;  %1527 = vmatpush.msra.mxu1 %v1299_v5  ;;  %1752 = vmatpush.msra.mxu3 %v1332_v7  ;;  %v1281_v12 = vld [vmem:[#allocation8 + $0x60] sm:$0xff]  ;;  %v1330_v15 = vld [vmem:[#allocation8 + $0x1e8] sm:$0xff]  ;;  %v1280_v16 = vld [vmem:[#allocation8 + $0x58] sm:$0xff]  ;;  %s6080_s30 = sshll.u32 %s242_s27, 8  ;;  %vm3179_vm4 = vcmask 1043459  }
  0x24   : > { %250 = vst [vmem:[#allocation2 + $0x20] sm:$0xff] %v6365_v0  ;;  %1640 = vmatpush.msra.mxu2 %v1315_v6  ;;  %v1297_v13 = vld [vmem:[#allocation8 + $0xe0] sm:$0xff]  ;;  %1415 = vmatpush.msra.mxu0 %v1282_v8  ;;  %v1296_v17 = vld [vmem:[#allocation8 + $0xd8] sm:$0xff]  ;;  %v1279_v20 = vld [vmem:[#allocation8 + $0x50] sm:$0xff]  ;;  %s6573_s9 = scalar_lea.vmem %s7654_s0, %s6080_s30  ;;  %vm3181_vm5 = vcmask 1044484   ;;  %vm3183_vm6 = vcmask 1045509  }
  0x25   : > { %251 = vst [vmem:[#allocation2 + $0x28] sm:$0x3] %v6365_v0  ;;  %1528 = vmatpush.msra.mxu1 %v1298_v9  ;;  %v1313_v14 = vld [vmem:[#allocation8 + $0x160] sm:$0xff]  ;;  %1753 = vmatpush.msra.mxu3 %v1331_v11  ;;  %v1312_v18 = vld [vmem:[#allocation8 + $0x158] sm:$0xff]  ;;  %v1295_v21 = vld [vmem:[#allocation8 + $0xd0] sm:$0xff]  ;;  %vm3185_vm7 = vcmask 1046534  }
  0x26   : > { %252 = vst [vmem:[#allocation2 + $0x30] sm:$0xff] %v6365_v0  ;;  %1641 = vmatpush.msra.mxu2 %v1314_v10  ;;  %1416 = vmatpush.msra.mxu0 %v1281_v12  ;;  %v1329_v19 = vld [vmem:[#allocation8 + $0x1e0] sm:$0xff]  ;;  %v1311_v22 = vld [vmem:[#allocation8 + $0x150] sm:$0xff]  ;;  %v1328_v23 = vld [vmem:[#allocation8 + $0x1d8] sm:$0xff]  ;;  %vm3187_vm8 = vcmask 1047559   ;;  %s238_s10 = sand.u32 1, %s6348_s16  }
  0x27   : > { %253 = vst [vmem:[#allocation2 + $0x38] sm:$0xff] %v6365_v0  ;;  %1529 = vmatpush.msra.mxu1 %v1297_v13  ;;  %1754 = vmatpush.msra.mxu3 %v1330_v15  ;;  %v1278_v24 = vld [vmem:[#allocation8 + $0x48] sm:$0xff]  ;;  %v1327_v27 = vld [vmem:[#allocation8 + $0x1d0] sm:$0xff]  ;;  %v1277_v28 = vld [vmem:[#allocation8 + $0x40] sm:$0xff]  ;;  %s6072_s11 = sshll.u32 %s238_s10, 4  ;;  %s6081_s13 = sshll.u32 %s6414_s19, 4 }
  0x28   : > { %254 = vst [vmem:[#allocation2 + $0x40] sm:$0x3] %v6365_v0  ;;  %1642 = vmatpush.msra.mxu2 %v1313_v14  ;;  %1417 = vmatpush.msra.mxu0 %v1280_v16  ;;  %v1294_v25 = vld [vmem:[#allocation8 + $0xc8] sm:$0xff]  ;;  %v1293_v29 = vld [vmem:[#allocation8 + $0xc0] sm:$0xff]  ;;  %v1276_v32 = vld [vmem:[#allocation8 + $0x38] sm:$0xff]  ;;  %s240_s12 = scalar_lea.vmem [#allocation14], %s6072_s11  ;;  %s5965_s22 = scalar_lea.hbm %s7658_s4, %s6081_s13 }
  0x29   : > { %255 = vst [vmem:[#allocation2 + $0x48] sm:$0xff] %v6365_v0  ;;  %1530 = vmatpush.msra.mxu1 %v1296_v17  ;;  %1755 = vmatpush.msra.mxu3 %v1329_v19  ;;  %v1310_v26 = vld [vmem:[#allocation8 + $0x148] sm:$0xff]  ;;  %v1309_v30 = vld [vmem:[#allocation8 + $0x140] sm:$0xff]  ;;  %v1292_v33 = vld [vmem:[#allocation8 + $0xb8] sm:$0xff]  ;;  %s5966_s23 = sshll.u32 %s240_s12, 4  ;;  %s5968_s28 = sshll.u32 %s5965_s22, 4  ;;  %s5967_s23 = int_to_ptr.vmem [resolvable:$true] %s5966_s23  ;;  %s5969_s28 = int_to_ptr.hbm [resolvable:$true] %s5968_s28 }
  0x2a   : > { %256 = vst [vmem:[#allocation2 + $0x50] sm:$0xff] %v6365_v0  ;;  %1643 = vmatpush.msra.mxu2 %v1312_v18  ;;  %1418 = vmatpush.msra.mxu0 %v1279_v20  ;;  %v1326_v31 = vld [vmem:[#allocation8 + $0x1c8] sm:$0xff]  ;;  %v1308_v34 = vld [vmem:[#allocation8 + $0x138] sm:$0xff]  ;;  %v1325_v35 = vld [vmem:[#allocation8 + $0x1c0] sm:$0xff]  ;;  %s5954_s29 = scalar_lea.sflag [#allocation10], %s238_s10  ;;  %s6300_s5 = sshra.s32 %s5969_s28, 4  ;;  %s6301_s5 = int_to_ptr.hbm [resolvable:$true] %s6300_s5 }
  0x2b   : > { %257 = vst [vmem:[#allocation2 + $0x58] sm:$0x3] %v6365_v0  ;;  %1531 = vmatpush.msra.mxu1 %v1295_v21  ;;  %1756 = vmatpush.msra.mxu3 %v1328_v23  ;;  %v1275_v36 = vld [vmem:[#allocation8 + $0x30] sm:$0xff]  ;;  %v1324_v39 = vld [vmem:[#allocation8 + $0x1b8] sm:$0xff]  ;;  %v1274_v40 = vld [vmem:[#allocation8 + $0x28] sm:$0xff]  ;;  %s6302_s19 = scalar_lea.hbm %s6301_s5, 16  ;;  %p6307_p3 = scmp.lt.s32.totalorder %s6301_s5, %s7658_s4 }
  0x2c   : > { %258 = vst [vmem:[#allocation2 + $0x60] sm:$0xff] %v6365_v0  ;;  %1644 = vmatpush.msra.mxu2 %v1311_v22  ;;  %1419 = vmatpush.msra.mxu0 %v1278_v24  ;;  %v1291_v37 = vld [vmem:[#allocation8 + $0xb0] sm:$0xff]  ;;  %v1290_v41 = vld [vmem:[#allocation8 + $0xa8] sm:$0xff]  ;;  %v1273_v44 = vld [vmem:[#allocation8 + $0x20] sm:$0xff]  ;;  %p6303_p0 = scmp.ne.s32.totalorder %s6301_s5, %s6302_s19  ;;  %s6306_s30 = scalar_lea.hbm %s7658_s4, 32 }
  0x2d   : > { %259 = vst [vmem:[#allocation2 + $0x68] sm:$0xff] %v6365_v0  ;;  %1532 = vmatpush.msra.mxu1 %v1294_v25  ;;  %1757 = vmatpush.msra.mxu3 %v1327_v27  ;;  %v1307_v38 = vld [vmem:[#allocation8 + $0x130] sm:$0xff]  ;;  %v1306_v42 = vld [vmem:[#allocation8 + $0x128] sm:$0xff]  ;;  %v1289_v45 = vld [vmem:[#allocation8 + $0xa0] sm:$0xff]  ;;  %p6308_p4 = scmp.lt.s32.totalorder %s6306_s30, %s6302_s19 }
  0x2e   : > { %260 = vst [vmem:[#allocation2 + $0x70] sm:$0x3] %v6365_v0  ;;  %1645 = vmatpush.msra.mxu2 %v1310_v26  ;;  %1420 = vmatpush.msra.mxu0 %v1277_v28  ;;  %v1323_v43 = vld [vmem:[#allocation8 + $0x1b0] sm:$0xff]  ;;  %v1305_v46 = vld [vmem:[#allocation8 + $0x120] sm:$0xff]  ;;  %v1322_v47 = vld [vmem:[#allocation8 + $0x1a8] sm:$0xff]  ;;  %p6304_p1 = pnand %p6303_p0, %p6431_p5 }
  0x2f   : > { %261 = vst [vmem:[#allocation2 + $0x78] sm:$0xff] %v6365_v0  ;;  %1533 = vmatpush.msra.mxu1 %v1293_v29  ;;  %1758 = vmatpush.msra.mxu3 %v1326_v31  ;;  %v1272_v48 = vld [vmem:[#allocation8 + $0x18] sm:$0xff]  ;;  %v1321_v51 = vld [vmem:[#allocation8 + $0x1a0] sm:$0xff]  ;;  %v1271_v52 = vld [vmem:[#allocation8 + $0x10] sm:$0xff]  ;;  %p6309_p7 = por %p6308_p4, %p6307_p3 }
  0x30   : > { %262 = vst [vmem:[#allocation2 + $0x80] sm:$0xff] %v6365_v0  ;;  %1646 = vmatpush.msra.mxu2 %v1309_v30  ;;  %1421 = vmatpush.msra.mxu0 %v1276_v32  ;;  %v1288_v49 = vld [vmem:[#allocation8 + $0x98] sm:$0xff]  ;;  %v1287_v53 = vld [vmem:[#allocation8 + $0x90] sm:$0xff]  ;;  %v1270_v56 = vld [vmem:[#allocation8 + $0x8] sm:$0xff]  ;;  %p6305_p2 = pneg %p6304_p1 }
  0x31   : > { %263 = vst [vmem:[#allocation2 + $0x88] sm:$0x3] %v6365_v0  ;;  %1534 = vmatpush.msra.mxu1 %v1292_v33  ;;  %1759 = vmatpush.msra.mxu3 %v1325_v35  ;;  %v1304_v50 = vld [vmem:[#allocation8 + $0x118] sm:$0xff]  ;;  %v1303_v54 = vld [vmem:[#allocation8 + $0x110] sm:$0xff]  ;;  %v1286_v57 = vld [vmem:[#allocation8 + $0x88] sm:$0xff] }
  0x32   : > { %264 = vst [vmem:[#allocation2 + $0x90] sm:$0xff] %v6365_v0  ;;  %1647 = vmatpush.msra.mxu2 %v1308_v34  ;;  %1422 = vmatpush.msra.mxu0 %v1275_v36  ;;  %v1320_v55 = vld [vmem:[#allocation8 + $0x198] sm:$0xff]  ;;  %v1302_v58 = vld [vmem:[#allocation8 + $0x108] sm:$0xff]  ;;  %v1319_v59 = vld [vmem:[#allocation8 + $0x190] sm:$0xff]  ;;  %p6310_p8 = pnand %p6309_p7, %p6305_p2 }
  0x33   : > { %265 = vst [vmem:[#allocation2 + $0x98] sm:$0xff] %v6365_v0  ;;  %1535 = vmatpush.msra.mxu1 %v1291_v37  ;;  %1760 = vmatpush.msra.mxu3 %v1324_v39  ;;  %v1269_v60 = vld [vmem:[#allocation8] sm:$0xff]  ;;  %v1318_v63 = vld [vmem:[#allocation8 + $0x188] sm:$0xff]  ;;  %v1348_v4 = vld [vmem:[#allocation8 + $0x278] sm:$0xff] }
  0x34   : > { %266 = vst [vmem:[#allocation2 + $0xa0] sm:$0x3] %v6365_v0  ;;  %1648 = vmatpush.msra.mxu2 %v1307_v38  ;;  %1423 = vmatpush.msra.mxu0 %v1274_v40  ;;  %v1285_v61 = vld [vmem:[#allocation8 + $0x80] sm:$0xff]  ;;  %v469_v5 = vld [vmem:[#allocation2 + $0x9] sm:$0xff]  ;;  %v338_v8 = vld [vmem:[%s6573_s9] sm:$0xff] }
  0x35   : > { %267 = vst [vmem:[#allocation2 + $0xa8] sm:$0xff] %v6365_v0  ;;  %1536 = vmatpush.msra.mxu1 %v1290_v41  ;;  %1761 = vmatpush.msra.mxu3 %v1323_v43  ;;  %v1301_v62 = vld [vmem:[#allocation8 + $0x100] sm:$0xff]  ;;  %v533_v6 = vld [vmem:[#allocation2 + $0xa] sm:$0xff]  ;;  %v342_v13 = vld [vmem:[%s6573_s9 + $0x20] sm:$0xff] }
  0x36   : > { %268 = vst [vmem:[#allocation2 + $0xb0] sm:$0xff] %v6365_v0  ;;  %1649 = vmatpush.msra.mxu2 %v1306_v42  ;;  %1424 = vmatpush.msra.mxu0 %v1273_v44  ;;  %v468_v1 = vld [vmem:[#allocation2 + $0x1] sm:$0xff]  ;;  %v1347_v7 = vld [vmem:[#allocation8 + $0x270] sm:$0xff]  ;;  %v346_v29 = vld [vmem:[%s6573_s9 + $0x40] sm:$0xff] }
  0x37   : > { %269 = vst [vmem:[#allocation2 + $0xb8] sm:$0x3] %v6365_v0  ;;  %1537 = vmatpush.msra.mxu1 %v1289_v45  ;;  %1762 = vmatpush.msra.mxu3 %v1322_v47  ;;  %v532_v2 = vld [vmem:[#allocation2 + $0x2] sm:$0xff]  ;;  %v341_v11 = vld [vmem:[%s6573_s9 + $0x18] sm:$0xff]  ;;  %v1344_v30 = vld [vmem:[#allocation8 + $0x258] sm:$0xff] }
  0x38   : > { %270 = vst [vmem:[#allocation2 + $0xc0] sm:$0xff] %v6365_v0  ;;  %1650 = vmatpush.msra.mxu2 %v1305_v46  ;;  %1425 = vmatpush.msra.mxu0 %v1272_v48  ;;  %v1317_v3 = vld [vmem:[#allocation8 + $0x180] sm:$0xff]  ;;  %v340_v10 = vld [vmem:[%s6573_s9 + $0x10] sm:$0xff]  ;;  %v345_v25 = vld [vmem:[%s6573_s9 + $0x38] sm:$0xff] }
  0x39   : > { %271 = vst [vmem:[#allocation2 + $0xc8] sm:$0xff] %v6365_v0  ;;  %1538 = vmatpush.msra.mxu1 %v1288_v49  ;;  %1763 = vmatpush.msra.mxu3 %v1321_v51  ;;  %v339_v9 = vld [vmem:[%s6573_s9 + $0x8] sm:$0xff]  ;;  %v1346_v12 = vld [vmem:[#allocation8 + $0x268] sm:$0xff]  ;;  %v1343_v39 = vld [vmem:[#allocation8 + $0x250] sm:$0xff] }
  0x3a   : > { %272 = vst [vmem:[#allocation2 + $0xd0] sm:$0x3] %v6365_v0  ;;  %1651 = vmatpush.msra.mxu2 %v1304_v50  ;;  %1426 = vmatpush.msra.mxu0 %v1271_v52  ;;  %v343_v16 = vld [vmem:[%s6573_s9 + $0x28] sm:$0xff]  ;;  %v344_v20 = vld [vmem:[%s6573_s9 + $0x30] sm:$0xff]  ;;  %v349_v43 = vld [vmem:[%s6573_s9 + $0x58] sm:$0xff] }
  0x3b   : > { %273 = vst [vmem:[#allocation2 + $0xd8] sm:$0xff] %v6365_v0  ;;  %1539 = vmatpush.msra.mxu1 %v1287_v53  ;;  %1764 = vmatpush.msra.mxu3 %v1320_v55  ;;  %v1345_v21 = vld [vmem:[#allocation8 + $0x260] sm:$0xff]  ;;  %v348_v38 = vld [vmem:[%s6573_s9 + $0x50] sm:$0xff]  ;;  %v350_v47 = vld [vmem:[%s6573_s9 + $0x60] sm:$0xff] }
  0x3c   : > { %274 = vst [vmem:[#allocation2 + $0xe0] sm:$0xff] %v6365_v0  ;;  %1652 = vmatpush.msra.mxu2 %v1303_v54  ;;  %1427 = vmatpush.msra.mxu0 %v1270_v56  ;;  %v347_v34 = vld [vmem:[%s6573_s9 + $0x48] sm:$0xff]  ;;  %v1342_v48 = vld [vmem:[#allocation8 + $0x248] sm:$0xff] }
  0x3d   : > { %275 = vst [vmem:[#allocation2 + $0xe8] sm:$0x3] %v6365_v0  ;;  %1540 = vmatpush.msra.mxu1 %v1286_v57  ;;  %1765 = vmatpush.msra.mxu3 %v1319_v59  ;;  %v351_v52 = vld [vmem:[%s6573_s9 + $0x68] sm:$0xff]  ;;  %v352_v56 = vld [vmem:[%s6573_s9 + $0x70] sm:$0xff] }
  0x3e   : > { %276 = vst [vmem:[#allocation2 + $0xf0] sm:$0xff] %v6365_v0  ;;  %1653 = vmatpush.msra.mxu2 %v1302_v58  ;;  %1428 = vmatpush.msra.mxu0 %v1269_v60  ;;  %v1341_v57 = vld [vmem:[#allocation8 + $0x240] sm:$0xff] }
  0x3f   : > { %277 = vst [vmem:[#allocation2 + $0xf8] sm:$0xff] %v6365_v0  ;;  %1541 = vmatpush.msra.mxu1 %v1285_v61  ;;  %1766 = vmatpush.msra.mxu3 %v1318_v63  ;;  %v353_v61 = vld [vmem:[%s6573_s9 + $0x78] sm:$0xff] }
  0x40   : > { %278 = vst [vmem:[#allocation2 + $0x100] sm:$0x3] %v6365_v0  ;;  %1654 = vmatpush.msra.mxu2 %v1301_v62  ;;  %1429 = vmatmul.f32.vlgmr.msra.gmra.mxu0 %v6365_v0 }
  0x41   : > { %279 = vst [vmem:[#allocation2 + $0x108] sm:$0xff] %v6365_v0  ;;  %1542 = vmatmul.f32.vlgmr.msra.gmra.mxu1 %v468_v1  ;;  %1655 = vmatmul.f32.vlgmr.msra.gmra.mxu2 %v532_v2  ;;  %v354_v2 = vld [vmem:[%s6573_s9 + $0x80] sm:$0xff] }
  0x42   : > { %280 = vst [vmem:[#allocation2 + $0x110] sm:$0xff] %v6365_v0  ;;  %1767 = vmatpush.msra.mxu3 %v1317_v3  ;;  %1865 = vmatpush.msrb.mxu0 %v1348_v4  ;;  %v1340_v3 = vld [vmem:[#allocation8 + $0x238] sm:$0xff] }
  0x43   : > { %281 = vst [vmem:[#allocation2 + $0x118] sm:$0x3] %v6365_v0 }
  0x44   : > { %282 = vst [vmem:[#allocation2 + $0x120] sm:$0xff] %v6365_v0  ;;  %1866 = vmatpush.msrb.mxu0 %v1347_v7  ;;  %v355_v7 = vld [vmem:[%s6573_s9 + $0x88] sm:$0xff] }
  0x45   : > { %283 = vst [vmem:[#allocation2 + $0x128] sm:$0xff] %v6365_v0 }
  0x46   : > { %284 = vst [vmem:[#allocation2 + $0x130] sm:$0x3] %v6365_v0  ;;  %1867 = vmatpush.msrb.mxu0 %v1346_v12 }
  0x47   : > { %285 = vst [vmem:[#allocation2 + $0x138] sm:$0xff] %v6365_v0 }
  0x48   : > { %286 = vst [vmem:[#allocation2 + $0x140] sm:$0xff] %v6365_v0  ;;  %1432 = vmatmul.f32.gmra.mxu0 %v6365_v0 }
  0x49   : > { %287 = vst [vmem:[#allocation2 + $0x148] sm:$0x3] %v6365_v0  ;;  %1545 = vmatmul.f32.gmra.mxu1 %v469_v5  ;;  %1658 = vmatmul.f32.gmra.mxu2 %v533_v6 }
  0x4a   : > { %288 = vst [vmem:[#allocation2 + $0x150] sm:$0xff] %v6365_v0  ;;  %1868 = vmatpush.msrb.mxu0 %v1345_v21 }
  0x4b   : > { %289 = vst [vmem:[#allocation2 + $0x158] sm:$0xff] %v6365_v0 }
  0x4c   : > { %290 = vst [vmem:[#allocation2 + $0x160] sm:$0x3] %v6365_v0  ;;  %1869 = vmatpush.msrb.mxu0 %v1344_v30 }
  0x4d   : > { %291 = vst [vmem:[#allocation2 + $0x168] sm:$0xff] %v6365_v0 }
  0x4e   : > { %292 = vst [vmem:[#allocation2 + $0x170] sm:$0xff] %v6365_v0  ;;  %1870 = vmatpush.msrb.mxu0 %v1343_v39 }
  0x4f   : > { %293 = vst [vmem:[#allocation2 + $0x178] sm:$0x3] %v6365_v0 }
  0x50   : > { %294 = vst [vmem:[#allocation2 + $0x180] sm:$0xff] %v6365_v0  ;;  %1871 = vmatpush.msrb.mxu0 %v1342_v48 }
  0x51   : > { %295 = vst [vmem:[#allocation2 + $0x188] sm:$0xff] %v6365_v0 }
  0x52   : > { %296 = vst [vmem:[#allocation2 + $0x190] sm:$0x3] %v6365_v0  ;;  %1872 = vmatpush.msrb.mxu0 %v1341_v57 }
  0x53   : > { %297 = vst [vmem:[#allocation2 + $0x198] sm:$0xff] %v6365_v0 }
  0x54   : > { %298 = vst [vmem:[#allocation2 + $0x1a0] sm:$0xff] %v6365_v0  ;;  %1873 = vmatpush.msrb.mxu0 %v1340_v3  ;;  %v1336_v3 = vld [vmem:[#allocation8 + $0x218] sm:$0xff] }
  0x55   : > { %299 = vst [vmem:[#allocation2 + $0x1a8] sm:$0x3] %v6365_v0 }
  0x56   : > { %300 = vst [vmem:[#allocation3] sm:$0xff] %v6365_v0 }
  0x57   : > { %301 = vst [vmem:[#allocation3 + $0x8] sm:$0x3] %v6365_v0 }
  0x58   : > { %302 = vst [vmem:[#allocation3 + $0x10] sm:$0xff] %v6365_v0 }
  0x59   : > { %303 = vst [vmem:[#allocation3 + $0x18] sm:$0x3] %v6365_v0 }
  0x5a   : > { %304 = vst [vmem:[#allocation3 + $0x20] sm:$0xff] %v6365_v0 }
  0x5b   : > { %305 = vst [vmem:[#allocation3 + $0x28] sm:$0x3] %v6365_v0 }
  0x5c   : > { %306 = vst [vmem:[#allocation3 + $0x30] sm:$0xff] %v6365_v0 }
  0x5d   : > { %307 = vst [vmem:[#allocation3 + $0x38] sm:$0x3] %v6365_v0 }
  0x5e   : > { %308 = vst [vmem:[#allocation3 + $0x40] sm:$0xff] %v6365_v0 }
  0x5f   : > { %309 = vst [vmem:[#allocation3 + $0x48] sm:$0x3] %v6365_v0 }
  0x60   : > { %310 = vst [vmem:[#allocation3 + $0x50] sm:$0xff] %v6365_v0 }
  0x61   : > { %311 = vst [vmem:[#allocation3 + $0x58] sm:$0x3] %v6365_v0 }
  0x62   : > { %312 = vst [vmem:[#allocation3 + $0x60] sm:$0xff] %v6365_v0 }
  0x63   : > { %313 = vst [vmem:[#allocation3 + $0x68] sm:$0x3] %v6365_v0 }
  0x64   : > { %314 = vst [vmem:[#allocation3 + $0x70] sm:$0xff] %v6365_v0 }
  0x65   : > { %315 = vst [vmem:[#allocation3 + $0x78] sm:$0x3] %v6365_v0 }
  0x66   : > { %316 = vst [vmem:[#allocation3 + $0x80] sm:$0xff] %v6365_v0 }
  0x67   : > { %317 = vst [vmem:[#allocation3 + $0x88] sm:$0x3] %v6365_v0 }
  0x68   : > { %318 = vst [vmem:[#allocation3 + $0x90] sm:$0xff] %v6365_v0 }
  0x69   : > { %319 = vst [vmem:[#allocation3 + $0x98] sm:$0x3] %v6365_v0 }
  0x6a   : > { %320 = vst [vmem:[#allocation4] sm:$0x3f] %v6365_v0 }
  0x6b   : > { %321 = vst [vmem:[#allocation4 + $0x8] sm:$0x3f] %v6365_v0 }
  0x6c   : > { %322 = vst [vmem:[#allocation4 + $0x10] sm:$0x3f] %v6365_v0 }
  0x6d   : > { %323 = vst [vmem:[#allocation4 + $0x18] sm:$0x3f] %v6365_v0 }
  0x6e   : > { %324 = vst [vmem:[#allocation4 + $0x20] sm:$0x3f] %v6365_v0 }
  0x6f   : > { %325 = vst [vmem:[#allocation4 + $0x28] sm:$0x3f] %v6365_v0 }
  0x70   : > { %326 = vst [vmem:[#allocation5] sm:$0x3f] %v6365_v0 }
  0x71   : > { %327 = vst [vmem:[#allocation5 + $0x8] sm:$0x3f] %v6365_v0 }
  0x72   : > { %328 = vst [vmem:[#allocation5 + $0x10] sm:$0x3f] %v6365_v0 }
  0x73   : > { %329 = vst [vmem:[#allocation5 + $0x18] sm:$0x3f] %v6365_v0 }
  0x74   : > { %330 = vst [vmem:[#allocation5 + $0x20] sm:$0x3f] %v6365_v0 }
  0x75   : > { %331 = vst [vmem:[#allocation5 + $0x28] sm:$0x3f] %v6365_v0 }
  0x76   : > { %332 = vst [vmem:[#allocation6] sm:$0x3f] %v6365_v0 }
  0x77   : > { %333 = vst [vmem:[#allocation6 + $0x8] sm:$0x3f] %v6365_v0 }
  0x78   : > { %334 = vst [vmem:[#allocation6 + $0x10] sm:$0x3f] %v6365_v0 }
  0x79   : > { %335 = vst [vmem:[#allocation6 + $0x18] sm:$0x3f] %v6365_v0 }
  0x7a   : > { %336 = vst [vmem:[#allocation6 + $0x20] sm:$0x3f] %v6365_v0 }
  0x7b   : > { %337 = vst [vmem:[#allocation6 + $0x28] sm:$0x3f] %v6365_v0 }
  0x7c   : > { %372 = vst.msk [vmem:[#allocation2 + $0x19] sm:$0xff] %vm371_vm0, %v338_v8 }
  0x7d   : > { %373 = vst.msk [vmem:[#allocation2 + $0x21] sm:$0xff] %vm371_vm0, %v339_v9 }
  0x7e   : > { %374 = vst.msk [vmem:[#allocation2 + $0x31] sm:$0xff] %vm371_vm0, %v340_v10 }
  0x7f   : > { %375 = vst.msk [vmem:[#allocation2 + $0x39] sm:$0xff] %vm371_vm0, %v341_v11  ;;  %v356_v11 = vld [vmem:[%s6573_s9 + $0x90] sm:$0xff] }
  0x80   : > { %376 = vst.msk [vmem:[#allocation2 + $0x49] sm:$0xff] %vm371_vm0, %v342_v13 }
  0x81   : > { %377 = vst.msk [vmem:[#allocation2 + $0x51] sm:$0xff] %vm371_vm0, %v343_v16 }
  0x82   : > { %378 = vst.msk [vmem:[#allocation2 + $0x61] sm:$0xff] %vm371_vm0, %v344_v20 }
  0x83   : > { %v596_v14 = vld [vmem:[#allocation2 + $0x18] sm:$0xff]  ;;  %379 = vst.msk [vmem:[#allocation2 + $0x69] sm:$0xff] %vm371_vm0, %v345_v25 }
  0x84   : > { %v470_v15 = vld [vmem:[#allocation2 + $0x19] sm:$0xff]  ;;  %1768 = vmatmul.f32.vlgmr.msra.gmra.mxu3 %v596_v14  ;;  %1435 = vmatmul.f32.gmra.mxu0 %v596_v14  ;;  %v471_v18 = vld [vmem:[#allocation2 + $0x21] sm:$0xff]  ;;  %380 = vst.msk [vmem:[#allocation2 + $0x79] sm:$0xff] %vm371_vm0, %v346_v29  ;;  %v1339_v14 = vld [vmem:[#allocation8 + $0x230] sm:$0xff] }
  0x85   : > { %v534_v0 = vld [vmem:[#allocation2 + $0x1a] sm:$0xff]  ;;  %1548 = vmatmul.f32.gmra.mxu1 %v470_v15  ;;  %v535_v19 = vld [vmem:[#allocation2 + $0x22] sm:$0xff]  ;;  %v598_v22 = vld [vmem:[#allocation2 + $0x30] sm:$0xff]  ;;  %381 = vst.msk [vmem:[#allocation2 + $0x81] sm:$0xff] %vm371_vm0, %v347_v34  ;;  %1874 = vmatpush.msrb.mxu0 %v1339_v14 }
  0x86   : > { %1661 = vmatmul.f32.gmra.mxu2 %v534_v0  ;;  %v597_v17 = vld [vmem:[#allocation2 + $0x20] sm:$0xff]  ;;  %v472_v23 = vld [vmem:[#allocation2 + $0x31] sm:$0xff]  ;;  %382 = vst.msk [vmem:[#allocation2 + $0x91] sm:$0xff] %vm371_vm0, %v348_v38 }
  0x87   : > { %v536_v24 = vld [vmem:[#allocation2 + $0x32] sm:$0xff]  ;;  %v537_v28 = vld [vmem:[#allocation2 + $0x3a] sm:$0xff]  ;;  %v600_v31 = vld [vmem:[#allocation2 + $0x48] sm:$0xff]  ;;  %383 = vst.msk [vmem:[#allocation2 + $0x99] sm:$0xff] %vm371_vm0, %v349_v43 }
  0x88   : > { %v599_v26 = vld [vmem:[#allocation2 + $0x38] sm:$0xff]  ;;  %v474_v32 = vld [vmem:[#allocation2 + $0x49] sm:$0xff]  ;;  %384 = vst.msk [vmem:[#allocation2 + $0xa9] sm:$0xff] %vm371_vm0, %v350_v47  ;;  %v1337_v43 = vld [vmem:[#allocation8 + $0x220] sm:$0xff] }
  0x89   : > { %v473_v27 = vld [vmem:[#allocation2 + $0x39] sm:$0xff]  ;;  %v538_v33 = vld [vmem:[#allocation2 + $0x4a] sm:$0xff]  ;;  %v476_v41 = vld [vmem:[#allocation2 + $0x61] sm:$0xff]  ;;  %385 = vst.msk [vmem:[#allocation2 + $0xb1] sm:$0xff] %vm371_vm0, %v351_v52 }
  0x8a   : > { %v601_v35 = vld [vmem:[#allocation2 + $0x50] sm:$0xff]  ;;  %v602_v40 = vld [vmem:[#allocation2 + $0x60] sm:$0xff]  ;;  %v603_v44 = vld [vmem:[#allocation2 + $0x68] sm:$0xff]  ;;  %386 = vst.msk [vmem:[#allocation2 + $0xc1] sm:$0xff] %vm371_vm0, %v352_v56 }
  0x8b   : > { %v475_v36 = vld [vmem:[#allocation2 + $0x51] sm:$0xff]  ;;  %v540_v42 = vld [vmem:[#allocation2 + $0x62] sm:$0xff]  ;;  %v478_v50 = vld [vmem:[#allocation2 + $0x79] sm:$0xff]  ;;  %387 = vst.msk [vmem:[#allocation2 + $0xc9] sm:$0xff] %vm371_vm0, %v353_v61 }
  0x8c   : > { %1771 = vmatmul.f32.gmra.mxu3 %v597_v17  ;;  %1438 = vmatmul.f32.gmra.mxu0 %v597_v17  ;;  %v539_v37 = vld [vmem:[#allocation2 + $0x52] sm:$0xff]  ;;  %v477_v45 = vld [vmem:[#allocation2 + $0x69] sm:$0xff]  ;;  %v542_v51 = vld [vmem:[#allocation2 + $0x7a] sm:$0xff]  ;;  %388 = vst.msk [vmem:[#allocation2 + $0xd9] sm:$0xff] %vm371_vm0, %v354_v2 }
  0x8d   : > { %1551 = vmatmul.f32.gmra.mxu1 %v471_v18  ;;  %v541_v46 = vld [vmem:[#allocation2 + $0x6a] sm:$0xff]  ;;  %v604_v49 = vld [vmem:[#allocation2 + $0x78] sm:$0xff]  ;;  %v605_v53 = vld [vmem:[#allocation2 + $0x80] sm:$0xff]  ;;  %389 = vst.msk [vmem:[#allocation2 + $0xe1] sm:$0xff] %vm371_vm0, %v355_v7 }
  0x8e   : > { %1664 = vmatmul.f32.gmra.mxu2 %v535_v19  ;;  %v479_v54 = vld [vmem:[#allocation2 + $0x81] sm:$0xff]  ;;  %v606_v58 = vld [vmem:[#allocation2 + $0x90] sm:$0xff]  ;;  %v607_v62 = vld [vmem:[#allocation2 + $0x98] sm:$0xff]  ;;  %390 = vst.msk [vmem:[#allocation2 + $0xf1] sm:$0xff] %vm371_vm0, %v356_v11 }
  0x8f   : > { %v543_v55 = vld [vmem:[#allocation2 + $0x82] sm:$0xff]  ;;  %v480_v59 = vld [vmem:[#allocation2 + $0x91] sm:$0xff]  ;;  %v481_v63 = vld [vmem:[#allocation2 + $0x99] sm:$0xff] }
  0x90   : > { %v544_v60 = vld [vmem:[#allocation2 + $0x92] sm:$0xff]  ;;  %v545_v1 = vld [vmem:[#allocation2 + $0x9a] sm:$0xff]  ;;  %v608_v4 = vld [vmem:[#allocation2 + $0xa8] sm:$0xff] }
  0x91   : > { %v482_v5 = vld [vmem:[#allocation2 + $0xa9] sm:$0xff]  ;;  %v483_v9 = vld [vmem:[#allocation2 + $0xb1] sm:$0xff]  ;;  %v610_v15 = vld [vmem:[#allocation2 + $0xc0] sm:$0xff] }
  0x92   : > { %v546_v6 = vld [vmem:[#allocation2 + $0xaa] sm:$0xff]  ;;  %v547_v10 = vld [vmem:[#allocation2 + $0xb2] sm:$0xff]  ;;  %v484_v16 = vld [vmem:[#allocation2 + $0xc1] sm:$0xff] }
  0x93   : > { %v609_v8 = vld [vmem:[#allocation2 + $0xb0] sm:$0xff]  ;;  %v548_v0 = vld [vmem:[#allocation2 + $0xc2] sm:$0xff]  ;;  %v486_v30 = vld [vmem:[#allocation2 + $0xd9] sm:$0xff] }
  0x94   : > { %1774 = vmatmul.f32.gmra.mxu3 %v598_v22  ;;  %1441 = vmatmul.f32.gmra.mxu0 %v598_v22  ;;  %v357_v17 = vld [vmem:[%s6573_s9 + $0x98] sm:$0xff]  ;;  %v611_v21 = vld [vmem:[#allocation2 + $0xc8] sm:$0xff]  ;;  %v362_v61 = vld [vmem:[%s6573_s9 + $0xc0] sm:$0xff] }
  0x95   : > { %1554 = vmatmul.f32.gmra.mxu1 %v472_v23  ;;  %391 = vst.msk [vmem:[#allocation2 + $0xf9] sm:$0xff] %vm371_vm0, %v357_v17  ;;  %v485_v22 = vld [vmem:[#allocation2 + $0xc9] sm:$0xff]  ;;  %v487_v38 = vld [vmem:[#allocation2 + $0xe1] sm:$0xff]  ;;  %v488_v48 = vld [vmem:[#allocation2 + $0xf1] sm:$0xff] }
  0x96   : > { %1667 = vmatmul.f32.gmra.mxu2 %v536_v24  ;;  %v549_v23 = vld [vmem:[#allocation2 + $0xca] sm:$0xff]  ;;  %v358_v24 = vld [vmem:[%s6573_s9 + $0xa0] sm:$0xff]  ;;  %v551_v39 = vld [vmem:[#allocation2 + $0xe2] sm:$0xff]  ;;  %396 = vst.msk [vmem:[#allocation2 + $0x139] sm:$0xff] %vm371_vm0, %v362_v61 }
  0x97   : > { %392 = vst.msk [vmem:[#allocation2 + $0x109] sm:$0xff] %vm371_vm0, %v358_v24 }
  0x9c   : > { %1777 = vmatmul.f32.gmra.mxu3 %v599_v26  ;;  %1444 = vmatmul.f32.gmra.mxu0 %v599_v26  ;;  %v1338_v26 = vld [vmem:[#allocation8 + $0x228] sm:$0xff] }
  0x9d   : > { %1557 = vmatmul.f32.gmra.mxu1 %v473_v27  ;;  %v612_v27 = vld [vmem:[#allocation2 + $0xd8] sm:$0xff]  ;;  %1875 = vmatpush.msrb.mxu0 %v1338_v26  ;;  %v364_v26 = vld [vmem:[%s6573_s9 + $0xd0] sm:$0xff] }
  0x9e   : > { %1670 = vmatmul.f32.gmra.mxu2 %v537_v28  ;;  %398 = vst.msk [vmem:[#allocation2 + $0x151] sm:$0xff] %vm371_vm0, %v364_v26 }
  0x9f   : > { %1876 = vmatpush.msrb.mxu0 %v1337_v43 }
  0xa1   : > { %1877 = vmatpush.msrb.mxu0 %v1336_v3  ;;  %v367_v3 = vld [vmem:[%s6573_s9 + $0xe8] sm:$0xff] }
  0xa2   : > { %401 = vst.msk [vmem:[#allocation2 + $0x171] sm:$0xff] %vm371_vm0, %v367_v3  ;;  %v1356_v3 = vld [vmem:[#allocation8 + $0x2b8] sm:$0xff] }
  0xa4   : > { %1780 = vmatmul.f32.gmra.mxu3 %v600_v31  ;;  %1447 = vmatmul.f32.gmra.mxu0 %v600_v31  ;;  %v550_v31 = vld [vmem:[#allocation2 + $0xda] sm:$0xff] }
  0xa5   : > { %1560 = vmatmul.f32.gmra.mxu1 %v474_v32  ;;  %v359_v32 = vld [vmem:[%s6573_s9 + $0xa8] sm:$0xff] }
  0xa6   : > { %1673 = vmatmul.f32.gmra.mxu2 %v538_v33  ;;  %393 = vst.msk [vmem:[#allocation2 + $0x111] sm:$0xff] %vm371_vm0, %v359_v32 }
  0xac   : > { %1783 = vmatmul.f32.gmra.mxu3 %v601_v35  ;;  %1450 = vmatmul.f32.gmra.mxu0 %v601_v35  ;;  %v613_v35 = vld [vmem:[#allocation2 + $0xe0] sm:$0xff] }
  0xad   : > { %1563 = vmatmul.f32.gmra.mxu1 %v475_v36  ;;  %v555_v24 = vld [vmem:[#allocation2 + $0x112] sm:$0xff] }
  0xae   : > { %1676 = vmatmul.f32.gmra.mxu2 %v539_v37 }
  0xb4   : > { %1786 = vmatmul.f32.gmra.mxu3 %v602_v40  ;;  %1453 = vmatmul.f32.gmra.mxu0 %v602_v40  ;;  %v360_v40 = vld [vmem:[%s6573_s9 + $0xb0] sm:$0xff] }
  0xb5   : > { %1566 = vmatmul.f32.gmra.mxu1 %v476_v41  ;;  %394 = vst.msk [vmem:[#allocation2 + $0x121] sm:$0xff] %vm371_vm0, %v360_v40 }
  0xb6   : > { %1679 = vmatmul.f32.gmra.mxu2 %v540_v42 }
  0xbc   : > { %1789 = vmatmul.f32.gmra.mxu3 %v603_v44  ;;  %1456 = vmatmul.f32.gmra.mxu0 %v603_v44  ;;  %v614_v44 = vld [vmem:[#allocation2 + $0xf0] sm:$0xff]  ;;  %v618_v32 = vld [vmem:[#allocation2 + $0x120] sm:$0xff] }
  0xbd   : > { %1569 = vmatmul.f32.gmra.mxu1 %v477_v45  ;;  %v6618_v12 = vpop.f32.mrf.mxu0 }
  0xbe   : > { %1682 = vmatmul.f32.gmra.mxu2 %v541_v46  ;;  %v6620_v13 = vpop.f32.mrf.mxu1 }
  0xc4   : > { %1792 = vmatmul.f32.gmra.mxu3 %v604_v49  ;;  %1459 = vmatmul.f32.gmra.mxu0 %v604_v49  ;;  %v6623_v18 = vpop.f32.mrf.mxu2  ;;  %v552_v49 = vld [vmem:[#allocation2 + $0xf2] sm:$0xff] }
  0xc5   : > { %1572 = vmatmul.f32.gmra.mxu1 %v478_v50  ;;  %v6626_v19 = vpop.f32.mrf.mxu0  ;;  %v361_v50 = vld [vmem:[%s6573_s9 + $0xb8] sm:$0xff] }
  0xc6   : > { %1685 = vmatmul.f32.gmra.mxu2 %v542_v51  ;;  %v6628_v20 = vpop.f32.mrf.mxu1  ;;  %395 = vst.msk [vmem:[#allocation2 + $0x129] sm:$0xff] %vm371_vm0, %v361_v50 }
  0xcc   : > { %1795 = vmatmul.f32.gmra.mxu3 %v605_v53  ;;  %1462 = vmatmul.f32.gmra.mxu0 %v605_v53  ;;  %v6632_v25 = vpop.f32.mrf.mxu2 }
  0xcd   : > { %1575 = vmatmul.f32.gmra.mxu1 %v479_v54  ;;  %v557_v50 = vld [vmem:[#allocation2 + $0x12a] sm:$0xff] }
  0xce   : > { %1688 = vmatmul.f32.gmra.mxu2 %v543_v55  ;;  %v615_v55 = vld [vmem:[#allocation2 + $0xf8] sm:$0xff] }
  0xd4   : > { %1798 = vmatmul.f32.gmra.mxu3 %v606_v58  ;;  %1465 = vmatmul.f32.gmra.mxu0 %v606_v58 }
  0xd5   : > { %1578 = vmatmul.f32.gmra.mxu1 %v480_v59  ;;  %v489_v59 = vld [vmem:[#allocation2 + $0xf9] sm:$0xff] }
  0xd6   : > { %1691 = vmatmul.f32.gmra.mxu2 %v544_v60  ;;  %v553_v60 = vld [vmem:[#allocation2 + $0xfa] sm:$0xff] }
  0xdc   : > { %1801 = vmatmul.f32.gmra.mxu3 %v607_v62  ;;  %1468 = vmatmul.f32.gmra.mxu0 %v607_v62 }
  0xdd   : > { %1581 = vmatmul.f32.gmra.mxu1 %v481_v63 }
  0xde   : > { %1694 = vmatmul.f32.gmra.mxu2 %v545_v1 }
  0xe4   : > { %1804 = vmatmul.f32.gmra.mxu3 %v608_v4  ;;  %1471 = vmatmul.f32.gmra.mxu0 %v608_v4  ;;  %v616_v4 = vld [vmem:[#allocation2 + $0x108] sm:$0xff] }
  0xe5   : > { %1584 = vmatmul.f32.gmra.mxu1 %v482_v5 }
  0xe6   : > { %1697 = vmatmul.f32.gmra.mxu2 %v546_v6 }
  0xec   : > { %1807 = vmatmul.f32.gmra.mxu3 %v609_v8  ;;  %1474 = vmatmul.f32.gmra.mxu0 %v609_v8  ;;  %v490_v8 = vld [vmem:[#allocation2 + $0x109] sm:$0xff] }
  0xed   : > { %1587 = vmatmul.f32.gmra.mxu1 %v483_v9  ;;  %v554_v9 = vld [vmem:[#allocation2 + $0x10a] sm:$0xff] }
  0xee   : > { %1700 = vmatmul.f32.gmra.mxu2 %v547_v10  ;;  %v363_v10 = vld [vmem:[%s6573_s9 + $0xc8] sm:$0xff] }
  0xef   : > { %397 = vst.msk [vmem:[#allocation2 + $0x141] sm:$0xff] %vm371_vm0, %v363_v10  ;;  %v1395_v10 = vld [vmem:[#allocation8 + $0x3f0] sm:$0xff] }
  0xf4   : > { %1810 = vmatmul.f32.gmra.mxu3 %v610_v15  ;;  %1477 = vmatmul.f32.gmra.mxu0 %v610_v15 }
  0xf5   : > { %1590 = vmatmul.f32.gmra.mxu1 %v484_v16 }
  0xf6   : > { %1703 = vmatmul.f32.gmra.mxu2 %v548_v0  ;;  %v617_v0 = vld [vmem:[#allocation2 + $0x110] sm:$0xff] }
  0xfc   : > { %1813 = vmatmul.f32.gmra.mxu3 %v611_v21  ;;  %1480 = vmatmul.f32.gmra.mxu0 %v611_v21 }
  0xfd   : > { %1593 = vmatmul.f32.gmra.mxu1 %v485_v22 }
  0xfe   : > { %1706 = vmatmul.f32.gmra.mxu2 %v549_v23  ;;  %v491_v23 = vld [vmem:[#allocation2 + $0x111] sm:$0xff] }
 0x101   : > { %v1436_v28 = vpop.f32.mrf.mxu0 }
 0x102   : > { %v1549_v29 = vpop.f32.mrf.mxu1 }
 0x103   : > { %v1550_v46 = vadd.f32 %v1549_v29, %v1436_v28 }
 0x104   : > { %1816 = vmatmul.f32.gmra.mxu3 %v612_v27  ;;  %1483 = vmatmul.f32.gmra.mxu0 %v612_v27 }
 0x105   : > { %1596 = vmatmul.f32.gmra.mxu1 %v486_v30 }
 0x106   : > { %1709 = vmatmul.f32.gmra.mxu2 %v550_v31  ;;  %v1335_v31 = vld [vmem:[#allocation8 + $0x210] sm:$0xff] }
 0x107   : > { %v6636_v33 = vpop.f32.mrf.mxu3  ;;  %1878 = vmatpush.msrb.mxu0 %v1335_v31  ;;  %v1376_v31 = vld [vmem:[#allocation8 + $0x358] sm:$0xff] }
 0x109   : > { %v1662_v34 = vpop.f32.mrf.mxu2  ;;  %v1439_v36 = vpop.f32.mrf.mxu0 }
 0x10a   : > { %v1552_v37 = vpop.f32.mrf.mxu1  ;;  %v1663_v51 = vadd.f32 %v1662_v34, %v1550_v46 }
 0x10b   : > { %v1553_v57 = vadd.f32 %v1552_v37, %v1439_v36  ;;  %v492_v37 = vld [vmem:[#allocation2 + $0x121] sm:$0xff] }
 0x10c   : > { %1819 = vmatmul.f32.gmra.mxu3 %v613_v35  ;;  %1486 = vmatmul.f32.gmra.mxu0 %v613_v35 }
 0x10d   : > { %1599 = vmatmul.f32.gmra.mxu1 %v487_v38  ;;  %v556_v38 = vld [vmem:[#allocation2 + $0x122] sm:$0xff] }
 0x10e   : > { %1712 = vmatmul.f32.gmra.mxu2 %v551_v39  ;;  %v365_v39 = vld [vmem:[%s6573_s9 + $0xd8] sm:$0xff] }
 0x10f   : > { %v6640_v41 = vpop.f32.mrf.mxu3  ;;  %399 = vst.msk [vmem:[#allocation2 + $0x159] sm:$0xff] %vm371_vm0, %v365_v39 }
 0x111   : > { %v1665_v42 = vpop.f32.mrf.mxu2  ;;  %v1442_v45 = vpop.f32.mrf.mxu0 }
 0x112   : > { %v1555_v47 = vpop.f32.mrf.mxu1  ;;  %v1666_v62 = vadd.f32 %v1665_v42, %v1553_v57  ;;  %v1334_v57 = vld [vmem:[#allocation8 + $0x208] sm:$0xff] }
 0x113   : > { %v1556_v6 = vadd.f32 %v1555_v47, %v1442_v45  ;;  %v619_v45 = vld [vmem:[#allocation2 + $0x128] sm:$0xff]  ;;  %1879 = vmatpush.msrb.mxu0 %v1334_v57  ;;  %v1373_v57 = vld [vmem:[#allocation8 + $0x340] sm:$0xff] }
 0x114   : > { %1822 = vmatmul.f32.gmra.mxu3 %v614_v44  ;;  %1489 = vmatmul.f32.gmra.mxu0 %v614_v44 }
 0x115   : > { %1602 = vmatmul.f32.gmra.mxu1 %v488_v48 }
 0x116   : > { %1715 = vmatmul.f32.gmra.mxu2 %v552_v49  ;;  %v493_v49 = vld [vmem:[#allocation2 + $0x129] sm:$0xff] }
 0x117   : > { %v1775_v52 = vpop.f32.mrf.mxu3 }
 0x118   : > { %v6644_v53 = vadd.f32 %v1775_v52, %v1663_v51  ;;  %v366_v51 = vld [vmem:[%s6573_s9 + $0xe0] sm:$0xff] }
 0x119   : > { %v1668_v54 = vpop.f32.mrf.mxu2  ;;  %v1445_v56 = vpop.f32.mrf.mxu0  ;;  %400 = vst.msk [vmem:[#allocation2 + $0x169] sm:$0xff] %vm371_vm0, %v366_v51 }
 0x11a   : > { %v1558_v58 = vpop.f32.mrf.mxu1  ;;  %v1669_v11 = vadd.f32 %v1668_v54, %v1556_v6  ;;  %v1379_v6 = vld [vmem:[#allocation8 + $0x370] sm:$0xff] }
 0x11b   : > { %v1559_v21 = vadd.f32 %v1558_v58, %v1445_v56  ;;  %v620_v58 = vld [vmem:[#allocation2 + $0x138] sm:$0xff] }
 0x11c   : > { %1825 = vmatmul.f32.gmra.mxu3 %v615_v55  ;;  %1492 = vmatmul.f32.gmra.mxu0 %v615_v55 }
 0x11d   : > { %1605 = vmatmul.f32.gmra.mxu1 %v489_v59 }
 0x11e   : > { %1718 = vmatmul.f32.gmra.mxu2 %v553_v60  ;;  %v1380_v60 = vld [vmem:[#allocation8 + $0x378] sm:$0xff] }
 0x11f   : > { %v1778_v63 = vpop.f32.mrf.mxu3  ;;  %2091 = vmatpush.msrb.mxu2 %v1380_v60 }
 0x120   : > { %v6648_v1 = vadd.f32 %v1778_v63, %v1666_v62  ;;  %v494_v63 = vld [vmem:[#allocation2 + $0x139] sm:$0xff] }
 0x121   : > { %v1671_v2 = vpop.f32.mrf.mxu2  ;;  %v1448_v5 = vpop.f32.mrf.mxu0  ;;  %2092 = vmatpush.msrb.mxu2 %v1379_v6 }
 0x122   : > { %v1561_v7 = vpop.f32.mrf.mxu1  ;;  %v1672_v27 = vadd.f32 %v1671_v2, %v1559_v21  ;;  %v558_v2 = vld [vmem:[#allocation2 + $0x13a] sm:$0xff]  ;;  %v1394_v21 = vld [vmem:[#allocation8 + $0x3e8] sm:$0xff] }
 0x123   : > { %v1562_v35 = vadd.f32 %v1561_v7, %v1448_v5  ;;  %v1364_v5 = vld [vmem:[#allocation8 + $0x2f8] sm:$0xff] }
 0x124   : > { %1828 = vmatmul.f32.gmra.mxu3 %v616_v4  ;;  %1495 = vmatmul.f32.gmra.mxu0 %v616_v4  ;;  %v1396_v7 = vld [vmem:[#allocation8 + $0x3f8] sm:$0xff] }
 0x125   : > { %1608 = vmatmul.f32.gmra.mxu1 %v490_v8  ;;  %v1363_v8 = vld [vmem:[#allocation8 + $0x2f0] sm:$0xff]  ;;  %2204 = vmatpush.msrb.mxu3 %v1396_v7  ;;  %v1388_v7 = vld [vmem:[#allocation8 + $0x3b8] sm:$0xff] }
 0x126   : > { %1721 = vmatmul.f32.gmra.mxu2 %v554_v9  ;;  %1978 = vmatpush.msrb.mxu1 %v1364_v5  ;;  %v1378_v9 = vld [vmem:[#allocation8 + $0x368] sm:$0xff] }
 0x127   : > { %v1781_v14 = vpop.f32.mrf.mxu3  ;;  %2093 = vmatpush.msrb.mxu2 %v1378_v9  ;;  %2205 = vmatpush.msrb.mxu3 %v1395_v10 }
 0x128   : > { %v6652_v15 = vadd.f32 %v1781_v14, %v1669_v11  ;;  %1979 = vmatpush.msrb.mxu1 %v1363_v8  ;;  %v623_v8 = vld [vmem:[#allocation2 + $0x158] sm:$0xff] }
 0x129   : > { %v1674_v16 = vpop.f32.mrf.mxu2  ;;  %v1451_v17 = vpop.f32.mrf.mxu0  ;;  %2206 = vmatpush.msrb.mxu3 %v1394_v21  ;;  %v1370_v21 = vld [vmem:[#allocation8 + $0x328] sm:$0xff] }
 0x12a   : > { %v1564_v22 = vpop.f32.mrf.mxu1  ;;  %v1675_v40 = vadd.f32 %v1674_v16, %v1562_v35  ;;  %v1393_v35 = vld [vmem:[#allocation8 + $0x3e0] sm:$0xff] }
 0x12b   : > { %v1565_v47 = vadd.f32 %v1564_v22, %v1451_v17  ;;  %v1377_v17 = vld [vmem:[#allocation8 + $0x360] sm:$0xff]  ;;  %2207 = vmatpush.msrb.mxu3 %v1393_v35 }
 0x12c   : > { %1831 = vmatmul.f32.gmra.mxu3 %v617_v0  ;;  %1498 = vmatmul.f32.gmra.mxu0 %v617_v0  ;;  %v1362_v0 = vld [vmem:[#allocation8 + $0x2e8] sm:$0xff]  ;;  %v621_v22 = vld [vmem:[#allocation2 + $0x140] sm:$0xff] }
 0x12d   : > { %1611 = vmatmul.f32.gmra.mxu1 %v491_v23  ;;  %2094 = vmatpush.msrb.mxu2 %v1377_v17  ;;  %v1355_v17 = vld [vmem:[#allocation8 + $0x2b0] sm:$0xff]  ;;  %v1385_v35 = vld [vmem:[#allocation8 + $0x3a0] sm:$0xff] }
 0x12e   : > { %1724 = vmatmul.f32.gmra.mxu2 %v555_v24  ;;  %1980 = vmatpush.msrb.mxu1 %v1362_v0  ;;  %v561_v0 = vld [vmem:[#allocation2 + $0x15a] sm:$0xff] }
 0x12f   : > { %v1784_v28 = vpop.f32.mrf.mxu3  ;;  %2095 = vmatpush.msrb.mxu2 %v1376_v31  ;;  %v1368_v31 = vld [vmem:[#allocation8 + $0x318] sm:$0xff] }
 0x130   : > { %v6656_v29 = vadd.f32 %v1784_v28, %v1672_v27  ;;  %v495_v27 = vld [vmem:[#allocation2 + $0x141] sm:$0xff] }
 0x131   : > { %v1677_v30 = vpop.f32.mrf.mxu2  ;;  %v1454_v34 = vpop.f32.mrf.mxu0  ;;  %v559_v28 = vld [vmem:[#allocation2 + $0x142] sm:$0xff] }
 0x132   : > { %v1567_v36 = vpop.f32.mrf.mxu1  ;;  %v1678_v52 = vadd.f32 %v1677_v30, %v1565_v47  ;;  %v1361_v30 = vld [vmem:[#allocation8 + $0x2e0] sm:$0xff]  ;;  %v622_v47 = vld [vmem:[#allocation2 + $0x150] sm:$0xff] }
 0x133   : > { %v1568_v61 = vadd.f32 %v1567_v36, %v1454_v34  ;;  %v1360_v36 = vld [vmem:[#allocation8 + $0x2d8] sm:$0xff]  ;;  %1981 = vmatpush.msrb.mxu1 %v1361_v30  ;;  %v1353_v30 = vld [vmem:[#allocation8 + $0x2a0] sm:$0xff] }
 0x134   : > { %1834 = vmatmul.f32.gmra.mxu3 %v618_v32  ;;  %1501 = vmatmul.f32.gmra.mxu0 %v618_v32  ;;  %v368_v32 = vld [vmem:[%s6573_s9 + $0xf0] sm:$0xff] }
 0x135   : > { %1614 = vmatmul.f32.gmra.mxu1 %v492_v37  ;;  %402 = vst.msk [vmem:[#allocation2 + $0x181] sm:$0xff] %vm371_vm0, %v368_v32  ;;  %v1375_v37 = vld [vmem:[#allocation8 + $0x350] sm:$0xff] }
 0x136   : > { %1727 = vmatmul.f32.gmra.mxu2 %v556_v38  ;;  %v1392_v38 = vld [vmem:[#allocation8 + $0x3d8] sm:$0xff]  ;;  %1982 = vmatpush.msrb.mxu1 %v1360_v36  ;;  %v624_v36 = vld [vmem:[#allocation2 + $0x168] sm:$0xff] }
 0x137   : > { %v1787_v42 = vpop.f32.mrf.mxu3  ;;  %2096 = vmatpush.msrb.mxu2 %v1375_v37  ;;  %2208 = vmatpush.msrb.mxu3 %v1392_v38  ;;  %v1412_v38 = vld [vmem:[#allocation8 + $0x478] sm:$0xff] }
 0x138   : > { %v6660_v43 = vadd.f32 %v1787_v42, %v1675_v40  ;;  %v1359_v40 = vld [vmem:[#allocation8 + $0x2d0] sm:$0xff]  ;;  %v1374_v42 = vld [vmem:[#allocation8 + $0x348] sm:$0xff] }
 0x139   : > { %v1680_v44 = vpop.f32.mrf.mxu2  ;;  %v1457_v46 = vpop.f32.mrf.mxu0  ;;  %1983 = vmatpush.msrb.mxu1 %v1359_v40  ;;  %2097 = vmatpush.msrb.mxu2 %v1374_v42  ;;  %v498_v42 = vld [vmem:[#allocation2 + $0x169] sm:$0xff] }
 0x13a   : > { %v1570_v48 = vpop.f32.mrf.mxu1  ;;  %v1681_v4 = vadd.f32 %v1680_v44, %v1568_v61  ;;  %v1390_v61 = vld [vmem:[#allocation8 + $0x3c8] sm:$0xff] }
 0x13b   : > { %v1571_v24 = vadd.f32 %v1570_v48, %v1457_v46  ;;  %v1391_v46 = vld [vmem:[#allocation8 + $0x3d0] sm:$0xff]  ;;  %2098 = vmatpush.msrb.mxu2 %v1373_v57  ;;  %v1365_v57 = vld [vmem:[#allocation8 + $0x300] sm:$0xff] }
 0x13c   : > { %1837 = vmatmul.f32.gmra.mxu3 %v619_v45  ;;  %1504 = vmatmul.f32.gmra.mxu0 %v619_v45 }
 0x13d   : > { %1617 = vmatmul.f32.gmra.mxu1 %v493_v49  ;;  %v1333_v49 = vld [vmem:[#allocation8 + $0x200] sm:$0xff]  ;;  %2209 = vmatpush.msrb.mxu3 %v1391_v46  ;;  %v1352_v46 = vld [vmem:[#allocation8 + $0x298] sm:$0xff] }
 0x13e   : > { %1730 = vmatmul.f32.gmra.mxu2 %v557_v50  ;;  %1880 = vmatpush.msrb.mxu0 %v1333_v49 }
 0x13f   : > { %v1790_v54 = vpop.f32.mrf.mxu3  ;;  %2210 = vmatpush.msrb.mxu3 %v1390_v61  ;;  %v1382_v61 = vld [vmem:[#allocation8 + $0x388] sm:$0xff] }
 0x140   : > { %v6664_v55 = vadd.f32 %v1790_v54, %v1678_v52  ;;  %v496_v52 = vld [vmem:[#allocation2 + $0x151] sm:$0xff]  ;;  %2317 = vmatpush.msra.mxu0 %v1412_v38 }
 0x141   : > { %v1683_v56 = vpop.f32.mrf.mxu2  ;;  %v6666_v59 = vpop.f32.mrf.mxu0  ;;  %v560_v54 = vld [vmem:[#allocation2 + $0x152] sm:$0xff] }
 0x142   : > { %v6668_v62 = vpop.f32.mrf.mxu1  ;;  %v1684_v34 = vadd.f32 %v1683_v56, %v1571_v24  ;;  %v1358_v56 = vld [vmem:[#allocation8 + $0x2c8] sm:$0xff]  ;;  %v1387_v24 = vld [vmem:[#allocation8 + $0x3b0] sm:$0xff] }
 0x143   : > { %v1574_v50 = vadd.f32 %v6668_v62, %v6666_v59  ;;  %v1357_v59 = vld [vmem:[#allocation8 + $0x2c0] sm:$0xff]  ;;  %v1372_v62 = vld [vmem:[#allocation8 + $0x338] sm:$0xff]  ;;  %1984 = vmatpush.msrb.mxu1 %v1358_v56  ;;  %v1350_v56 = vld [vmem:[#allocation8 + $0x288] sm:$0xff] }
 0x144   : > { %1840 = vmatmul.f32.gmra.mxu3 %v620_v58  ;;  %1507 = vmatmul.f32.gmra.mxu0 %v620_v58  ;;  %v369_v58 = vld [vmem:[%s6573_s9 + $0xf8] sm:$0xff] }
 0x145   : > { %1620 = vmatmul.f32.gmra.mxu1 %v494_v63  ;;  %403 = vst.msk [vmem:[#allocation2 + $0x189] sm:$0xff] %vm371_vm0, %v369_v58  ;;  %v1389_v63 = vld [vmem:[#allocation8 + $0x3c0] sm:$0xff]  ;;  %2099 = vmatpush.msrb.mxu2 %v1372_v62 }
 0x146   : > { %1733 = vmatmul.f32.gmra.mxu2 %v558_v2  ;;  %1985 = vmatpush.msrb.mxu1 %v1357_v59  ;;  %v625_v59 = vld [vmem:[#allocation2 + $0x170] sm:$0xff] }
 0x147   : > { %v1793_v11 = vpop.f32.mrf.mxu3  ;;  %2211 = vmatpush.msrb.mxu3 %v1389_v63 }
 0x148   : > { %v6672_v14 = vadd.f32 %v1793_v11, %v1681_v4  ;;  %v1371_v4 = vld [vmem:[#allocation8 + $0x330] sm:$0xff]  ;;  %1986 = vmatpush.msrb.mxu1 %v1356_v3 }
 0x149   : > { %v1686_v16 = vpop.f32.mrf.mxu2  ;;  %v6674_v23 = vpop.f32.mrf.mxu0  ;;  %2100 = vmatpush.msrb.mxu2 %v1371_v4  ;;  %2212 = vmatpush.msrb.mxu3 %v1388_v7  ;;  %v6706_v3 = vld [vmem:[#allocation2 + $0x171] sm:$0xff]  ;;  %v1381_v7 = vld [vmem:[#allocation8 + $0x380] sm:$0xff] }
 0x14a   : > { %v6676_v26 = vpop.f32.mrf.mxu1  ;;  %v1687_v60 = vadd.f32 %v1686_v16, %v1574_v50  ;;  %v497_v16 = vld [vmem:[#allocation2 + $0x159] sm:$0xff]  ;;  %1987 = vmatpush.msrb.mxu1 %v1355_v17 }
 0x14b   : > { %v1577_v10 = vadd.f32 %v6676_v26, %v6674_v23  ;;  %2101 = vmatpush.msrb.mxu2 %v1370_v21  ;;  %v1386_v23 = vld [vmem:[#allocation8 + $0x3a8] sm:$0xff]  ;;  %2213 = vmatpush.msrb.mxu3 %v1387_v24  ;;  %v1384_v50 = vld [vmem:[#allocation8 + $0x398] sm:$0xff] }
 0x14c   : > { %1843 = vmatmul.f32.gmra.mxu3 %v621_v22  ;;  %1510 = vmatmul.f32.gmra.mxu0 %v621_v22  ;;  %v563_v4 = vld [vmem:[#allocation2 + $0x172] sm:$0xff] }
 0x14d   : > { %1623 = vmatmul.f32.gmra.mxu1 %v495_v27  ;;  %v1354_v27 = vld [vmem:[#allocation8 + $0x2a8] sm:$0xff]  ;;  %2214 = vmatpush.msrb.mxu3 %v1386_v23  ;;  %v660_v21 = vld [vmem:[#allocation2 + $0x19] sm:$0xff] }
 0x14e   : > { %1736 = vmatmul.f32.gmra.mxu2 %v559_v28  ;;  %v1369_v28 = vld [vmem:[#allocation8 + $0x320] sm:$0xff]  ;;  %1988 = vmatpush.msrb.mxu1 %v1354_v27  ;;  %v789_v27 = vld [vmem:[#allocation2 + $0x30] sm:$0xff] }
 0x14f   : > { %v1796_v39 = vpop.f32.mrf.mxu3  ;;  %2102 = vmatpush.msrb.mxu2 %v1369_v28  ;;  %2215 = vmatpush.msrb.mxu3 %v1385_v35  ;;  %v724_v28 = vld [vmem:[#allocation2 + $0x1a] sm:$0xff] }
 0x150   : > { %v6680_v44 = vadd.f32 %v1796_v39, %v1684_v34  ;;  %1989 = vmatpush.msrb.mxu1 %v1353_v30 }
 0x151   : > { %v1689_v45 = vpop.f32.mrf.mxu2  ;;  %v6682_v48 = vpop.f32.mrf.mxu0  ;;  %2103 = vmatpush.msrb.mxu2 %v1368_v31  ;;  %2216 = vmatpush.msrb.mxu3 %v1384_v50  ;;  %v853_v50 = vld [vmem:[#allocation2 + $0x31] sm:$0xff] }
 0x152   : > { %v6686_v51 = vpop.f32.mrf.mxu1  ;;  %v1690_v22 = vadd.f32 %v1689_v45, %v1577_v10  ;;  %v562_v45 = vld [vmem:[#allocation2 + $0x16a] sm:$0xff]  ;;  %1990 = vmatpush.msrb.mxu1 %v1352_v46 }
 0x153   : > { %v1580_v39 = vadd.f32 %v6686_v51, %v6682_v48  ;;  %v1383_v48 = vld [vmem:[#allocation8 + $0x390] sm:$0xff] }
 0x154   : > { %1846 = vmatmul.f32.gmra.mxu3 %v622_v47  ;;  %1513 = vmatmul.f32.gmra.mxu0 %v622_v47  ;;  %v1367_v47 = vld [vmem:[#allocation8 + $0x310] sm:$0xff] }
 0x155   : > { %1626 = vmatmul.f32.gmra.mxu1 %v496_v52  ;;  %v1351_v52 = vld [vmem:[#allocation8 + $0x290] sm:$0xff]  ;;  %2104 = vmatpush.msrb.mxu2 %v1367_v47 }
 0x156   : > { %1739 = vmatmul.f32.gmra.mxu2 %v560_v54  ;;  %v1366_v54 = vld [vmem:[#allocation8 + $0x308] sm:$0xff]  ;;  %1991 = vmatpush.msrb.mxu1 %v1351_v52 }
 0x157   : > { %v1799_v2 = vpop.f32.mrf.mxu3  ;;  %2105 = vmatpush.msrb.mxu2 %v1366_v54  ;;  %2217 = vmatpush.msrb.mxu3 %v1383_v48 }
 0x158   : > { %v6690_v5 = vadd.f32 %v1799_v2, %v1687_v60  ;;  %1992 = vmatpush.msrb.mxu1 %v1350_v56  ;;  %v6718_v56 = vld [vmem:[#allocation2 + $0x32] sm:$0xff] }
 0x159   : > { %v1692_v6 = vpop.f32.mrf.mxu2  ;;  %v6692_v9 = vpop.f32.mrf.mxu0  ;;  %2106 = vmatpush.msrb.mxu2 %v1365_v57  ;;  %2218 = vmatpush.msrb.mxu3 %v1382_v61 }
 0x15a   : > { %v6696_v11 = vpop.f32.mrf.mxu1  ;;  %v1693_v49 = vadd.f32 %v1692_v6, %v1580_v39  ;;  %v1349_v6 = vld [vmem:[#allocation8 + $0x280] sm:$0xff] }
 0x15b   : > { %v1583_v63 = vadd.f32 %v6696_v11, %v6692_v9  ;;  %1993 = vmatpush.msrb.mxu1 %v1349_v6  ;;  %2219 = vmatpush.msrb.mxu3 %v1381_v7  ;;  %v1411_v11 = vld [vmem:[#allocation8 + $0x470] sm:$0xff]  ;;  %v6723_v7 = vld [vmem:[#allocation2 + $0x3a] sm:$0xff] }
 0x15c   : > { %1849 = vmatmul.f32.gmra.mxu3 %v623_v8  ;;  %1516 = vmatmul.f32.gmra.mxu0 %v623_v8  ;;  %v792_v6 = vld [vmem:[#allocation2 + $0x50] sm:$0xff] }
 0x15d   : > { %1629 = vmatmul.f32.gmra.mxu1 %v497_v16  ;;  %2318 = vmatpush.msra.mxu0 %v1411_v11 }
 0x15e   : > { %1742 = vmatmul.f32.gmra.mxu2 %v561_v0  ;;  %v626_v0 = vld [vmem:[#allocation2 + $0x180] sm:$0xff] }
 0x15f   : > { %v1802_v26 = vpop.f32.mrf.mxu3 }
 0x160   : > { %v6698_v32 = vadd.f32 %v1802_v26, %v1690_v22 }
 0x161   : > { %v1695_v34 = vpop.f32.mrf.mxu2  ;;  %v1472_v37 = vpop.f32.mrf.mxu0 }
 0x162   : > { %v1585_v40 = vpop.f32.mrf.mxu1  ;;  %v1696_v8 = vadd.f32 %v1695_v34, %v1583_v63  ;;  %v6713_v34 = vld [vmem:[#allocation2 + $0x188] sm:$0xff] }
 0x163   : > { %v1586_v22 = vadd.f32 %v1585_v40, %v1472_v37  ;;  %v725_v37 = vld [vmem:[#allocation2 + $0x22] sm:$0xff] }
 0x164   : > { %1852 = vmatmul.f32.gmra.mxu3 %v624_v36  ;;  %1519 = vmatmul.f32.gmra.mxu0 %v624_v36  ;;  %v661_v36 = vld [vmem:[#allocation2 + $0x21] sm:$0xff] }
 0x165   : > { %1632 = vmatmul.f32.gmra.mxu1 %v498_v42  ;;  %v790_v42 = vld [vmem:[#allocation2 + $0x38] sm:$0xff] }
 0x166   : > { %1745 = vmatmul.f32.gmra.mxu2 %v562_v45 }
 0x167   : > { %v1805_v51 = vpop.f32.mrf.mxu3 }
 0x168   : > { %v6702_v58 = vadd.f32 %v1805_v51, %v1693_v49  ;;  %v1410_v49 = vld [vmem:[#allocation8 + $0x468] sm:$0xff] }
 0x169   : > { %v1698_v60 = vpop.f32.mrf.mxu2  ;;  %v1475_v62 = vpop.f32.mrf.mxu0  ;;  %2319 = vmatpush.msra.mxu0 %v1410_v49  ;;  %v791_v51 = vld [vmem:[#allocation2 + $0x48] sm:$0xff] }
 0x16a   : > { %v1588_v2 = vpop.f32.mrf.mxu1  ;;  %v1699_v23 = vadd.f32 %v1698_v60, %v1586_v22 }
 0x16b   : > { %v1589_v38 = vadd.f32 %v1588_v2, %v1475_v62  ;;  %v854_v62 = vld [vmem:[#allocation2 + $0x39] sm:$0xff] }
 0x16c   : > { %1855 = vmatmul.f32.gmra.mxu3 %v625_v59  ;;  %1522 = vmatmul.f32.gmra.mxu0 %v625_v59 }
 0x16d   : > { %1635 = vmatmul.f32.gmra.mxu1 %v6706_v3 }
 0x16e   : > { %1748 = vmatmul.f32.gmra.mxu2 %v563_v4 }
 0x16f   : > { %v1808_v10 = vpop.f32.mrf.mxu3 }
 0x170   : > { %v6709_v16 = vadd.f32 %v1808_v10, %v1696_v8 }
 0x171   : > { %v1701_v9 = vpop.f32.mrf.mxu2  ;;  %v1478_v17 = vpop.f32.mrf.mxu0 }
 0x172   : > { %v1591_v24 = vpop.f32.mrf.mxu1  ;;  %v1702_v40 = vadd.f32 %v1701_v9, %v1589_v38 }
 0x173   : > { %v1592_v54 = vadd.f32 %v1591_v24, %v1478_v17  ;;  %v855_v17 = vld [vmem:[#allocation2 + $0x49] sm:$0xff] }
 0x174   : > { %1858 = vmatmul.f32.gmra.mxu3 %v626_v0  ;;  %1881 = vmatmul.f32.vlgmr.msrb.gmra.mxu0 %v660_v21  ;;  %v1409_v0 = vld [vmem:[#allocation8 + $0x460] sm:$0xff] }
 0x175   : > { %1994 = vmatmul.f32.vlgmr.msrb.gmra.mxu1 %v724_v28  ;;  %2320 = vmatpush.msra.mxu0 %v1409_v0  ;;  %v6728_v28 = vld [vmem:[#allocation2 + $0x4a] sm:$0xff]  ;;  %v796_v0 = vld [vmem:[#allocation2 + $0x80] sm:$0xff] }
 0x176   : > { %2107 = vmatmul.f32.vlgmr.msrb.gmra.mxu2 %v789_v27  ;;  %v793_v27 = vld [vmem:[#allocation2 + $0x60] sm:$0xff] }
 0x177   : > { %v1811_v26 = vpop.f32.mrf.mxu3 }
 0x178   : > { %v6711_v30 = vadd.f32 %v1811_v26, %v1699_v23 }
 0x179   : > { %v1704_v31 = vpop.f32.mrf.mxu2  ;;  %v1481_v35 = vpop.f32.mrf.mxu0 }
 0x17a   : > { %v1594_v39 = vpop.f32.mrf.mxu1  ;;  %v1705_v57 = vadd.f32 %v1704_v31, %v1592_v54  ;;  %v857_v54 = vld [vmem:[#allocation2 + $0x61] sm:$0xff] }
 0x17b   : > { %v1595_v2 = vadd.f32 %v1594_v39, %v1481_v35 }
 0x17c   : > { %1861 = vmatmul.f32.gmra.mxu3 %v6713_v34  ;;  %1884 = vmatmul.f32.gmra.mxu0 %v661_v36  ;;  %v856_v36 = vld [vmem:[#allocation2 + $0x51] sm:$0xff] }
 0x17d   : > { %1997 = vmatmul.f32.gmra.mxu1 %v725_v37  ;;  %v794_v37 = vld [vmem:[#allocation2 + $0x68] sm:$0xff] }
 0x17e   : > { %2110 = vmatmul.f32.gmra.mxu2 %v790_v42 }
 0x17f   : > { %v1814_v45 = vpop.f32.mrf.mxu3 }
 0x180   : > { %v6716_v46 = vadd.f32 %v1814_v45, %v1702_v40  ;;  %v6733_v40 = vld [vmem:[#allocation2 + $0x52] sm:$0xff] }
 0x181   : > { %v1707_v47 = vpop.f32.mrf.mxu2  ;;  %v1484_v52 = vpop.f32.mrf.mxu0 }
 0x182   : > { %v1597_v48 = vpop.f32.mrf.mxu1  ;;  %v1708_v8 = vadd.f32 %v1707_v47, %v1595_v2 }
 0x183   : > { %v1598_v22 = vadd.f32 %v1597_v48, %v1484_v52  ;;  %v1408_v52 = vld [vmem:[#allocation8 + $0x458] sm:$0xff] }
 0x184   : > { %2220 = vmatmul.f32.vlgmr.msrb.gmra.mxu3 %v853_v50  ;;  %1887 = vmatmul.f32.gmra.mxu0 %v853_v50 }
 0x185   : > { %2000 = vmatmul.f32.gmra.mxu1 %v6718_v56  ;;  %2321 = vmatpush.msra.mxu0 %v1408_v52  ;;  %v860_v52 = vld [vmem:[#allocation2 + $0x81] sm:$0xff] }
 0x186   : > { %2113 = vmatmul.f32.gmra.mxu2 %v791_v51 }
 0x187   : > { %v1817_v60 = vpop.f32.mrf.mxu3 }
 0x188   : > { %v6721_v61 = vadd.f32 %v1817_v60, %v1705_v57  ;;  %v795_v60 = vld [vmem:[#allocation2 + $0x78] sm:$0xff] }
 0x189   : > { %v1710_v59 = vpop.f32.mrf.mxu2  ;;  %v1487_v63 = vpop.f32.mrf.mxu0 }
 0x18a   : > { %7663 = vst [vmem:[#allocation18_spill] sm:$0xff] %v6721_v61  ;;  %v1600_v4 = vpop.f32.mrf.mxu1  ;;  %v1711_v23 = vadd.f32 %v1710_v59, %v1598_v22  ;;  %v6738_v59 = vld [vmem:[#allocation2 + $0x62] sm:$0xff] }
 0x18b   : > { %v1601_v39 = vadd.f32 %v1600_v4, %v1487_v63 }
 0x18c   : > { %2223 = vmatmul.f32.gmra.mxu3 %v854_v62  ;;  %1890 = vmatmul.f32.gmra.mxu0 %v854_v62 }
 0x18d   : > { %2003 = vmatmul.f32.gmra.mxu1 %v6723_v7 }
 0x18e   : > { %2116 = vmatmul.f32.gmra.mxu2 %v792_v6  ;;  %v858_v6 = vld [vmem:[#allocation2 + $0x69] sm:$0xff] }
 0x18f   : > { %v1820_v10 = vpop.f32.mrf.mxu3 }
 0x190   : > { %v6726_v9 = vadd.f32 %v1820_v10, %v1708_v8 }
 0x191   : > { %v1713_v11 = vpop.f32.mrf.mxu2  ;;  %v1490_v21 = vpop.f32.mrf.mxu0 }
 0x192   : > { %7664 = vst [vmem:[#allocation19_spill] sm:$0xff] %v6726_v9  ;;  %v1603_v24 = vpop.f32.mrf.mxu1  ;;  %v1714_v45 = vadd.f32 %v1713_v11, %v1601_v39  ;;  %v797_v39 = vld [vmem:[#allocation2 + $0x90] sm:$0xff] }
 0x193   : > { %v1604_v51 = vadd.f32 %v1603_v24, %v1490_v21 }
 0x194   : > { %2226 = vmatmul.f32.gmra.mxu3 %v855_v17  ;;  %1893 = vmatmul.f32.gmra.mxu0 %v855_v17  ;;  %v6743_v17 = vld [vmem:[#allocation2 + $0x6a] sm:$0xff] }
 0x195   : > { %2006 = vmatmul.f32.gmra.mxu1 %v6728_v28 }
 0x196   : > { %2119 = vmatmul.f32.gmra.mxu2 %v793_v27 }
 0x197   : > { %v1823_v26 = vpop.f32.mrf.mxu3 }
 0x198   : > { %v6731_v31 = vadd.f32 %v1823_v26, %v1711_v23  ;;  %v1407_v23 = vld [vmem:[#allocation8 + $0x450] sm:$0xff]  ;;  %v859_v26 = vld [vmem:[#allocation2 + $0x79] sm:$0xff] }
 0x199   : > { %v1716_v35 = vpop.f32.mrf.mxu2  ;;  %v1493_v38 = vpop.f32.mrf.mxu0  ;;  %2322 = vmatpush.msra.mxu0 %v1407_v23  ;;  %v6758_v23 = vld [vmem:[#allocation2 + $0x92] sm:$0xff] }
 0x19a   : > { %7665 = vst [vmem:[#allocation20_spill] sm:$0xff] %v6731_v31  ;;  %v1606_v42 = vpop.f32.mrf.mxu1  ;;  %v1717_v62 = vadd.f32 %v1716_v35, %v1604_v51 }
 0x19b   : > { %v1607_v10 = vadd.f32 %v1606_v42, %v1493_v38  ;;  %v6748_v42 = vld [vmem:[#allocation2 + $0x7a] sm:$0xff] }
 0x19c   : > { %2229 = vmatmul.f32.gmra.mxu3 %v856_v36  ;;  %1896 = vmatmul.f32.gmra.mxu0 %v856_v36 }
 0x19d   : > { %2009 = vmatmul.f32.gmra.mxu1 %v6733_v40 }
 0x19e   : > { %2122 = vmatmul.f32.gmra.mxu2 %v794_v37 }
 0x19f   : > { %v1826_v47 = vpop.f32.mrf.mxu3 }
 0x1a0   : > { %v6736_v49 = vadd.f32 %v1826_v47, %v1714_v45 }
 0x1a1   : > { %v1719_v50 = vpop.f32.mrf.mxu2  ;;  %v1496_v48 = vpop.f32.mrf.mxu0 }
 0x1a2   : > { %7666 = vst [vmem:[#allocation21_spill] sm:$0xff] %v6736_v49  ;;  %v1609_v57 = vpop.f32.mrf.mxu1  ;;  %v1720_v21 = vadd.f32 %v1719_v50, %v1607_v10  ;;  %v1406_v10 = vld [vmem:[#allocation8 + $0x448] sm:$0xff] }
 0x1a3   : > { %v1610_v36 = vadd.f32 %v1609_v57, %v1496_v48  ;;  %v6753_v48 = vld [vmem:[#allocation2 + $0x82] sm:$0xff]  ;;  %2323 = vmatpush.msra.mxu0 %v1406_v10 }
 0x1a4   : > { %2232 = vmatmul.f32.gmra.mxu3 %v857_v54  ;;  %1899 = vmatmul.f32.gmra.mxu0 %v857_v54  ;;  %v1405_v10 = vld [vmem:[#allocation8 + $0x440] sm:$0xff] }
 0x1a5   : > { %2012 = vmatmul.f32.gmra.mxu1 %v6738_v59  ;;  %2324 = vmatpush.msra.mxu0 %v1405_v10  ;;  %v802_v10 = vld [vmem:[#allocation2 + $0xc8] sm:$0xff] }
 0x1a6   : > { %2125 = vmatmul.f32.gmra.mxu2 %v795_v60 }
 0x1a7   : > { %v1829_v63 = vpop.f32.mrf.mxu3 }
 0x1a8   : > { %v6741_v2 = vadd.f32 %v1829_v63, %v1717_v62  ;;  %v798_v62 = vld [vmem:[#allocation2 + $0x98] sm:$0xff] }
 0x1a9   : > { %v1722_v4 = vpop.f32.mrf.mxu2  ;;  %v1499_v8 = vpop.f32.mrf.mxu0 }
 0x1aa   : > { %7667 = vst [vmem:[#allocation22_spill] sm:$0xff] %v6741_v2  ;;  %v1612_v11 = vpop.f32.mrf.mxu1  ;;  %v1723_v37 = vadd.f32 %v1722_v4, %v1610_v36 }
 0x1ab   : > { %v1613_v51 = vadd.f32 %v1612_v11, %v1499_v8  ;;  %v799_v11 = vld [vmem:[#allocation2 + $0xa8] sm:$0xff] }
 0x1ac   : > { %2235 = vmatmul.f32.gmra.mxu3 %v858_v6  ;;  %1902 = vmatmul.f32.gmra.mxu0 %v858_v6 }
 0x1ad   : > { %2015 = vmatmul.f32.gmra.mxu1 %v6743_v17 }
 0x1ae   : > { %2128 = vmatmul.f32.gmra.mxu2 %v796_v0  ;;  %v861_v0 = vld [vmem:[#allocation2 + $0x91] sm:$0xff] }
 0x1af   : > { %v1832_v22 = vpop.f32.mrf.mxu3 }
 0x1b0   : > { %v6746_v24 = vadd.f32 %v1832_v22, %v1720_v21 }
 0x1b1   : > { %v1725_v27 = vpop.f32.mrf.mxu2  ;;  %v1502_v35 = vpop.f32.mrf.mxu0 }
 0x1b2   : > { %7668 = vst [vmem:[#allocation23_spill] sm:$0xff] %v6746_v24  ;;  %v1615_v38 = vpop.f32.mrf.mxu1  ;;  %v1726_v57 = vadd.f32 %v1725_v27, %v1613_v51 }
 0x1b3   : > { %v1616_v22 = vadd.f32 %v1615_v38, %v1502_v35  ;;  %v6763_v35 = vld [vmem:[#allocation2 + $0x9a] sm:$0xff] }
 0x1b4   : > { %2238 = vmatmul.f32.gmra.mxu3 %v859_v26  ;;  %1905 = vmatmul.f32.gmra.mxu0 %v859_v26 }
 0x1b5   : > { %2018 = vmatmul.f32.gmra.mxu1 %v6748_v42 }
 0x1b6   : > { %2131 = vmatmul.f32.gmra.mxu2 %v797_v39 }
 0x1b7   : > { %v1835_v45 = vpop.f32.mrf.mxu3 }
 0x1b8   : > { %v6751_v47 = vadd.f32 %v1835_v45, %v1723_v37  ;;  %v862_v37 = vld [vmem:[#allocation2 + $0x99] sm:$0xff] }
 0x1b9   : > { %v1728_v50 = vpop.f32.mrf.mxu2  ;;  %v1505_v54 = vpop.f32.mrf.mxu0 }
 0x1ba   : > { %7669 = vst [vmem:[#allocation24_spill] sm:$0xff] %v6751_v47  ;;  %v1618_v60 = vpop.f32.mrf.mxu1  ;;  %v1729_v26 = vadd.f32 %v1728_v50, %v1616_v22 }
 0x1bc   : > { %2241 = vmatmul.f32.gmra.mxu3 %v860_v52  ;;  %1908 = vmatmul.f32.gmra.mxu0 %v860_v52  ;;  %v1619_v52 = vadd.f32 %v1618_v60, %v1505_v54  ;;  %v801_v60 = vld [vmem:[#allocation2 + $0xc0] sm:$0xff] }
 0x1bd   : > { %2021 = vmatmul.f32.gmra.mxu1 %v6753_v48 }
 0x1be   : > { %2134 = vmatmul.f32.gmra.mxu2 %v798_v62  ;;  %v800_v62 = vld [vmem:[#allocation2 + $0xb0] sm:$0xff] }
 0x1bf   : > { %v1838_v63 = vpop.f32.mrf.mxu3 }
 0x1c0   : > { %v6756_v4 = vadd.f32 %v1838_v63, %v1726_v57 }
 0x1c1   : > { %v1731_v6 = vpop.f32.mrf.mxu2  ;;  %v1508_v21 = vpop.f32.mrf.mxu0 }
 0x1c2   : > { %7670 = vst [vmem:[#allocation25_spill] sm:$0xff] %v6756_v4  ;;  %v1621_v8 = vpop.f32.mrf.mxu1  ;;  %v1732_v38 = vadd.f32 %v1731_v6, %v1619_v52 }
 0x1c4   : > { %2244 = vmatmul.f32.gmra.mxu3 %v861_v0  ;;  %1911 = vmatmul.f32.gmra.mxu0 %v861_v0  ;;  %v863_v0 = vld [vmem:[#allocation2 + $0xa9] sm:$0xff] }
 0x1c5   : > { %2024 = vmatmul.f32.gmra.mxu1 %v6758_v23 }
 0x1c6   : > { %2137 = vmatmul.f32.gmra.mxu2 %v799_v11  ;;  %v1622_v11 = vadd.f32 %v1621_v8, %v1508_v21  ;;  %v6773_v21 = vld [vmem:[#allocation2 + $0xb2] sm:$0xff] }
 0x1c7   : > { %v1841_v27 = vpop.f32.mrf.mxu3 }
 0x1c8   : > { %v6761_v36 = vadd.f32 %v1841_v27, %v1729_v26  ;;  %v6768_v26 = vld [vmem:[#allocation2 + $0xaa] sm:$0xff] }
 0x1c9   : > { %v1734_v39 = vpop.f32.mrf.mxu2  ;;  %v1511_v45 = vpop.f32.mrf.mxu0 }
 0x1ca   : > { %7671 = vst [vmem:[#allocation26_spill] sm:$0xff] %v6761_v36  ;;  %v1624_v51 = vpop.f32.mrf.mxu1  ;;  %v1735_v27 = vadd.f32 %v1734_v39, %v1622_v11  ;;  %v6778_v36 = vld [vmem:[#allocation2 + $0xc2] sm:$0xff] }
 0x1cc   : > { %2247 = vmatmul.f32.gmra.mxu3 %v862_v37  ;;  %1914 = vmatmul.f32.gmra.mxu0 %v862_v37 }
 0x1cd   : > { %2027 = vmatmul.f32.gmra.mxu1 %v6763_v35 }
 0x1ce   : > { %2140 = vmatmul.f32.gmra.mxu2 %v800_v62  ;;  %v864_v62 = vld [vmem:[#allocation2 + $0xb1] sm:$0xff] }
 0x1cf   : > { %v1844_v50 = vpop.f32.mrf.mxu3 }
 0x1d0   : > { %v6766_v57 = vadd.f32 %v1844_v50, %v1732_v38  ;;  %v1625_v50 = vadd.f32 %v1624_v51, %v1511_v45  ;;  %v803_v51 = vld [vmem:[#allocation2 + $0xd8] sm:$0xff] }
 0x1d1   : > { %v1737_v63 = vpop.f32.mrf.mxu2  ;;  %v1514_v22 = vpop.f32.mrf.mxu0 }
 0x1d2   : > { %7672 = vst [vmem:[#allocation27_spill] sm:$0xff] %v6766_v57  ;;  %v1627_v54 = vpop.f32.mrf.mxu1  ;;  %v1738_v8 = vadd.f32 %v1737_v63, %v1625_v50 }
 0x1d4   : > { %2250 = vmatmul.f32.gmra.mxu3 %v863_v0  ;;  %1917 = vmatmul.f32.gmra.mxu0 %v863_v0 }
 0x1d5   : > { %2030 = vmatmul.f32.gmra.mxu1 %v6768_v26 }
 0x1d6   : > { %2143 = vmatmul.f32.gmra.mxu2 %v801_v60  ;;  %v1404_v60 = vld [vmem:[#allocation8 + $0x438] sm:$0xff] }
 0x1d7   : > { %v1847_v6 = vpop.f32.mrf.mxu3  ;;  %2325 = vmatpush.msra.mxu0 %v1404_v60  ;;  %v804_v60 = vld [vmem:[#allocation2 + $0xe0] sm:$0xff] }
 0x1d8   : > { %v6771_v37 = vadd.f32 %v1847_v6, %v1735_v27  ;;  %v865_v27 = vld [vmem:[#allocation2 + $0xc1] sm:$0xff] }
 0x1d9   : > { %v1740_v52 = vpop.f32.mrf.mxu2  ;;  %v1517_v38 = vpop.f32.mrf.mxu0 }
 0x1da   : > { %7673 = vst [vmem:[#allocation28_spill] sm:$0xff] %v6771_v37  ;;  %v1630_v57 = vpop.f32.mrf.mxu1  ;;  %v1628_v37 = vadd.f32 %v1627_v54, %v1514_v22  ;;  %v6783_v22 = vld [vmem:[#allocation2 + $0xca] sm:$0xff]  ;;  %v1544_v54 = vadd.f32 %v6620_v13, %v6618_v12 }
 0x1db   : > { %v805_v13 = vld [vmem:[#allocation2 + $0xf0] sm:$0xff] }
 0x1dc   : > { %2253 = vmatmul.f32.gmra.mxu3 %v864_v62  ;;  %1920 = vmatmul.f32.gmra.mxu0 %v864_v62  ;;  %v1741_v4 = vadd.f32 %v1740_v52, %v1628_v37  ;;  %v1657_v52 = vadd.f32 %v6623_v18, %v1544_v54  ;;  %v1547_v18 = vadd.f32 %v6628_v20, %v6626_v19 }
 0x1dd   : > { %2033 = vmatmul.f32.gmra.mxu1 %v6773_v21 }
 0x1de   : > { %2146 = vmatmul.f32.gmra.mxu2 %v802_v10  ;;  %v866_v10 = vld [vmem:[#allocation2 + $0xc9] sm:$0xff] }
 0x1df   : > { %v1850_v39 = vpop.f32.mrf.mxu3 }
 0x1e0   : > { %v6776_v0 = vadd.f32 %v1850_v39, %v1738_v8  ;;  %v1631_v39 = vadd.f32 %v1630_v57, %v1517_v38  ;;  %v1403_v57 = vld [vmem:[#allocation8 + $0x430] sm:$0xff]  ;;  %v1770_v38 = vadd.f32 %v6636_v33, %v1657_v52  ;;  %v868_v52 = vld [vmem:[#allocation2 + $0xe1] sm:$0xff] }
 0x1e1   : > { %v1743_v11 = vpop.f32.mrf.mxu2  ;;  %v1520_v6 = vpop.f32.mrf.mxu0  ;;  %2326 = vmatpush.msra.mxu0 %v1403_v57 }
 0x1e2   : > { %7674 = vst [vmem:[#allocation29_spill] sm:$0xff] %v6776_v0  ;;  %v1633_v45 = vpop.f32.mrf.mxu1  ;;  %v1744_v37 = vadd.f32 %v1743_v11, %v1631_v39  ;;  %v6792_v11 = vld [vmem:[#allocation2 + $0xda] sm:$0xff] }
 0x1e3   : > { %v1634_v24 = vadd.f32 %v1633_v45, %v1520_v6 }
 0x1e4   : > { %2256 = vmatmul.f32.gmra.mxu3 %v865_v27  ;;  %1923 = vmatmul.f32.gmra.mxu0 %v865_v27 }
 0x1e5   : > { %2036 = vmatmul.f32.gmra.mxu1 %v6778_v36 }
 0x1e6   : > { %2149 = vmatmul.f32.gmra.mxu2 %v803_v51 }
 0x1e7   : > { %v1853_v63 = vpop.f32.mrf.mxu3 }
 0x1e8   : > { %v6781_v62 = vadd.f32 %v1853_v63, %v1741_v4  ;;  %v867_v63 = vld [vmem:[#allocation2 + $0xd9] sm:$0xff] }
 0x1e9   : > { %v1746_v50 = vpop.f32.mrf.mxu2  ;;  %v1523_v8 = vpop.f32.mrf.mxu0 }
 0x1ea   : > { %7675 = vst [vmem:[#allocation30_spill] sm:$0xff] %v6781_v62  ;;  %v1636_v0 = vpop.f32.mrf.mxu1  ;;  %v1747_v39 = vadd.f32 %v1746_v50, %v1634_v24  ;;  %v6801_v24 = vld [vmem:[#allocation2 + $0xe2] sm:$0xff] }
 0x1eb   : > { %v1637_v19 = vadd.f32 %v1636_v0, %v1523_v8 }
 0x1ec   : > { %2259 = vmatmul.f32.gmra.mxu3 %v866_v10  ;;  %1926 = vmatmul.f32.gmra.mxu0 %v866_v10 }
 0x1ed   : > { %2039 = vmatmul.f32.gmra.mxu1 %v6783_v22 }
 0x1ee   : > { %2152 = vmatmul.f32.gmra.mxu2 %v804_v60  ;;  %v1660_v60 = vadd.f32 %v6632_v25, %v1547_v18  ;;  %v869_v18 = vld [vmem:[#allocation2 + $0xf1] sm:$0xff] }
 0x1ef   : > { %v1856_v4 = vpop.f32.mrf.mxu3 }
 0x1f0   : > { %v6789_v27 = vadd.f32 %v1856_v4, %v1744_v37  ;;  %v1773_v45 = vadd.f32 %v6640_v41, %v1660_v60  ;;  %v6806_v60 = vld [vmem:[#allocation2 + $0xf2] sm:$0xff] }
 0x1f1   : > { %v1749_v51 = vpop.f32.mrf.mxu2  ;;  %v1882_v62 = vpop.f32.mrf.mxu0 }
 0x1f2   : > { %7676 = vst [vmem:[#allocation31_spill] sm:$0xff] %v6789_v27  ;;  %v1995_v12 = vpop.f32.mrf.mxu1  ;;  %v1883_v10 = vadd.f32 %v1882_v62, %v1770_v38  ;;  %v806_v62 = vld [vmem:[#allocation2 + $0xf8] sm:$0xff]  ;;  %v1750_v25 = vadd.f32 %v1749_v51, %v1637_v19 }
 0x1f4   : > { %2262 = vmatmul.f32.gmra.mxu3 %v867_v63  ;;  %1929 = vmatmul.f32.gmra.mxu0 %v867_v63  ;;  %v1996_v54 = vadd.f32 %v1995_v12, %v1883_v10 }
 0x1f5   : > { %2042 = vmatmul.f32.gmra.mxu1 %v6792_v11 }
 0x1f6   : > { %2155 = vmatmul.f32.gmra.mxu2 %v805_v13  ;;  %v1402_v13 = vld [vmem:[#allocation8 + $0x428] sm:$0xff] }
 0x1f7   : > { %v1859_v33 = vpop.f32.mrf.mxu3  ;;  %2327 = vmatpush.msra.mxu0 %v1402_v13  ;;  %v871_v13 = vld [vmem:[#allocation2 + $0x109] sm:$0xff] }
 0x1f8   : > { %v6798_v37 = vadd.f32 %v1859_v33, %v1747_v39  ;;  %v807_v39 = vld [vmem:[#allocation2 + $0x108] sm:$0xff] }
 0x1f9   : > { %v2108_v6 = vpop.f32.mrf.mxu2  ;;  %v1885_v57 = vpop.f32.mrf.mxu0 }
 0x1fa   : > { %7677 = vst [vmem:[#allocation32_spill] sm:$0xff] %v6798_v37  ;;  %v2109_v4 = vadd.f32 %v2108_v6, %v1996_v54  ;;  %v1998_v20 = vpop.f32.mrf.mxu1  ;;  %v1886_v50 = vadd.f32 %v1885_v57, %v1773_v45 }
 0x1fc   : > { %2265 = vmatmul.f32.gmra.mxu3 %v868_v52  ;;  %1932 = vmatmul.f32.gmra.mxu0 %v868_v52  ;;  %v1999_v63 = vadd.f32 %v1998_v20, %v1886_v50  ;;  %v870_v52 = vld [vmem:[#allocation2 + $0xf9] sm:$0xff] }
 0x1fd   : > { %2045 = vmatmul.f32.gmra.mxu1 %v6801_v24  ;;  %v6812_v50 = vld [vmem:[#allocation2 + $0xfa] sm:$0xff] }
 0x1fe   : > { %2158 = vmatmul.f32.gmra.mxu2 %v806_v62  ;;  %v808_v62 = vld [vmem:[#allocation2 + $0x110] sm:$0xff] }
 0x1ff   : > { %v1862_v38 = vpop.f32.mrf.mxu3 }
 0x200   : > { %v6804_v12 = vadd.f32 %v1862_v38, %v1750_v25 }
 0x201   : > { %v2111_v41 = vpop.f32.mrf.mxu2  ;;  %v1888_v0 = vpop.f32.mrf.mxu0 }
 0x202   : > { %7678 = vst [vmem:[#allocation33_spill] sm:$0xff] %v6804_v12  ;;  %v2112_v10 = vadd.f32 %v2111_v41, %v1999_v63  ;;  %v2001_v8 = vpop.f32.mrf.mxu1  ;;  %v1889_v51 = vadd.f32 %v1888_v0, %v6644_v53  ;;  %v1401_v41 = vld [vmem:[#allocation8 + $0x420] sm:$0xff] }
 0x203   : > { %2328 = vmatpush.msra.mxu0 %v1401_v41 }
 0x204   : > { %2268 = vmatmul.f32.gmra.mxu3 %v869_v18  ;;  %1935 = vmatmul.f32.gmra.mxu0 %v869_v18  ;;  %v2002_v54 = vadd.f32 %v2001_v8, %v1889_v51  ;;  %v6818_v51 = vld [vmem:[#allocation2 + $0x10a] sm:$0xff] }
 0x205   : > { %2048 = vmatmul.f32.gmra.mxu1 %v6806_v60 }
 0x206   : > { %2161 = vmatmul.f32.gmra.mxu2 %v807_v39  ;;  %v809_v39 = vld [vmem:[#allocation2 + $0x120] sm:$0xff] }
 0x207   : > { %v2221_v33 = vpop.f32.mrf.mxu3 }
 0x208   : > { %v6810_v6 = vadd.f32 %v2221_v33, %v2109_v4 }
 0x209   : > { %v2114_v45 = vpop.f32.mrf.mxu2  ;;  %v1891_v19 = vpop.f32.mrf.mxu0 }
 0x20a   : > { %v2115_v57 = vadd.f32 %v2114_v45, %v2002_v54  ;;  %v2004_v20 = vpop.f32.mrf.mxu1  ;;  %v1892_v25 = vadd.f32 %v1891_v19, %v6648_v1 }
 0x20c   : > { %2271 = vmatmul.f32.gmra.mxu3 %v870_v52  ;;  %1938 = vmatmul.f32.gmra.mxu0 %v870_v52  ;;  %v2005_v38 = vadd.f32 %v2004_v20, %v1892_v25  ;;  %v872_v52 = vld [vmem:[#allocation2 + $0x111] sm:$0xff]  ;;  %v810_v25 = vld [vmem:[#allocation2 + $0x128] sm:$0xff] }
 0x20d   : > { %2051 = vmatmul.f32.gmra.mxu1 %v6812_v50 }
 0x20e   : > { %2164 = vmatmul.f32.gmra.mxu2 %v808_v62 }
 0x20f   : > { %v2224_v53 = vpop.f32.mrf.mxu3 }
 0x210   : > { %v6816_v63 = vadd.f32 %v2224_v53, %v2112_v10  ;;  %v6824_v53 = vld [vmem:[#allocation2 + $0x112] sm:$0xff] }
 0x211   : > { %v2117_v4 = vpop.f32.mrf.mxu2  ;;  %v1894_v0 = vpop.f32.mrf.mxu0 }
 0x212   : > { %v2118_v18 = vadd.f32 %v2117_v4, %v2005_v38  ;;  %v2007_v8 = vpop.f32.mrf.mxu1  ;;  %v1895_v1 = vadd.f32 %v1894_v0, %v6652_v15  ;;  %v873_v0 = vld [vmem:[#allocation2 + $0x121] sm:$0xff] }
 0x214   : > { %2274 = vmatmul.f32.gmra.mxu3 %v871_v13  ;;  %1941 = vmatmul.f32.gmra.mxu0 %v871_v13  ;;  %v2008_v10 = vadd.f32 %v2007_v8, %v1895_v1  ;;  %v1400_v13 = vld [vmem:[#allocation8 + $0x418] sm:$0xff] }
 0x215   : > { %2054 = vmatmul.f32.gmra.mxu1 %v6818_v51  ;;  %2329 = vmatpush.msra.mxu0 %v1400_v13 }
 0x216   : > { %2167 = vmatmul.f32.gmra.mxu2 %v809_v39 }
 0x217   : > { %v2227_v33 = vpop.f32.mrf.mxu3 }
 0x218   : > { %v6822_v54 = vadd.f32 %v2227_v33, %v2115_v57  ;;  %v811_v33 = vld [vmem:[#allocation2 + $0x138] sm:$0xff] }
 0x219   : > { %v2120_v45 = vpop.f32.mrf.mxu2  ;;  %v1897_v20 = vpop.f32.mrf.mxu0 }
 0x21a   : > { %v2121_v19 = vadd.f32 %v2120_v45, %v2008_v10  ;;  %v2010_v62 = vpop.f32.mrf.mxu1  ;;  %v1898_v38 = vadd.f32 %v1897_v20, %v6656_v29  ;;  %v6830_v10 = vld [vmem:[#allocation2 + $0x122] sm:$0xff] }
 0x21c   : > { %2277 = vmatmul.f32.gmra.mxu3 %v872_v52  ;;  %1944 = vmatmul.f32.gmra.mxu0 %v872_v52  ;;  %v2011_v4 = vadd.f32 %v2010_v62, %v1898_v38  ;;  %v874_v62 = vld [vmem:[#allocation2 + $0x129] sm:$0xff] }
 0x21d   : > { %2057 = vmatmul.f32.gmra.mxu1 %v6824_v53 }
 0x21e   : > { %2170 = vmatmul.f32.gmra.mxu2 %v810_v25 }
 0x21f   : > { %v2230_v15 = vpop.f32.mrf.mxu3 }
 0x220   : > { %v6828_v41 = vadd.f32 %v2230_v15, %v2118_v18  ;;  %v812_v15 = vld [vmem:[#allocation2 + $0x140] sm:$0xff] }
 0x221   : > { %v2123_v57 = vpop.f32.mrf.mxu2  ;;  %v1900_v39 = vpop.f32.mrf.mxu0 }
 0x222   : > { %v2124_v8 = vadd.f32 %v2123_v57, %v2011_v4  ;;  %v2013_v1 = vpop.f32.mrf.mxu1  ;;  %v1901_v29 = vadd.f32 %v1900_v39, %v6660_v43  ;;  %v6836_v4 = vld [vmem:[#allocation2 + $0x12a] sm:$0xff] }
 0x224   : > { %2280 = vmatmul.f32.gmra.mxu3 %v873_v0  ;;  %1947 = vmatmul.f32.gmra.mxu0 %v873_v0  ;;  %v2014_v18 = vadd.f32 %v2013_v1, %v1901_v29  ;;  %v1399_v1 = vld [vmem:[#allocation8 + $0x410] sm:$0xff] }
 0x225   : > { %2060 = vmatmul.f32.gmra.mxu1 %v6830_v10  ;;  %2330 = vmatpush.msra.mxu0 %v1399_v1 }
 0x226   : > { %2173 = vmatmul.f32.gmra.mxu2 %v811_v33  ;;  %v875_v33 = vld [vmem:[#allocation2 + $0x139] sm:$0xff] }
 0x227   : > { %v2233_v45 = vpop.f32.mrf.mxu3 }
 0x228   : > { %v6834_v52 = vadd.f32 %v2233_v45, %v2121_v19 }
 0x229   : > { %v2126_v20 = vpop.f32.mrf.mxu2  ;;  %v1903_v38 = vpop.f32.mrf.mxu0 }
 0x22a   : > { %v2127_v25 = vadd.f32 %v2126_v20, %v2014_v18  ;;  %v1904_v57 = vadd.f32 %v1903_v38, %v6664_v55  ;;  %v2016_v43 = vpop.f32.mrf.mxu1  ;;  %v813_v18 = vld [vmem:[#allocation2 + $0x150] sm:$0xff]  ;;  %v748_v20 = vld [vmem:[#allocation2 + $0x13a] sm:$0xff] }
 0x22b   : > { %v876_v38 = vld [vmem:[#allocation2 + $0x141] sm:$0xff] }
 0x22c   : > { %2283 = vmatmul.f32.gmra.mxu3 %v874_v62  ;;  %1950 = vmatmul.f32.gmra.mxu0 %v874_v62  ;;  %v2017_v0 = vadd.f32 %v2016_v43, %v1904_v57  ;;  %v749_v57 = vld [vmem:[#allocation2 + $0x142] sm:$0xff] }
 0x22d   : > { %2063 = vmatmul.f32.gmra.mxu1 %v6836_v4 }
 0x22e   : > { %2176 = vmatmul.f32.gmra.mxu2 %v812_v15 }
 0x22f   : > { %v2236_v13 = vpop.f32.mrf.mxu3 }
 0x230   : > { %v6840_v39 = vadd.f32 %v2236_v13, %v2124_v8  ;;  %v814_v8 = vld [vmem:[#allocation2 + $0x158] sm:$0xff] }
 0x231   : > { %v2129_v19 = vpop.f32.mrf.mxu2  ;;  %v6842_v45 = vpop.f32.mrf.mxu0 }
 0x232   : > { %v2130_v29 = vadd.f32 %v2129_v19, %v2017_v0  ;;  %v1398_v0 = vld [vmem:[#allocation8 + $0x408] sm:$0xff]  ;;  %v877_v19 = vld [vmem:[#allocation2 + $0x151] sm:$0xff] }
 0x233   : > { %2331 = vmatpush.msra.mxu0 %v1398_v0  ;;  %v752_v0 = vld [vmem:[#allocation2 + $0x16a] sm:$0xff] }
 0x234   : > { %2286 = vmatmul.f32.gmra.mxu3 %v875_v33  ;;  %1953 = vmatmul.f32.gmra.mxu0 %v875_v33  ;;  %v815_v33 = vld [vmem:[#allocation2 + $0x168] sm:$0xff] }
 0x235   : > { %2066 = vmatmul.f32.gmra.mxu1 %v748_v20 }
 0x236   : > { %2179 = vmatmul.f32.gmra.mxu2 %v813_v18  ;;  %v878_v18 = vld [vmem:[#allocation2 + $0x159] sm:$0xff] }
 0x237   : > { %v2239_v55 = vpop.f32.mrf.mxu3 }
 0x238   : > { %v6844_v62 = vadd.f32 %v2239_v55, %v2127_v25  ;;  %v750_v25 = vld [vmem:[#allocation2 + $0x152] sm:$0xff] }
 0x239   : > { %v6846_v15 = vpop.f32.mrf.mxu0  ;;  %v816_v55 = vld [vmem:[#allocation2 + $0x170] sm:$0xff] }
 0x23c   : > { %2289 = vmatmul.f32.gmra.mxu3 %v876_v38  ;;  %1956 = vmatmul.f32.gmra.mxu0 %v876_v38  ;;  %v751_v38 = vld [vmem:[#allocation2 + $0x15a] sm:$0xff] }
 0x23d   : > { %2069 = vmatmul.f32.gmra.mxu1 %v749_v57 }
 0x23e   : > { %2182 = vmatmul.f32.gmra.mxu2 %v814_v8  ;;  %v879_v8 = vld [vmem:[#allocation2 + $0x169] sm:$0xff] }
 0x23f   : > { %v2242_v43 = vpop.f32.mrf.mxu3 }
 0x240   : > { %v6848_v13 = vadd.f32 %v2242_v43, %v2130_v29  ;;  %v1397_v29 = vld [vmem:[#allocation8 + $0x400] sm:$0xff] }
 0x241   : > { %v6850_v1 = vpop.f32.mrf.mxu0  ;;  %2332 = vmatpush.msra.mxu0 %v1397_v29  ;;  %v817_v43 = vld [vmem:[#allocation2 + $0x180] sm:$0xff] }
 0x242   : > { %v6862_v29 = vld [vmem:[#allocation2] sm:$0xff] }
 0x244   : > { %2292 = vmatmul.f32.gmra.mxu3 %v877_v19  ;;  %1959 = vmatmul.f32.gmra.mxu0 %v877_v19 }
 0x245   : > { %2072 = vmatmul.f32.gmra.mxu1 %v750_v25  ;;  %v753_v25 = vld [vmem:[#allocation2 + $0x172] sm:$0xff] }
 0x246   : > { %2185 = vmatmul.f32.gmra.mxu2 %v815_v33  ;;  %v689_v33 = vld [vmem:[#allocation2 + $0x171] sm:$0xff] }
 0x249   : > { %v6852_v20 = vpop.f32.mrf.mxu0 }
 0x24c   : > { %2295 = vmatmul.f32.gmra.mxu3 %v878_v18  ;;  %1962 = vmatmul.f32.gmra.mxu0 %v878_v18  ;;  %v881_v18 = vld [vmem:[#allocation2 + $0x181] sm:$0xff] }
 0x24d   : > { %2075 = vmatmul.f32.gmra.mxu1 %v751_v38  ;;  %v754_v38 = vld [vmem:[#allocation2 + $0x182] sm:$0xff] }
 0x24e   : > { %2188 = vmatmul.f32.gmra.mxu2 %v816_v55 }
 0x251   : > { %v6854_v57 = vpop.f32.mrf.mxu0 }
 0x254   : > { %2298 = vmatmul.f32.gmra.mxu3 %v879_v8  ;;  %1965 = vmatmul.f32.gmra.mxu0 %v879_v8  ;;  %v882_v8 = vld [vmem:[#allocation2 + $0x189] sm:$0xff] }
 0x255   : > { %2078 = vmatmul.f32.gmra.mxu1 %v752_v0  ;;  %v755_v0 = vld [vmem:[#allocation2 + $0x18a] sm:$0xff] }
 0x256   : > { %2191 = vmatmul.f32.gmra.mxu2 %v817_v43 }
 0x259   : > { %v6856_v19 = vpop.f32.mrf.mxu0 }
 0x25c   : > { %2301 = vmatmul.f32.gmra.mxu3 %v6706_v3  ;;  %1968 = vmatmul.f32.gmra.mxu0 %v689_v33  ;;  %v883_v3 = vld [vmem:[#allocation2 + $0x199] sm:$0xff]  ;;  %v884_v33 = vld [vmem:[#allocation2 + $0x1a1] sm:$0xff] }
 0x25d   : > { %2081 = vmatmul.f32.gmra.mxu1 %v753_v25 }
 0x25e   : > { %2194 = vmatmul.f32.gmra.mxu2 %v6713_v34 }
 0x261   : > { %v6860_v55 = vpop.f32.mrf.mxu0 }
 0x264   : > { %2304 = vmatmul.f32.gmra.mxu3 %v881_v18  ;;  %1971 = vmatmul.f32.gmra.mxu0 %v881_v18 }
 0x265   : > { %2084 = vmatmul.f32.gmra.mxu1 %v754_v38 }
 0x266   : > { %2197 = vmatmul.f32.gmra.mxu2 %v6862_v29 }
 0x269   : > { %v6865_v43 = vpop.f32.mrf.mxu0 }
 0x26c   : > { %2307 = vmatmul.f32.gmra.mxu3 %v882_v8  ;;  %1974 = vmatmul.f32.gmra.mxu0 %v882_v8 }
 0x26d   : > { %2087 = vmatmul.f32.gmra.mxu1 %v755_v0 }
 0x26e   : > { %2200 = vmatmul.f32.gmra.mxu2 %v6862_v29 }
 0x271   : > { %v6868_v34 = vpop.f32.mrf.mxu0 }
 0x272   : > { %7679 = vst [vmem:[#allocation34_spill] sm:$0xff] %v6868_v34 }
 0x274   : > { %2310 = vmatmul.f32.gmra.mxu3 %v883_v3  ;;  %2333 = vmatmul.f32.vlgmr.msra.gmra.mxu0 %v6718_v56  ;;  %v3504_v56 = vld [vmem:[#allocation8 + $0x578] sm:$0xff] }
 0x275   : > { %v3520_v3 = vld [vmem:[#allocation8 + $0x5f8] sm:$0xff]  ;;  %3658 = vmatpush.msra.mxu2 %v3504_v56  ;;  %v3518_v56 = vld [vmem:[#allocation8 + $0x5e8] sm:$0xff] }
 0x276   : > { %3699 = vmatpush.msra.mxu3 %v3520_v3 }
 0x279   : > { %v6871_v25 = vpop.f32.mrf.mxu0 }
 0x27a   : > { %7680 = vst [vmem:[#allocation35_spill] sm:$0xff] %v6871_v25 }
 0x27c   : > { %2313 = vmatmul.f32.gmra.mxu3 %v884_v33  ;;  %2336 = vmatmul.f32.gmra.mxu0 %v6723_v7  ;;  %v3488_v7 = vld [vmem:[#allocation8 + $0x4f8] sm:$0xff] }
 0x27d   : > { %3617 = vmatpush.msra.mxu1 %v3488_v7 }
 0x281   : > { %v6874_v18 = vpop.f32.mrf.mxu0 }
 0x282   : > { %7681 = vst [vmem:[#allocation36_spill] sm:$0xff] %v6874_v18 }
 0x284   : > { %2339 = vmatmul.f32.gmra.mxu0 %v6728_v28 }
 0x289   : > { %v6877_v38 = vpop.f32.mrf.mxu0 }
 0x28a   : > { %7682 = vst [vmem:[#allocation37_spill] sm:$0xff] %v6877_v38 }
 0x28c   : > { %2342 = vmatmul.f32.gmra.mxu0 %v6733_v40  ;;  %v3503_v40 = vld [vmem:[#allocation8 + $0x570] sm:$0xff] }
 0x28d   : > { %3659 = vmatpush.msra.mxu2 %v3503_v40  ;;  %v3517_v40 = vld [vmem:[#allocation8 + $0x5e0] sm:$0xff] }
 0x291   : > { %v6880_v8 = vpop.f32.mrf.mxu0 }
 0x292   : > { %7683 = vst [vmem:[#allocation38_spill] sm:$0xff] %v6880_v8  ;;  %v3506_v8 = vld [vmem:[#allocation8 + $0x588] sm:$0xff] }
 0x294   : > { %2345 = vmatmul.f32.gmra.mxu0 %v6738_v59  ;;  %v3519_v59 = vld [vmem:[#allocation8 + $0x5f0] sm:$0xff] }
 0x295   : > { %3700 = vmatpush.msra.mxu3 %v3519_v59 }
 0x297   : > { %3701 = vmatpush.msra.mxu3 %v3518_v56  ;;  %v3516_v56 = vld [vmem:[#allocation8 + $0x5d8] sm:$0xff] }
 0x299   : > { %v6883_v0 = vpop.f32.mrf.mxu0  ;;  %3702 = vmatpush.msra.mxu3 %v3517_v40  ;;  %v3498_v40 = vld [vmem:[#allocation8 + $0x548] sm:$0xff] }
 0x29a   : > { %7684 = vst [vmem:[#allocation39_spill] sm:$0xff] %v6883_v0 }
 0x29b   : > { %3703 = vmatpush.msra.mxu3 %v3516_v56  ;;  %v3497_v56 = vld [vmem:[#allocation8 + $0x540] sm:$0xff] }
 0x29c   : > { %2348 = vmatmul.f32.gmra.mxu0 %v6743_v17  ;;  %v3487_v17 = vld [vmem:[#allocation8 + $0x4f0] sm:$0xff] }
 0x29d   : > { %3618 = vmatpush.msra.mxu1 %v3487_v17 }
 0x2a1   : > { %v6886_v33 = vpop.f32.mrf.mxu0 }
 0x2a2   : > { %7685 = vst [vmem:[#allocation40_spill] sm:$0xff] %v6886_v33  ;;  %v3507_v33 = vld [vmem:[#allocation8 + $0x590] sm:$0xff] }
 0x2a4   : > { %2351 = vmatmul.f32.gmra.mxu0 %v6748_v42  ;;  %v3502_v42 = vld [vmem:[#allocation8 + $0x568] sm:$0xff] }
 0x2a5   : > { %3660 = vmatpush.msra.mxu2 %v3502_v42 }
 0x2a9   : > { %v6889_v28 = vpop.f32.mrf.mxu0 }
 0x2aa   : > { %7686 = vst [vmem:[#allocation41_spill] sm:$0xff] %v6889_v28 }
 0x2ac   : > { %2354 = vmatmul.f32.gmra.mxu0 %v6753_v48  ;;  %v3486_v48 = vld [vmem:[#allocation8 + $0x4e8] sm:$0xff] }
 0x2ad   : > { %3619 = vmatpush.msra.mxu1 %v3486_v48 }
 0x2b1   : > { %v6892_v12 = vpop.f32.mrf.mxu0 }
 0x2b2   : > { %7687 = vst [vmem:[#allocation42_spill] sm:$0xff] %v6892_v12  ;;  %v3477_v12 = vld [vmem:[#allocation8 + $0x4a0] sm:$0xff] }
 0x2b4   : > { %2357 = vmatmul.f32.gmra.mxu0 %v6758_v23  ;;  %v3501_v23 = vld [vmem:[#allocation8 + $0x560] sm:$0xff] }
 0x2b5   : > { %3661 = vmatpush.msra.mxu2 %v3501_v23  ;;  %v3499_v23 = vld [vmem:[#allocation8 + $0x550] sm:$0xff] }
 0x2b9   : > { %v6895_v37 = vpop.f32.mrf.mxu0 }
 0x2ba   : > { %7688 = vst [vmem:[#allocation43_spill] sm:$0xff] %v6895_v37  ;;  %v3492_v37 = vld [vmem:[#allocation8 + $0x518] sm:$0xff] }
 0x2bc   : > { %2360 = vmatmul.f32.gmra.mxu0 %v6763_v35  ;;  %v3485_v35 = vld [vmem:[#allocation8 + $0x4e0] sm:$0xff] }
 0x2bd   : > { %3620 = vmatpush.msra.mxu1 %v3485_v35 }
 0x2c1   : > { %v6898_v3 = vpop.f32.mrf.mxu0 }
 0x2c2   : > { %7689 = vst [vmem:[#allocation44_spill] sm:$0xff] %v6898_v3  ;;  %v3478_v3 = vld [vmem:[#allocation8 + $0x4a8] sm:$0xff] }
 0x2c4   : > { %2363 = vmatmul.f32.gmra.mxu0 %v6768_v26  ;;  %v3500_v26 = vld [vmem:[#allocation8 + $0x558] sm:$0xff] }
 0x2c5   : > { %3662 = vmatpush.msra.mxu2 %v3500_v26  ;;  %v6919_v26 = vpop.f32.mrf.mxu2 }
 0x2c7   : > { %3663 = vmatpush.msra.mxu2 %v3499_v23  ;;  %v3495_v23 = vld [vmem:[#allocation8 + $0x530] sm:$0xff] }
 0x2c9   : > { %v6901_v7 = vpop.f32.mrf.mxu0  ;;  %3664 = vmatpush.msra.mxu2 %v3498_v40 }
 0x2ca   : > { %7690 = vst [vmem:[#allocation45_spill] sm:$0xff] %v6901_v7  ;;  %v3493_v7 = vld [vmem:[#allocation8 + $0x520] sm:$0xff] }
 0x2cb   : > { %3665 = vmatpush.msra.mxu2 %v3497_v56  ;;  %v3482_v56 = vld [vmem:[#allocation8 + $0x4c8] sm:$0xff] }
 0x2cc   : > { %2366 = vmatmul.f32.gmra.mxu0 %v6773_v21  ;;  %v3484_v21 = vld [vmem:[#allocation8 + $0x4d8] sm:$0xff] }
 0x2cd   : > { %3621 = vmatpush.msra.mxu1 %v3484_v21  ;;  %v6922_v21 = vld [vmem:[#allocation11] ss:$0 sm:$0xff] }
 0x2d1   : > { %v6904_v59 = vpop.f32.mrf.mxu0 }
 0x2d2   : > { %7691 = vst [vmem:[#allocation46_spill] sm:$0xff] %v6904_v59  ;;  %v3513_v59 = vld [vmem:[#allocation8 + $0x5c0] sm:$0xff] }
 0x2d4   : > { %2369 = vmatmul.f32.gmra.mxu0 %v6778_v36 }
 0x2d9   : > { %v6907_v17 = vpop.f32.mrf.mxu0 }
 0x2da   : > { %7692 = vst [vmem:[#allocation47_spill] sm:$0xff] %v6907_v17  ;;  %v6927_v17 = vld [vmem:[#allocation13] ss:$0 sm:$0xff] }
 0x2dc   : > { %2372 = vmatmul.f32.gmra.mxu0 %v6783_v22  ;;  %v6917_v22 = vpop.f32.mrf.mxu1 }
 0x2e1   : > { %v6910_v42 = vpop.f32.mrf.mxu0 }
 0x2e2   : > { %7693 = vst [vmem:[#allocation48_spill] sm:$0xff] %v6910_v42  ;;  %v6925_v42 = vpop.f32.mrf.mxu3 }
 0x2e4   : > { %2375 = vmatmul.f32.gmra.mxu0 %v6792_v11 }
 0x2e9   : > { %v6913_v48 = vpop.f32.mrf.mxu0 }
 0x2ea   : > { %7694 = vst [vmem:[#allocation49_spill] sm:$0xff] %v6913_v48  ;;  %v3515_v48 = vld [vmem:[#allocation8 + $0x5d0] sm:$0xff] }
 0x2eb   : > { %3704 = vmatpush.msra.mxu3 %v3515_v48 }
 0x2ec   : > { %2378 = vmatmul.f32.gmra.mxu0 %v6801_v24  ;;  %v3496_v24 = vld [vmem:[#allocation8 + $0x538] sm:$0xff] }
 0x2ed   : > { %3666 = vmatpush.msra.mxu2 %v3496_v24  ;;  %v3481_v24 = vld [vmem:[#allocation8 + $0x4c0] sm:$0xff] }
 0x2ef   : > { %3667 = vmatpush.msra.mxu2 %v3495_v23 }
 0x2f1   : > { %v2334_v36 = vpop.f32.mrf.mxu0 }
 0x2f2   : > { %v2335_v11 = vadd.f32 %v2334_v36, %v6810_v6  ;;  %v3514_v6 = vld [vmem:[#allocation8 + $0x5c8] sm:$0xff] }
 0x2f3   : > { %v3494_v36 = vld [vmem:[#allocation8 + $0x528] sm:$0xff]  ;;  %3705 = vmatpush.msra.mxu3 %v3514_v6  ;;  %v3512_v6 = vld [vmem:[#allocation8 + $0x5b8] sm:$0xff] }
 0x2f4   : > { %2381 = vmatmul.f32.gmra.mxu0 %v6806_v60  ;;  %v3483_v60 = vld [vmem:[#allocation8 + $0x4d0] sm:$0xff]  ;;  %v2434_v40 = vmul.f32 %v6922_v21, %v2335_v11  ;;  %3668 = vmatpush.msra.mxu2 %v3494_v36 }
 0x2f5   : > { %3622 = vmatpush.msra.mxu1 %v3483_v60  ;;  %3706 = vmatpush.msra.mxu3 %v3513_v59  ;;  %v6933_v60 = vpop.f32.mrf.mxu2  ;;  %v3479_v36 = vld [vmem:[#allocation8 + $0x4b0] sm:$0xff] }
 0x2f6   : > { %v2470_v11 = vadd.f32 %v6927_v17, %v2434_v40  ;;  %3669 = vmatpush.msra.mxu2 %v3493_v7  ;;  %v3511_v59 = vld [vmem:[#allocation8 + $0x5b0] sm:$0xff]  ;;  %v6940_v7 = vpop.f32.mrf.mxu3 }
 0x2f7   : > { %3623 = vmatpush.msra.mxu1 %v3482_v56  ;;  %v3480_v56 = vld [vmem:[#allocation8 + $0x4b8] sm:$0xff]  ;;  %3707 = vmatpush.msra.mxu3 %v3512_v6 }
 0x2f8   : > { %3670 = vmatpush.msra.mxu2 %v3492_v37  ;;  %v2502_v40 = vmax.f32 %v2470_v11, 0.0  ;;  %v3476_v6 = vld [vmem:[#allocation8 + $0x498] sm:$0xff]  ;;  %v3490_v11 = vld [vmem:[#allocation8 + $0x508] sm:$0xff] }
 0x2f9   : > { %v2337_v35 = vpop.f32.mrf.mxu0  ;;  %3624 = vmatpush.msra.mxu1 %v3481_v24  ;;  %v3491_v24 = vld [vmem:[#allocation8 + $0x510] sm:$0xff]  ;;  %3708 = vmatpush.msra.mxu3 %v3511_v59 }
 0x2fa   : > { %3671 = vmatpush.msra.mxu2 %v3491_v24 }
 0x2fb   : > { %3625 = vmatpush.msra.mxu1 %v3480_v56 }
 0x2fc   : > { %2384 = vmatmul.f32.gmra.mxu0 %v6812_v50  ;;  %v6930_v50 = vpop.f32.mrf.mxu1  ;;  %3672 = vmatpush.msra.mxu2 %v3490_v11 }
 0x2fd   : > { %3626 = vmatpush.msra.mxu1 %v3479_v36  ;;  %v3508_v36 = vld [vmem:[#allocation8 + $0x598] sm:$0xff] }
 0x2fe   : > { %v6956_v49 = vpop.f32.mrf.mxu3 }
 0x2ff   : > { %3627 = vmatpush.msra.mxu1 %v3478_v3 }
 0x301   : > { %v2340_v27 = vpop.f32.mrf.mxu0  ;;  %3628 = vmatpush.msra.mxu1 %v3477_v12 }
 0x302   : > { %v2341_v48 = vadd.f32 %v2340_v27, %v6822_v54  ;;  %v2338_v27 = vadd.f32 %v2337_v35, %v6816_v63  ;;  %v3509_v63 = vld [vmem:[#allocation8 + $0x5a0] sm:$0xff] }
 0x303   : > { %3629 = vmatpush.msra.mxu1 %v3476_v6 }
 0x304   : > { %v2436_v23 = vmul.f32 %v6922_v21, %v2341_v48  ;;  %2387 = vmatmul.f32.gmra.mxu0 %v6818_v51  ;;  %v3510_v51 = vld [vmem:[#allocation8 + $0x5a8] sm:$0xff]  ;;  %v2435_v35 = vmul.f32 %v6922_v21, %v2338_v27  ;;  %v6944_v59 = vpop.f32.mrf.mxu1 }
 0x305   : > { %3709 = vmatpush.msra.mxu3 %v3510_v51 }
 0x306   : > { %v2472_v54 = vadd.f32 %v6927_v17, %v2436_v23  ;;  %v2471_v12 = vadd.f32 %v6927_v17, %v2435_v35 }
 0x307   : > { %3710 = vmatpush.msra.mxu3 %v3509_v63 }
 0x308   : > { %v2504_v48 = vmax.f32 %v2472_v54, 0.0  ;;  %v3489_v54 = vld [vmem:[#allocation8 + $0x500] sm:$0xff] }
 0x309   : > { %v2343_v56 = vpop.f32.mrf.mxu0  ;;  %3711 = vmatpush.msra.mxu3 %v3508_v36  ;;  %3673 = vmatpush.msra.mxu2 %v3489_v54  ;;  %v3474_v36 = vld [vmem:[#allocation8 + $0x488] sm:$0xff] }
 0x30a   : > { %v2534_v23 = vmax.f32 %v2502_v40, %v2504_v48  ;;  %v2344_v37 = vadd.f32 %v2343_v56, %v6828_v41  ;;  %v3271_v41 = vld [vmem:[#allocation3 + $0x1] sm:$0xff]  ;;  %v6949_v48 = vpop.f32.mrf.mxu2 }
 0x30b   : > { %3712 = vmatpush.msra.mxu3 %v3507_v33  ;;  %3674 = vmatmul.f32.vlgmr.msra.gmra.mxu2 %v3271_v41 }
 0x30c   : > { %v2566_v24 = vrot.slane %v2534_v23, 2  ;;  %v2567_v28 = vrot.slane %v2534_v23, 4  ;;  %v2568_v0 = vrot.slane %v2534_v23, 6  ;;  %v2663_v3 = vsel %vm2662_vm1, %v2534_v23, -inf  ;;  %2390 = vmatmul.f32.gmra.mxu0 %v6824_v53  ;;  %v3475_v23 = vld [vmem:[#allocation8 + $0x490] sm:$0xff] }
 0x30d   : > { %v2664_v27 = vrot.slane %v2663_v3, 4  ;;  %v2437_v40 = vmul.f32 %v6922_v21, %v2344_v37  ;;  %3630 = vmatpush.msra.mxu1 %v3475_v23  ;;  %3713 = vmatpush.msra.mxu3 %v3506_v8 }
 0x30e   : > { %v2670_v51 = vsel %vm2662_vm1, %v2566_v24, -inf  ;;  %v2677_v56 = vsel %vm2662_vm1, %v2567_v28, -inf  ;;  %v2684_v63 = vsel %vm2662_vm1, %v2568_v0, -inf  ;;  %v2503_v0 = vmax.f32 %v2471_v12, 0.0  ;;  %v6960_v12 = vpop.f32.mrf.mxu1 }
 0x30f   : > { %v2665_v53 = vmax.f32 %v2663_v3, %v2664_v27  ;;  %v2671_v11 = vrot.slane %v2670_v51, 4  ;;  %v2678_v47 = vrot.slane %v2677_v56, 4  ;;  %v2685_v37 = vrot.slane %v2684_v63, 4  ;;  %3631 = vmatpush.msra.mxu1 %v3474_v36  ;;  %v3473_v3 = vld [vmem:[#allocation8 + $0x480] sm:$0xff] }
 0x310   : > { %v2473_v6 = vadd.f32 %v6927_v17, %v2437_v40  ;;  %v3505_v27 = vld [vmem:[#allocation8 + $0x580] sm:$0xff]  ;;  %v3287_v40 = vld [vmem:[#allocation3 + $0x2] sm:$0xff] }
 0x311   : > { %v2666_v35 = vrot.slane %v2665_v53, 2  ;;  %v2672_v24 = vmax.f32 %v2670_v51, %v2671_v11  ;;  %v2679_v2 = vmax.f32 %v2677_v56, %v2678_v47  ;;  %v2686_v28 = vmax.f32 %v2684_v63, %v2685_v37  ;;  %v2346_v38 = vpop.f32.mrf.mxu0  ;;  %3632 = vmatpush.msra.mxu1 %v3473_v3  ;;  %3714 = vmatpush.msra.mxu3 %v3505_v27 }
 0x312   : > { %v2505_v54 = vmax.f32 %v2473_v6, 0.0  ;;  %3633 = vmatmul.f32.vlgmr.msra.gmra.mxu1 %v6862_v29  ;;  %3715 = vmatmul.f32.vlgmr.msra.gmra.mxu3 %v3287_v40  ;;  %v2347_v18 = vadd.f32 %v2346_v38, %v6834_v52 }
 0x313   : > { %v2667_v23 = vmax.f32 %v2665_v53, %v2666_v35  ;;  %v2673_v33 = vrot.slane %v2672_v24, 2  ;;  %v2680_v25 = vrot.slane %v2679_v2, 2  ;;  %v2687_v8 = vrot.slane %v2686_v28, 2  ;;  %v6963_v35 = vpop.f32.mrf.mxu2 }
 0x314   : > { %v2535_v41 = vmax.f32 %v2503_v0, %v2505_v54  ;;  %2393 = vmatmul.f32.gmra.mxu0 %v6830_v10  ;;  %v2438_v52 = vmul.f32 %v6922_v21, %v2347_v18 }
 0x315   : > { %v2674_v47 = vmax.f32 %v2672_v24, %v2673_v33  ;;  %v2681_v51 = vmax.f32 %v2679_v2, %v2680_v25  ;;  %v2668_v37 = vrot.slane %v2667_v23, 1  ;;  %v2688_v24 = vmax.f32 %v2686_v28, %v2687_v8 }
 0x316   : > { %v2569_v56 = vrot.slane %v2535_v41, 2  ;;  %v2570_v63 = vrot.slane %v2535_v41, 4  ;;  %v2571_v11 = vrot.slane %v2535_v41, 6  ;;  %v2691_v53 = vsel %vm2662_vm1, %v2535_v41, -inf  ;;  %v6974_v38 = vpop.f32.mrf.mxu1 }
 0x317   : > { %v2675_v6 = vrot.slane %v2674_v47, 1  ;;  %v2682_v36 = vrot.slane %v2681_v51, 1  ;;  %v2692_v0 = vrot.slane %v2691_v53, 4  ;;  %v2669_v41 = vmax.f32 %v2667_v23, %v2668_v37 }
 0x318   : > { %v2698_v10 = vsel %vm2662_vm1, %v2569_v56, -inf  ;;  %v2705_v29 = vsel %vm2662_vm1, %v2570_v63, -inf  ;;  %v2712_v2 = vsel %vm2662_vm1, %v2571_v11, -inf  ;;  %v6970_v63 = vpop.f32.mrf.mxu3 }
 0x319   : > { %v2676_v25 = vmax.f32 %v2674_v47, %v2675_v6  ;;  %v2699_v54 = vrot.slane %v2698_v10, 4  ;;  %v2349_v3 = vpop.f32.mrf.mxu0  ;;  %v2693_v27 = vmax.f32 %v2691_v53, %v2692_v0  ;;  %v2706_v33 = vrot.slane %v2705_v29, 4 }
 0x31a   : > { %v2713_v40 = vrot.slane %v2712_v2, 4  ;;  %v2683_v31 = vmax.f32 %v2681_v51, %v2682_v36  ;;  %v2689_v47 = vrot.slane %v2688_v24, 1 }
 0x31b   : > { %v2700_v9 = vmax.f32 %v2698_v10, %v2699_v54  ;;  %v2694_v34 = vrot.slane %v2693_v27, 2  ;;  %v2707_v61 = vmax.f32 %v2705_v29, %v2706_v33  ;;  %v3176_v28 = vsel %vm3175_vm2, %v2676_v25, %v2669_v41 }
 0x31c   : > { %v2714_v56 = vmax.f32 %v2712_v2, %v2713_v40  ;;  %2396 = vmatmul.f32.gmra.mxu0 %v6836_v4  ;;  %v3178_v51 = vsel %vm3177_vm3, %v2683_v31, %v3176_v28  ;;  %v2690_v0 = vmax.f32 %v2688_v24, %v2689_v47  ;;  %v939_v2 = vld [vmem:[#allocation2 + $0x13a] sm:$0xff]  ;;  %v2474_v24 = vadd.f32 %v6927_v17, %v2438_v52  ;;  %v940_v52 = vld [vmem:[#allocation2 + $0x142] sm:$0xff] }
 0x31d   : > { %v2701_v8 = vrot.slane %v2700_v9, 2  ;;  %v2695_v11 = vmax.f32 %v2693_v27, %v2694_v34  ;;  %v2708_v53 = vrot.slane %v2707_v61, 2  ;;  %v6977_v34 = vpop.f32.mrf.mxu2 }
 0x31e   : > { %v2715_v6 = vrot.slane %v2714_v56, 2  ;;  %v3180_v27 = vsel %vm3179_vm4, %v2690_v0, %v3178_v51  ;;  %v6991_v51 = vpop.f32.mrf.mxu1 }
 0x31f   : > { %v2702_v23 = vmax.f32 %v2700_v9, %v2701_v8  ;;  %v2696_v37 = vrot.slane %v2695_v11, 1  ;;  %v2709_v4 = vmax.f32 %v2707_v61, %v2708_v53  ;;  %v2506_v53 = vmax.f32 %v2474_v24, 0.0 }
 0x320   : > { %v2716_v36 = vmax.f32 %v2714_v56, %v2715_v6  ;;  %v6988_v8 = vpop.f32.mrf.mxu3 }
 0x321   : > { %v2703_v10 = vrot.slane %v2702_v23, 1  ;;  %v2352_v29 = vpop.f32.mrf.mxu0  ;;  %v2697_v25 = vmax.f32 %v2695_v11, %v2696_v37  ;;  %v2710_v54 = vrot.slane %v2709_v4, 1 }
 0x322   : > { %v2717_v9 = vrot.slane %v2716_v36, 1  ;;  %v2353_v18 = vadd.f32 %v2352_v29, %v6844_v62  ;;  %v2350_v62 = vadd.f32 %v2349_v3, %v6840_v39 }
 0x323   : > { %v2704_v33 = vmax.f32 %v2702_v23, %v2703_v10  ;;  %v2711_v61 = vmax.f32 %v2709_v4, %v2710_v54  ;;  %v3182_v31 = vsel %vm3181_vm5, %v2697_v25, %v3180_v27 }
 0x324   : > { %v2440_v40 = vmul.f32 %v6922_v21, %v2353_v18  ;;  %2399 = vmatmul.f32.gmra.mxu0 %v939_v2  ;;  %v2718_v41 = vmax.f32 %v2716_v36, %v2717_v9  ;;  %v2439_v37 = vmul.f32 %v6922_v21, %v2350_v62  ;;  %v1907_v2 = vadd.f32 %v6842_v45, %v6672_v14 }
 0x325   : > { %v3184_v56 = vsel %vm3183_vm6, %v2704_v33, %v3182_v31  ;;  %v6995_v39 = vpop.f32.mrf.mxu2 }
 0x326   : > { %v3186_v47 = vsel %vm3185_vm7, %v2711_v61, %v3184_v56  ;;  %v2476_v28 = vadd.f32 %v6927_v17, %v2440_v40  ;;  %v2475_v9 = vadd.f32 %v6927_v17, %v2439_v37  ;;  %v1913_v37 = vadd.f32 %v6850_v1, %v6690_v5 }
 0x327   : > { %v3188_v11 = vsel %vm3187_vm8, %v2718_v41, %v3186_v47 }
 0x328   : > { %3247 = vst [vmem:[#allocation3 + $0x11] sm:$0xff] %v3188_v11  ;;  %v2508_v6 = vmax.f32 %v2476_v28, 0.0  ;;  %3677 = vmatmul.f32.gmra.mxu2 %v3188_v11  ;;  %v7006_v14 = vpop.f32.mrf.mxu3 }
 0x329   : > { %v2355_v23 = vpop.f32.mrf.mxu0 }
 0x32a   : > { %v2536_v4 = vmax.f32 %v2506_v53, %v2508_v6  ;;  %v2356_v36 = vadd.f32 %v2355_v23, %v6848_v13  ;;  %v941_v53 = vld [vmem:[#allocation2 + $0x152] sm:$0xff]  ;;  %v2020_v6 = vadd.f32 %v6917_v22, %v1907_v2  ;;  %v2507_v23 = vmax.f32 %v2475_v9, 0.0 }
 0x32c   : > { %v2572_v3 = vrot.slane %v2536_v4, 2  ;;  %v2573_v0 = vrot.slane %v2536_v4, 4  ;;  %v2574_v10 = vrot.slane %v2536_v4, 6  ;;  %v2719_v29 = vsel %vm2662_vm1, %v2536_v4, -inf  ;;  %2402 = vmatmul.f32.gmra.mxu0 %v940_v52 }
 0x32d   : > { %v2720_v25 = vrot.slane %v2719_v29, 4  ;;  %v2441_v54 = vmul.f32 %v6922_v21, %v2356_v36  ;;  %v7016_v2 = vpop.f32.mrf.mxu2 }
 0x32e   : > { %v2726_v18 = vsel %vm2662_vm1, %v2572_v3, -inf  ;;  %v2733_v13 = vsel %vm2662_vm1, %v2573_v0, -inf  ;;  %v2740_v27 = vsel %vm2662_vm1, %v2574_v10, -inf  ;;  %v2133_v0 = vadd.f32 %v6919_v26, %v2020_v6  ;;  %v7012_v10 = vpop.f32.mrf.mxu1 }
 0x32f   : > { %v2721_v33 = vmax.f32 %v2719_v29, %v2720_v25  ;;  %v2727_v61 = vrot.slane %v2726_v18, 4  ;;  %v2734_v31 = vrot.slane %v2733_v13, 4  ;;  %v2741_v24 = vrot.slane %v2740_v27, 4  ;;  %v3256_v40 = vld [vmem:[#allocation3 + $0x10] sm:$0xff] }
 0x330   : > { %v3288_v41 = vld [vmem:[#allocation3 + $0x12] sm:$0xff]  ;;  %v2477_v56 = vadd.f32 %v6927_v17, %v2441_v54  ;;  %3636 = vmatmul.f32.gmra.mxu1 %v3256_v40  ;;  %v1910_v25 = vadd.f32 %v6846_v15, %v6680_v44  ;;  %v2246_v40 = vadd.f32 %v6925_v42, %v2133_v0 }
 0x331   : > { %3718 = vmatmul.f32.gmra.mxu3 %v3288_v41  ;;  %v2722_v45 = vrot.slane %v2721_v33, 2  ;;  %v2728_v47 = vmax.f32 %v2726_v18, %v2727_v61  ;;  %v2735_v62 = vmax.f32 %v2733_v13, %v2734_v31  ;;  %v2742_v28 = vmax.f32 %v2740_v27, %v2741_v24  ;;  %v2358_v11 = vpop.f32.mrf.mxu0 }
 0x332   : > { %v2509_v52 = vmax.f32 %v2477_v56, 0.0  ;;  %v2026_v27 = vadd.f32 %v6944_v59, %v1913_v37  ;;  %v7026_v37 = vpop.f32.mrf.mxu3 }
 0x333   : > { %v2723_v4 = vmax.f32 %v2721_v33, %v2722_v45  ;;  %v2729_v36 = vrot.slane %v2728_v47, 2  ;;  %v2736_v3 = vrot.slane %v2735_v62, 2  ;;  %v2743_v22 = vrot.slane %v2742_v28, 2 }
 0x334   : > { %v2537_v29 = vmax.f32 %v2507_v23, %v2509_v52  ;;  %2405 = vmatmul.f32.gmra.mxu0 %v941_v53  ;;  %v2023_v53 = vadd.f32 %v6930_v50, %v1910_v25  ;;  %v2139_v52 = vadd.f32 %v6949_v48, %v2026_v27 }
 0x335   : > { %v2730_v54 = vmax.f32 %v2728_v47, %v2729_v36  ;;  %v2737_v18 = vmax.f32 %v2735_v62, %v2736_v3  ;;  %v2724_v26 = vrot.slane %v2723_v4, 1  ;;  %v2744_v56 = vmax.f32 %v2742_v28, %v2743_v22  ;;  %v942_v62 = vld [vmem:[#allocation2 + $0x15a] sm:$0xff] }
 0x336   : > { %v2575_v9 = vrot.slane %v2537_v29, 2  ;;  %v2576_v13 = vrot.slane %v2537_v29, 4  ;;  %v2577_v5 = vrot.slane %v2537_v29, 6  ;;  %v2747_v1 = vsel %vm2662_vm1, %v2537_v29, -inf  ;;  %v7031_v22 = vpop.f32.mrf.mxu1 }
 0x337   : > { %v2731_v33 = vrot.slane %v2730_v54, 1  ;;  %v2738_v61 = vrot.slane %v2737_v18, 1  ;;  %v2748_v31 = vrot.slane %v2747_v1, 4  ;;  %v2725_v36 = vmax.f32 %v2723_v4, %v2724_v26  ;;  %v7036_v26 = vpop.f32.mrf.mxu2 }
 0x338   : > { %v2754_v24 = vsel %vm2662_vm1, %v2575_v9, -inf  ;;  %v2761_v44 = vsel %vm2662_vm1, %v2576_v13, -inf  ;;  %v2768_v15 = vsel %vm2662_vm1, %v2577_v5, -inf  ;;  %v2359_v29 = vadd.f32 %v2358_v11, %v2246_v40  ;;  %v943_v40 = vld [vmem:[#allocation2 + $0x16a] sm:$0xff] }
 0x339   : > { %v2732_v41 = vmax.f32 %v2730_v54, %v2731_v33  ;;  %v2755_v45 = vrot.slane %v2754_v24, 4  ;;  %v2361_v47 = vpop.f32.mrf.mxu0  ;;  %v2749_v59 = vmax.f32 %v2747_v1, %v2748_v31  ;;  %v2762_v6 = vrot.slane %v2761_v44, 4 }
 0x33a   : > { %v2769_v23 = vrot.slane %v2768_v15, 4  ;;  %v2739_v9 = vmax.f32 %v2737_v18, %v2738_v61  ;;  %v1916_v28 = vadd.f32 %v6852_v20, %v6698_v32  ;;  %v2745_v54 = vrot.slane %v2744_v56, 1 }
 0x33b   : > { %v2756_v3 = vmax.f32 %v2754_v24, %v2755_v45  ;;  %v2750_v13 = vrot.slane %v2749_v59, 2  ;;  %v2763_v42 = vmax.f32 %v2761_v44, %v2762_v6  ;;  %v3189_v50 = vsel %vm3175_vm2, %v2732_v41, %v2725_v36  ;;  %v7046_v36 = vpop.f32.mrf.mxu3 }
 0x33c   : > { %v2770_v0 = vmax.f32 %v2768_v15, %v2769_v23  ;;  %2408 = vmatmul.f32.gmra.mxu0 %v942_v62  ;;  %v2136_v4 = vadd.f32 %v6933_v60, %v2023_v53  ;;  %v2252_v11 = vadd.f32 %v6956_v49, %v2139_v52  ;;  %v2442_v27 = vmul.f32 %v6922_v21, %v2359_v29 }
 0x33d   : > { %v2757_v25 = vrot.slane %v2756_v3, 2  ;;  %v2751_v48 = vmax.f32 %v2749_v59, %v2750_v13  ;;  %v2764_v5 = vrot.slane %v2763_v42, 2  ;;  %v3190_v32 = vsel %vm3177_vm3, %v2739_v9, %v3189_v50 }
 0x33e   : > { %v2771_v1 = vrot.slane %v2770_v0, 2  ;;  %v2029_v31 = vadd.f32 %v6960_v12, %v1916_v28  ;;  %v2746_v24 = vmax.f32 %v2744_v56, %v2745_v54  ;;  %v2249_v62 = vadd.f32 %v6940_v7, %v2136_v4 }
 0x33f   : > { %v2758_v18 = vmax.f32 %v2756_v3, %v2757_v25  ;;  %v2752_v20 = vrot.slane %v2751_v48, 1  ;;  %v2765_v33 = vmax.f32 %v2763_v42, %v2764_v5  ;;  %v2478_v12 = vadd.f32 %v6927_v17, %v2442_v27  ;;  %v944_v25 = vld [vmem:[#allocation2 + $0x172] sm:$0xff] }
 0x340   : > { %v2772_v61 = vmax.f32 %v2770_v0, %v2771_v1  ;;  %v2142_v53 = vadd.f32 %v6963_v35, %v2029_v31  ;;  %v3191_v59 = vsel %vm3179_vm4, %v2746_v24, %v3190_v32  ;;  %v2362_v9 = vadd.f32 %v2361_v47, %v2249_v62  ;;  %v7053_v0 = vpop.f32.mrf.mxu1 }
 0x341   : > { %v2759_v44 = vrot.slane %v2758_v18, 1  ;;  %v2364_v15 = vpop.f32.mrf.mxu0  ;;  %v2753_v41 = vmax.f32 %v2751_v48, %v2752_v20  ;;  %v2766_v60 = vrot.slane %v2765_v33, 1  ;;  %v2510_v28 = vmax.f32 %v2478_v12, 0.0  ;;  %v7055_v48 = vpop.f32.mrf.mxu2 }
 0x342   : > { %v2773_v45 = vrot.slane %v2772_v61, 1  ;;  %v2365_v49 = vadd.f32 %v2364_v15, %v2252_v11  ;;  %v2255_v42 = vadd.f32 %v6970_v63, %v2142_v53  ;;  %v2443_v5 = vmul.f32 %v6922_v21, %v2362_v9 }
 0x343   : > { %v2760_v6 = vmax.f32 %v2758_v18, %v2759_v44  ;;  %v2767_v23 = vmax.f32 %v2765_v33, %v2766_v60  ;;  %v3192_v52 = vsel %vm3181_vm5, %v2753_v41, %v3191_v59  ;;  %v1919_v63 = vadd.f32 %v6854_v57, %v6702_v58  ;;  %v7066_v44 = vpop.f32.mrf.mxu3 }
 0x344   : > { %v2444_v56 = vmul.f32 %v6922_v21, %v2365_v49  ;;  %2411 = vmatmul.f32.gmra.mxu0 %v943_v40  ;;  %v2774_v3 = vmax.f32 %v2772_v61, %v2773_v45  ;;  %v2479_v33 = vadd.f32 %v6927_v17, %v2443_v5 }
 0x345   : > { %v3193_v29 = vsel %vm3183_vm6, %v2760_v6, %v3192_v52  ;;  %v2032_v52 = vadd.f32 %v6974_v38, %v1919_v63 }
 0x346   : > { %v3194_v7 = vsel %vm3185_vm7, %v2767_v23, %v3193_v29  ;;  %v2480_v35 = vadd.f32 %v6927_v17, %v2444_v56  ;;  %v945_v23 = vld [vmem:[#allocation2 + $0x182] sm:$0xff]  ;;  %v2511_v56 = vmax.f32 %v2479_v33, 0.0  ;;  %v1925_v29 = vadd.f32 %v6860_v55, %v6711_v30 }
 0x347   : > { %v3195_v13 = vsel %vm3187_vm8, %v2774_v3, %v3194_v7 }
 0x348   : > { %3248 = vst [vmem:[#allocation3 + $0x21] sm:$0xff] %v3195_v13  ;;  %v2512_v54 = vmax.f32 %v2480_v35, 0.0  ;;  %3680 = vmatmul.f32.gmra.mxu2 %v3195_v13  ;;  %v7070_v12 = vpop.f32.mrf.mxu1  ;;  %v2145_v13 = vadd.f32 %v6977_v34, %v2032_v52  ;;  %v2038_v55 = vadd.f32 %v7012_v10, %v1925_v29 }
 0x349   : > { %v2367_v50 = vpop.f32.mrf.mxu0 }
 0x34a   : > { %v2538_v1 = vmax.f32 %v2510_v28, %v2512_v54  ;;  %v2368_v47 = vadd.f32 %v2367_v50, %v2255_v42  ;;  %v7075_v42 = vpop.f32.mrf.mxu2  ;;  %v1922_v54 = vadd.f32 %v6856_v19, %v6709_v16  ;;  %v2258_v19 = vadd.f32 %v6988_v8, %v2145_v13 }
 0x34c   : > { %v2578_v4 = vrot.slane %v2538_v1, 2  ;;  %v2579_v11 = vrot.slane %v2538_v1, 4  ;;  %v2580_v18 = vrot.slane %v2538_v1, 6  ;;  %v2775_v27 = vsel %vm2662_vm1, %v2538_v1, -inf  ;;  %2414 = vmatmul.f32.gmra.mxu0 %v944_v25 }
 0x34d   : > { %v2776_v32 = vrot.slane %v2775_v27, 4  ;;  %v2445_v20 = vmul.f32 %v6922_v21, %v2368_v47  ;;  %v2035_v10 = vadd.f32 %v6991_v51, %v1922_v54 }
 0x34e   : > { %v2782_v61 = vsel %vm2662_vm1, %v2578_v4, -inf  ;;  %v2789_v31 = vsel %vm2662_vm1, %v2579_v11, -inf  ;;  %v2796_v24 = vsel %vm2662_vm1, %v2580_v18, -inf }
 0x34f   : > { %v2777_v15 = vmax.f32 %v2775_v27, %v2776_v32  ;;  %v2783_v40 = vrot.slane %v2782_v61, 4  ;;  %v2790_v41 = vrot.slane %v2789_v31, 4  ;;  %v2797_v60 = vrot.slane %v2796_v24, 4  ;;  %v3257_v45 = vld [vmem:[#allocation3 + $0x20] sm:$0xff]  ;;  %v7085_v32 = vpop.f32.mrf.mxu3 }
 0x350   : > { %v3289_v49 = vld [vmem:[#allocation3 + $0x22] sm:$0xff]  ;;  %v2481_v58 = vadd.f32 %v6927_v17, %v2445_v20  ;;  %3639 = vmatmul.f32.gmra.mxu1 %v3257_v45 }
 0x351   : > { %3721 = vmatmul.f32.gmra.mxu3 %v3289_v49  ;;  %v2778_v57 = vrot.slane %v2777_v15, 2  ;;  %v2784_v62 = vmax.f32 %v2782_v61, %v2783_v40  ;;  %v2791_v53 = vmax.f32 %v2789_v31, %v2790_v41  ;;  %v2798_v59 = vmax.f32 %v2796_v24, %v2797_v60  ;;  %v2370_v6 = vpop.f32.mrf.mxu0  ;;  %v946_v24 = vld [vmem:[#allocation2 + $0x18a] sm:$0xff] }
 0x352   : > { %v2513_v3 = vmax.f32 %v2481_v58, 0.0  ;;  %v2151_v60 = vadd.f32 %v7016_v2, %v2038_v55  ;;  %v2371_v58 = vadd.f32 %v2370_v6, %v2258_v19  ;;  %v2148_v6 = vadd.f32 %v6995_v39, %v2035_v10 }
 0x353   : > { %v2779_v7 = vmax.f32 %v2777_v15, %v2778_v57  ;;  %v2785_v9 = vrot.slane %v2784_v62, 2  ;;  %v2792_v35 = vrot.slane %v2791_v53, 2  ;;  %v2799_v25 = vrot.slane %v2798_v59, 2  ;;  %v7089_v57 = vpop.f32.mrf.mxu1 }
 0x354   : > { %v2539_v28 = vmax.f32 %v2511_v56, %v2513_v3  ;;  %2417 = vmatmul.f32.gmra.mxu0 %v945_v23  ;;  %v7094_v3 = vpop.f32.mrf.mxu2  ;;  %v2446_v13 = vmul.f32 %v6922_v21, %v2371_v58 }
 0x355   : > { %v2786_v38 = vmax.f32 %v2784_v62, %v2785_v9  ;;  %v2793_v50 = vmax.f32 %v2791_v53, %v2792_v35  ;;  %v2780_v4 = vrot.slane %v2779_v7, 1  ;;  %v2800_v33 = vmax.f32 %v2798_v59, %v2799_v25 }
 0x356   : > { %v2581_v5 = vrot.slane %v2539_v28, 2  ;;  %v2582_v1 = vrot.slane %v2539_v28, 4  ;;  %v2583_v47 = vrot.slane %v2539_v28, 6  ;;  %v2803_v30 = vsel %vm2662_vm1, %v2539_v28, -inf }
 0x357   : > { %v2787_v11 = vrot.slane %v2786_v38, 1  ;;  %v2794_v34 = vrot.slane %v2793_v50, 1  ;;  %v2804_v18 = vrot.slane %v2803_v30, 4  ;;  %v2781_v45 = vmax.f32 %v2779_v7, %v2780_v4 }
 0x358   : > { %v2810_v27 = vsel %vm2662_vm1, %v2581_v5, -inf  ;;  %v2817_v63 = vsel %vm2662_vm1, %v2582_v1, -inf  ;;  %v2824_v16 = vsel %vm2662_vm1, %v2583_v47, -inf  ;;  %v1928_v59 = vadd.f32 %v6865_v43, %v6716_v46  ;;  %v947_v1 = vld [vmem:[#allocation2 + $0x19a] sm:$0xff] }
 0x359   : > { %v2788_v20 = vmax.f32 %v2786_v38, %v2787_v11  ;;  %v2811_v61 = vrot.slane %v2810_v27, 4  ;;  %v2373_v31 = vpop.f32.mrf.mxu0  ;;  %v2805_v15 = vmax.f32 %v2803_v30, %v2804_v18  ;;  %v2818_v40 = vrot.slane %v2817_v63, 4  ;;  %v7103_v11 = vpop.f32.mrf.mxu3 }
 0x35a   : > { %v2825_v41 = vrot.slane %v2824_v16, 4  ;;  %v2795_v8 = vmax.f32 %v2793_v50, %v2794_v34  ;;  %v2801_v52 = vrot.slane %v2800_v33, 1  ;;  %v2264_v9 = vadd.f32 %v7026_v37, %v2151_v60 }
 0x35b   : > { %v2812_v49 = vmax.f32 %v2810_v27, %v2811_v61  ;;  %v2806_v62 = vrot.slane %v2805_v15, 2  ;;  %v2819_v53 = vmax.f32 %v2817_v63, %v2818_v40  ;;  %v3196_v51 = vsel %vm3175_vm2, %v2788_v20, %v2781_v45  ;;  %v948_v45 = vld [vmem:[#allocation2 + $0x1a2] sm:$0xff] }
 0x35c   : > { %v2826_v23 = vmax.f32 %v2824_v16, %v2825_v41  ;;  %2420 = vmatmul.f32.gmra.mxu0 %v946_v24  ;;  %v3197_v28 = vsel %vm3177_vm3, %v2795_v8, %v3196_v51  ;;  %v2041_v38 = vadd.f32 %v7031_v22, %v1928_v59  ;;  %v2802_v50 = vmax.f32 %v2800_v33, %v2801_v52  ;;  %v7110_v33 = vpop.f32.mrf.mxu1  ;;  %v7695_v59 = vld [vmem:[#allocation18_spill] sm:$0xff] }
 0x35d   : > { %v2813_v56 = vrot.slane %v2812_v49, 2  ;;  %v2807_v2 = vmax.f32 %v2805_v15, %v2806_v62  ;;  %v2820_v29 = vrot.slane %v2819_v53, 2  ;;  %v2261_v37 = vadd.f32 %v7006_v14, %v2148_v6  ;;  %v7116_v15 = vpop.f32.mrf.mxu2 }
 0x35e   : > { %v2827_v7 = vrot.slane %v2826_v23, 2  ;;  %v2154_v4 = vadd.f32 %v7036_v26, %v2041_v38  ;;  %v3198_v34 = vsel %vm3179_vm4, %v2802_v50, %v3197_v28  ;;  %v2482_v63 = vadd.f32 %v6927_v17, %v2446_v13 }
 0x35f   : > { %v2814_v35 = vmax.f32 %v2812_v49, %v2813_v56  ;;  %v2808_v54 = vrot.slane %v2807_v2, 1  ;;  %v2821_v46 = vmax.f32 %v2819_v53, %v2820_v29  ;;  %v2374_v26 = vadd.f32 %v2373_v31, %v2261_v37 }
 0x360   : > { %v2828_v43 = vmax.f32 %v2826_v23, %v2827_v7  ;;  %v2267_v10 = vadd.f32 %v7046_v36, %v2154_v4  ;;  %v2514_v40 = vmax.f32 %v2482_v63, 0.0  ;;  %v7696_v36 = vld [vmem:[#allocation34_spill] sm:$0xff]  ;;  %v7697_v4 = vld [vmem:[#allocation20_spill] sm:$0xff] }
 0x361   : > { %v2815_v25 = vrot.slane %v2814_v35, 1  ;;  %v2376_v5 = vpop.f32.mrf.mxu0  ;;  %v2809_v47 = vmax.f32 %v2807_v2, %v2808_v54  ;;  %v2822_v30 = vrot.slane %v2821_v46, 1  ;;  %v2447_v49 = vmul.f32 %v6922_v21, %v2374_v26  ;;  %v7122_v51 = vpop.f32.mrf.mxu3 }
 0x362   : > { %v2829_v55 = vrot.slane %v2828_v43, 1  ;;  %v2377_v39 = vadd.f32 %v2376_v5, %v2264_v9  ;;  %v1931_v52 = vadd.f32 %v7696_v36, %v7695_v59 }
 0x363   : > { %v2816_v18 = vmax.f32 %v2814_v35, %v2815_v25  ;;  %v2823_v27 = vmax.f32 %v2821_v46, %v2822_v30  ;;  %v3199_v22 = vsel %vm3181_vm5, %v2809_v47, %v3198_v34  ;;  %v2483_v29 = vadd.f32 %v6927_v17, %v2447_v49  ;;  %v7698_v34 = vld [vmem:[#allocation36_spill] sm:$0xff] }
 0x364   : > { %v2448_v16 = vmul.f32 %v6922_v21, %v2377_v39  ;;  %2423 = vmatmul.f32.gmra.mxu0 %v947_v1  ;;  %v2830_v19 = vmax.f32 %v2828_v43, %v2829_v55  ;;  %v7129_v38 = vpop.f32.mrf.mxu1  ;;  %v2044_v30 = vadd.f32 %v7053_v0, %v1931_v52 }
 0x365   : > { %v3200_v20 = vsel %vm3183_vm6, %v2816_v18, %v3199_v22  ;;  %v7133_v55 = vpop.f32.mrf.mxu2  ;;  %v2515_v39 = vmax.f32 %v2483_v29, 0.0  ;;  %v1937_v18 = vadd.f32 %v7698_v34, %v7697_v4 }
 0x366   : > { %v3201_v14 = vsel %vm3185_vm7, %v2823_v27, %v3200_v20  ;;  %v2484_v61 = vadd.f32 %v6927_v17, %v2448_v16  ;;  %v7700_v20 = vld [vmem:[#allocation35_spill] sm:$0xff] }
 0x367   : > { %v3202_v24 = vsel %vm3187_vm8, %v2830_v19, %v3201_v14  ;;  %v7699_v19 = vld [vmem:[#allocation19_spill] sm:$0xff] }
 0x368   : > { %3249 = vst [vmem:[#allocation3 + $0x31] sm:$0xff] %v3202_v24  ;;  %v2516_v41 = vmax.f32 %v2484_v61, 0.0  ;;  %3683 = vmatmul.f32.gmra.mxu2 %v3202_v24  ;;  %v1934_v14 = vadd.f32 %v7700_v20, %v7699_v19 }
 0x369   : > { %v2379_v60 = vpop.f32.mrf.mxu0 }
 0x36a   : > { %v2540_v58 = vmax.f32 %v2514_v40, %v2516_v41  ;;  %v2380_v8 = vadd.f32 %v2379_v60, %v2267_v10  ;;  %v2050_v60 = vadd.f32 %v7089_v57, %v1937_v18  ;;  %v2047_v57 = vadd.f32 %v7070_v12, %v1934_v14  ;;  %v7159_v18 = vld [vmem:[#allocation11] ss:$0 sm:$0xff] }
 0x36c   : > { %v2584_v62 = vrot.slane %v2540_v58, 2  ;;  %v2585_v31 = vrot.slane %v2540_v58, 4  ;;  %v2586_v53 = vrot.slane %v2540_v58, 6  ;;  %v2831_v23 = vsel %vm2662_vm1, %v2540_v58, -inf  ;;  %2426 = vmatmul.f32.gmra.mxu0 %v948_v45  ;;  %v7142_v45 = vpop.f32.mrf.mxu3 }
 0x36d   : > { %v2832_v56 = vrot.slane %v2831_v23, 4  ;;  %v2449_v2 = vmul.f32 %v6922_v21, %v2380_v8 }
 0x36e   : > { %v2838_v7 = vsel %vm2662_vm1, %v2584_v62, -inf  ;;  %v2845_v6 = vsel %vm2662_vm1, %v2585_v31, -inf  ;;  %v2852_v9 = vsel %vm2662_vm1, %v2586_v53, -inf }
 0x36f   : > { %v2833_v35 = vmax.f32 %v2831_v23, %v2832_v56  ;;  %v2839_v13 = vrot.slane %v2838_v7, 4  ;;  %v2846_v28 = vrot.slane %v2845_v6, 4  ;;  %v2853_v54 = vrot.slane %v2852_v9, 4  ;;  %v3258_v46 = vld [vmem:[#allocation3 + $0x30] sm:$0xff] }
 0x370   : > { %v3290_v43 = vld [vmem:[#allocation3 + $0x32] sm:$0xff]  ;;  %v2485_v50 = vadd.f32 %v6927_v17, %v2449_v2  ;;  %3642 = vmatmul.f32.gmra.mxu1 %v3258_v46  ;;  %v2157_v17 = vadd.f32 %v7055_v48, %v2044_v30  ;;  %v7149_v2 = vpop.f32.mrf.mxu1 }
 0x371   : > { %3724 = vmatmul.f32.gmra.mxu3 %v3290_v43  ;;  %v2834_v21 = vrot.slane %v2833_v35, 2  ;;  %v2840_v25 = vmax.f32 %v2838_v7, %v2839_v13  ;;  %v2847_v5 = vmax.f32 %v2845_v6, %v2846_v28  ;;  %v2854_v1 = vmax.f32 %v2852_v9, %v2853_v54  ;;  %v2382_v47 = vpop.f32.mrf.mxu0  ;;  %v7152_v54 = vpop.f32.mrf.mxu2 }
 0x372   : > { %v2517_v37 = vmax.f32 %v2485_v50, 0.0  ;;  %v2270_v23 = vadd.f32 %v7066_v44, %v2157_v17  ;;  %v2163_v9 = vadd.f32 %v7094_v3, %v2050_v60  ;;  %v2160_v3 = vadd.f32 %v7075_v42, %v2047_v57 }
 0x373   : > { %v2835_v27 = vmax.f32 %v2833_v35, %v2834_v21  ;;  %v2841_v22 = vrot.slane %v2840_v25, 2  ;;  %v2848_v63 = vrot.slane %v2847_v5, 2  ;;  %v2855_v24 = vrot.slane %v2854_v1, 2  ;;  %v7701_v21 = vld [vmem:[#allocation21_spill] sm:$0xff] }
 0x374   : > { %v2541_v16 = vmax.f32 %v2515_v39, %v2517_v37  ;;  %v2383_v28 = vadd.f32 %v2382_v47, %v2270_v23  ;;  %v2276_v47 = vadd.f32 %v7103_v11, %v2163_v9  ;;  %v7164_v20 = vpop.f32.mrf.mxu3 }
 0x375   : > { %v2842_v26 = vmax.f32 %v2840_v25, %v2841_v22  ;;  %v2849_v61 = vmax.f32 %v2847_v5, %v2848_v63  ;;  %v2836_v49 = vrot.slane %v2835_v27, 1  ;;  %v2856_v36 = vmax.f32 %v2854_v1, %v2855_v24  ;;  %v7702_v25 = vld [vmem:[#allocation37_spill] sm:$0xff] }
 0x376   : > { %v2587_v0 = vrot.slane %v2541_v16, 2  ;;  %v2588_v10 = vrot.slane %v2541_v16, 4  ;;  %v2589_v40 = vrot.slane %v2541_v16, 6  ;;  %v2859_v41 = vsel %vm2662_vm1, %v2541_v16, -inf }
 0x377   : > { %v2843_v58 = vrot.slane %v2842_v26, 1  ;;  %v2850_v8 = vrot.slane %v2849_v61, 1  ;;  %v2860_v48 = vrot.slane %v2859_v41, 4  ;;  %v2837_v35 = vmax.f32 %v2835_v27, %v2836_v49 }
 0x378   : > { %v2866_v62 = vsel %vm2662_vm1, %v2587_v0, -inf  ;;  %v2873_v31 = vsel %vm2662_vm1, %v2588_v10, -inf  ;;  %v2880_v53 = vsel %vm2662_vm1, %v2589_v40, -inf  ;;  %v1940_v5 = vadd.f32 %v7702_v25, %v7701_v21  ;;  %v7169_v49 = vpop.f32.mrf.mxu1 }
 0x379   : > { %v2844_v59 = vmax.f32 %v2842_v26, %v2843_v58  ;;  %v2867_v52 = vrot.slane %v2866_v62, 4  ;;  %v2385_v56 = vpop.f32.mrf.mxu0  ;;  %v2861_v29 = vmax.f32 %v2859_v41, %v2860_v48  ;;  %v2874_v7 = vrot.slane %v2873_v31, 4 }
 0x37a   : > { %v2881_v6 = vrot.slane %v2880_v53, 4  ;;  %v2851_v46 = vmax.f32 %v2849_v61, %v2850_v8  ;;  %v2857_v12 = vrot.slane %v2856_v36, 1  ;;  %v2450_v27 = vmul.f32 %v7159_v18, %v2383_v28  ;;  %v7172_v8 = vld [vmem:[#allocation13] ss:$0 sm:$0xff] }
 0x37b   : > { %v2868_v13 = vmax.f32 %v2866_v62, %v2867_v52  ;;  %v2862_v44 = vrot.slane %v2861_v29, 2  ;;  %v2875_v43 = vmax.f32 %v2873_v31, %v2874_v7  ;;  %v3203_v1 = vsel %vm3175_vm2, %v2844_v59, %v2837_v35 }
 0x37c   : > { %v2882_v50 = vmax.f32 %v2880_v53, %v2881_v6  ;;  %v3204_v22 = vsel %vm3177_vm3, %v2851_v46, %v3203_v1  ;;  %v2053_v19 = vadd.f32 %v7110_v33, %v1940_v5  ;;  %v2858_v14 = vmax.f32 %v2856_v36, %v2857_v12 }
 0x37d   : > { %v2869_v30 = vrot.slane %v2868_v13, 2  ;;  %v2863_v39 = vmax.f32 %v2861_v29, %v2862_v44  ;;  %v2876_v37 = vrot.slane %v2875_v43, 2  ;;  %v2273_v10 = vadd.f32 %v7085_v32, %v2160_v3  ;;  %v7177_v32 = vpop.f32.mrf.mxu2 }
 0x37e   : > { %v2883_v4 = vrot.slane %v2882_v50, 2  ;;  %v2166_v40 = vadd.f32 %v7116_v15, %v2053_v19  ;;  %v3205_v41 = vsel %vm3179_vm4, %v2858_v14, %v3204_v22  ;;  %v2486_v48 = vadd.f32 %v7172_v8, %v2450_v27 }
 0x37f   : > { %v2870_v34 = vmax.f32 %v2868_v13, %v2869_v30  ;;  %v2864_v63 = vrot.slane %v2863_v39, 1  ;;  %v2877_v17 = vmax.f32 %v2875_v43, %v2876_v37  ;;  %v2386_v23 = vadd.f32 %v2385_v56, %v2273_v10  ;;  %v7184_v13 = vpop.f32.mrf.mxu3  ;;  %v7703_v43 = vld [vmem:[#allocation22_spill] sm:$0xff] }
 0x380   : > { %v2884_v16 = vmax.f32 %v2882_v50, %v2883_v4  ;;  %v2279_v52 = vadd.f32 %v7122_v51, %v2166_v40  ;;  %v2518_v57 = vmax.f32 %v2486_v48, 0.0  ;;  %v7704_v50 = vld [vmem:[#allocation38_spill] sm:$0xff]  ;;  %v7190_v5 = vpop.f32.mrf.mxu1  ;;  %v7707_v48 = vld [vmem:[#allocation23_spill] sm:$0xff] }
 0x381   : > { %v2871_v26 = vrot.slane %v2870_v34, 1  ;;  %v2388_v61 = vpop.f32.mrf.mxu0  ;;  %v2865_v42 = vmax.f32 %v2863_v39, %v2864_v63  ;;  %v2878_v24 = vrot.slane %v2877_v17, 1  ;;  %v2451_v6 = vmul.f32 %v7159_v18, %v2386_v23 }
 0x382   : > { %v2885_v11 = vrot.slane %v2884_v16, 1  ;;  %v2389_v0 = vadd.f32 %v2388_v61, %v2276_v47  ;;  %v1943_v21 = vadd.f32 %v7704_v50, %v7703_v43 }
 0x383   : > { %v2872_v60 = vmax.f32 %v2870_v34, %v2871_v26  ;;  %v2879_v58 = vmax.f32 %v2877_v17, %v2878_v24  ;;  %v3206_v33 = vsel %vm3181_vm5, %v2865_v42, %v3205_v41  ;;  %v2487_v12 = vadd.f32 %v7172_v8, %v2451_v6 }
 0x384   : > { %v2452_v62 = vmul.f32 %v7159_v18, %v2389_v0  ;;  %v2886_v31 = vmax.f32 %v2884_v16, %v2885_v11  ;;  %v2056_v61 = vadd.f32 %v7129_v38, %v1943_v21  ;;  %v7705_v11 = vld [vmem:[#allocation24_spill] sm:$0xff] }
 0x385   : > { %v3207_v53 = vsel %vm3183_vm6, %v2872_v60, %v3206_v33  ;;  %v7196_v22 = vpop.f32.mrf.mxu2  ;;  %v2519_v42 = vmax.f32 %v2487_v12, 0.0  ;;  %v7706_v0 = vld [vmem:[#allocation40_spill] sm:$0xff] }
 0x386   : > { %v3208_v15 = vsel %vm3185_vm7, %v2879_v58, %v3207_v53  ;;  %v2488_v59 = vadd.f32 %v7172_v8, %v2452_v62  ;;  %v1949_v10 = vadd.f32 %v7706_v0, %v7705_v11  ;;  %v2169_v58 = vadd.f32 %v7133_v55, %v2056_v61  ;;  %v7708_v62 = vld [vmem:[#allocation39_spill] sm:$0xff] }
 0x387   : > { %v3209_v36 = vsel %vm3187_vm8, %v2886_v31, %v3208_v15  ;;  %v1946_v31 = vadd.f32 %v7708_v62, %v7707_v48  ;;  %v7205_v53 = vpop.f32.mrf.mxu3 }
 0x388   : > { %3250 = vst [vmem:[#allocation3 + $0x41] sm:$0xff] %v3209_v36  ;;  %v2520_v29 = vmax.f32 %v2488_v59, 0.0  ;;  %3686 = vmatmul.f32.gmra.mxu2 %v3209_v36  ;;  %v7209_v55 = vpop.f32.mrf.mxu1 }
 0x389   : > { %v2391_v7 = vpop.f32.mrf.mxu0 }
 0x38a   : > { %v2542_v9 = vmax.f32 %v2518_v57, %v2520_v29  ;;  %v2392_v35 = vadd.f32 %v2391_v7, %v2279_v52  ;;  %v2062_v29 = vadd.f32 %v7169_v49, %v1949_v10  ;;  %v2059_v49 = vadd.f32 %v7149_v2, %v1946_v31 }
 0x38c   : > { %v2590_v28 = vrot.slane %v2542_v9, 2  ;;  %v2591_v46 = vrot.slane %v2542_v9, 4  ;;  %v2592_v56 = vrot.slane %v2542_v9, 6  ;;  %v2887_v44 = vsel %vm2662_vm1, %v2542_v9, -inf }
 0x38d   : > { %v2888_v51 = vrot.slane %v2887_v44, 4  ;;  %v2453_v25 = vmul.f32 %v7159_v18, %v2392_v35  ;;  %v2172_v11 = vadd.f32 %v7152_v54, %v2059_v49  ;;  %v3568_v49 = vld [vmem:[#allocation8 + $0x778] sm:$0xff] }
 0x38e   : > { %v2894_v1 = vsel %vm2662_vm1, %v2590_v28, -inf  ;;  %v2901_v30 = vsel %vm2662_vm1, %v2591_v46, -inf  ;;  %v2908_v39 = vsel %vm2662_vm1, %v2592_v56, -inf  ;;  %3822 = vmatpush.msrb.mxu3 %v3568_v49 }
 0x38f   : > { %v2889_v37 = vmax.f32 %v2887_v44, %v2888_v51  ;;  %v2895_v4 = vrot.slane %v2894_v1, 4  ;;  %v2902_v3 = vrot.slane %v2901_v30, 4  ;;  %v2909_v47 = vrot.slane %v2908_v39, 4  ;;  %v3259_v34 = vld [vmem:[#allocation3 + $0x40] sm:$0xff]  ;;  %v7224_v0 = vpop.f32.mrf.mxu3 }
 0x390   : > { %v3291_v27 = vld [vmem:[#allocation3 + $0x42] sm:$0xff]  ;;  %v2489_v63 = vadd.f32 %v7172_v8, %v2453_v25  ;;  %3645 = vmatmul.f32.gmra.mxu1 %v3259_v34  ;;  %v2282_v44 = vadd.f32 %v7142_v45, %v2169_v58  ;;  %v7216_v25 = vpop.f32.mrf.mxu2 }
 0x391   : > { %3727 = vmatmul.f32.gmra.mxu3 %v3291_v27  ;;  %v2890_v17 = vrot.slane %v2889_v37, 2  ;;  %v2896_v16 = vmax.f32 %v2894_v1, %v2895_v4  ;;  %v2903_v19 = vmax.f32 %v2901_v30, %v2902_v3  ;;  %v2910_v14 = vmax.f32 %v2908_v39, %v2909_v47  ;;  %v2394_v26 = vpop.f32.mrf.mxu0 }
 0x392   : > { %v2521_v24 = vmax.f32 %v2489_v63, 0.0  ;;  %v2175_v39 = vadd.f32 %v7177_v32, %v2062_v29  ;;  %v2395_v3 = vadd.f32 %v2394_v26, %v2282_v44  ;;  %v7709_v63 = vld [vmem:[#allocation25_spill] sm:$0xff] }
 0x393   : > { %v2891_v40 = vmax.f32 %v2889_v37, %v2890_v17  ;;  %v2897_v41 = vrot.slane %v2896_v16, 2  ;;  %v2904_v60 = vrot.slane %v2903_v19, 2  ;;  %v2911_v59 = vrot.slane %v2910_v14, 2  ;;  %v7710_v17 = vld [vmem:[#allocation41_spill] sm:$0xff] }
 0x394   : > { %v2543_v33 = vmax.f32 %v2519_v42, %v2521_v24  ;;  %v2288_v32 = vadd.f32 %v7184_v13, %v2175_v39  ;;  %v2454_v10 = vmul.f32 %v7159_v18, %v2395_v3  ;;  %v3551_v39 = vld [vmem:[#allocation8 + $0x6f0] sm:$0xff] }
 0x395   : > { %v2898_v15 = vmax.f32 %v2896_v16, %v2897_v41  ;;  %v2905_v23 = vmax.f32 %v2903_v19, %v2904_v60  ;;  %v2892_v7 = vrot.slane %v2891_v40, 1  ;;  %v2912_v50 = vmax.f32 %v2910_v14, %v2911_v59 }
 0x396   : > { %v2593_v38 = vrot.slane %v2543_v33, 2  ;;  %v2594_v36 = vrot.slane %v2543_v33, 4  ;;  %v2595_v52 = vrot.slane %v2543_v33, 6  ;;  %v2915_v57 = vsel %vm2662_vm1, %v2543_v33, -inf }
 0x397   : > { %v2899_v6 = vrot.slane %v2898_v15, 1  ;;  %v2906_v9 = vrot.slane %v2905_v23, 1  ;;  %v2916_v35 = vrot.slane %v2915_v57, 4  ;;  %v2893_v37 = vmax.f32 %v2891_v40, %v2892_v7 }
 0x398   : > { %v2922_v28 = vsel %vm2662_vm1, %v2593_v38, -inf  ;;  %v2929_v46 = vsel %vm2662_vm1, %v2594_v36, -inf  ;;  %v2936_v56 = vsel %vm2662_vm1, %v2595_v52, -inf  ;;  %v1952_v16 = vadd.f32 %v7710_v17, %v7709_v63  ;;  %v7234_v29 = vpop.f32.mrf.mxu2 }
 0x399   : > { %v2900_v43 = vmax.f32 %v2898_v15, %v2899_v6  ;;  %v2923_v21 = vrot.slane %v2922_v28, 4  ;;  %v2397_v51 = vpop.f32.mrf.mxu0  ;;  %v2917_v12 = vmax.f32 %v2915_v57, %v2916_v35  ;;  %v2930_v1 = vrot.slane %v2929_v46, 4  ;;  %v7229_v15 = vpop.f32.mrf.mxu1 }
 0x39a   : > { %v2937_v30 = vrot.slane %v2936_v56, 4  ;;  %v2907_v47 = vmax.f32 %v2905_v23, %v2906_v9  ;;  %v2913_v19 = vrot.slane %v2912_v50, 1  ;;  %v2065_v33 = vadd.f32 %v7190_v5, %v1952_v16 }
 0x39b   : > { %v2924_v4 = vmax.f32 %v2922_v28, %v2923_v21  ;;  %v2918_v34 = vrot.slane %v2917_v12, 2  ;;  %v2931_v27 = vmax.f32 %v2929_v46, %v2930_v1  ;;  %v3210_v2 = vsel %vm3175_vm2, %v2900_v43, %v2893_v37  ;;  %v3552_v21 = vld [vmem:[#allocation8 + $0x6f8] sm:$0xff]  ;;  %v7244_v1 = vpop.f32.mrf.mxu3  ;;  %v3535_v37 = vld [vmem:[#allocation8 + $0x670] sm:$0xff] }
 0x39c   : > { %v2938_v45 = vmax.f32 %v2936_v56, %v2937_v30  ;;  %v3211_v40 = vsel %vm3177_vm3, %v2907_v47, %v3210_v2  ;;  %v2914_v48 = vmax.f32 %v2912_v50, %v2913_v19  ;;  %v2285_v38 = vadd.f32 %v7164_v20, %v2172_v11  ;;  %3781 = vmatpush.msrb.mxu2 %v3552_v21  ;;  %v7711_v19 = vld [vmem:[#allocation26_spill] sm:$0xff] }
 0x39d   : > { %v2925_v14 = vrot.slane %v2924_v4, 2  ;;  %v2919_v61 = vmax.f32 %v2917_v12, %v2918_v34  ;;  %v2932_v42 = vrot.slane %v2931_v27, 2  ;;  %v2178_v36 = vadd.f32 %v7196_v22, %v2065_v33  ;;  %v3536_v12 = vld [vmem:[#allocation8 + $0x678] sm:$0xff]  ;;  %v3566_v34 = vld [vmem:[#allocation8 + $0x768] sm:$0xff] }
 0x39e   : > { %v2939_v24 = vrot.slane %v2938_v45, 2  ;;  %v3212_v57 = vsel %vm3179_vm4, %v2914_v48, %v3211_v40  ;;  %v2490_v6 = vadd.f32 %v7172_v8, %v2454_v10  ;;  %v2398_v20 = vadd.f32 %v2397_v51, %v2285_v38  ;;  %v3567_v51 = vld [vmem:[#allocation8 + $0x770] sm:$0xff]  ;;  %3740 = vmatpush.msrb.mxu1 %v3536_v12  ;;  %3782 = vmatpush.msrb.mxu2 %v3551_v39 }
 0x39f   : > { %v2926_v26 = vmax.f32 %v2924_v4, %v2925_v14  ;;  %v2920_v41 = vrot.slane %v2919_v61, 1  ;;  %v2933_v60 = vmax.f32 %v2931_v27, %v2932_v42  ;;  %v2291_v44 = vadd.f32 %v7205_v53, %v2178_v36  ;;  %v3550_v53 = vld [vmem:[#allocation8 + $0x6e8] sm:$0xff]  ;;  %3823 = vmatpush.msrb.mxu3 %v3567_v51 }
 0x3a0   : > { %v2940_v58 = vmax.f32 %v2938_v45, %v2939_v24  ;;  %v2522_v43 = vmax.f32 %v2490_v6, 0.0  ;;  %v2455_v4 = vmul.f32 %v7159_v18, %v2398_v20  ;;  %3741 = vmatpush.msrb.mxu1 %v3535_v37  ;;  %v7712_v2 = vld [vmem:[#allocation42_spill] sm:$0xff]  ;;  %3783 = vmatpush.msrb.mxu2 %v3550_v53  ;;  %v2186_v24 = vpop.f32.mrf.mxu2 }
 0x3a1   : > { %v2927_v62 = vrot.slane %v2926_v26, 1  ;;  %v2400_v31 = vpop.f32.mrf.mxu0  ;;  %v2921_v54 = vmax.f32 %v2919_v61, %v2920_v41  ;;  %v2934_v23 = vrot.slane %v2933_v60, 1  ;;  %v2073_v27 = vpop.f32.mrf.mxu1  ;;  %v1955_v14 = vadd.f32 %v7712_v2, %v7711_v19  ;;  %3824 = vmatpush.msrb.mxu3 %v3566_v34 }
 0x3a2   : > { %v2941_v13 = vrot.slane %v2940_v58, 1  ;;  %v2401_v59 = vadd.f32 %v2400_v31, %v2288_v32  ;;  %v2491_v11 = vadd.f32 %v7172_v8, %v2455_v4 }
 0x3a3   : > { %v2928_v52 = vmax.f32 %v2926_v26, %v2927_v62  ;;  %v2935_v7 = vmax.f32 %v2933_v60, %v2934_v23  ;;  %v3213_v5 = vsel %vm3181_vm5, %v2921_v54, %v3212_v57  ;;  %v2068_v38 = vadd.f32 %v7209_v55, %v1955_v14  ;;  %v7713_v57 = vld [vmem:[#allocation28_spill] sm:$0xff]  ;;  %v2299_v6 = vpop.f32.mrf.mxu3 }
 0x3a4   : > { %v2456_v9 = vmul.f32 %v7159_v18, %v2401_v59  ;;  %v2942_v35 = vmax.f32 %v2940_v58, %v2941_v13  ;;  %v2523_v36 = vmax.f32 %v2491_v11, 0.0 }
 0x3a5   : > { %v3214_v28 = vsel %vm3183_vm6, %v2928_v52, %v3213_v5 }
 0x3a6   : > { %v3215_v46 = vsel %vm3185_vm7, %v2935_v7, %v3214_v28  ;;  %v2492_v22 = vadd.f32 %v7172_v8, %v2456_v9  ;;  %v7714_v7 = vld [vmem:[#allocation44_spill] sm:$0xff] }
 0x3a7   : > { %v3216_v56 = vsel %vm3187_vm8, %v2942_v35, %v3215_v46  ;;  %v1961_v5 = vadd.f32 %v7714_v7, %v7713_v57  ;;  %v2181_v46 = vadd.f32 %v7216_v25, %v2068_v38 }
 0x3a8   : > { %3251 = vst [vmem:[#allocation3 + $0x51] sm:$0xff] %v3216_v56  ;;  %v2524_v50 = vmax.f32 %v2492_v22, 0.0  ;;  %3689 = vmatmul.f32.gmra.mxu2 %v3216_v56  ;;  %v7715_v22 = vld [vmem:[#allocation27_spill] sm:$0xff] }
 0x3a9   : > { %v2403_v30 = vpop.f32.mrf.mxu0  ;;  %v7716_v56 = vld [vmem:[#allocation43_spill] sm:$0xff]  ;;  %v2076_v49 = vpop.f32.mrf.mxu1  ;;  %v2074_v51 = vadd.f32 %v2073_v27, %v1961_v5 }
 0x3aa   : > { %v2544_v3 = vmax.f32 %v2522_v43, %v2524_v50  ;;  %v2404_v47 = vadd.f32 %v2403_v30, %v2291_v44  ;;  %v1958_v44 = vadd.f32 %v7716_v56, %v7715_v22  ;;  %v3548_v5 = vld [vmem:[#allocation8 + $0x6d8] sm:$0xff] }
 0x3ab   : > { %v2187_v11 = vadd.f32 %v2186_v24, %v2074_v51 }
 0x3ac   : > { %v2596_v45 = vrot.slane %v2544_v3, 2  ;;  %v2597_v63 = vrot.slane %v2544_v3, 4  ;;  %v2598_v17 = vrot.slane %v2544_v3, 6  ;;  %v2943_v16 = vsel %vm2662_vm1, %v2544_v3, -inf }
 0x3ad   : > { %v2944_v61 = vrot.slane %v2943_v16, 4  ;;  %v2457_v42 = vmul.f32 %v7159_v18, %v2404_v47  ;;  %v2189_v47 = vpop.f32.mrf.mxu2  ;;  %v2071_v27 = vadd.f32 %v7229_v15, %v1958_v44  ;;  %v3534_v15 = vld [vmem:[#allocation8 + $0x668] sm:$0xff] }
 0x3ae   : > { %v2950_v32 = vsel %vm2662_vm1, %v2596_v45, -inf  ;;  %v2957_v26 = vsel %vm2662_vm1, %v2597_v63, -inf  ;;  %v2964_v10 = vsel %vm2662_vm1, %v2598_v17, -inf  ;;  %v2294_v63 = vadd.f32 %v7224_v0, %v2181_v46  ;;  %v7718_v0 = vld [vmem:[#allocation45_spill] sm:$0xff]  ;;  %3742 = vmatpush.msrb.mxu1 %v3534_v15 }
 0x3af   : > { %v2945_v40 = vmax.f32 %v2943_v16, %v2944_v61  ;;  %v2951_v41 = vrot.slane %v2950_v32, 4  ;;  %v2958_v60 = vrot.slane %v2957_v26, 4  ;;  %v2965_v58 = vrot.slane %v2964_v10, 4  ;;  %v7255_v33 = vld [vmem:[#allocation3 + $0x50] sm:$0xff] }
 0x3b0   : > { %v7257_v48 = vld [vmem:[#allocation3 + $0x52] sm:$0xff]  ;;  %v2493_v62 = vadd.f32 %v7172_v8, %v2457_v42  ;;  %3648 = vmatmul.f32.gmra.mxu1 %v7255_v33 }
 0x3b1   : > { %3730 = vmatmul.f32.gmra.mxu3 %v7257_v48  ;;  %v2946_v31 = vrot.slane %v2945_v40, 2  ;;  %v2952_v54 = vmax.f32 %v2950_v32, %v2951_v41  ;;  %v2959_v23 = vmax.f32 %v2957_v26, %v2958_v60  ;;  %v2966_v13 = vmax.f32 %v2964_v10, %v2965_v58  ;;  %v2406_v59 = vpop.f32.mrf.mxu0  ;;  %v7281_v22 = vpop.f32.mrf.mxu1 }
 0x3b2   : > { %v2525_v52 = vmax.f32 %v2493_v62, 0.0  ;;  %v2407_v10 = vadd.f32 %v2406_v59, %v2294_v63  ;;  %v7717_v62 = vld [vmem:[#allocation29_spill] sm:$0xff] }
 0x3b3   : > { %v2947_v9 = vmax.f32 %v2945_v40, %v2946_v31  ;;  %v2953_v35 = vrot.slane %v2952_v54, 2  ;;  %v2960_v28 = vrot.slane %v2959_v23, 2  ;;  %v2967_v21 = vrot.slane %v2966_v13, 2  ;;  %v3533_v59 = vld [vmem:[#allocation8 + $0x660] sm:$0xff] }
 0x3b4   : > { %v2545_v20 = vmax.f32 %v2523_v36, %v2525_v52  ;;  %v1964_v31 = vadd.f32 %v7718_v0, %v7717_v62  ;;  %v3549_v36 = vld [vmem:[#allocation8 + $0x6e0] sm:$0xff]  ;;  %3743 = vmatpush.msrb.mxu1 %v3533_v59  ;;  %v3560_v59 = vld [vmem:[#allocation8 + $0x738] sm:$0xff] }
 0x3b5   : > { %v2954_v43 = vmax.f32 %v2952_v54, %v2953_v35  ;;  %v2961_v50 = vmax.f32 %v2959_v23, %v2960_v28  ;;  %v2948_v37 = vrot.slane %v2947_v9, 1  ;;  %v2968_v16 = vmax.f32 %v2966_v13, %v2967_v21  ;;  %v2302_v54 = vpop.f32.mrf.mxu3  ;;  %v3565_v52 = vld [vmem:[#allocation8 + $0x760] sm:$0xff]  ;;  %3784 = vmatpush.msrb.mxu2 %v3549_v36 }
 0x3b6   : > { %v2599_v55 = vrot.slane %v2545_v20, 2  ;;  %v2600_v12 = vrot.slane %v2545_v20, 4  ;;  %v2601_v30 = vrot.slane %v2545_v20, 6  ;;  %v2971_v39 = vsel %vm2662_vm1, %v2545_v20, -inf  ;;  %3825 = vmatpush.msrb.mxu3 %v3565_v52 }
 0x3b7   : > { %v2955_v4 = vrot.slane %v2954_v43, 1  ;;  %v2962_v3 = vrot.slane %v2961_v50, 1  ;;  %v2972_v53 = vrot.slane %v2971_v39, 4  ;;  %v2949_v32 = vmax.f32 %v2947_v9, %v2948_v37  ;;  %v3564_v9 = vld [vmem:[#allocation8 + $0x758] sm:$0xff]  ;;  %3785 = vmatpush.msrb.mxu2 %v3548_v5  ;;  %v7719_v5 = vld [vmem:[#allocation30_spill] sm:$0xff] }
 0x3b8   : > { %v2978_v25 = vsel %vm2662_vm1, %v2599_v55, -inf  ;;  %v2985_v34 = vsel %vm2662_vm1, %v2600_v12, -inf  ;;  %v2992_v45 = vsel %vm2662_vm1, %v2601_v30, -inf  ;;  %v2969_v23 = vrot.slane %v2968_v16, 1  ;;  %3826 = vmatpush.msrb.mxu3 %v3564_v9  ;;  %v7720_v9 = vld [vmem:[#allocation46_spill] sm:$0xff] }
 0x3b9   : > { %v2956_v17 = vmax.f32 %v2954_v43, %v2955_v4  ;;  %v2979_v19 = vrot.slane %v2978_v25, 4  ;;  %v7273_v2 = vpop.f32.mrf.mxu0  ;;  %v2973_v14 = vmax.f32 %v2971_v39, %v2972_v53  ;;  %v2986_v61 = vrot.slane %v2985_v34, 4 }
 0x3ba   : > { %v2993_v42 = vrot.slane %v2992_v45, 4  ;;  %v2963_v40 = vmax.f32 %v2961_v50, %v2962_v3  ;;  %v2184_v35 = vadd.f32 %v7234_v29, %v2071_v27  ;;  %v2300_v28 = vadd.f32 %v2299_v6, %v2187_v11  ;;  %v7284_v29 = vpop.f32.mrf.mxu2 }
 0x3bb   : > { %v2980_v26 = vmax.f32 %v2978_v25, %v2979_v19  ;;  %v2974_v41 = vrot.slane %v2973_v14, 2  ;;  %v2987_v60 = vmax.f32 %v2985_v34, %v2986_v61  ;;  %v3217_v13 = vsel %vm3175_vm2, %v2956_v17, %v2949_v32 }
 0x3bc   : > { %v2994_v58 = vmax.f32 %v2992_v45, %v2993_v42  ;;  %v2458_v20 = vmul.f32 %v7159_v18, %v2407_v10  ;;  %v3218_v56 = vsel %vm3177_vm3, %v2963_v40, %v3217_v13  ;;  %v2077_v21 = vadd.f32 %v2076_v49, %v1964_v31  ;;  %v3563_v10 = vld [vmem:[#allocation8 + $0x750] sm:$0xff]  ;;  %v3561_v13 = vld [vmem:[#allocation8 + $0x740] sm:$0xff] }
 0x3bd   : > { %v2981_v38 = vrot.slane %v2980_v26, 2  ;;  %v2975_v57 = vmax.f32 %v2973_v14, %v2974_v41  ;;  %v2988_v24 = vrot.slane %v2987_v60, 2  ;;  %v2970_v55 = vmax.f32 %v2968_v16, %v2969_v23  ;;  %v7295_v14 = vpop.f32.mrf.mxu3  ;;  %v3531_v40 = vld [vmem:[#allocation8 + $0x650] sm:$0xff]  ;;  %3827 = vmatpush.msrb.mxu3 %v3563_v10  ;;  %v3546_v41 = vld [vmem:[#allocation8 + $0x6c8] sm:$0xff]  ;;  %v3545_v23 = vld [vmem:[#allocation8 + $0x6c0] sm:$0xff] }
 0x3be   : > { %v2995_v7 = vrot.slane %v2994_v58, 2  ;;  %v2297_v4 = vadd.f32 %v7244_v1, %v2184_v35  ;;  %v2190_v3 = vadd.f32 %v2189_v47, %v2077_v21  ;;  %v2494_v49 = vadd.f32 %v7172_v8, %v2458_v20  ;;  %v3547_v47 = vld [vmem:[#allocation8 + $0x6d0] sm:$0xff]  ;;  %v7723_v10 = vld [vmem:[#allocation32_spill] sm:$0xff] }
 0x3bf   : > { %v2982_v46 = vmax.f32 %v2980_v26, %v2981_v38  ;;  %v2976_v44 = vrot.slane %v2975_v57, 1  ;;  %v2989_v43 = vmax.f32 %v2987_v60, %v2988_v24  ;;  %v3219_v53 = vsel %vm3179_vm4, %v2970_v55, %v3218_v56  ;;  %3786 = vmatpush.msrb.mxu2 %v3547_v47  ;;  %v3532_v26 = vld [vmem:[#allocation8 + $0x658] sm:$0xff]  ;;  %v3562_v60 = vld [vmem:[#allocation8 + $0x748] sm:$0xff] }
 0x3c0   : > { %v2996_v50 = vmax.f32 %v2994_v58, %v2995_v7  ;;  %v2410_v27 = vadd.f32 %v7273_v2, %v2297_v4  ;;  %v2303_v42 = vadd.f32 %v2302_v54, %v2190_v3  ;;  %v2526_v11 = vmax.f32 %v2494_v49, 0.0  ;;  %3744 = vmatpush.msrb.mxu1 %v3532_v26  ;;  %v2082_v58 = vpop.f32.mrf.mxu1  ;;  %v3530_v54 = vld [vmem:[#allocation8 + $0x648] sm:$0xff]  ;;  %3828 = vmatpush.msrb.mxu3 %v3562_v60  ;;  %v3544_v38 = vld [vmem:[#allocation8 + $0x6b8] sm:$0xff]  ;;  %v3529_v7 = vld [vmem:[#allocation8 + $0x640] sm:$0xff] }
 0x3c1   : > { %v2983_v12 = vrot.slane %v2982_v46, 1  ;;  %v2412_v30 = vpop.f32.mrf.mxu0  ;;  %v2977_v6 = vmax.f32 %v2975_v57, %v2976_v44  ;;  %v2990_v39 = vrot.slane %v2989_v43, 1  ;;  %3787 = vmatpush.msrb.mxu2 %v3546_v41  ;;  %v1967_v35 = vadd.f32 %v7720_v9, %v7719_v5  ;;  %v3541_v26 = vld [vmem:[#allocation8 + $0x6a0] sm:$0xff] }
 0x3c2   : > { %v2997_v51 = vrot.slane %v2996_v50, 1  ;;  %v2413_v37 = vadd.f32 %v2412_v30, %v2300_v28  ;;  %v2459_v62 = vmul.f32 %v7159_v18, %v2410_v27  ;;  %3745 = vmatpush.msrb.mxu1 %v3531_v40  ;;  %v2195_v15 = vpop.f32.mrf.mxu2  ;;  %v7721_v28 = vld [vmem:[#allocation31_spill] sm:$0xff]  ;;  %3829 = vmatpush.msrb.mxu3 %v3561_v13  ;;  %v7724_v40 = vld [vmem:[#allocation48_spill] sm:$0xff] }
 0x3c3   : > { %v2984_v25 = vmax.f32 %v2982_v46, %v2983_v12  ;;  %v2991_v34 = vmax.f32 %v2989_v43, %v2990_v39  ;;  %v3220_v45 = vsel %vm3181_vm5, %v2977_v6, %v3219_v53  ;;  %3788 = vmatpush.msrb.mxu2 %v3545_v23  ;;  %v7722_v46 = vld [vmem:[#allocation47_spill] sm:$0xff]  ;;  %v2080_v47 = vadd.f32 %v7281_v22, %v1967_v35 }
 0x3c4   : > { %v2460_v63 = vmul.f32 %v7159_v18, %v2413_v37  ;;  %v2998_v17 = vmax.f32 %v2996_v50, %v2997_v51  ;;  %v1970_v20 = vadd.f32 %v7722_v46, %v7721_v28  ;;  %3746 = vmatpush.msrb.mxu1 %v3530_v54  ;;  %v2495_v43 = vadd.f32 %v7172_v8, %v2459_v62  ;;  %v3528_v12 = vld [vmem:[#allocation8 + $0x638] sm:$0xff]  ;;  %v3543_v30 = vld [vmem:[#allocation8 + $0x6b0] sm:$0xff] }
 0x3c5   : > { %v3221_v16 = vsel %vm3183_vm6, %v2984_v25, %v3220_v45  ;;  %3789 = vmatpush.msrb.mxu2 %v3544_v38  ;;  %3830 = vmatpush.msrb.mxu3 %v3560_v59  ;;  %v3559_v53 = vld [vmem:[#allocation8 + $0x730] sm:$0xff]  ;;  %v3542_v45 = vld [vmem:[#allocation8 + $0x6a8] sm:$0xff]  ;;  %v7320_v49 = vpop.f32.mrf.mxu3  ;;  %v3540_v23 = vld [vmem:[#allocation8 + $0x698] sm:$0xff] }
 0x3c6   : > { %v3222_v19 = vsel %vm3185_vm7, %v2991_v34, %v3221_v16  ;;  %v2496_v1 = vadd.f32 %v7172_v8, %v2460_v63  ;;  %3747 = vmatpush.msrb.mxu1 %v3529_v7  ;;  %v3527_v34 = vld [vmem:[#allocation8 + $0x630] sm:$0xff] }
 0x3c7   : > { %v7298_v61 = vsel %vm3187_vm8, %v2998_v17, %v3222_v19  ;;  %3790 = vmatpush.msrb.mxu2 %v3543_v30  ;;  %3831 = vmatpush.msrb.mxu3 %v3559_v53  ;;  %v3539_v59 = vld [vmem:[#allocation8 + $0x690] sm:$0xff]  ;;  %v3525_v53 = vld [vmem:[#allocation8 + $0x620] sm:$0xff] }
 0x3c8   : > { %3252 = vst [vmem:[#allocation3 + $0x61] sm:$0xff] %v7298_v61  ;;  %v2528_v32 = vmax.f32 %v2496_v1, 0.0  ;;  %3692 = vmatmul.f32.gmra.mxu2 %v7298_v61  ;;  %3748 = vmatpush.msrb.mxu1 %v3528_v12  ;;  %v3558_v1 = vld [vmem:[#allocation8 + $0x728] sm:$0xff] }
 0x3c9   : > { %v2415_v2 = vpop.f32.mrf.mxu0  ;;  %3791 = vmatpush.msrb.mxu2 %v3542_v45  ;;  %3832 = vmatpush.msrb.mxu3 %v3558_v1  ;;  %v3538_v12 = vld [vmem:[#allocation8 + $0x688] sm:$0xff] }
 0x3ca   : > { %v2546_v0 = vmax.f32 %v2526_v11, %v2528_v32  ;;  %v2416_v31 = vadd.f32 %v2415_v2, %v2303_v42  ;;  %v2083_v42 = vadd.f32 %v2082_v58, %v1970_v20  ;;  %v2527_v11 = vmax.f32 %v2495_v43, 0.0  ;;  %3749 = vmatpush.msrb.mxu1 %v3527_v34 }
 0x3cb   : > { %v1973_v2 = vadd.f32 %v7724_v40, %v7723_v10  ;;  %3792 = vmatpush.msrb.mxu2 %v3541_v26 }
 0x3cc   : > { %v2602_v36 = vrot.slane %v2546_v0, 2  ;;  %v2603_v52 = vrot.slane %v2546_v0, 4  ;;  %v2604_v57 = vrot.slane %v2546_v0, 6  ;;  %v2999_v24 = vsel %vm2662_vm1, %v2546_v0, -inf }
 0x3cd   : > { %v3000_v56 = vrot.slane %v2999_v24, 4  ;;  %v2461_v44 = vmul.f32 %v7159_v18, %v2416_v31  ;;  %v2193_v0 = vadd.f32 %v7284_v29, %v2080_v47  ;;  %v2085_v31 = vpop.f32.mrf.mxu1  ;;  %v7326_v22 = vadd.f32 %v2195_v15, %v2083_v42  ;;  %3793 = vmatpush.msrb.mxu2 %v3540_v23  ;;  %v3556_v47 = vld [vmem:[#allocation8 + $0x718] sm:$0xff] }
 0x3ce   : > { %v3006_v50 = vsel %vm2662_vm1, %v2602_v36, -inf  ;;  %v3013_v21 = vsel %vm2662_vm1, %v2603_v52, -inf  ;;  %v3020_v55 = vsel %vm2662_vm1, %v2604_v57, -inf  ;;  %v2198_v36 = vpop.f32.mrf.mxu2  ;;  %v2086_v5 = vadd.f32 %v2085_v31, %v1973_v2  ;;  %v3524_v42 = vld [vmem:[#allocation8 + $0x618] sm:$0xff]  ;;  %v3523_v31 = vld [vmem:[#allocation8 + $0x610] sm:$0xff] }
 0x3cf   : > { %v3001_v6 = vmax.f32 %v2999_v24, %v3000_v56  ;;  %v3007_v39 = vrot.slane %v3006_v50, 4  ;;  %v3014_v51 = vrot.slane %v3013_v21, 4  ;;  %v3021_v37 = vrot.slane %v3020_v55, 4  ;;  %v7313_v4 = vld [vmem:[#allocation3 + $0x60] sm:$0xff]  ;;  %v3526_v56 = vld [vmem:[#allocation8 + $0x628] sm:$0xff]  ;;  %3794 = vmatpush.msrb.mxu2 %v3539_v59 }
 0x3d0   : > { %v7315_v3 = vld [vmem:[#allocation3 + $0x62] sm:$0xff]  ;;  %v2497_v25 = vadd.f32 %v7172_v8, %v2461_v44  ;;  %3651 = vmatmul.f32.gmra.mxu1 %v7313_v4  ;;  %v2306_v44 = vadd.f32 %v7295_v14, %v2193_v0  ;;  %v2199_v30 = vadd.f32 %v2198_v36, %v2086_v5  ;;  %v3537_v14 = vld [vmem:[#allocation8 + $0x680] sm:$0xff]  ;;  %v2309_v59 = vadd.f32 %v7320_v49, %v7326_v22 }
 0x3d1   : > { %3733 = vmatmul.f32.gmra.mxu3 %v7315_v3  ;;  %v3002_v63 = vrot.slane %v3001_v6, 2  ;;  %v3008_v17 = vmax.f32 %v3006_v50, %v3007_v39  ;;  %v3015_v16 = vmax.f32 %v3013_v21, %v3014_v51  ;;  %v3022_v19 = vmax.f32 %v3020_v55, %v3021_v37  ;;  %v2418_v27 = vpop.f32.mrf.mxu0  ;;  %3750 = vmatpush.msrb.mxu1 %v3526_v56  ;;  %v3557_v37 = vld [vmem:[#allocation8 + $0x720] sm:$0xff]  ;;  %v3555_v0 = vld [vmem:[#allocation8 + $0x710] sm:$0xff] }
 0x3d2   : > { %v2529_v32 = vmax.f32 %v2497_v25, 0.0  ;;  %v2311_v25 = vpop.f32.mrf.mxu3  ;;  %3833 = vmatpush.msrb.mxu3 %v3557_v37  ;;  %3795 = vmatpush.msrb.mxu2 %v3538_v12  ;;  %v3553_v56 = vld [vmem:[#allocation8 + $0x700] sm:$0xff] }
 0x3d3   : > { %v3003_v41 = vmax.f32 %v3001_v6, %v3002_v63  ;;  %v3009_v60 = vrot.slane %v3008_v17, 2  ;;  %v3016_v62 = vrot.slane %v3015_v16, 2  ;;  %v3023_v38 = vrot.slane %v3022_v19, 2  ;;  %3751 = vmatpush.msrb.mxu1 %v3525_v53 }
 0x3d4   : > { %v2547_v54 = vmax.f32 %v2527_v11, %v2529_v32  ;;  %v2419_v63 = vadd.f32 %v2418_v27, %v2306_v44  ;;  %v7725_v11 = vld [vmem:[#allocation33_spill] sm:$0xff]  ;;  %3834 = vmatpush.msrb.mxu3 %v3556_v47  ;;  %3796 = vmatpush.msrb.mxu2 %v3537_v14  ;;  %v3599_v47 = vld [vmem:[#allocation8 + $0x870] sm:$0xff] }
 0x3d5   : > { %v3010_v58 = vmax.f32 %v3008_v17, %v3009_v60  ;;  %v3017_v13 = vmax.f32 %v3015_v16, %v3016_v62  ;;  %v3004_v9 = vrot.slane %v3003_v41, 1  ;;  %v3024_v50 = vmax.f32 %v3022_v19, %v3023_v38  ;;  %v7726_v32 = vld [vmem:[#allocation49_spill] sm:$0xff]  ;;  %3752 = vmatpush.msrb.mxu1 %v3524_v42  ;;  %v2088_v27 = vpop.f32.mrf.mxu1  ;;  %v3583_v42 = vld [vmem:[#allocation8 + $0x7f0] sm:$0xff] }
 0x3d6   : > { %v2605_v52 = vrot.slane %v2547_v54, 2  ;;  %v2606_v57 = vrot.slane %v2547_v54, 4  ;;  %v2607_v24 = vrot.slane %v2547_v54, 6  ;;  %v3027_v7 = vsel %vm2662_vm1, %v2547_v54, -inf  ;;  %3835 = vmatpush.msrb.mxu3 %v3555_v0  ;;  %v3521_v44 = vld [vmem:[#allocation8 + $0x600] sm:$0xff] }
 0x3d7   : > { %v3011_v29 = vrot.slane %v3010_v58, 1  ;;  %v3018_v35 = vrot.slane %v3017_v13, 1  ;;  %v3028_v28 = vrot.slane %v3027_v7, 4  ;;  %v3005_v34 = vmax.f32 %v3003_v41, %v3004_v9  ;;  %3753 = vmatpush.msrb.mxu1 %v3523_v31  ;;  %v3597_v0 = vld [vmem:[#allocation8 + $0x860] sm:$0xff] }
 0x3d8   : > { %v3034_v15 = vsel %vm2662_vm1, %v2605_v52, -inf  ;;  %v3041_v46 = vsel %vm2662_vm1, %v2606_v57, -inf  ;;  %v3048_v20 = vsel %vm2662_vm1, %v2607_v24, -inf  ;;  %v1976_v26 = vadd.f32 %v7726_v32, %v7725_v11  ;;  %v3554_v24 = vld [vmem:[#allocation8 + $0x708] sm:$0xff]  ;;  %v3613_v31 = vld [vmem:[#allocation8 + $0x8e0] sm:$0xff] }
 0x3d9   : > { %v3012_v43 = vmax.f32 %v3010_v58, %v3011_v29  ;;  %v3035_v21 = vrot.slane %v3034_v15, 4  ;;  %v7333_v55 = vpop.f32.mrf.mxu0  ;;  %v3029_v6 = vmax.f32 %v3027_v7, %v3028_v28  ;;  %v3042_v39 = vrot.slane %v3041_v46, 4  ;;  %v3522_v7 = vld [vmem:[#allocation8 + $0x608] sm:$0xff]  ;;  %3836 = vmatpush.msrb.mxu3 %v3554_v24 }
 0x3da   : > { %v3049_v51 = vrot.slane %v3048_v20, 4  ;;  %v3019_v17 = vmax.f32 %v3017_v13, %v3018_v35  ;;  %v3025_v10 = vrot.slane %v3024_v50, 1  ;;  %v2312_v54 = vadd.f32 %v2311_v25, %v2199_v30  ;;  %v2201_v13 = vpop.f32.mrf.mxu2  ;;  %3754 = vmatpush.msrb.mxu1 %v3522_v7 }
 0x3db   : > { %v3036_v45 = vmax.f32 %v3034_v15, %v3035_v21  ;;  %v3030_v16 = vrot.slane %v3029_v6, 2  ;;  %v3043_v19 = vmax.f32 %v3041_v46, %v3042_v39  ;;  %v3224_v40 = vsel %vm3175_vm2, %v3012_v43, %v3005_v34  ;;  %3837 = vmatpush.msrb.mxu3 %v3553_v56 }
 0x3dc   : > { %v3050_v1 = vmax.f32 %v3048_v20, %v3049_v51  ;;  %v2462_v58 = vmul.f32 %v7159_v18, %v2419_v63  ;;  %v3225_v38 = vsel %vm3177_vm3, %v3019_v17, %v3224_v40  ;;  %v2089_v5 = vadd.f32 %v2088_v27, %v1976_v26  ;;  %3755 = vmatpush.msrb.mxu1 %v3521_v44  ;;  %v3600_v17 = vld [vmem:[#allocation8 + $0x878] sm:$0xff]  ;;  %v3614_v40 = vld [vmem:[#allocation8 + $0x8e8] sm:$0xff] }
 0x3dd   : > { %v3037_v2 = vrot.slane %v3036_v45, 2  ;;  %v3031_v41 = vmax.f32 %v3029_v6, %v3030_v16  ;;  %v3044_v60 = vrot.slane %v3043_v19, 2  ;;  %v3026_v9 = vmax.f32 %v3024_v50, %v3025_v10  ;;  %v2314_v6 = vpop.f32.mrf.mxu3  ;;  %v3616_v16 = vld [vmem:[#allocation8 + $0x8f8] sm:$0xff]  ;;  %3904 = vmatpush.msra.mxu2 %v3600_v17  ;;  %v3598_v10 = vld [vmem:[#allocation8 + $0x868] sm:$0xff] }
 0x3de   : > { %v3051_v62 = vrot.slane %v3050_v1, 2  ;;  %v2202_v43 = vadd.f32 %v2201_v13, %v2089_v5  ;;  %v2498_v22 = vadd.f32 %v7172_v8, %v2462_v58  ;;  %v2422_v53 = vadd.f32 %v7333_v55, %v2309_v59  ;;  %3945 = vmatpush.msra.mxu3 %v3616_v16  ;;  %v3615_v55 = vld [vmem:[#allocation8 + $0x8f0] sm:$0xff] }
 0x3df   : > { %v3038_v23 = vmax.f32 %v3036_v45, %v3037_v2  ;;  %v3032_v36 = vrot.slane %v3031_v41, 1  ;;  %v3045_v52 = vmax.f32 %v3043_v19, %v3044_v60  ;;  %v3226_v21 = vsel %vm3179_vm4, %v3026_v9, %v3225_v38  ;;  %v3584_v19 = vld [vmem:[#allocation8 + $0x7f8] sm:$0xff]  ;;  %3905 = vmatpush.msra.mxu2 %v3599_v47  ;;  %v3582_v2 = vld [vmem:[#allocation8 + $0x7e8] sm:$0xff]  ;;  %v3609_v47 = vld [vmem:[#allocation8 + $0x8c0] sm:$0xff] }
 0x3e0   : > { %v3052_v57 = vmax.f32 %v3050_v1, %v3051_v62  ;;  %v2315_v45 = vadd.f32 %v2314_v6, %v2202_v43  ;;  %v2530_v63 = vmax.f32 %v2498_v22, 0.0  ;;  %v2463_v11 = vmul.f32 %v7159_v18, %v2422_v53  ;;  %3863 = vmatpush.msra.mxu1 %v3584_v19  ;;  %3946 = vmatpush.msra.mxu3 %v3615_v55  ;;  %v3579_v22 = vld [vmem:[#allocation8 + $0x7d0] sm:$0xff] }
 0x3e1   : > { %v3039_v29 = vrot.slane %v3038_v23, 1  ;;  %v2424_v35 = vpop.f32.mrf.mxu0  ;;  %v3033_v28 = vmax.f32 %v3031_v41, %v3032_v36  ;;  %v3046_v15 = vrot.slane %v3045_v52, 1  ;;  %3906 = vmatpush.msra.mxu2 %v3598_v10  ;;  %v3593_v10 = vld [vmem:[#allocation8 + $0x840] sm:$0xff] }
 0x3e2   : > { %v3053_v46 = vrot.slane %v3052_v57, 1  ;;  %v2425_v20 = vadd.f32 %v2424_v35, %v2312_v54  ;;  %3864 = vmatpush.msra.mxu1 %v3583_v42  ;;  %3947 = vmatpush.msra.mxu3 %v3614_v40  ;;  %v6189_v35 = vld [vmem:[#allocation13] ss:$0 sm:$0xff] }
 0x3e3   : > { %v3040_v12 = vmax.f32 %v3038_v23, %v3039_v29  ;;  %v3047_v30 = vmax.f32 %v3045_v52, %v3046_v15  ;;  %v3227_v49 = vsel %vm3181_vm5, %v3033_v28, %v3226_v21  ;;  %v6188_v23 = vld [vmem:[#allocation11] ss:$0 sm:$0xff]  ;;  %3907 = vmatpush.msra.mxu2 %v3597_v0  ;;  %v3319_v15 = vld [vmem:[#allocation3 + $0x11] sm:$0xff]  ;;  %v3595_v21 = vld [vmem:[#allocation8 + $0x850] sm:$0xff] }
 0x3e4   : > { %v2464_v50 = vmul.f32 %v7159_v18, %v2425_v20  ;;  %v3054_v39 = vmax.f32 %v3052_v57, %v3053_v46  ;;  %v2499_v18 = vadd.f32 %v7172_v8, %v2463_v11  ;;  %3865 = vmatpush.msra.mxu1 %v3582_v2  ;;  %v3581_v52 = vld [vmem:[#allocation8 + $0x7e0] sm:$0xff]  ;;  %v3596_v57 = vld [vmem:[#allocation8 + $0x858] sm:$0xff]  ;;  %3948 = vmatpush.msra.mxu3 %v3613_v31 }
 0x3e5   : > { %v3228_v51 = vsel %vm3183_vm6, %v3040_v12, %v3227_v49  ;;  %v3580_v46 = vld [vmem:[#allocation8 + $0x7d8] sm:$0xff]  ;;  %v3611_v12 = vld [vmem:[#allocation8 + $0x8d0] sm:$0xff]  ;;  %3908 = vmatpush.msra.mxu2 %v3596_v57 }
 0x3e6   : > { %v3229_v37 = vsel %vm3185_vm7, %v3047_v30, %v3228_v51  ;;  %v2500_v25 = vadd.f32 %v7172_v8, %v2464_v50  ;;  %v3612_v8 = vld [vmem:[#allocation8 + $0x8d8] sm:$0xff]  ;;  %3866 = vmatpush.msra.mxu1 %v3581_v52  ;;  %v2531_v30 = vmax.f32 %v2499_v18, 0.0  ;;  %v3594_v51 = vld [vmem:[#allocation8 + $0x848] sm:$0xff]  ;;  %v3607_v52 = vld [vmem:[#allocation8 + $0x8b0] sm:$0xff] }
 0x3e7   : > { %v7351_v34 = vsel %vm3187_vm8, %v3054_v39, %v3229_v37  ;;  %3949 = vmatpush.msra.mxu3 %v3612_v8  ;;  %v3610_v37 = vld [vmem:[#allocation8 + $0x8c8] sm:$0xff]  ;;  %3909 = vmatpush.msra.mxu2 %v3595_v21  ;;  %v3576_v18 = vld [vmem:[#allocation8 + $0x7b8] sm:$0xff]  ;;  %v7375_v21 = vld [vmem:[#allocation3 + $0x20] sm:$0xff] }
 0x3e8   : > { %3253 = vst [vmem:[#allocation3 + $0x71] sm:$0xff] %v7351_v34  ;;  %v2532_v14 = vmax.f32 %v2500_v25, 0.0  ;;  %3695 = vmatmul.f32.gmra.mxu2 %v7351_v34  ;;  %3867 = vmatpush.msra.mxu1 %v3580_v46  ;;  %v3578_v25 = vld [vmem:[#allocation8 + $0x7c8] sm:$0xff] }
 0x3e9   : > { %v2427_v1 = vpop.f32.mrf.mxu0  ;;  %3950 = vmatpush.msra.mxu3 %v3611_v12  ;;  %3910 = vmatpush.msra.mxu2 %v3594_v51  ;;  %v7377_v12 = vld [vmem:[#allocation3 + $0x22] sm:$0xff]  ;;  %v3590_v51 = vld [vmem:[#allocation8 + $0x828] sm:$0xff] }
 0x3ea   : > { %v2548_v32 = vmax.f32 %v2530_v63, %v2532_v14  ;;  %v2428_v26 = vadd.f32 %v2427_v1, %v2315_v45  ;;  %3868 = vmatpush.msra.mxu1 %v3579_v22 }
 0x3eb   : > { %3951 = vmatpush.msra.mxu3 %v3610_v37  ;;  %3911 = vmatpush.msra.mxu2 %v3593_v10  ;;  %v3606_v37 = vld [vmem:[#allocation8 + $0x8a8] sm:$0xff] }
 0x3ec   : > { %v2608_v27 = vrot.slane %v2548_v32, 2  ;;  %v2609_v41 = vrot.slane %v2548_v32, 4  ;;  %v2610_v60 = vrot.slane %v2548_v32, 6  ;;  %v3055_v62 = vsel %vm2662_vm1, %v2548_v32, -inf  ;;  %v3303_v32 = vld [vmem:[#allocation3 + $0x10] sm:$0xff]  ;;  %3869 = vmatpush.msra.mxu1 %v3578_v25 }
 0x3ed   : > { %v3056_v54 = vrot.slane %v3055_v62, 4  ;;  %v2465_v58 = vmul.f32 %v6188_v23, %v2428_v26  ;;  %v3335_v26 = vld [vmem:[#allocation3 + $0x12] sm:$0xff]  ;;  %3952 = vmatpush.msra.mxu3 %v3609_v47  ;;  %v3592_v23 = vld [vmem:[#allocation8 + $0x838] sm:$0xff] }
 0x3ee   : > { %v3062_v13 = vsel %vm2662_vm1, %v2608_v27, -inf  ;;  %v3069_v38 = vsel %vm2662_vm1, %v2609_v41, -inf  ;;  %v3076_v36 = vsel %vm2662_vm1, %v2610_v60, -inf  ;;  %v7371_v60 = vld [vmem:[#allocation3 + $0x21] sm:$0xff]  ;;  %3912 = vmatpush.msra.mxu2 %v3592_v23 }
 0x3ef   : > { %v3057_v24 = vmax.f32 %v3055_v62, %v3056_v54  ;;  %v3063_v7 = vrot.slane %v3062_v13, 4  ;;  %v3070_v59 = vrot.slane %v3069_v38, 4  ;;  %v3077_v5 = vrot.slane %v3076_v36, 4  ;;  %v7361_v9 = vld [vmem:[#allocation3 + $0x70] sm:$0xff]  ;;  %v3603_v23 = vld [vmem:[#allocation8 + $0x890] sm:$0xff] }
 0x3f0   : > { %v7363_v29 = vld [vmem:[#allocation3 + $0x72] sm:$0xff]  ;;  %v2501_v28 = vadd.f32 %v6189_v35, %v2465_v58  ;;  %3654 = vmatmul.f32.gmra.mxu1 %v7361_v9  ;;  %3797 = vmatmul.f32.vlgmr.msrb.gmra.mxu2 %v3319_v15  ;;  %v3608_v58 = vld [vmem:[#allocation8 + $0x8b8] sm:$0xff] }
 0x3f1   : > { %3736 = vmatmul.f32.gmra.mxu3 %v7363_v29  ;;  %v3058_v20 = vrot.slane %v3057_v24, 2  ;;  %v3064_v56 = vmax.f32 %v3062_v13, %v3063_v7  ;;  %v3071_v44 = vmax.f32 %v3069_v38, %v3070_v59  ;;  %v3078_v43 = vmax.f32 %v3076_v36, %v3077_v5  ;;  %v3577_v62 = vld [vmem:[#allocation8 + $0x7c0] sm:$0xff]  ;;  %v3591_v7 = vld [vmem:[#allocation8 + $0x830] sm:$0xff] }
 0x3f2   : > { %v2533_v49 = vmax.f32 %v2501_v28, 0.0  ;;  %3870 = vmatpush.msra.mxu1 %v3577_v62  ;;  %3953 = vmatpush.msra.mxu3 %v3608_v58  ;;  %v3588_v62 = vld [vmem:[#allocation8 + $0x818] sm:$0xff]  ;;  %v6190_v58 = vld [vmem:[#allocation3 + $0x40] sm:$0xff] }
 0x3f3   : > { %v3059_v50 = vmax.f32 %v3057_v24, %v3058_v20  ;;  %v3065_v6 = vrot.slane %v3064_v56, 2  ;;  %v3072_v39 = vrot.slane %v3071_v44, 2  ;;  %v3079_v14 = vrot.slane %v3078_v43, 2  ;;  %3913 = vmatpush.msra.mxu2 %v3591_v7  ;;  %v3601_v7 = vld [vmem:[#allocation8 + $0x880] sm:$0xff] }
 0x3f4   : > { %v2549_v53 = vmax.f32 %v2531_v30, %v2533_v49  ;;  %3871 = vmatpush.msra.mxu1 %v3576_v18  ;;  %3954 = vmatpush.msra.mxu3 %v3607_v52  ;;  %v7379_v30 = vld [vmem:[#allocation3 + $0x31] sm:$0xff]  ;;  %v6191_v18 = vld [vmem:[#allocation3 + $0x42] sm:$0xff] }
 0x3f5   : > { %v3066_v45 = vmax.f32 %v3064_v56, %v3065_v6  ;;  %v3073_v63 = vmax.f32 %v3071_v44, %v3072_v39  ;;  %v3060_v55 = vrot.slane %v3059_v50, 1  ;;  %v3080_v31 = vmax.f32 %v3078_v43, %v3079_v14  ;;  %v3575_v39 = vld [vmem:[#allocation8 + $0x7b0] sm:$0xff]  ;;  %v3605_v14 = vld [vmem:[#allocation8 + $0x8a0] sm:$0xff]  ;;  %3914 = vmatpush.msra.mxu2 %v3590_v51 }
 0x3f6   : > { %v2611_v17 = vrot.slane %v2549_v53, 2  ;;  %v2612_v16 = vrot.slane %v2549_v53, 4  ;;  %v2613_v19 = vrot.slane %v2549_v53, 6  ;;  %v3083_v1 = vsel %vm2662_vm1, %v2549_v53, -inf  ;;  %3872 = vmatpush.msra.mxu1 %v3575_v39  ;;  %3955 = vmatpush.msra.mxu3 %v3606_v37  ;;  %v6192_v52 = vld [vmem:[#allocation3 + $0x51] sm:$0xff] }
 0x3f7   : > { %v3067_v42 = vrot.slane %v3066_v45, 1  ;;  %v3074_v11 = vrot.slane %v3073_v63, 1  ;;  %v3084_v40 = vrot.slane %v3083_v1, 4  ;;  %v3061_v57 = vmax.f32 %v3059_v50, %v3060_v55  ;;  %v6194_v39 = vld [vmem:[#allocation3 + $0x52] sm:$0xff] }
 0x3f8   : > { %v3090_v2 = vsel %vm2662_vm1, %v2611_v17, -inf  ;;  %v3097_v27 = vsel %vm2662_vm1, %v2612_v16, -inf  ;;  %v3104_v41 = vsel %vm2662_vm1, %v2613_v19, -inf  ;;  %3756 = vmatmul.f32.vlgmr.msrb.gmra.mxu1 %v3303_v32  ;;  %3800 = vmatmul.f32.gmra.mxu2 %v7371_v60  ;;  %v3081_v28 = vrot.slane %v3080_v31, 1 }
 0x3f9   : > { %3838 = vmatmul.f32.vlgmr.msrb.gmra.mxu3 %v3335_v26  ;;  %v3068_v0 = vmax.f32 %v3066_v45, %v3067_v42  ;;  %v3091_v54 = vrot.slane %v3090_v2, 4  ;;  %v3085_v13 = vmax.f32 %v3083_v1, %v3084_v40  ;;  %v3098_v38 = vrot.slane %v3097_v27, 4  ;;  %v3574_v45 = vld [vmem:[#allocation8 + $0x7a8] sm:$0xff]  ;;  %v7392_v40 = vld [vmem:[#allocation3 + $0x30] sm:$0xff] }
 0x3fa   : > { %v3105_v36 = vrot.slane %v3104_v41, 4  ;;  %v3075_v59 = vmax.f32 %v3073_v63, %v3074_v11  ;;  %v3082_v53 = vmax.f32 %v3080_v31, %v3081_v28  ;;  %v3589_v63 = vld [vmem:[#allocation8 + $0x820] sm:$0xff]  ;;  %3873 = vmatpush.msra.mxu1 %v3574_v45  ;;  %3956 = vmatpush.msra.mxu3 %v3605_v14  ;;  %v3572_v31 = vld [vmem:[#allocation8 + $0x798] sm:$0xff]  ;;  %v4520_v28 = vld [vmem:[#allocation8 + $0xc70] sm:$0xff] }
 0x3fb   : > { %v3092_v24 = vmax.f32 %v3090_v2, %v3091_v54  ;;  %v3086_v5 = vrot.slane %v3085_v13, 2  ;;  %v3099_v8 = vmax.f32 %v3097_v27, %v3098_v38  ;;  %v3231_v15 = vsel %vm3175_vm2, %v3068_v0, %v3061_v57  ;;  %3915 = vmatpush.msra.mxu2 %v3589_v63  ;;  %v7394_v2 = vld [vmem:[#allocation3 + $0x32] sm:$0xff]  ;;  %v7396_v27 = vld [vmem:[#allocation3 + $0x41] sm:$0xff] }
 0x3fc   : > { %v3106_v35 = vmax.f32 %v3104_v41, %v3105_v36  ;;  %v3232_v49 = vsel %vm3177_vm3, %v3075_v59, %v3231_v15  ;;  %v3573_v41 = vld [vmem:[#allocation8 + $0x7a0] sm:$0xff]  ;;  %v3604_v0 = vld [vmem:[#allocation8 + $0x898] sm:$0xff]  ;;  %v3587_v54 = vld [vmem:[#allocation8 + $0x810] sm:$0xff]  ;;  %v7418_v15 = vpop.f32.mrf.mxu3 }
 0x3fd   : > { %v3093_v46 = vrot.slane %v3092_v24, 2  ;;  %v3087_v20 = vmax.f32 %v3085_v13, %v3086_v5  ;;  %v3100_v56 = vrot.slane %v3099_v8, 2  ;;  %v3233_v1 = vsel %vm3179_vm4, %v3082_v53, %v3232_v49  ;;  %3874 = vmatpush.msra.mxu1 %v3573_v41  ;;  %3916 = vmatpush.msra.mxu2 %v3588_v62  ;;  %v3571_v13 = vld [vmem:[#allocation8 + $0x790] sm:$0xff]  ;;  %v3586_v38 = vld [vmem:[#allocation8 + $0x808] sm:$0xff]  ;;  %v3569_v59 = vld [vmem:[#allocation8 + $0x780] sm:$0xff] }
 0x3fe   : > { %v3107_v44 = vrot.slane %v3106_v35, 2  ;;  %3957 = vmatpush.msra.mxu3 %v3604_v0  ;;  %v3602_v36 = vld [vmem:[#allocation8 + $0x888] sm:$0xff]  ;;  %v4521_v5 = vld [vmem:[#allocation8 + $0xc78] sm:$0xff]  ;;  %v4518_v63 = vld [vmem:[#allocation8 + $0xc60] sm:$0xff] }
 0x3ff   : > { %v3094_v43 = vmax.f32 %v3092_v24, %v3093_v46  ;;  %v3088_v22 = vrot.slane %v3087_v20, 1  ;;  %v3101_v50 = vmax.f32 %v3099_v8, %v3100_v56  ;;  %3875 = vmatpush.msra.mxu1 %v3572_v31  ;;  %3917 = vmatpush.msra.mxu2 %v3587_v54  ;;  %v3570_v57 = vld [vmem:[#allocation8 + $0x788] sm:$0xff]  ;;  %v3585_v24 = vld [vmem:[#allocation8 + $0x800] sm:$0xff] }
 0x400   : > { %v3108_v6 = vmax.f32 %v3106_v35, %v3107_v44  ;;  %3759 = vmatmul.f32.gmra.mxu1 %v7375_v21  ;;  %3803 = vmatmul.f32.gmra.mxu2 %v7379_v30  ;;  %v7414_v35 = vpop.f32.mrf.mxu1  ;;  %v4515_v0 = vld [vmem:[#allocation8 + $0xc48] sm:$0xff] }
 0x401   : > { %3841 = vmatmul.f32.gmra.mxu3 %v7377_v12  ;;  %v3095_v25 = vrot.slane %v3094_v43, 1  ;;  %v3089_v17 = vmax.f32 %v3087_v20, %v3088_v22  ;;  %v3102_v16 = vrot.slane %v3101_v50, 1  ;;  %3876 = vmatpush.msra.mxu1 %v3571_v13 }
 0x402   : > { %v3109_v19 = vrot.slane %v3108_v6, 1  ;;  %3958 = vmatpush.msra.mxu3 %v3603_v23  ;;  %3918 = vmatpush.msra.mxu2 %v3586_v38 }
 0x403   : > { %v3096_v47 = vmax.f32 %v3094_v43, %v3095_v25  ;;  %v3103_v55 = vmax.f32 %v3101_v50, %v3102_v16  ;;  %v3234_v42 = vsel %vm3181_vm5, %v3089_v17, %v3233_v1  ;;  %3877 = vmatpush.msra.mxu1 %v3570_v57  ;;  %4692 = vmatpush.msrb.mxu0 %v4521_v5  ;;  %v3354_v43 = vld [vmem:[#allocation3 + $0x40] sm:$0xff]  ;;  %v3375_v17 = vld [vmem:[#allocation3 + $0x91] sm:$0xff] }
 0x404   : > { %v3110_v11 = vmax.f32 %v3108_v6, %v3109_v19  ;;  %3959 = vmatpush.msra.mxu3 %v3602_v36  ;;  %3919 = vmatpush.msra.mxu2 %v3585_v24  ;;  %v6193_v6 = vld [vmem:[#allocation3 + $0x50] sm:$0xff]  ;;  %v4517_v19 = vld [vmem:[#allocation8 + $0xc58] sm:$0xff] }
 0x405   : > { %v3235_v32 = vsel %vm3183_vm6, %v3096_v47, %v3234_v42  ;;  %3878 = vmatpush.msra.mxu1 %v3569_v59  ;;  %4693 = vmatpush.msrb.mxu0 %v4520_v28  ;;  %v3391_v47 = vld [vmem:[#allocation3 + $0x92] sm:$0xff] }
 0x406   : > { %v3236_v26 = vsel %vm3185_vm7, %v3103_v55, %v3235_v32  ;;  %3960 = vmatpush.msra.mxu3 %v3601_v7  ;;  %v6195_v55 = vld [vmem:[#allocation2] sm:$0xff] }
 0x407   : > { %v7390_v10 = vsel %vm3187_vm8, %v3110_v11, %v3236_v26  ;;  %v4516_v26 = vld [vmem:[#allocation8 + $0xc50] sm:$0xff] }
 0x408   : > { %3254 = vst [vmem:[#allocation3 + $0x81] sm:$0xff] %v7390_v10  ;;  %3762 = vmatmul.f32.gmra.mxu1 %v7392_v40  ;;  %3806 = vmatmul.f32.gmra.mxu2 %v7396_v27  ;;  %v7423_v20 = vpop.f32.mrf.mxu1 }
 0x409   : > { %3844 = vmatmul.f32.gmra.mxu3 %v7394_v2 }
 0x40f   : > { %v3310_v8 = vld [vmem:[#allocation3 + $0x80] sm:$0xff] }
 0x410   : > { %3765 = vmatmul.f32.gmra.mxu1 %v6190_v58  ;;  %3809 = vmatmul.f32.gmra.mxu2 %v6192_v52  ;;  %v7432_v44 = vpop.f32.mrf.mxu1  ;;  %v4514_v52 = vld [vmem:[#allocation8 + $0xc40] sm:$0xff] }
 0x411   : > { %3847 = vmatmul.f32.gmra.mxu3 %v6191_v18 }
 0x418   : > { %3768 = vmatmul.f32.gmra.mxu1 %v7255_v33  ;;  %3812 = vmatmul.f32.gmra.mxu2 %v7298_v61  ;;  %v3342_v33 = vld [vmem:[#allocation3 + $0x82] sm:$0xff]  ;;  %v7438_v50 = vpop.f32.mrf.mxu1 }
 0x419   : > { %3850 = vmatmul.f32.gmra.mxu3 %v7257_v48  ;;  %v7411_v48 = vpop.f32.mrf.mxu2 }
 0x420   : > { %3771 = vmatmul.f32.gmra.mxu1 %v7313_v4  ;;  %3815 = vmatmul.f32.gmra.mxu2 %v7351_v34  ;;  %v7445_v53 = vpop.f32.mrf.mxu1 }
 0x421   : > { %3853 = vmatmul.f32.gmra.mxu3 %v7315_v3  ;;  %v7421_v46 = vpop.f32.mrf.mxu2 }
 0x428   : > { %3774 = vmatmul.f32.gmra.mxu1 %v7361_v9  ;;  %3818 = vmatmul.f32.gmra.mxu2 %v7390_v10 }
 0x429   : > { %3856 = vmatmul.f32.gmra.mxu3 %v7363_v29  ;;  %v7430_v56 = vpop.f32.mrf.mxu2 }
 0x42d   : > { %v7454_v14 = vpop.f32.mrf.mxu1 }
 0x430   : > { %3777 = vmatmul.f32.gmra.mxu1 %v3310_v8  ;;  %3920 = vmatmul.f32.vlgmr.msra.gmra.mxu2 %v7371_v60  ;;  %v7428_v60 = vpop.f32.mrf.mxu3 }
 0x431   : > { %3859 = vmatmul.f32.gmra.mxu3 %v3342_v33  ;;  %v7436_v22 = vpop.f32.mrf.mxu2 }
 0x438   : > { %3879 = vmatmul.f32.vlgmr.msra.gmra.mxu1 %v7375_v21  ;;  %3923 = vmatmul.f32.gmra.mxu2 %v7379_v30  ;;  %v3386_v21 = vld [vmem:[#allocation3 + $0x42] sm:$0xff]  ;;  %v4519_v30 = vld [vmem:[#allocation8 + $0xc68] sm:$0xff]  ;;  %v7434_v49 = vpop.f32.mrf.mxu3 }
 0x439   : > { %3961 = vmatmul.f32.vlgmr.msra.gmra.mxu3 %v7377_v12  ;;  %v3371_v12 = vld [vmem:[#allocation3 + $0x51] sm:$0xff]  ;;  %4694 = vmatpush.msrb.mxu0 %v4519_v30  ;;  %v7443_v37 = vpop.f32.mrf.mxu2 }
 0x43b   : > { %4695 = vmatpush.msrb.mxu0 %v4518_v63 }
 0x43d   : > { %4696 = vmatpush.msrb.mxu0 %v4517_v19 }
 0x43f   : > { %4697 = vmatpush.msrb.mxu0 %v4516_v26 }
 0x440   : > { %3882 = vmatmul.f32.gmra.mxu1 %v7392_v40  ;;  %3926 = vmatmul.f32.gmra.mxu2 %v7396_v27  ;;  %v7441_v51 = vpop.f32.mrf.mxu3 }
 0x441   : > { %3964 = vmatmul.f32.gmra.mxu3 %v7394_v2  ;;  %v7452_v45 = vpop.f32.mrf.mxu2  ;;  %4698 = vmatpush.msrb.mxu0 %v4515_v0 }
 0x443   : > { %4699 = vmatpush.msrb.mxu0 %v4514_v52 }
 0x448   : > { %3885 = vmatmul.f32.gmra.mxu1 %v3354_v43  ;;  %3929 = vmatmul.f32.gmra.mxu2 %v3371_v12  ;;  %v7450_v25 = vpop.f32.mrf.mxu3 }
 0x449   : > { %3967 = vmatmul.f32.gmra.mxu3 %v3386_v21 }
 0x450   : > { %3888 = vmatmul.f32.gmra.mxu1 %v6193_v6  ;;  %3932 = vmatmul.f32.gmra.mxu2 %v7298_v61  ;;  %v7459_v61 = vpop.f32.mrf.mxu3 }
 0x451   : > { %3970 = vmatmul.f32.gmra.mxu3 %v6194_v39 }
 0x458   : > { %3891 = vmatmul.f32.gmra.mxu1 %v7313_v4  ;;  %3935 = vmatmul.f32.gmra.mxu2 %v7351_v34  ;;  %v3693_v4 = vpop.f32.mrf.mxu2  ;;  %v3734_v34 = vpop.f32.mrf.mxu3 }
 0x459   : > { %3973 = vmatmul.f32.gmra.mxu3 %v7315_v3  ;;  %v3652_v3 = vpop.f32.mrf.mxu1 }
 0x45a   : > { %v3694_v36 = vadd.f32 %v3693_v4, %v3652_v3 }
 0x45c   : > { %v3735_v24 = vadd.f32 %v3734_v34, %v3694_v36 }
 0x460   : > { %3894 = vmatmul.f32.gmra.mxu1 %v7361_v9  ;;  %3938 = vmatmul.f32.gmra.mxu2 %v7390_v10 }
 0x461   : > { %3976 = vmatmul.f32.gmra.mxu3 %v7363_v29 }
 0x468   : > { %3897 = vmatmul.f32.gmra.mxu1 %v3310_v8  ;;  %3941 = vmatmul.f32.gmra.mxu2 %v3375_v17  ;;  %v3676_v8 = vadd.f32 %v7411_v48, %v7414_v35  ;;  %v3679_v17 = vadd.f32 %v7421_v46, %v7423_v20  ;;  %v4425_v46 = vld [vmem:[#allocation8 + $0x978] sm:$0xff] }
 0x469   : > { %3979 = vmatmul.f32.gmra.mxu3 %v3342_v33  ;;  %4554 = vmatpush.msrb.mxu1 %v4425_v46 }
 0x46a   : > { %v3717_v39 = vadd.f32 %v7418_v15, %v3676_v8  ;;  %v3720_v19 = vadd.f32 %v7428_v60, %v3679_v17  ;;  %v3682_v15 = vadd.f32 %v7430_v56, %v7432_v44  ;;  %v7499_v44 = vld [vmem:[#allocation13 + $0x1] ss:$0 sm:$0xff] }
 0x46b   : > { %v3696_v16 = vpop.f32.mrf.mxu2 }
 0x46c   : > { %v3723_v20 = vadd.f32 %v7434_v49, %v3682_v15  ;;  %v3685_v49 = vadd.f32 %v7436_v22, %v7438_v50  ;;  %v4420_v22 = vld [vmem:[#allocation8 + $0x950] sm:$0xff] }
 0x46d   : > { %v3655_v1 = vpop.f32.mrf.mxu1  ;;  %v4440_v50 = vld [vmem:[#allocation8 + $0x9f0] sm:$0xff] }
 0x46e   : > { %v3697_v33 = vadd.f32 %v3696_v16, %v3655_v1 }
 0x470   : > { %3900 = vmatmul.f32.gmra.mxu1 %v6195_v55 }
 0x471   : > { %3982 = vmatmul.f32.gmra.mxu3 %v3391_v47 }
 0x473   : > { %v3798_v29 = vpop.f32.mrf.mxu2 }
 0x474   : > { %v3737_v9 = vpop.f32.mrf.mxu3 }
 0x475   : > { %v3757_v42 = vpop.f32.mrf.mxu1  ;;  %v3738_v21 = vadd.f32 %v3737_v9, %v3697_v33 }
 0x476   : > { %v3758_v4 = vadd.f32 %v3757_v42, %v3717_v39 }
 0x478   : > { %v3799_v48 = vadd.f32 %v3798_v29, %v3758_v4 }
 0x47b   : > { %v3801_v32 = vpop.f32.mrf.mxu2 }
 0x47c   : > { %v3839_v11 = vpop.f32.mrf.mxu3 }
 0x47d   : > { %v3760_v10 = vpop.f32.mrf.mxu1  ;;  %v3840_v47 = vadd.f32 %v3839_v11, %v3799_v48  ;;  %v4424_v11 = vld [vmem:[#allocation8 + $0x970] sm:$0xff] }
 0x47e   : > { %v3761_v55 = vadd.f32 %v3760_v10, %v3720_v19  ;;  %4555 = vmatpush.msrb.mxu1 %v4424_v11 }
 0x480   : > { %v3802_v26 = vadd.f32 %v3801_v32, %v3761_v55  ;;  %v4201_v32 = vld [vmem:[#allocation4] sm:$0xf] }
 0x481   : > { %4209 = vst [vmem:[#allocation1] ss:$2 sm:$0xff] %v4201_v32  ;;  %v4456_v32 = vld [vmem:[#allocation8 + $0xa70] sm:$0xff] }
 0x483   : > { %v7461_v2 = vpop.f32.mrf.mxu2 }
 0x484   : > { %v3842_v40 = vpop.f32.mrf.mxu3 }
 0x485   : > { %v3763_v27 = vpop.f32.mrf.mxu1  ;;  %v3843_v0 = vadd.f32 %v3842_v40, %v3802_v26 }
 0x486   : > { %v3764_v10 = vadd.f32 %v3763_v27, %v3723_v20 }
 0x488   : > { %v3805_v8 = vadd.f32 %v7461_v2, %v3764_v10 }
 0x48b   : > { %v7465_v62 = vpop.f32.mrf.mxu2 }
 0x48c   : > { %v7463_v41 = vpop.f32.mrf.mxu3 }
 0x48d   : > { %v7467_v31 = vpop.f32.mrf.mxu1 }
 0x493   : > { %v7471_v23 = vpop.f32.mrf.mxu2 }
 0x494   : > { %v7469_v54 = vpop.f32.mrf.mxu3 }
 0x495   : > { %v7473_v58 = vpop.f32.mrf.mxu1 }
 0x49b   : > { %v7477_v13 = vpop.f32.mrf.mxu2 }
 0x49c   : > { %v7475_v18 = vpop.f32.mrf.mxu3 }
 0x49d   : > { %v7479_v38 = vpop.f32.mrf.mxu1 }
 0x4a3   : > { %v3816_v7 = vpop.f32.mrf.mxu2 }
 0x4a4   : > { %v7481_v57 = vpop.f32.mrf.mxu3 }
 0x4a5   : > { %v3775_v59 = vpop.f32.mrf.mxu1 }
 0x4a6   : > { %v3776_v5 = vadd.f32 %v3775_v59, %v3735_v24  ;;  %v7496_v24 = vld [vmem:[#allocation11 + $0x1] ss:$0 sm:$0xff]  ;;  %v4423_v59 = vld [vmem:[#allocation8 + $0x968] sm:$0xff] }
 0x4a7   : > { %4556 = vmatpush.msrb.mxu1 %v4423_v59 }
 0x4a8   : > { %v3817_v28 = vadd.f32 %v3816_v7, %v3776_v5  ;;  %v4422_v5 = vld [vmem:[#allocation8 + $0x960] sm:$0xff] }
 0x4a9   : > { %4557 = vmatpush.msrb.mxu1 %v4422_v5  ;;  %v4455_v5 = vld [vmem:[#allocation8 + $0xa68] sm:$0xff] }
 0x4ab   : > { %v3819_v30 = vpop.f32.mrf.mxu2 }
 0x4ac   : > { %v3857_v43 = vpop.f32.mrf.mxu3 }
 0x4ad   : > { %v7485_v12 = vadd.f32 %v3857_v43, %v3817_v28  ;;  %v3778_v6 = vpop.f32.mrf.mxu1  ;;  %v4421_v43 = vld [vmem:[#allocation8 + $0x958] sm:$0xff] }
 0x4ae   : > { %v3779_v63 = vadd.f32 %v3778_v6, %v3738_v21  ;;  %v4441_v21 = vld [vmem:[#allocation8 + $0x9f8] sm:$0xff]  ;;  %v3846_v6 = vadd.f32 %v7463_v41, %v3805_v8  ;;  %4558 = vmatpush.msrb.mxu1 %v4421_v43  ;;  %v3688_v41 = vadd.f32 %v7443_v37, %v7445_v53 }
 0x4af   : > { %4577 = vmatpush.msrb.mxu2 %v4441_v21 }
 0x4b0   : > { %v3820_v3 = vadd.f32 %v3819_v30, %v3779_v63  ;;  %v3726_v30 = vadd.f32 %v7441_v51, %v3685_v49  ;;  %4559 = vmatpush.msrb.mxu1 %v4420_v22  ;;  %v4439_v51 = vld [vmem:[#allocation8 + $0x9e8] sm:$0xff] }
 0x4b1   : > { %4578 = vmatpush.msrb.mxu2 %v4440_v50 }
 0x4b2   : > { %v3767_v2 = vadd.f32 %v7467_v31, %v3726_v30 }
 0x4b3   : > { %v3921_v16 = vpop.f32.mrf.mxu2  ;;  %4579 = vmatpush.msrb.mxu2 %v4439_v51  ;;  %v4433_v51 = vld [vmem:[#allocation8 + $0x9b8] sm:$0xff] }
 0x4b4   : > { %v3860_v34 = vpop.f32.mrf.mxu3  ;;  %v3808_v31 = vadd.f32 %v7465_v62, %v3767_v2 }
 0x4b5   : > { %v7491_v35 = vadd.f32 %v3860_v34, %v3820_v3  ;;  %v3880_v1 = vpop.f32.mrf.mxu1  ;;  %v4419_v34 = vld [vmem:[#allocation8 + $0x948] sm:$0xff] }
 0x4b6   : > { %v3881_v9 = vadd.f32 %v3880_v1, %v3840_v47  ;;  %4560 = vmatpush.msrb.mxu1 %v4419_v34  ;;  %v4438_v1 = vld [vmem:[#allocation8 + $0x9e0] sm:$0xff]  ;;  %v3729_v47 = vadd.f32 %v7450_v25, %v3688_v41  ;;  %v3849_v37 = vadd.f32 %v7469_v54, %v3808_v31  ;;  %v4413_v34 = vld [vmem:[#allocation8 + $0x918] sm:$0xff] }
 0x4b7   : > { %4580 = vmatpush.msrb.mxu2 %v4438_v1  ;;  %v4453_v41 = vld [vmem:[#allocation8 + $0xa58] sm:$0xff] }
 0x4b8   : > { %v3922_v36 = vadd.f32 %v3921_v16, %v3881_v9  ;;  %v4418_v16 = vld [vmem:[#allocation8 + $0x940] sm:$0xff]  ;;  %v3770_v53 = vadd.f32 %v7473_v58, %v3729_v47 }
 0x4b9   : > { %4561 = vmatpush.msrb.mxu1 %v4418_v16 }
 0x4ba   : > { %v3811_v43 = vadd.f32 %v7471_v23, %v3770_v53 }
 0x4bb   : > { %v3924_v52 = vpop.f32.mrf.mxu2 }
 0x4bc   : > { %v3962_v42 = vpop.f32.mrf.mxu3 }
 0x4bd   : > { %v3883_v60 = vpop.f32.mrf.mxu1  ;;  %v3963_v29 = vadd.f32 %v3962_v42, %v3922_v36  ;;  %v4417_v42 = vld [vmem:[#allocation8 + $0x938] sm:$0xff] }
 0x4be   : > { %v3884_v7 = vadd.f32 %v3883_v60, %v3843_v0  ;;  %v4437_v0 = vld [vmem:[#allocation8 + $0x9d8] sm:$0xff]  ;;  %4562 = vmatpush.msrb.mxu1 %v4417_v42 }
 0x4bf   : > { %v3991_v56 = vmul.f32 %v7496_v24, %v3963_v29  ;;  %v4457_v36 = vld [vmem:[#allocation8 + $0xa78] sm:$0xff]  ;;  %4581 = vmatpush.msrb.mxu2 %v4437_v0  ;;  %v4416_v29 = vld [vmem:[#allocation8 + $0x930] sm:$0xff] }
 0x4c0   : > { %v3925_v40 = vadd.f32 %v3924_v52, %v3884_v7  ;;  %4600 = vmatpush.msrb.mxu3 %v4457_v36  ;;  %v4436_v7 = vld [vmem:[#allocation8 + $0x9d0] sm:$0xff]  ;;  %4563 = vmatpush.msrb.mxu1 %v4416_v29 }
 0x4c1   : > { %v4004_v63 = vadd.f32 %v7499_v44, %v3991_v56  ;;  %4582 = vmatpush.msrb.mxu2 %v4436_v7  ;;  %v4415_v56 = vld [vmem:[#allocation8 + $0x928] sm:$0xff] }
 0x4c2   : > { %4601 = vmatpush.msrb.mxu3 %v4456_v32  ;;  %4564 = vmatpush.msrb.mxu1 %v4415_v56  ;;  %v4430_v32 = vld [vmem:[#allocation8 + $0x9a0] sm:$0xff] }
 0x4c3   : > { %v3927_v27 = vpop.f32.mrf.mxu2  ;;  %v4012_v19 = vmax.f32 %v4004_v63, 0.0  ;;  %v4454_v63 = vld [vmem:[#allocation8 + $0xa60] sm:$0xff] }
 0x4c4   : > { %v3965_v33 = vpop.f32.mrf.mxu3  ;;  %4602 = vmatpush.msrb.mxu3 %v4455_v5 }
 0x4c5   : > { %v3966_v28 = vadd.f32 %v3965_v33, %v3925_v40  ;;  %v3886_v39 = vpop.f32.mrf.mxu1  ;;  %v4435_v40 = vld [vmem:[#allocation8 + $0x9c8] sm:$0xff] }
 0x4c6   : > { %v3887_v3 = vadd.f32 %v3886_v39, %v3846_v6  ;;  %4583 = vmatpush.msrb.mxu2 %v4435_v40  ;;  %v4414_v6 = vld [vmem:[#allocation8 + $0x920] sm:$0xff]  ;;  %4603 = vmatpush.msrb.mxu3 %v4454_v63 }
 0x4c7   : > { %v3992_v4 = vmul.f32 %v7496_v24, %v3966_v28  ;;  %v4434_v39 = vld [vmem:[#allocation8 + $0x9c0] sm:$0xff]  ;;  %4565 = vmatpush.msrb.mxu1 %v4414_v6 }
 0x4c8   : > { %v3928_v55 = vadd.f32 %v3927_v27, %v3887_v3  ;;  %v3691_v27 = vadd.f32 %v7452_v45, %v7454_v14  ;;  %4584 = vmatpush.msrb.mxu2 %v4434_v39  ;;  %v3852_v45 = vadd.f32 %v7475_v18, %v3811_v43  ;;  %4604 = vmatpush.msrb.mxu3 %v4453_v41  ;;  %v4448_v41 = vld [vmem:[#allocation8 + $0xa30] sm:$0xff] }
 0x4c9   : > { %v4005_v17 = vadd.f32 %v7499_v44, %v3992_v4  ;;  %4566 = vmatpush.msrb.mxu1 %v4413_v34 }
 0x4ca   : > { %4585 = vmatpush.msrb.mxu2 %v4433_v51  ;;  %v4428_v51 = vld [vmem:[#allocation8 + $0x990] sm:$0xff] }
 0x4cb   : > { %v4013_v48 = vmax.f32 %v4005_v17, 0.0  ;;  %v3930_v15 = vpop.f32.mrf.mxu2  ;;  %v3732_v17 = vadd.f32 %v7459_v61, %v3691_v27 }
 0x4cc   : > { %v3968_v9 = vpop.f32.mrf.mxu3 }
 0x4cd   : > { %v4020_v26 = vmax.f32 %v4012_v19, %v4013_v48  ;;  %v3969_v52 = vadd.f32 %v3968_v9, %v3928_v55  ;;  %v3889_v46 = vpop.f32.mrf.mxu1  ;;  %v3773_v31 = vadd.f32 %v7479_v38, %v3732_v17  ;;  %v4412_v9 = vld [vmem:[#allocation8 + $0x910] sm:$0xff]  ;;  %v4431_v38 = vld [vmem:[#allocation8 + $0x9a8] sm:$0xff] }
 0x4ce   : > { %v3890_v10 = vadd.f32 %v3889_v46, %v3849_v37  ;;  %4567 = vmatpush.msrb.mxu1 %v4412_v9 }
 0x4cf   : > { %v4028_v25 = vrot.slane %v4020_v26, 2  ;;  %v4029_v20 = vrot.slane %v4020_v26, 4  ;;  %v4030_v62 = vrot.slane %v4020_v26, 6  ;;  %v4052_v60 = vsel %vm2662_vm1, %v4020_v26, -inf  ;;  %v4432_v26 = vld [vmem:[#allocation8 + $0x9b0] sm:$0xff] }
 0x4d0   : > { %v4053_v11 = vrot.slane %v4052_v60, 4  ;;  %v3993_v21 = vmul.f32 %v7496_v24, %v3969_v52  ;;  %v3931_v30 = vadd.f32 %v3930_v15, %v3890_v10  ;;  %v4452_v15 = vld [vmem:[#allocation8 + $0xa50] sm:$0xff]  ;;  %4586 = vmatpush.msrb.mxu2 %v4432_v26  ;;  %v4411_v52 = vld [vmem:[#allocation8 + $0x908] sm:$0xff]  ;;  %v4410_v10 = vld [vmem:[#allocation8 + $0x900] sm:$0xff] }
 0x4d1   : > { %v4059_v54 = vsel %vm2662_vm1, %v4028_v25, -inf  ;;  %v4066_v58 = vsel %vm2662_vm1, %v4029_v20, -inf  ;;  %v4073_v59 = vsel %vm2662_vm1, %v4030_v62, -inf  ;;  %4605 = vmatpush.msrb.mxu3 %v4452_v15  ;;  %4568 = vmatpush.msrb.mxu1 %v4411_v52  ;;  %v4451_v62 = vld [vmem:[#allocation8 + $0xa48] sm:$0xff] }
 0x4d2   : > { %v4054_v49 = vmax.f32 %v4052_v60, %v4053_v11  ;;  %v4060_v8 = vrot.slane %v4059_v54, 4  ;;  %v4067_v33 = vrot.slane %v4066_v58, 4  ;;  %v4074_v28 = vrot.slane %v4073_v59, 4  ;;  %4587 = vmatpush.msrb.mxu2 %v4431_v38  ;;  %v4471_v15 = vld [vmem:[#allocation8 + $0xae8] sm:$0xff] }
 0x4d3   : > { %v3933_v23 = vpop.f32.mrf.mxu2  ;;  %v4006_v55 = vadd.f32 %v7499_v44, %v3993_v21  ;;  %v3814_v60 = vadd.f32 %v7477_v13, %v3773_v31  ;;  %4606 = vmatpush.msrb.mxu3 %v4451_v62  ;;  %4569 = vmatpush.msrb.mxu1 %v4410_v10  ;;  %v4427_v31 = vld [vmem:[#allocation8 + $0x988] sm:$0xff] }
 0x4d4   : > { %v4055_v4 = vrot.slane %v4054_v49, 2  ;;  %v4061_v22 = vmax.f32 %v4059_v54, %v4060_v8  ;;  %v4068_v50 = vmax.f32 %v4066_v58, %v4067_v33  ;;  %v4075_v2 = vmax.f32 %v4073_v59, %v4074_v28  ;;  %v3971_v3 = vpop.f32.mrf.mxu3  ;;  %v4450_v54 = vld [vmem:[#allocation8 + $0xa40] sm:$0xff]  ;;  %4588 = vmatpush.msrb.mxu2 %v4430_v32  ;;  %v4449_v8 = vld [vmem:[#allocation8 + $0xa38] sm:$0xff] }
 0x4d5   : > { %v3972_v14 = vadd.f32 %v3971_v3, %v3931_v30  ;;  %v3892_v47 = vpop.f32.mrf.mxu1  ;;  %v4014_v29 = vmax.f32 %v4006_v55, 0.0  ;;  %4607 = vmatpush.msrb.mxu3 %v4450_v54  ;;  %v3855_v33 = vadd.f32 %v7481_v57, %v3814_v60  ;;  %v4473_v30 = vld [vmem:[#allocation8 + $0xaf8] sm:$0xff]  ;;  %v4447_v55 = vld [vmem:[#allocation8 + $0xa28] sm:$0xff] }
 0x4d6   : > { %v4056_v19 = vmax.f32 %v4054_v49, %v4055_v4  ;;  %v4062_v48 = vrot.slane %v4061_v22, 2  ;;  %v4069_v16 = vrot.slane %v4068_v50, 2  ;;  %v4076_v1 = vrot.slane %v4075_v2, 2  ;;  %v4429_v49 = vld [vmem:[#allocation8 + $0x998] sm:$0xff]  ;;  %4623 = vmatpush.msra.mxu1 %v4473_v30 }
 0x4d7   : > { %v3994_v61 = vmul.f32 %v7496_v24, %v3972_v14  ;;  %v3893_v18 = vadd.f32 %v3892_v47, %v3852_v45  ;;  %4589 = vmatpush.msrb.mxu2 %v4429_v49  ;;  %4608 = vmatpush.msrb.mxu3 %v4449_v8 }
 0x4d8   : > { %v4057_v42 = vrot.slane %v4056_v19, 1  ;;  %v4063_v0 = vmax.f32 %v4061_v22, %v4062_v48  ;;  %v4070_v36 = vmax.f32 %v4068_v50, %v4069_v16  ;;  %v4077_v37 = vmax.f32 %v4075_v2, %v4076_v1  ;;  %v4513_v48 = vld [vmem:[#allocation8 + $0xc38] sm:$0xff] }
 0x4d9   : > { %v4007_v53 = vadd.f32 %v7499_v44, %v3994_v61  ;;  %v3934_v11 = vadd.f32 %v3933_v23, %v3893_v18  ;;  %4590 = vmatpush.msrb.mxu2 %v4428_v51  ;;  %4609 = vmatpush.msrb.mxu3 %v4448_v41  ;;  %v4442_v41 = vld [vmem:[#allocation8 + $0xa00] sm:$0xff] }
 0x4da   : > { %v4064_v46 = vrot.slane %v4063_v0, 1  ;;  %v4071_v25 = vrot.slane %v4070_v36, 1  ;;  %v4078_v20 = vrot.slane %v4077_v37, 1  ;;  %v4058_v58 = vmax.f32 %v4056_v19, %v4057_v42  ;;  %v4472_v19 = vld [vmem:[#allocation8 + $0xaf0] sm:$0xff]  ;;  %4700 = vmatpush.msrb.mxu0 %v4513_v48 }
 0x4db   : > { %v4015_v7 = vmax.f32 %v4007_v53, 0.0  ;;  %v3936_v21 = vpop.f32.mrf.mxu2  ;;  %4624 = vmatpush.msra.mxu1 %v4472_v19  ;;  %4591 = vmatpush.msrb.mxu2 %v4427_v31  ;;  %v4466_v19 = vld [vmem:[#allocation8 + $0xac0] sm:$0xff] }
 0x4dc   : > { %v4065_v59 = vmax.f32 %v4063_v0, %v4064_v46  ;;  %v4072_v56 = vmax.f32 %v4070_v36, %v4071_v25  ;;  %v3974_v40 = vpop.f32.mrf.mxu3  ;;  %v4079_v13 = vmax.f32 %v4077_v37, %v4078_v20  ;;  %4610 = vmatpush.msrb.mxu3 %v4447_v55  ;;  %v4426_v36 = vld [vmem:[#allocation8 + $0x980] sm:$0xff] }
 0x4dd   : > { %v4021_v5 = vmax.f32 %v4014_v29, %v4015_v7  ;;  %v3975_v27 = vadd.f32 %v3974_v40, %v3934_v11  ;;  %v3895_v43 = vpop.f32.mrf.mxu1  ;;  %v4446_v37 = vld [vmem:[#allocation8 + $0xa20] sm:$0xff]  ;;  %4625 = vmatpush.msra.mxu1 %v4471_v15  ;;  %4592 = vmatpush.msrb.mxu2 %v4426_v36  ;;  %v4445_v29 = vld [vmem:[#allocation8 + $0xa18] sm:$0xff] }
 0x4de   : > { %v4180_v28 = vsel %vm3175_vm2, %v4065_v59, %v4058_v58  ;;  %v3896_v57 = vadd.f32 %v3895_v43, %v3855_v33  ;;  %v4470_v25 = vld [vmem:[#allocation8 + $0xae0] sm:$0xff]  ;;  %4611 = vmatpush.msrb.mxu3 %v4446_v37  ;;  %v4469_v33 = vld [vmem:[#allocation8 + $0xad8] sm:$0xff] }
 0x4df   : > { %v4181_v6 = vsel %vm3177_vm3, %v4072_v56, %v4180_v28  ;;  %v4031_v39 = vrot.slane %v4021_v5, 2  ;;  %v4032_v63 = vrot.slane %v4021_v5, 4  ;;  %v4033_v4 = vrot.slane %v4021_v5, 6  ;;  %4626 = vmatpush.msra.mxu1 %v4470_v25  ;;  %v4444_v28 = vld [vmem:[#allocation8 + $0xa10] sm:$0xff] }
 0x4e0   : > { %v4182_v22 = vsel %vm3179_vm4, %v4079_v13, %v4181_v6  ;;  %v4080_v50 = vsel %vm2662_vm1, %v4021_v5, -inf  ;;  %v3995_v1 = vmul.f32 %v7496_v24, %v3975_v27  ;;  %v3937_v47 = vadd.f32 %v3936_v21, %v3896_v57  ;;  %4612 = vmatpush.msrb.mxu3 %v4445_v29  ;;  %v4489_v13 = vld [vmem:[#allocation8 + $0xb78] sm:$0xff]  ;;  %v4222_v57 = vld [vmem:[#allocation4 + $0x1] sm:$0xf] }
 0x4e1   : > { %4197 = vst [vmem:[#allocation4 + $0x9] sm:$0xf] %v4182_v22  ;;  %v4081_v2 = vrot.slane %v4080_v50, 4  ;;  %v4087_v3 = vsel %vm2662_vm1, %v4031_v39, -inf  ;;  %v4094_v17 = vsel %vm2662_vm1, %v4032_v63, -inf  ;;  %v4101_v45 = vsel %vm2662_vm1, %v4033_v4, -inf  ;;  %4627 = vmatpush.msra.mxu1 %v4469_v33  ;;  %4646 = vmatpush.msra.mxu2 %v4489_v13 }
 0x4e2   : > { %v4088_v14 = vrot.slane %v4087_v3, 4  ;;  %v4095_v23 = vrot.slane %v4094_v17, 4  ;;  %v4102_v34 = vrot.slane %v4101_v45, 4  ;;  %v4008_v62 = vadd.f32 %v7499_v44, %v3995_v1  ;;  %v4468_v39 = vld [vmem:[#allocation8 + $0xad0] sm:$0xff]  ;;  %v4443_v4 = vld [vmem:[#allocation8 + $0xa08] sm:$0xff]  ;;  %4613 = vmatpush.msrb.mxu3 %v4444_v28  ;;  %v4482_v28 = vld [vmem:[#allocation8 + $0xb40] sm:$0xff] }
 0x4e3   : > { %v4082_v16 = vmax.f32 %v4080_v50, %v4081_v2  ;;  %v3939_v54 = vpop.f32.mrf.mxu2  ;;  %v4488_v63 = vld [vmem:[#allocation8 + $0xb70] sm:$0xff]  ;;  %v4467_v50 = vld [vmem:[#allocation8 + $0xac8] sm:$0xff]  ;;  %4628 = vmatpush.msra.mxu1 %v4468_v39 }
 0x4e4   : > { %v4089_v61 = vmax.f32 %v4087_v3, %v4088_v14  ;;  %v4096_v18 = vmax.f32 %v4094_v17, %v4095_v23  ;;  %v4103_v9 = vmax.f32 %v4101_v45, %v4102_v34  ;;  %v3977_v26 = vpop.f32.mrf.mxu3  ;;  %v4016_v49 = vmax.f32 %v4008_v62, 0.0  ;;  %v4487_v45 = vld [vmem:[#allocation8 + $0xb68] sm:$0xff]  ;;  %4647 = vmatpush.msra.mxu2 %v4488_v63  ;;  %4614 = vmatpush.msrb.mxu3 %v4443_v4  ;;  %v4484_v29 = vld [vmem:[#allocation8 + $0xb50] sm:$0xff] }
 0x4e5   : > { %v4083_v42 = vrot.slane %v4082_v16, 2  ;;  %v3978_v0 = vadd.f32 %v3977_v26, %v3937_v47  ;;  %v3898_v46 = vpop.f32.mrf.mxu1  ;;  %4629 = vmatpush.msra.mxu1 %v4467_v50 }
 0x4e6   : > { %v4090_v53 = vrot.slane %v4089_v61, 2  ;;  %v4097_v52 = vrot.slane %v4096_v18, 2  ;;  %v4104_v38 = vrot.slane %v4103_v9, 2  ;;  %v3899_v30 = vadd.f32 %v3898_v46, %v7485_v12  ;;  %4648 = vmatpush.msra.mxu2 %v4487_v45  ;;  %4615 = vmatpush.msrb.mxu3 %v4442_v41  ;;  %v4464_v46 = vld [vmem:[#allocation8 + $0xab0] sm:$0xff] }
 0x4e7   : > { %v4084_v20 = vmax.f32 %v4082_v16, %v4083_v42  ;;  %v3996_v60 = vmul.f32 %v7496_v24, %v3978_v0  ;;  %4630 = vmatpush.msra.mxu1 %v4466_v19 }
 0x4e8   : > { %v4202_v7 = vld [vmem:[#allocation4 + $0x8] sm:$0xf]  ;;  %v4091_v11 = vmax.f32 %v4089_v61, %v4090_v53  ;;  %v4098_v10 = vmax.f32 %v4096_v18, %v4097_v52  ;;  %v4105_v32 = vmax.f32 %v4103_v9, %v4104_v38  ;;  %v3940_v47 = vadd.f32 %v3939_v54, %v3899_v30  ;;  %v4486_v61 = vld [vmem:[#allocation8 + $0xb60] sm:$0xff] }
 0x4e9   : > { %4211 = vst [vmem:[#allocation1 + $0x1] ss:$2 sm:$0xff] %v4202_v7  ;;  %v4009_v58 = vadd.f32 %v7499_v44, %v3996_v60  ;;  %v4085_v59 = vrot.slane %v4084_v20, 1  ;;  %v4223_v14 = vld [vmem:[#allocation4 + $0x9] sm:$0xf]  ;;  %4649 = vmatpush.msra.mxu2 %v4486_v61  ;;  %v4458_v61 = vld [vmem:[#allocation8 + $0xa80] sm:$0xff] }
 0x4ea   : > { %v4092_v56 = vrot.slane %v4091_v11, 1  ;;  %v4099_v40 = vrot.slane %v4098_v10, 1  ;;  %v4106_v5 = vrot.slane %v4105_v32, 1  ;;  %v4465_v18 = vld [vmem:[#allocation8 + $0xab8] sm:$0xff] }
 0x4eb   : > { %v4017_v8 = vmax.f32 %v4009_v58, 0.0  ;;  %v4086_v27 = vmax.f32 %v4084_v20, %v4085_v59  ;;  %v3942_v55 = vpop.f32.mrf.mxu2  ;;  %4631 = vmatpush.msra.mxu1 %v4465_v18  ;;  %v4483_v58 = vld [vmem:[#allocation8 + $0xb48] sm:$0xff]  ;;  %v4243_v59 = vld [vmem:[#allocation4 + $0x2] sm:$0xf]  ;;  %v4244_v33 = vld [vmem:[#allocation4 + $0xa] sm:$0xf] }
 0x4ec   : > { %v4093_v43 = vmax.f32 %v4091_v11, %v4092_v56  ;;  %v4100_v21 = vmax.f32 %v4098_v10, %v4099_v40  ;;  %v3980_v6 = vpop.f32.mrf.mxu3  ;;  %v4107_v2 = vmax.f32 %v4105_v32, %v4106_v5  ;;  %v4463_v10 = vld [vmem:[#allocation8 + $0xaa8] sm:$0xff] }
 0x4ed   : > { %v4022_v22 = vmax.f32 %v4016_v49, %v4017_v8  ;;  %v3901_v17 = vpop.f32.mrf.mxu1  ;;  %v3981_v53 = vadd.f32 %v3980_v6, %v3940_v47  ;;  %4632 = vmatpush.msra.mxu1 %v4464_v46  ;;  %v4462_v49 = vld [vmem:[#allocation8 + $0xaa0] sm:$0xff]  ;;  %v4505_v8 = vld [vmem:[#allocation8 + $0xbf8] sm:$0xff]  ;;  %v4511_v47 = vld [vmem:[#allocation8 + $0xc28] sm:$0xff] }
 0x4ee   : > { %v4183_v3 = vsel %vm3175_vm2, %v4093_v43, %v4086_v27  ;;  %v3902_v31 = vadd.f32 %v3901_v17, %v7491_v35  ;;  %v4485_v35 = vld [vmem:[#allocation8 + $0xb58] sm:$0xff]  ;;  %4669 = vmatpush.msra.mxu3 %v4505_v8 }
 0x4ef   : > { %v4184_v23 = vsel %vm3177_vm3, %v4100_v21, %v4183_v3  ;;  %v4034_v12 = vrot.slane %v4022_v22, 2  ;;  %v4035_v34 = vrot.slane %v4022_v22, 4  ;;  %v4036_v51 = vrot.slane %v4022_v22, 6  ;;  %4650 = vmatpush.msra.mxu2 %v4485_v35  ;;  %4633 = vmatpush.msra.mxu1 %v4463_v10  ;;  %v4461_v43 = vld [vmem:[#allocation8 + $0xa98] sm:$0xff]  ;;  %v4504_v21 = vld [vmem:[#allocation8 + $0xbf0] sm:$0xff] }
 0x4f0   : > { %v4216_v48 = vld.sshfl [vmem:[#allocation1] sm:$0xff pattern:$0x75316420]  ;;  %v4185_v16 = vsel %vm3179_vm4, %v4107_v2, %v4184_v23  ;;  %v4108_v1 = vsel %vm2662_vm1, %v4022_v22, -inf  ;;  %v3943_v38 = vadd.f32 %v3942_v55, %v3902_v31  ;;  %v3997_v54 = vmul.f32 %v7496_v24, %v3981_v53  ;;  %4670 = vmatpush.msra.mxu3 %v4504_v21  ;;  %v4460_v23 = vld [vmem:[#allocation8 + $0xa90] sm:$0xff]  ;;  %v4502_v55 = vld [vmem:[#allocation8 + $0xbe0] sm:$0xff] }
 0x4f1   : > { %4230 = vst [vmem:[#allocation1] ss:$2 sm:$0xff] %v4222_v57  ;;  %v4109_v9 = vrot.slane %v4108_v1, 4  ;;  %v4115_v26 = vsel %vm2662_vm1, %v4034_v12, -inf  ;;  %v4122_v15 = vsel %vm2662_vm1, %v4035_v34, -inf  ;;  %v4129_v42 = vsel %vm2662_vm1, %v4036_v51, -inf  ;;  %4570 = vmatmul.f32.vlgmr.msrb.gmra.mxu1 %v4216_v48  ;;  %4651 = vmatpush.msra.mxu2 %v4484_v29 }
 0x4f2   : > { %4232 = vst [vmem:[#allocation1 + $0x1] ss:$2 sm:$0xff] %v4223_v14  ;;  %v4116_v0 = vrot.slane %v4115_v26, 4  ;;  %v4123_v36 = vrot.slane %v4122_v15, 4  ;;  %v4130_v37 = vrot.slane %v4129_v42, 4  ;;  %v4010_v39 = vadd.f32 %v7499_v44, %v3997_v54  ;;  %4634 = vmatpush.msra.mxu1 %v4462_v49  ;;  %v4512_v57 = vld [vmem:[#allocation8 + $0xc30] sm:$0xff] }
 0x4f3   : > { %4198 = vst [vmem:[#allocation4 + $0x11] sm:$0xf] %v4185_v16  ;;  %v4110_v52 = vmax.f32 %v4108_v1, %v4109_v9  ;;  %4652 = vmatpush.msra.mxu2 %v4483_v58  ;;  %4701 = vmatpush.msrb.mxu0 %v4512_v57  ;;  %v4480_v12 = vld [vmem:[#allocation8 + $0xb30] sm:$0xff]  ;;  %v4503_v34 = vld [vmem:[#allocation8 + $0xbe8] sm:$0xff]  ;;  %v4264_v51 = vld [vmem:[#allocation4 + $0x8] sm:$0xf] }
 0x4f4   : > { %v4117_v25 = vmax.f32 %v4115_v26, %v4116_v0  ;;  %v4124_v20 = vmax.f32 %v4122_v15, %v4123_v36  ;;  %v4131_v62 = vmax.f32 %v4129_v42, %v4130_v37  ;;  %v3983_v60 = vpop.f32.mrf.mxu3  ;;  %4635 = vmatpush.msra.mxu1 %v4461_v43  ;;  %v4018_v3 = vmax.f32 %v4010_v39, 0.0  ;;  %v4479_v48 = vld [vmem:[#allocation8 + $0xb28] sm:$0xff]  ;;  %4671 = vmatpush.msra.mxu3 %v4503_v34  ;;  %v4478_v15 = vld [vmem:[#allocation8 + $0xb20] sm:$0xff]  ;;  %v4537_v42 = vld [vmem:[#allocation8 + $0xcf8] sm:$0xff] }
 0x4f5   : > { %v4111_v7 = vrot.slane %v4110_v52, 2  ;;  %v3984_v11 = vadd.f32 %v3983_v60, %v3943_v38  ;;  %4653 = vmatpush.msra.mxu2 %v4482_v28  ;;  %4702 = vmatpush.msrb.mxu0 %v4511_v47  ;;  %v4501_v35 = vld [vmem:[#allocation8 + $0xbd8] sm:$0xff]  ;;  %v4510_v54 = vld [vmem:[#allocation8 + $0xc20] sm:$0xff]  ;;  %v4476_v58 = vld [vmem:[#allocation8 + $0xb10] sm:$0xff] }
 0x4f6   : > { %v4118_v32 = vrot.slane %v4117_v25, 2  ;;  %v4125_v56 = vrot.slane %v4124_v20, 2  ;;  %v4132_v40 = vrot.slane %v4131_v62, 2  ;;  %4636 = vmatpush.msra.mxu1 %v4460_v23  ;;  %4672 = vmatpush.msra.mxu3 %v4502_v55  ;;  %v4477_v46 = vld [vmem:[#allocation8 + $0xb18] sm:$0xff]  ;;  %v4498_v43 = vld [vmem:[#allocation8 + $0xbc0] sm:$0xff]  ;;  %v4496_v34 = vld [vmem:[#allocation8 + $0xbb0] sm:$0xff] }
 0x4f7   : > { %v3998_v5 = vmul.f32 %v7496_v24, %v3984_v11  ;;  %v4112_v13 = vmax.f32 %v4110_v52, %v4111_v7  ;;  %v4481_v24 = vld [vmem:[#allocation8 + $0xb38] sm:$0xff]  ;;  %4703 = vmatpush.msrb.mxu0 %v4510_v54  ;;  %v4534_v21 = vld [vmem:[#allocation8 + $0xce0] sm:$0xff]  ;;  %v4531_v47 = vld [vmem:[#allocation8 + $0xcc8] sm:$0xff] }
 0x4f8   : > { %v4119_v6 = vmax.f32 %v4117_v25, %v4118_v32  ;;  %v4126_v63 = vmax.f32 %v4124_v20, %v4125_v56  ;;  %v4133_v4 = vmax.f32 %v4131_v62, %v4132_v40  ;;  %4654 = vmatpush.msra.mxu2 %v4481_v24  ;;  %v4500_v25 = vld [vmem:[#allocation8 + $0xbd0] sm:$0xff]  ;;  %4673 = vmatpush.msra.mxu3 %v4501_v35  ;;  %v4509_v56 = vld [vmem:[#allocation8 + $0xc18] sm:$0xff]  ;;  %v4499_v40 = vld [vmem:[#allocation8 + $0xbc8] sm:$0xff] }
 0x4f9   : > { %v4237_v27 = vld.sshfl [vmem:[#allocation1] sm:$0xff pattern:$0x75316420]  ;;  %v4011_v22 = vadd.f32 %v7499_v44, %v3998_v5  ;;  %v4113_v50 = vrot.slane %v4112_v13, 1  ;;  %v4459_v44 = vld [vmem:[#allocation8 + $0xa88] sm:$0xff]  ;;  %v4536_v20 = vld [vmem:[#allocation8 + $0xcf0] sm:$0xff]  ;;  %4704 = vmatpush.msrb.mxu0 %v4509_v56 }
 0x4fa   : > { %4251 = vst [vmem:[#allocation1] ss:$2 sm:$0xff] %v4243_v59  ;;  %v4203_v30 = vld [vmem:[#allocation4 + $0x10] sm:$0xf]  ;;  %4593 = vmatmul.f32.vlgmr.msrb.gmra.mxu2 %v4237_v27  ;;  %v4120_v2 = vrot.slane %v4119_v6, 1  ;;  %v4127_v17 = vrot.slane %v4126_v63, 1  ;;  %4637 = vmatpush.msra.mxu1 %v4459_v44 }
 0x4fb   : > { %4253 = vst [vmem:[#allocation1 + $0x1] ss:$2 sm:$0xff] %v4244_v33  ;;  %v4134_v45 = vrot.slane %v4133_v4, 1  ;;  %v4019_v14 = vmax.f32 %v4011_v22, 0.0  ;;  %v4114_v41 = vmax.f32 %v4112_v13, %v4113_v50  ;;  %4655 = vmatpush.msra.mxu2 %v4480_v12  ;;  %v4265_v16 = vld [vmem:[#allocation4 + $0x10] sm:$0xf]  ;;  %4674 = vmatpush.msra.mxu3 %v4500_v25 }
 0x4fc   : > { %4213 = vst [vmem:[#allocation1 + $0x10] ss:$2 sm:$0xff] %v4203_v30  ;;  %v4121_v19 = vmax.f32 %v4119_v6, %v4120_v2  ;;  %v4128_v1 = vmax.f32 %v4126_v63, %v4127_v17  ;;  %4638 = vmatpush.msra.mxu1 %v4458_v61  ;;  %v4535_v5 = vld [vmem:[#allocation8 + $0xce8] sm:$0xff]  ;;  %v4285_v28 = vld [vmem:[#allocation4 + $0x9] sm:$0xf]  ;;  %v4508_v30 = vld [vmem:[#allocation8 + $0xc10] sm:$0xff] }
 0x4fd   : > { %v4023_v31 = vmax.f32 %v4018_v3, %v4019_v14  ;;  %v4135_v9 = vmax.f32 %v4133_v4, %v4134_v45  ;;  %4656 = vmatpush.msra.mxu2 %v4479_v48  ;;  %v4475_v13 = vld [vmem:[#allocation8 + $0xb08] sm:$0xff]  ;;  %v4286_v6 = vld [vmem:[#allocation4 + $0x11] sm:$0xf]  ;;  %4675 = vmatpush.msra.mxu3 %v4499_v40  ;;  %v4497_v22 = vld [vmem:[#allocation8 + $0xbb8] sm:$0xff] }
 0x4fe   : > { %v4186_v26 = vsel %vm3175_vm2, %v4121_v19, %v4114_v41  ;;  %4715 = vmatpush.msrb.mxu1 %v4537_v42  ;;  %v4474_v4 = vld [vmem:[#allocation8 + $0xb00] sm:$0xff]  ;;  %v4533_v2 = vld [vmem:[#allocation8 + $0xcd8] sm:$0xff]  ;;  %4705 = vmatpush.msrb.mxu0 %v4508_v30  ;;  %v4507_v3 = vld [vmem:[#allocation8 + $0xc08] sm:$0xff] }
 0x4ff   : > { %v4187_v0 = vsel %vm3177_vm3, %v4128_v1, %v4186_v26  ;;  %v4037_v36 = vrot.slane %v4023_v31, 2  ;;  %v4038_v37 = vrot.slane %v4023_v31, 4  ;;  %v4039_v53 = vrot.slane %v4023_v31, 6  ;;  %4657 = vmatpush.msra.mxu2 %v4478_v15  ;;  %4676 = vmatpush.msra.mxu3 %v4498_v43  ;;  %v4553_v12 = vld [vmem:[#allocation8 + $0xd78] sm:$0xff]  ;;  %v4552_v41 = vld [vmem:[#allocation8 + $0xd70] sm:$0xff]  ;;  %v4495_v19 = vld [vmem:[#allocation8 + $0xba8] sm:$0xff] }
 0x500   : > { %v4188_v52 = vsel %vm3179_vm4, %v4135_v9, %v4187_v0  ;;  %v4136_v38 = vsel %vm2662_vm1, %v4023_v31, -inf  ;;  %4716 = vmatpush.msrb.mxu1 %v4536_v20  ;;  %4706 = vmatpush.msrb.mxu0 %v4507_v3  ;;  %v4551_v31 = vld [vmem:[#allocation8 + $0xd68] sm:$0xff]  ;;  %v4494_v55 = vld [vmem:[#allocation8 + $0xba0] sm:$0xff]  ;;  %v4306_v0 = vld [vmem:[#allocation4 + $0xa] sm:$0xf] }
 0x501   : > { %4199 = vst [vmem:[#allocation4 + $0x19] sm:$0xf] %v4188_v52  ;;  %v4137_v62 = vrot.slane %v4136_v38, 4  ;;  %v4143_v60 = vsel %vm2662_vm1, %v4037_v36, -inf  ;;  %v4150_v29 = vsel %vm2662_vm1, %v4038_v37, -inf  ;;  %v4157_v7 = vsel %vm2662_vm1, %v4039_v53, -inf  ;;  %4658 = vmatpush.msra.mxu2 %v4477_v46  ;;  %4677 = vmatpush.msra.mxu3 %v4497_v22 }
 0x502   : > { %v4258_v18 = vld.sshfl [vmem:[#allocation1] sm:$0xff pattern:$0x75316420]  ;;  %v4144_v11 = vrot.slane %v4143_v60, 4  ;;  %v4151_v10 = vrot.slane %v4150_v29, 4  ;;  %v4158_v32 = vrot.slane %v4157_v7, 4  ;;  %4717 = vmatpush.msrb.mxu1 %v4535_v5 }
 0x503   : > { %4272 = vst [vmem:[#allocation1] ss:$2 sm:$0xff] %v4264_v51  ;;  %4616 = vmatmul.f32.vlgmr.msrb.gmra.mxu3 %v4258_v18  ;;  %v4138_v59 = vmax.f32 %v4136_v38, %v4137_v62  ;;  %4659 = vmatpush.msra.mxu2 %v4476_v58  ;;  %v4532_v51 = vld [vmem:[#allocation8 + $0xcd0] sm:$0xff]  ;;  %v4506_v61 = vld [vmem:[#allocation8 + $0xc00] sm:$0xff]  ;;  %v4493_v37 = vld [vmem:[#allocation8 + $0xb98] sm:$0xff] }
 0x504   : > { %4274 = vst [vmem:[#allocation1 + $0x1] ss:$2 sm:$0xff] %v4265_v16  ;;  %v4145_v49 = vmax.f32 %v4143_v60, %v4144_v11  ;;  %v4152_v8 = vmax.f32 %v4150_v29, %v4151_v10  ;;  %v4159_v33 = vmax.f32 %v4157_v7, %v4158_v32  ;;  %4718 = vmatpush.msrb.mxu1 %v4534_v21  ;;  %v4530_v15 = vld [vmem:[#allocation8 + $0xcc0] sm:$0xff]  ;;  %v4529_v38 = vld [vmem:[#allocation8 + $0xcb8] sm:$0xff]  ;;  %v4492_v62 = vld [vmem:[#allocation8 + $0xb90] sm:$0xff] }
 0x505   : > { %v4139_v27 = vrot.slane %v4138_v59, 2  ;;  %4660 = vmatpush.msra.mxu2 %v4475_v13  ;;  %4678 = vmatpush.msra.mxu3 %v4496_v34  ;;  %v4550_v42 = vld [vmem:[#allocation8 + $0xd60] sm:$0xff]  ;;  %v4549_v46 = vld [vmem:[#allocation8 + $0xd58] sm:$0xff]  ;;  %v4528_v7 = vld [vmem:[#allocation8 + $0xcb0] sm:$0xff] }
 0x506   : > { %v4146_v39 = vrot.slane %v4145_v49, 2  ;;  %v4153_v24 = vrot.slane %v4152_v8, 2  ;;  %v4160_v63 = vrot.slane %v4159_v33, 2  ;;  %4719 = vmatpush.msrb.mxu1 %v4533_v2  ;;  %v4307_v36 = vld [vmem:[#allocation4 + $0x12] sm:$0xf]  ;;  %4707 = vmatpush.msrb.mxu0 %v4506_v61  ;;  %v4548_v11 = vld [vmem:[#allocation8 + $0xd50] sm:$0xff] }
 0x507   : > { %v4140_v57 = vmax.f32 %v4138_v59, %v4139_v27  ;;  %4661 = vmatpush.msra.mxu2 %v4474_v4  ;;  %4679 = vmatpush.msra.mxu3 %v4495_v19  ;;  %v4224_v60 = vld [vmem:[#allocation4 + $0x11] sm:$0xf]  ;;  %v4491_v32 = vld [vmem:[#allocation8 + $0xb88] sm:$0xff]  ;;  %v4525_v5 = vld [vmem:[#allocation8 + $0xc98] sm:$0xff] }
 0x508   : > { %v4204_v17 = vld [vmem:[#allocation4 + $0x18] sm:$0xf]  ;;  %v4147_v45 = vmax.f32 %v4145_v49, %v4146_v39  ;;  %v4154_v14 = vmax.f32 %v4152_v8, %v4153_v24  ;;  %v4161_v23 = vmax.f32 %v4159_v33, %v4160_v63  ;;  %4720 = vmatpush.msrb.mxu1 %v4532_v51  ;;  %v4490_v59 = vld [vmem:[#allocation8 + $0xb80] sm:$0xff]  ;;  %v4545_v49 = vld [vmem:[#allocation8 + $0xd38] sm:$0xff] }
 0x509   : > { %4215 = vst [vmem:[#allocation1 + $0x11] ss:$2 sm:$0xff] %v4204_v17  ;;  %4738 = vmatpush.msrb.mxu2 %v4553_v12  ;;  %v4141_v44 = vrot.slane %v4140_v57, 1  ;;  %4680 = vmatpush.msra.mxu3 %v4494_v55  ;;  %v4225_v10 = vld [vmem:[#allocation4 + $0x19] sm:$0xf]  ;;  %v4526_v56 = vld [vmem:[#allocation8 + $0xca0] sm:$0xff] }
 0x50a   : > { %v4148_v48 = vrot.slane %v4147_v45, 1  ;;  %v4155_v16 = vrot.slane %v4154_v14, 1  ;;  %v4162_v1 = vrot.slane %v4161_v23, 1  ;;  %4721 = vmatpush.msrb.mxu1 %v4531_v47  ;;  %v4527_v54 = vld [vmem:[#allocation8 + $0xca8] sm:$0xff]  ;;  %v4546_v40 = vld [vmem:[#allocation8 + $0xd40] sm:$0xff]  ;;  %v4524_v27 = vld [vmem:[#allocation8 + $0xc90] sm:$0xff] }
 0x50b   : > { %v7563_v50 = vld.sshfl [vmem:[#allocation1] sm:$0xff pattern:$0x75316420]  ;;  %4739 = vmatpush.msrb.mxu2 %v4552_v41  ;;  %v4142_v18 = vmax.f32 %v4140_v57, %v4141_v44  ;;  %4681 = vmatpush.msra.mxu3 %v4493_v37  ;;  %v4547_v58 = vld [vmem:[#allocation8 + $0xd48] sm:$0xff]  ;;  %v4245_v8 = vld [vmem:[#allocation4 + $0x12] sm:$0xf] }
 0x50c   : > { %4293 = vst [vmem:[#allocation1] ss:$2 sm:$0xff] %v4285_v28  ;;  %v4149_v9 = vmax.f32 %v4147_v45, %v4148_v48  ;;  %v4156_v26 = vmax.f32 %v4154_v14, %v4155_v16  ;;  %v4163_v35 = vmax.f32 %v4161_v23, %v4162_v1  ;;  %4722 = vmatpush.msrb.mxu1 %v4530_v15  ;;  %v4328_v13 = vld [vmem:[#allocation4 + $0x10] sm:$0xf]  ;;  %v4329_v28 = vld [vmem:[#allocation4 + $0x18] sm:$0xf] }
 0x50d   : > { %4295 = vst [vmem:[#allocation1 + $0x1] ss:$2 sm:$0xff] %v4286_v6  ;;  %4740 = vmatpush.msrb.mxu2 %v4551_v31  ;;  %4682 = vmatpush.msra.mxu3 %v4492_v62  ;;  %v4544_v43 = vld [vmem:[#allocation8 + $0xd30] sm:$0xff]  ;;  %v4246_v30 = vld [vmem:[#allocation4 + $0x1a] sm:$0xf]  ;;  %v4522_v24 = vld [vmem:[#allocation8 + $0xc80] sm:$0xff] }
 0x50e   : > { %v4189_v52 = vsel %vm3175_vm2, %v4149_v9, %v4142_v18  ;;  %4723 = vmatpush.msrb.mxu1 %v4529_v38  ;;  %v4523_v6 = vld [vmem:[#allocation8 + $0xc88] sm:$0xff]  ;;  %v4542_v63 = vld [vmem:[#allocation8 + $0xd20] sm:$0xff]  ;;  %v4541_v4 = vld [vmem:[#allocation8 + $0xd18] sm:$0xff] }
 0x50f   : > { %v4190_v20 = vsel %vm3177_vm3, %v4156_v26, %v4189_v52  ;;  %4741 = vmatpush.msrb.mxu2 %v4550_v42  ;;  %4683 = vmatpush.msra.mxu3 %v4491_v32  ;;  %v4543_v39 = vld [vmem:[#allocation8 + $0xd28] sm:$0xff]  ;;  %v4349_v22 = vld [vmem:[#allocation4 + $0x11] sm:$0xf]  ;;  %v4540_v57 = vld [vmem:[#allocation8 + $0xd10] sm:$0xff] }
 0x510   : > { %v4217_v25 = vld.sshfl [vmem:[#allocation1 + $0x10] sm:$0xff pattern:$0x75316420]  ;;  %v4191_v29 = vsel %vm3179_vm4, %v4163_v35, %v4190_v20  ;;  %4724 = vmatpush.msrb.mxu1 %v4528_v7  ;;  %v4538_v23 = vld [vmem:[#allocation8 + $0xd00] sm:$0xff]  ;;  %v4331_v55 = vld [vmem:[#allocation4 + $0x28] sm:$0xf] }
 0x511   : > { %4573 = vmatmul.f32.gmra.mxu1 %v4217_v25  ;;  %4234 = vst [vmem:[#allocation1 + $0x10] ss:$2 sm:$0xff] %v4224_v60  ;;  %4742 = vmatpush.msrb.mxu2 %v4549_v46  ;;  %v4266_v2 = vld [vmem:[#allocation4 + $0x18] sm:$0xf]  ;;  %v4370_v12 = vld [vmem:[#allocation4 + $0x12] sm:$0xf] }
 0x512   : > { %4236 = vst [vmem:[#allocation1 + $0x11] ss:$2 sm:$0xff] %v4225_v10  ;;  %4725 = vmatpush.msrb.mxu1 %v4527_v54  ;;  %4684 = vmatpush.msra.mxu3 %v4490_v59  ;;  %v4350_v3 = vld [vmem:[#allocation4 + $0x19] sm:$0xf]  ;;  %v4788_v48 = vld [vmem:[#allocation5] sm:$0xf] }
 0x513   : > { %4200 = vst [vmem:[#allocation4 + $0x21] sm:$0xf] %v4191_v29  ;;  %4743 = vmatpush.msrb.mxu2 %v4548_v11  ;;  %v4539_v45 = vld [vmem:[#allocation8 + $0xd08] sm:$0xff]  ;;  %v4352_v9 = vld [vmem:[#allocation4 + $0x29] sm:$0xf]  ;;  %v5011_v35 = vld [vmem:[#allocation8 + $0xdf0] sm:$0xff] }
 0x514   : > { %v7565_v53 = vld.sshfl [vmem:[#allocation1] sm:$0xff pattern:$0x75316420]  ;;  %4726 = vmatpush.msrb.mxu1 %v4526_v56  ;;  %v4287_v51 = vld [vmem:[#allocation4 + $0x19] sm:$0xf]  ;;  %v5009_v62 = vld [vmem:[#allocation8 + $0xde0] sm:$0xff] }
 0x515   : > { %4314 = vst [vmem:[#allocation1] ss:$2 sm:$0xff] %v4306_v0  ;;  %4744 = vmatpush.msrb.mxu2 %v4547_v58  ;;  %v4371_v41 = vld [vmem:[#allocation4 + $0x1a] sm:$0xf]  ;;  %v4373_v42 = vld [vmem:[#allocation4 + $0x2a] sm:$0xf] }
 0x516   : > { %4316 = vst [vmem:[#allocation1 + $0x1] ss:$2 sm:$0xff] %v4307_v36  ;;  %4727 = vmatpush.msrb.mxu1 %v4525_v5  ;;  %v4308_v1 = vld [vmem:[#allocation4 + $0x1a] sm:$0xf]  ;;  %v5008_v29 = vld [vmem:[#allocation8 + $0xdd8] sm:$0xff]  ;;  %v5007_v11 = vld [vmem:[#allocation8 + $0xdd0] sm:$0xff] }
 0x517   : > { %4745 = vmatpush.msrb.mxu2 %v4546_v40  ;;  %v5010_v38 = vld [vmem:[#allocation8 + $0xde8] sm:$0xff]  ;;  %v5028_v7 = vld [vmem:[#allocation8 + $0xe78] sm:$0xff]  ;;  %v5027_v10 = vld [vmem:[#allocation8 + $0xe70] sm:$0xff] }
 0x518   : > { %4728 = vmatpush.msrb.mxu1 %v4524_v27  ;;  %5164 = vmatpush.msra.mxu0 %v5028_v7  ;;  %v5006_v54 = vld [vmem:[#allocation8 + $0xdc8] sm:$0xff]  ;;  %v5005_v56 = vld [vmem:[#allocation8 + $0xdc0] sm:$0xff]  ;;  %v5004_v5 = vld [vmem:[#allocation8 + $0xdb8] sm:$0xff] }
 0x519   : > { %4639 = vmatmul.f32.vlgmr.msra.gmra.mxu1 %v7563_v50  ;;  %v4238_v21 = vld.sshfl [vmem:[#allocation1 + $0x10] sm:$0xff pattern:$0x75316420]  ;;  %4746 = vmatpush.msrb.mxu2 %v4545_v49  ;;  %v5025_v40 = vld [vmem:[#allocation8 + $0xe60] sm:$0xff]  ;;  %v5024_v49 = vld [vmem:[#allocation8 + $0xe58] sm:$0xff] }
 0x51a   : > { %4255 = vst [vmem:[#allocation1 + $0x10] ss:$2 sm:$0xff] %v4245_v8  ;;  %4596 = vmatmul.f32.gmra.mxu2 %v4238_v21  ;;  %4729 = vmatpush.msrb.mxu1 %v4523_v6  ;;  %v4267_v14 = vld [vmem:[#allocation4 + $0x20] sm:$0xf]  ;;  %v5026_v58 = vld [vmem:[#allocation8 + $0xe68] sm:$0xff]  ;;  %v5044_v8 = vld [vmem:[#allocation8 + $0xef8] sm:$0xff] }
 0x51b   : > { %4257 = vst [vmem:[#allocation1 + $0x11] ss:$2 sm:$0xff] %v4246_v30  ;;  %4747 = vmatpush.msrb.mxu2 %v4544_v43  ;;  %v4288_v44 = vld [vmem:[#allocation4 + $0x21] sm:$0xf]  ;;  %5165 = vmatpush.msra.mxu0 %v5027_v10  ;;  %v5002_v30 = vld [vmem:[#allocation8 + $0xda8] sm:$0xff] }
 0x51c   : > { %4730 = vmatpush.msrb.mxu1 %v4522_v24  ;;  %v4309_v31 = vld [vmem:[#allocation4 + $0x22] sm:$0xf]  ;;  %v5022_v6 = vld [vmem:[#allocation8 + $0xe48] sm:$0xff] }
 0x51d   : > { %v4321_v33 = vld.sshfl [vmem:[#allocation1] sm:$0xff pattern:$0x75316420]  ;;  %4748 = vmatpush.msrb.mxu2 %v4543_v39  ;;  %v4330_v18 = vld [vmem:[#allocation4 + $0x20] sm:$0xf]  ;;  %5166 = vmatpush.msra.mxu0 %v5026_v58  ;;  %v5042_v39 = vld [vmem:[#allocation8 + $0xee8] sm:$0xff] }
 0x51e   : > { %4336 = vst [vmem:[#allocation1] ss:$2 sm:$0xff] %v4328_v13  ;;  %v4351_v15 = vld [vmem:[#allocation4 + $0x21] sm:$0xf]  ;;  %5187 = vmatpush.msra.mxu1 %v5044_v8  ;;  %v5034_v58 = vld [vmem:[#allocation8 + $0xea8] sm:$0xff]  ;;  %v5053_v8 = vld [vmem:[#allocation8 + $0xf40] sm:$0xff] }
 0x51f   : > { %4338 = vst [vmem:[#allocation1 + $0x1] ss:$2 sm:$0xff] %v4329_v28  ;;  %4749 = vmatpush.msrb.mxu2 %v4542_v63  ;;  %v4372_v36 = vld [vmem:[#allocation4 + $0x22] sm:$0xf]  ;;  %5167 = vmatpush.msra.mxu0 %v5025_v40 }
 0x520   : > { %v5003_v28 = vld [vmem:[#allocation8 + $0xdb0] sm:$0xff] }
 0x521   : > { %4750 = vmatpush.msrb.mxu2 %v4541_v4  ;;  %5168 = vmatpush.msra.mxu0 %v5024_v49  ;;  %v5023_v27 = vld [vmem:[#allocation8 + $0xe50] sm:$0xff]  ;;  %v5033_v49 = vld [vmem:[#allocation8 + $0xea0] sm:$0xff] }
 0x522   : > { %v4259_v17 = vld.sshfl [vmem:[#allocation1 + $0x10] sm:$0xff pattern:$0x75316420]  ;;  %4662 = vmatmul.f32.vlgmr.msra.gmra.mxu2 %v7565_v53  ;;  %v5012_v53 = vld [vmem:[#allocation8 + $0xdf8] sm:$0xff]  ;;  %v5043_v43 = vld [vmem:[#allocation8 + $0xef0] sm:$0xff] }
 0x523   : > { %4276 = vst [vmem:[#allocation1 + $0x10] ss:$2 sm:$0xff] %v4266_v2  ;;  %4619 = vmatmul.f32.gmra.mxu3 %v4259_v17  ;;  %4751 = vmatpush.msrb.mxu2 %v4540_v57  ;;  %v5041_v57 = vld [vmem:[#allocation8 + $0xee0] sm:$0xff]  ;;  %v5020_v17 = vld [vmem:[#allocation8 + $0xe38] sm:$0xff]  ;;  %v5055_v7 = vld [vmem:[#allocation8 + $0xf50] sm:$0xff] }
 0x524   : > { %4278 = vst [vmem:[#allocation1 + $0x11] ss:$2 sm:$0xff] %v4267_v14  ;;  %5141 = vmatpush.msrb.mxu3 %v5012_v53  ;;  %5169 = vmatpush.msra.mxu0 %v5023_v27  ;;  %v5052_v27 = vld [vmem:[#allocation8 + $0xf38] sm:$0xff] }
 0x525   : > { %4752 = vmatpush.msrb.mxu2 %v4539_v45  ;;  %5188 = vmatpush.msra.mxu1 %v5043_v43  ;;  %v5040_v45 = vld [vmem:[#allocation8 + $0xed8] sm:$0xff] }
 0x526   : > { %v4343_v50 = vld.sshfl [vmem:[#allocation1] sm:$0xff pattern:$0x75316420]  ;;  %5142 = vmatpush.msrb.mxu3 %v5011_v35  ;;  %5170 = vmatpush.msra.mxu0 %v5022_v6  ;;  %v5031_v6 = vld [vmem:[#allocation8 + $0xe90] sm:$0xff] }
 0x527   : > { %4357 = vst [vmem:[#allocation1] ss:$2 sm:$0xff] %v4349_v22  ;;  %4708 = vmatmul.f32.vlgmr.msrb.gmra.mxu0 %v4343_v50  ;;  %4753 = vmatpush.msrb.mxu2 %v4538_v23  ;;  %v5001_v22 = vld [vmem:[#allocation8 + $0xda0] sm:$0xff]  ;;  %v5060_v23 = vld [vmem:[#allocation8 + $0xf78] sm:$0xff] }
 0x528   : > { %4359 = vst [vmem:[#allocation1 + $0x1] ss:$2 sm:$0xff] %v4350_v3  ;;  %5143 = vmatpush.msrb.mxu3 %v5010_v38  ;;  %5189 = vmatpush.msra.mxu1 %v5042_v39  ;;  %v5021_v50 = vld [vmem:[#allocation8 + $0xe40] sm:$0xff]  ;;  %v5000_v3 = vld [vmem:[#allocation8 + $0xd98] sm:$0xff]  ;;  %v5051_v39 = vld [vmem:[#allocation8 + $0xf30] sm:$0xff] }
 0x529   : > { %5171 = vmatpush.msra.mxu0 %v5021_v50  ;;  %5210 = vmatpush.msra.mxu2 %v5060_v23  ;;  %v5016_v35 = vld [vmem:[#allocation8 + $0xe18] sm:$0xff] }
 0x52a   : > { %5144 = vmatpush.msrb.mxu3 %v5009_v62  ;;  %5190 = vmatpush.msra.mxu1 %v5041_v57  ;;  %v5056_v38 = vld [vmem:[#allocation8 + $0xf58] sm:$0xff]  ;;  %v5015_v62 = vld [vmem:[#allocation8 + $0xe10] sm:$0xff] }
 0x52b   : > { %v4280_v19 = vld.sshfl [vmem:[#allocation1 + $0x10] sm:$0xff pattern:$0x75316420]  ;;  %4685 = vmatmul.f32.vlgmr.msra.gmra.mxu3 %v4321_v33  ;;  %5172 = vmatpush.msra.mxu0 %v5020_v17  ;;  %v5072_v43 = vld [vmem:[#allocation8 + $0xfd8] sm:$0xff]  ;;  %v4809_v17 = vld [vmem:[#allocation5 + $0x1] sm:$0xf] }
 0x52c   : > { %4297 = vst [vmem:[#allocation1 + $0x10] ss:$2 sm:$0xff] %v4287_v51  ;;  %4642 = vmatmul.f32.gmra.mxu1 %v4280_v19  ;;  %5145 = vmatpush.msrb.mxu3 %v5008_v29  ;;  %v5019_v51 = vld [vmem:[#allocation8 + $0xe30] sm:$0xff] }
 0x52d   : > { %4299 = vst [vmem:[#allocation1 + $0x11] ss:$2 sm:$0xff] %v4288_v44  ;;  %5191 = vmatpush.msra.mxu1 %v5040_v45  ;;  %5173 = vmatpush.msra.mxu0 %v5019_v51  ;;  %v5059_v19 = vld [vmem:[#allocation8 + $0xf70] sm:$0xff]  ;;  %v5049_v51 = vld [vmem:[#allocation8 + $0xf20] sm:$0xff] }
 0x52e   : > { %5146 = vmatpush.msrb.mxu3 %v5007_v11  ;;  %5211 = vmatpush.msra.mxu2 %v5059_v19  ;;  %v5035_v29 = vld [vmem:[#allocation8 + $0xeb0] sm:$0xff] }
 0x52f   : > { %v4364_v34 = vld.sshfl [vmem:[#allocation1] sm:$0xff pattern:$0x75316420]  ;;  %v5075_v11 = vld [vmem:[#allocation8 + $0xff0] sm:$0xff] }
 0x530   : > { %4378 = vst [vmem:[#allocation1] ss:$2 sm:$0xff] %v4370_v12  ;;  %5147 = vmatpush.msrb.mxu3 %v5006_v54  ;;  %v5014_v54 = vld [vmem:[#allocation8 + $0xe08] sm:$0xff] }
 0x531   : > { %4380 = vst [vmem:[#allocation1 + $0x1] ss:$2 sm:$0xff] %v4371_v41  ;;  %v5039_v41 = vld [vmem:[#allocation8 + $0xed0] sm:$0xff] }
 0x532   : > { %5148 = vmatpush.msrb.mxu3 %v5005_v56  ;;  %5192 = vmatpush.msra.mxu1 %v5039_v41  ;;  %v5074_v56 = vld [vmem:[#allocation8 + $0xfe8] sm:$0xff]  ;;  %v5069_v41 = vld [vmem:[#allocation8 + $0xfc0] sm:$0xff] }
 0x534   : > { %v4301_v47 = vld.sshfl [vmem:[#allocation1 + $0x10] sm:$0xff pattern:$0x75316420]  ;;  %4731 = vmatmul.f32.vlgmr.msrb.gmra.mxu1 %v4364_v34  ;;  %5149 = vmatpush.msrb.mxu3 %v5004_v5  ;;  %v4999_v34 = vld [vmem:[#allocation8 + $0xd90] sm:$0xff]  ;;  %v5013_v5 = vld [vmem:[#allocation8 + $0xe00] sm:$0xff] }
 0x535   : > { %4318 = vst [vmem:[#allocation1 + $0x10] ss:$2 sm:$0xff] %v4308_v1  ;;  %4665 = vmatmul.f32.gmra.mxu2 %v4301_v47  ;;  %v5038_v1 = vld [vmem:[#allocation8 + $0xec8] sm:$0xff] }
 0x536   : > { %4320 = vst [vmem:[#allocation1 + $0x11] ss:$2 sm:$0xff] %v4309_v31  ;;  %5150 = vmatpush.msrb.mxu3 %v5003_v28  ;;  %v5058_v31 = vld [vmem:[#allocation8 + $0xf68] sm:$0xff]  ;;  %5193 = vmatpush.msra.mxu1 %v5038_v1  ;;  %v5032_v28 = vld [vmem:[#allocation8 + $0xe98] sm:$0xff] }
 0x537   : > { %5212 = vmatpush.msra.mxu2 %v5058_v31 }
 0x538   : > { %v4385_v16 = vld.sshfl [vmem:[#allocation1] sm:$0xff pattern:$0x75316420]  ;;  %5151 = vmatpush.msrb.mxu3 %v5002_v30 }
 0x539   : > { %4796 = vst [vmem:[#allocation1] ss:$2 sm:$0xff] %v4788_v48  ;;  %v4998_v48 = vld [vmem:[#allocation8 + $0xd88] sm:$0xff] }
 0x53a   : > { %5152 = vmatpush.msrb.mxu3 %v5001_v22  ;;  %v5070_v22 = vld [vmem:[#allocation8 + $0xfc8] sm:$0xff] }
 0x53c   : > { %5153 = vmatpush.msrb.mxu3 %v5000_v3 }
 0x53d   : > { %v4322_v61 = vld.sshfl [vmem:[#allocation1 + $0x10] sm:$0xff pattern:$0x75316420]  ;;  %4754 = vmatmul.f32.vlgmr.msrb.gmra.mxu2 %v4385_v16 }
 0x53e   : > { %4340 = vst [vmem:[#allocation1 + $0x10] ss:$2 sm:$0xff] %v4330_v18  ;;  %4688 = vmatmul.f32.gmra.mxu3 %v4322_v61  ;;  %v5018_v16 = vld [vmem:[#allocation8 + $0xe28] sm:$0xff]  ;;  %v7582_v18 = vld [vmem:[#allocation11 + $0x2] ss:$0 sm:$0xff] }
 0x53f   : > { %4342 = vst [vmem:[#allocation1 + $0x11] ss:$2 sm:$0xff] %v4331_v55  ;;  %5154 = vmatpush.msrb.mxu3 %v4999_v34  ;;  %5174 = vmatpush.msra.mxu0 %v5018_v16  ;;  %v5029_v34 = vld [vmem:[#allocation8 + $0xe80] sm:$0xff] }
 0x541   : > { %5155 = vmatpush.msrb.mxu3 %v4998_v48  ;;  %v5068_v48 = vld [vmem:[#allocation8 + $0xfb8] sm:$0xff] }
 0x546   : > { %v4344_v26 = vld.sshfl [vmem:[#allocation1 + $0x10] sm:$0xff pattern:$0x75316420] }
 0x547   : > { %4361 = vst [vmem:[#allocation1 + $0x10] ss:$2 sm:$0xff] %v4351_v15  ;;  %4711 = vmatmul.f32.gmra.mxu0 %v4344_v26  ;;  %v7584_v15 = vld [vmem:[#allocation13 + $0x2] ss:$0 sm:$0xff] }
 0x548   : > { %4363 = vst [vmem:[#allocation1 + $0x11] ss:$2 sm:$0xff] %v4352_v9 }
 0x54f   : > { %v4365_v0 = vld.sshfl [vmem:[#allocation1 + $0x10] sm:$0xff pattern:$0x75316420] }
 0x550   : > { %4382 = vst [vmem:[#allocation1 + $0x10] ss:$2 sm:$0xff] %v4372_v36  ;;  %4734 = vmatmul.f32.gmra.mxu1 %v4365_v0  ;;  %v5017_v0 = vld [vmem:[#allocation8 + $0xe20] sm:$0xff] }
 0x551   : > { %4384 = vst [vmem:[#allocation1 + $0x11] ss:$2 sm:$0xff] %v4373_v42  ;;  %v4997_v42 = vld [vmem:[#allocation8 + $0xd80] sm:$0xff]  ;;  %5175 = vmatpush.msra.mxu0 %v5017_v0 }
 0x552   : > { %5156 = vmatpush.msrb.mxu3 %v4997_v42  ;;  %v5037_v36 = vld [vmem:[#allocation8 + $0xec0] sm:$0xff]  ;;  %v5046_v42 = vld [vmem:[#allocation8 + $0xf08] sm:$0xff] }
 0x553   : > { %5194 = vmatpush.msra.mxu1 %v5037_v36  ;;  %5176 = vmatpush.msra.mxu0 %v5016_v35  ;;  %v5066_v36 = vld [vmem:[#allocation8 + $0xfa8] sm:$0xff] }
 0x554   : > { %v5106_v35 = vld [vmem:[#allocation8 + $0x10e8] sm:$0xff] }
 0x555   : > { %5177 = vmatpush.msra.mxu0 %v5015_v62  ;;  %v5105_v62 = vld [vmem:[#allocation8 + $0x10e0] sm:$0xff] }
 0x557   : > { %5178 = vmatpush.msra.mxu0 %v5014_v54  ;;  %v5084_v54 = vld [vmem:[#allocation8 + $0x1038] sm:$0xff] }
 0x558   : > { %v4386_v37 = vld.sshfl [vmem:[#allocation1 + $0x10] sm:$0xff pattern:$0x75316420] }
 0x559   : > { %4757 = vmatmul.f32.gmra.mxu2 %v4386_v37  ;;  %v5057_v37 = vld [vmem:[#allocation8 + $0xf60] sm:$0xff]  ;;  %5179 = vmatpush.msra.mxu0 %v5013_v5  ;;  %v5123_v5 = vld [vmem:[#allocation8 + $0x1170] sm:$0xff] }
 0x55a   : > { %5213 = vmatpush.msra.mxu2 %v5057_v37  ;;  %v5086_v37 = vld [vmem:[#allocation8 + $0x1048] sm:$0xff] }
 0x55c   : > { %5214 = vmatpush.msra.mxu2 %v5056_v38 }
 0x55e   : > { %5215 = vmatpush.msra.mxu2 %v5055_v7  ;;  %v4830_v7 = vld [vmem:[#allocation5 + $0x2] sm:$0xf] }
 0x56e   : > { %v4571_v52 = vpop.f32.mrf.mxu1 }
 0x57d   : > { %v4594_v46 = vpop.f32.mrf.mxu2 }
 0x57e   : > { %v4595_v33 = vadd.f32 %v4594_v46, %v4571_v52  ;;  %v5036_v52 = vld [vmem:[#allocation8 + $0xeb8] sm:$0xff] }
 0x57f   : > { %v5076_v46 = vld [vmem:[#allocation8 + $0xff8] sm:$0xff]  ;;  %5195 = vmatpush.msra.mxu1 %v5036_v52  ;;  %v5045_v52 = vld [vmem:[#allocation8 + $0xf00] sm:$0xff] }
 0x580   : > { %5233 = vmatpush.msra.mxu3 %v5076_v46  ;;  %v5065_v46 = vld [vmem:[#allocation8 + $0xfa0] sm:$0xff] }
 0x581   : > { %5196 = vmatpush.msra.mxu1 %v5035_v29  ;;  %v5124_v29 = vld [vmem:[#allocation8 + $0x1178] sm:$0xff] }
 0x582   : > { %5234 = vmatpush.msra.mxu3 %v5075_v11 }
 0x583   : > { %5197 = vmatpush.msra.mxu1 %v5034_v58  ;;  %v5104_v58 = vld [vmem:[#allocation8 + $0x10d8] sm:$0xff] }
 0x584   : > { %5235 = vmatpush.msra.mxu3 %v5074_v56 }
 0x585   : > { %5198 = vmatpush.msra.mxu1 %v5033_v49 }
 0x586   : > { %v4617_v25 = vpop.f32.mrf.mxu3 }
 0x587   : > { %v4618_v21 = vadd.f32 %v4617_v25, %v4595_v33  ;;  %v5073_v33 = vld [vmem:[#allocation8 + $0xfe0] sm:$0xff]  ;;  %5199 = vmatpush.msra.mxu1 %v5032_v28  ;;  %v5122_v28 = vld [vmem:[#allocation8 + $0x1168] sm:$0xff] }
 0x588   : > { %5236 = vmatpush.msra.mxu3 %v5073_v33 }
 0x589   : > { %5200 = vmatpush.msra.mxu1 %v5031_v6  ;;  %v5081_v6 = vld [vmem:[#allocation8 + $0x1020] sm:$0xff] }
 0x58a   : > { %5237 = vmatpush.msra.mxu3 %v5072_v43 }
 0x58e   : > { %v7572_v20 = vpop.f32.mrf.mxu1 }
 0x596   : > { %v4640_v59 = vpop.f32.mrf.mxu1 }
 0x597   : > { %v4641_v24 = vadd.f32 %v4640_v59, %v4618_v21  ;;  %v5054_v59 = vld [vmem:[#allocation8 + $0xf48] sm:$0xff]  ;;  %v5092_v21 = vld [vmem:[#allocation8 + $0x1078] sm:$0xff] }
 0x598   : > { %5216 = vmatpush.msra.mxu2 %v5054_v59  ;;  %5256 = vmatpush.msrb.mxu0 %v5092_v21  ;;  %v5061_v21 = vld [vmem:[#allocation8 + $0xf80] sm:$0xff] }
 0x59a   : > { %5217 = vmatpush.msra.mxu2 %v5053_v8  ;;  %v5083_v8 = vld [vmem:[#allocation8 + $0x1030] sm:$0xff] }
 0x59c   : > { %5218 = vmatpush.msra.mxu2 %v5052_v27  ;;  %v5082_v27 = vld [vmem:[#allocation8 + $0x1028] sm:$0xff] }
 0x59d   : > { %v7574_v60 = vpop.f32.mrf.mxu2 }
 0x59e   : > { %5219 = vmatpush.msra.mxu2 %v5051_v39  ;;  %v5101_v39 = vld [vmem:[#allocation8 + $0x10c0] sm:$0xff] }
 0x5a4   : > { %v4709_v44 = vpop.f32.mrf.mxu0 }
 0x5a5   : > { %v4663_v13 = vpop.f32.mrf.mxu2 }
 0x5a6   : > { %v7576_v32 = vpop.f32.mrf.mxu3  ;;  %v4664_v2 = vadd.f32 %v4663_v13, %v4641_v24  ;;  %v4598_v13 = vadd.f32 %v7574_v60, %v7572_v20  ;;  %v5071_v24 = vld [vmem:[#allocation8 + $0xfd0] sm:$0xff]  ;;  %v5030_v20 = vld [vmem:[#allocation8 + $0xe88] sm:$0xff] }
 0x5a7   : > { %v5050_v60 = vld [vmem:[#allocation8 + $0xf28] sm:$0xff]  ;;  %5238 = vmatpush.msra.mxu3 %v5071_v24  ;;  %5201 = vmatpush.msra.mxu1 %v5030_v20  ;;  %v5120_v24 = vld [vmem:[#allocation8 + $0x1158] sm:$0xff] }
 0x5a8   : > { %v4621_v30 = vadd.f32 %v7576_v32, %v4598_v13  ;;  %5220 = vmatpush.msra.mxu2 %v5050_v60  ;;  %v5062_v13 = vld [vmem:[#allocation8 + $0xf88] sm:$0xff]  ;;  %v5080_v20 = vld [vmem:[#allocation8 + $0x1018] sm:$0xff] }
 0x5a9   : > { %v7578_v63 = vpop.f32.mrf.mxu1  ;;  %5239 = vmatpush.msra.mxu3 %v5070_v22  ;;  %5202 = vmatpush.msra.mxu1 %v5029_v34  ;;  %v5100_v22 = vld [vmem:[#allocation8 + $0x10b8] sm:$0xff]  ;;  %v5138_v34 = vld [vmem:[#allocation8 + $0x11e8] sm:$0xff] }
 0x5aa   : > { %v4644_v57 = vadd.f32 %v7578_v63, %v4621_v30  ;;  %5221 = vmatpush.msra.mxu2 %v5049_v51  ;;  %v5089_v63 = vld [vmem:[#allocation8 + $0x1060] sm:$0xff]  ;;  %v5098_v51 = vld [vmem:[#allocation8 + $0x10a8] sm:$0xff] }
 0x5ab   : > { %5240 = vmatpush.msra.mxu3 %v5069_v41  ;;  %v5121_v30 = vld [vmem:[#allocation8 + $0x1160] sm:$0xff] }
 0x5ac   : > { %v5117_v41 = vld [vmem:[#allocation8 + $0x1140] sm:$0xff] }
 0x5ad   : > { %5241 = vmatpush.msra.mxu3 %v5068_v48  ;;  %v5116_v48 = vld [vmem:[#allocation8 + $0x1138] sm:$0xff] }
 0x5ae   : > { %v4686_v4 = vpop.f32.mrf.mxu3 }
 0x5af   : > { %v4687_v14 = vadd.f32 %v4686_v4, %v4664_v2  ;;  %v5091_v4 = vld [vmem:[#allocation8 + $0x1070] sm:$0xff] }
 0x5b0   : > { %5257 = vmatpush.msrb.mxu0 %v5091_v4  ;;  %v5140_v4 = vld [vmem:[#allocation8 + $0x11f8] sm:$0xff] }
 0x5b1   : > { %v4710_v47 = vadd.f32 %v4709_v44, %v4687_v14  ;;  %v4732_v55 = vpop.f32.mrf.mxu1  ;;  %v5090_v14 = vld [vmem:[#allocation8 + $0x1068] sm:$0xff]  ;;  %v5048_v44 = vld [vmem:[#allocation8 + $0xf18] sm:$0xff] }
 0x5b2   : > { %5258 = vmatpush.msrb.mxu0 %v5090_v14  ;;  %5222 = vmatpush.msra.mxu2 %v5048_v44  ;;  %v5097_v44 = vld [vmem:[#allocation8 + $0x10a0] sm:$0xff] }
 0x5b3   : > { %v4733_v61 = vadd.f32 %v4732_v55, %v4710_v47  ;;  %v5108_v47 = vld [vmem:[#allocation8 + $0x10f8] sm:$0xff]  ;;  %v5047_v55 = vld [vmem:[#allocation8 + $0xf10] sm:$0xff] }
 0x5b4   : > { %5259 = vmatpush.msrb.mxu0 %v5089_v63  ;;  %5279 = vmatpush.msrb.mxu1 %v5108_v47  ;;  %v5137_v63 = vld [vmem:[#allocation8 + $0x11e0] sm:$0xff] }
 0x5b5   : > { %5223 = vmatpush.msra.mxu2 %v5047_v55 }
 0x5b7   : > { %5224 = vmatpush.msra.mxu2 %v5046_v42  ;;  %v5114_v42 = vld [vmem:[#allocation8 + $0x1128] sm:$0xff] }
 0x5b8   : > { %v7580_v12 = vpop.f32.mrf.mxu2 }
 0x5b9   : > { %v4667_v3 = vadd.f32 %v7580_v12, %v4644_v57  ;;  %v5088_v12 = vld [vmem:[#allocation8 + $0x1058] sm:$0xff]  ;;  %5225 = vmatpush.msra.mxu2 %v5045_v52  ;;  %v5093_v52 = vld [vmem:[#allocation8 + $0x1080] sm:$0xff] }
 0x5ba   : > { %5260 = vmatpush.msrb.mxu0 %v5088_v12 }
 0x5bb   : > { %5302 = vmatpush.msrb.mxu2 %v5124_v29  ;;  %v5131_v29 = vld [vmem:[#allocation8 + $0x11b0] sm:$0xff] }
 0x5bd   : > { %5303 = vmatpush.msrb.mxu2 %v5123_v5 }
 0x5bf   : > { %5304 = vmatpush.msrb.mxu2 %v5122_v28  ;;  %v5126_v28 = vld [vmem:[#allocation8 + $0x1188] sm:$0xff] }
 0x5c0   : > { %v4755_v9 = vpop.f32.mrf.mxu2 }
 0x5c1   : > { %v4756_v26 = vadd.f32 %v4755_v9, %v4733_v61  ;;  %v4689_v32 = vpop.f32.mrf.mxu3  ;;  %v5067_v61 = vld [vmem:[#allocation8 + $0xfb0] sm:$0xff]  ;;  %5305 = vmatpush.msrb.mxu2 %v5121_v30 }
 0x5c2   : > { %v4690_v45 = vadd.f32 %v4689_v32, %v4667_v3  ;;  %v5087_v9 = vld [vmem:[#allocation8 + $0x1050] sm:$0xff]  ;;  %5242 = vmatpush.msra.mxu3 %v5067_v61 }
 0x5c3   : > { %v4766_v53 = vmul.f32 %v7582_v18, %v4756_v26  ;;  %v5107_v26 = vld [vmem:[#allocation8 + $0x10f0] sm:$0xff]  ;;  %5261 = vmatpush.msrb.mxu0 %v5087_v9  ;;  %5306 = vmatpush.msrb.mxu2 %v5120_v24 }
 0x5c4   : > { %v4712_v23 = vpop.f32.mrf.mxu0  ;;  %5280 = vmatpush.msrb.mxu1 %v5107_v26  ;;  %5243 = vmatpush.msra.mxu3 %v5066_v36  ;;  %v5079_v32 = vld [vmem:[#allocation8 + $0x1010] sm:$0xff]  ;;  %v5094_v36 = vld [vmem:[#allocation8 + $0x1088] sm:$0xff] }
 0x5c5   : > { %v4773_v25 = vadd.f32 %v7584_v15, %v4766_v53  ;;  %v4713_v31 = vadd.f32 %v4712_v23, %v4690_v45  ;;  %5262 = vmatpush.msrb.mxu0 %v5086_v37  ;;  %v5118_v45 = vld [vmem:[#allocation8 + $0x1148] sm:$0xff]  ;;  %v5095_v61 = vld [vmem:[#allocation8 + $0x1090] sm:$0xff] }
 0x5c6   : > { %5281 = vmatpush.msrb.mxu1 %v5106_v35  ;;  %5244 = vmatpush.msra.mxu3 %v5065_v46  ;;  %v5078_v23 = vld [vmem:[#allocation8 + $0x1008] sm:$0xff]  ;;  %v5135_v9 = vld [vmem:[#allocation8 + $0x11d0] sm:$0xff]  ;;  %v5113_v35 = vld [vmem:[#allocation8 + $0x1120] sm:$0xff] }
 0x5c7   : > { %v4775_v10 = vmax.f32 %v4773_v25, 0.0  ;;  %v5085_v25 = vld [vmem:[#allocation8 + $0x1040] sm:$0xff]  ;;  %v5134_v37 = vld [vmem:[#allocation8 + $0x11c8] sm:$0xff]  ;;  %v5112_v46 = vld [vmem:[#allocation8 + $0x1118] sm:$0xff] }
 0x5c8   : > { %5263 = vmatpush.msrb.mxu0 %v5085_v25  ;;  %5282 = vmatpush.msrb.mxu1 %v5105_v62  ;;  %v5132_v25 = vld [vmem:[#allocation8 + $0x11b8] sm:$0xff]  ;;  %v5111_v62 = vld [vmem:[#allocation8 + $0x1110] sm:$0xff] }
 0x5c9   : > { %v4779_v40 = vrot.slane %v4775_v10, 4  ;;  %4784 = vst [vmem:[#allocation5 + $0x9] sm:$0xf] %v4775_v10  ;;  %v5064_v10 = vld [vmem:[#allocation8 + $0xf98] sm:$0xff] }
 0x5ca   : > { %5245 = vmatpush.msra.mxu3 %v5064_v10  ;;  %5264 = vmatpush.msrb.mxu0 %v5084_v54  ;;  %v5110_v54 = vld [vmem:[#allocation8 + $0x1108] sm:$0xff] }
 0x5cb   : > { %4785 = vst [vmem:[#allocation5 + $0x11] sm:$0xf] %v4779_v40  ;;  %v5063_v40 = vld [vmem:[#allocation8 + $0xf90] sm:$0xff]  ;;  %5283 = vmatpush.msrb.mxu1 %v5104_v58 }
 0x5cc   : > { %5246 = vmatpush.msra.mxu3 %v5063_v40  ;;  %5265 = vmatpush.msrb.mxu0 %v5083_v8  ;;  %v5109_v40 = vld [vmem:[#allocation8 + $0x1100] sm:$0xff]  ;;  %v5128_v8 = vld [vmem:[#allocation8 + $0x1198] sm:$0xff] }
 0x5cd   : > { %v4735_v1 = vpop.f32.mrf.mxu1 }
 0x5ce   : > { %v4736_v0 = vadd.f32 %v4735_v1, %v4713_v31  ;;  %5247 = vmatpush.msra.mxu3 %v5062_v13  ;;  %5266 = vmatpush.msrb.mxu0 %v5082_v27  ;;  %v5096_v1 = vld [vmem:[#allocation8 + $0x1098] sm:$0xff]  ;;  %v5115_v31 = vld [vmem:[#allocation8 + $0x1130] sm:$0xff] }
 0x5d0   : > { %v4789_v50 = vld [vmem:[#allocation5 + $0x8] sm:$0xf]  ;;  %5248 = vmatpush.msra.mxu3 %v5061_v21  ;;  %5267 = vmatpush.msrb.mxu0 %v5081_v6  ;;  %v5125_v21 = vld [vmem:[#allocation8 + $0x1180] sm:$0xff] }
 0x5d1   : > { %4798 = vst [vmem:[#allocation1 + $0x1] ss:$2 sm:$0xff] %v4789_v50  ;;  %v4810_v19 = vld [vmem:[#allocation5 + $0x9] sm:$0xf]  ;;  %v5119_v50 = vld [vmem:[#allocation8 + $0x1150] sm:$0xff] }
 0x5d2   : > { %v4790_v2 = vld [vmem:[#allocation5 + $0x10] sm:$0xf]  ;;  %v4831_v49 = vld [vmem:[#allocation5 + $0xa] sm:$0xf]  ;;  %5268 = vmatpush.msrb.mxu0 %v5080_v20  ;;  %5307 = vmatpush.msrb.mxu2 %v5119_v50 }
 0x5d3   : > { %4800 = vst [vmem:[#allocation1 + $0x10] ss:$2 sm:$0xff] %v4790_v2  ;;  %v4851_v60 = vld [vmem:[#allocation5 + $0x8] sm:$0xf]  ;;  %v5139_v2 = vld [vmem:[#allocation8 + $0x11f0] sm:$0xff] }
 0x5d4   : > { %v4852_v3 = vld [vmem:[#allocation5 + $0x10] sm:$0xf]  ;;  %5269 = vmatpush.msrb.mxu0 %v5079_v32  ;;  %5308 = vmatpush.msrb.mxu2 %v5118_v45  ;;  %v4872_v12 = vld [vmem:[#allocation5 + $0x9] sm:$0xf] }
 0x5d5   : > { %v4873_v47 = vld [vmem:[#allocation5 + $0x11] sm:$0xf]  ;;  %v4893_v10 = vld [vmem:[#allocation5 + $0xa] sm:$0xf] }
 0x5d6   : > { %5270 = vmatpush.msrb.mxu0 %v5078_v23  ;;  %5309 = vmatpush.msrb.mxu2 %v5117_v41  ;;  %v4894_v58 = vld [vmem:[#allocation5 + $0x12] sm:$0xf]  ;;  %v4918_v45 = vld [vmem:[#allocation5 + $0x28] sm:$0xf] }
 0x5d7   : > { %v4915_v13 = vld [vmem:[#allocation5 + $0x10] sm:$0xf] }
 0x5d8   : > { %v4803_v16 = vld.sshfl [vmem:[#allocation1] sm:$0xff pattern:$0x75316420]  ;;  %5310 = vmatpush.msrb.mxu2 %v5116_v48  ;;  %v4936_v24 = vld [vmem:[#allocation5 + $0x11] sm:$0xf] }
 0x5d9   : > { %4817 = vst [vmem:[#allocation1] ss:$2 sm:$0xff] %v4809_v17  ;;  %5157 = vmatmul.f32.vlgmr.msrb.gmra.mxu3 %v4803_v16  ;;  %v5099_v17 = vld [vmem:[#allocation8 + $0x10b0] sm:$0xff]  ;;  %v5136_v16 = vld [vmem:[#allocation8 + $0x11d8] sm:$0xff] }
 0x5da   : > { %4819 = vst [vmem:[#allocation1 + $0x1] ss:$2 sm:$0xff] %v4810_v19  ;;  %5325 = vmatpush.msrb.mxu3 %v5140_v4  ;;  %v5077_v19 = vld [vmem:[#allocation8 + $0x1000] sm:$0xff]  ;;  %5311 = vmatpush.msrb.mxu2 %v5115_v31 }
 0x5db   : > { %5271 = vmatpush.msrb.mxu0 %v5077_v19  ;;  %v4960_v19 = vld [vmem:[#allocation5 + $0x2a] sm:$0xf]  ;;  %v5596_v31 = vld [vmem:[#allocation8 + $0x1260] sm:$0xff] }
 0x5dc   : > { %v4758_v53 = vpop.f32.mrf.mxu2  ;;  %5326 = vmatpush.msrb.mxu3 %v5139_v2  ;;  %5312 = vmatpush.msrb.mxu2 %v5114_v42  ;;  %v5594_v42 = vld [vmem:[#allocation8 + $0x1250] sm:$0xff] }
 0x5dd   : > { %v4759_v38 = vadd.f32 %v4758_v53, %v4736_v0  ;;  %v4811_v0 = vld [vmem:[#allocation5 + $0x11] sm:$0xf] }
 0x5de   : > { %5327 = vmatpush.msrb.mxu3 %v5138_v34  ;;  %5313 = vmatpush.msrb.mxu2 %v5113_v35  ;;  %v4939_v34 = vld [vmem:[#allocation5 + $0x29] sm:$0xf] }
 0x5df   : > { %v4767_v11 = vmul.f32 %v7582_v18, %v4759_v38  ;;  %v5103_v18 = vld [vmem:[#allocation8 + $0x10d0] sm:$0xff]  ;;  %v5133_v38 = vld [vmem:[#allocation8 + $0x11c0] sm:$0xff] }
 0x5e0   : > { %5284 = vmatpush.msrb.mxu1 %v5103_v18  ;;  %5328 = vmatpush.msrb.mxu3 %v5137_v63  ;;  %v5127_v18 = vld [vmem:[#allocation8 + $0x1190] sm:$0xff] }
 0x5e1   : > { %v4824_v59 = vld.sshfl [vmem:[#allocation1] sm:$0xff pattern:$0x75316420]  ;;  %v4774_v56 = vadd.f32 %v7584_v15, %v4767_v11  ;;  %v5102_v15 = vld [vmem:[#allocation8 + $0x10c8] sm:$0xff]  ;;  %5314 = vmatpush.msrb.mxu2 %v5112_v46 }
 0x5e2   : > { %4838 = vst [vmem:[#allocation1] ss:$2 sm:$0xff] %v4830_v7  ;;  %5180 = vmatmul.f32.vlgmr.msra.gmra.mxu0 %v4824_v59  ;;  %5285 = vmatpush.msrb.mxu1 %v5102_v15  ;;  %v4832_v7 = vld [vmem:[#allocation5 + $0x12] sm:$0xf]  ;;  %v5130_v59 = vld [vmem:[#allocation8 + $0x11a8] sm:$0xff]  ;;  %v5591_v46 = vld [vmem:[#allocation8 + $0x1238] sm:$0xff] }
 0x5e3   : > { %4840 = vst [vmem:[#allocation1 + $0x1] ss:$2 sm:$0xff] %v4831_v49  ;;  %v4776_v33 = vmax.f32 %v4774_v56, 0.0  ;;  %5329 = vmatpush.msrb.mxu3 %v5136_v16  ;;  %5315 = vmatpush.msrb.mxu2 %v5111_v62  ;;  %v5129_v49 = vld [vmem:[#allocation8 + $0x11a0] sm:$0xff]  ;;  %v5599_v16 = vld [vmem:[#allocation8 + $0x1278] sm:$0xff] }
 0x5e4   : > { %5286 = vmatpush.msrb.mxu1 %v5101_v39  ;;  %5728 = vmatpush.msra.mxu0 %v5599_v16  ;;  %v5631_v62 = vld [vmem:[#allocation8 + $0x1378] sm:$0xff] }
 0x5e5   : > { %v4780_v43 = vrot.slane %v4776_v33, 4  ;;  %4786 = vst [vmem:[#allocation5 + $0x19] sm:$0xf] %v4776_v33  ;;  %5330 = vmatpush.msrb.mxu3 %v5135_v9  ;;  %5316 = vmatpush.msrb.mxu2 %v5110_v54 }
 0x5e6   : > { %5287 = vmatpush.msrb.mxu1 %v5100_v22  ;;  %v4957_v22 = vld [vmem:[#allocation5 + $0x12] sm:$0xf] }
 0x5e7   : > { %4787 = vst [vmem:[#allocation5 + $0x21] sm:$0xf] %v4780_v43  ;;  %5331 = vmatpush.msrb.mxu3 %v5134_v37  ;;  %5317 = vmatpush.msrb.mxu2 %v5109_v40  ;;  %v5593_v37 = vld [vmem:[#allocation8 + $0x1248] sm:$0xff] }
 0x5e8   : > { %5288 = vmatpush.msrb.mxu1 %v5099_v17  ;;  %v5609_v40 = vld [vmem:[#allocation8 + $0x12c8] sm:$0xff] }
 0x5e9   : > { %5332 = vmatpush.msrb.mxu3 %v5133_v38  ;;  %v5612_v38 = vld [vmem:[#allocation8 + $0x12e0] sm:$0xff] }
 0x5ea   : > { %v4845_v57 = vld.sshfl [vmem:[#allocation1] sm:$0xff pattern:$0x75316420]  ;;  %5289 = vmatpush.msrb.mxu1 %v5098_v51 }
 0x5eb   : > { %4859 = vst [vmem:[#allocation1] ss:$2 sm:$0xff] %v4851_v60  ;;  %5203 = vmatmul.f32.vlgmr.msra.gmra.mxu1 %v4845_v57  ;;  %5333 = vmatpush.msrb.mxu3 %v5132_v25  ;;  %v5611_v25 = vld [vmem:[#allocation8 + $0x12d8] sm:$0xff] }
 0x5ec   : > { %4861 = vst [vmem:[#allocation1 + $0x1] ss:$2 sm:$0xff] %v4852_v3  ;;  %v4791_v14 = vld [vmem:[#allocation5 + $0x18] sm:$0xf]  ;;  %5290 = vmatpush.msrb.mxu1 %v5097_v44 }
 0x5ed   : > { %4802 = vst [vmem:[#allocation1 + $0x11] ss:$2 sm:$0xff] %v4791_v14  ;;  %v4812_v53 = vld [vmem:[#allocation5 + $0x19] sm:$0xf]  ;;  %5334 = vmatpush.msrb.mxu3 %v5131_v29 }
 0x5ee   : > { %5291 = vmatpush.msrb.mxu1 %v5096_v1  ;;  %v4833_v5 = vld [vmem:[#allocation5 + $0x1a] sm:$0xf]  ;;  %v4854_v30 = vld [vmem:[#allocation5 + $0x20] sm:$0xf]  ;;  %v5598_v1 = vld [vmem:[#allocation8 + $0x1270] sm:$0xff] }
 0x5ef   : > { %5335 = vmatpush.msrb.mxu3 %v5130_v59  ;;  %v4853_v27 = vld [vmem:[#allocation5 + $0x18] sm:$0xf]  ;;  %v4875_v60 = vld [vmem:[#allocation5 + $0x21] sm:$0xf]  ;;  %5729 = vmatpush.msra.mxu0 %v5598_v1 }
 0x5f0   : > { %5292 = vmatpush.msrb.mxu1 %v5095_v61  ;;  %v4916_v15 = vld [vmem:[#allocation5 + $0x18] sm:$0xf]  ;;  %v4896_v3 = vld [vmem:[#allocation5 + $0x22] sm:$0xf] }
 0x5f1   : > { %5336 = vmatpush.msrb.mxu3 %v5129_v49  ;;  %v4937_v39 = vld [vmem:[#allocation5 + $0x19] sm:$0xf]  ;;  %v4917_v23 = vld [vmem:[#allocation5 + $0x20] sm:$0xf] }
 0x5f2   : > { %5293 = vmatpush.msrb.mxu1 %v5094_v36  ;;  %v4874_v4 = vld [vmem:[#allocation5 + $0x19] sm:$0xf]  ;;  %v4938_v51 = vld [vmem:[#allocation5 + $0x21] sm:$0xf] }
 0x5f3   : > { %v4866_v55 = vld.sshfl [vmem:[#allocation1] sm:$0xff pattern:$0x75316420]  ;;  %5337 = vmatpush.msrb.mxu3 %v5128_v8  ;;  %v4959_v63 = vld [vmem:[#allocation5 + $0x22] sm:$0xf] }
 0x5f4   : > { %4880 = vst [vmem:[#allocation1] ss:$2 sm:$0xff] %v4872_v12  ;;  %v4804_v26 = vld.sshfl [vmem:[#allocation1 + $0x10] sm:$0xff pattern:$0x75316420]  ;;  %5226 = vmatmul.f32.vlgmr.msra.gmra.mxu2 %v4866_v55  ;;  %5294 = vmatpush.msrb.mxu1 %v5093_v52  ;;  %v5595_v55 = vld [vmem:[#allocation8 + $0x1258] sm:$0xff] }
 0x5f5   : > { %4882 = vst [vmem:[#allocation1 + $0x1] ss:$2 sm:$0xff] %v4873_v47  ;;  %5160 = vmatmul.f32.gmra.mxu3 %v4804_v26  ;;  %v4895_v57 = vld [vmem:[#allocation5 + $0x1a] sm:$0xf]  ;;  %v5597_v47 = vld [vmem:[#allocation8 + $0x1268] sm:$0xff]  ;;  %v5592_v52 = vld [vmem:[#allocation8 + $0x1240] sm:$0xff]  ;;  %5774 = vmatpush.msra.mxu2 %v5631_v62 }
 0x5f6   : > { %4821 = vst [vmem:[#allocation1 + $0x10] ss:$2 sm:$0xff] %v4811_v0  ;;  %5338 = vmatpush.msrb.mxu3 %v5127_v18  ;;  %v4958_v32 = vld [vmem:[#allocation5 + $0x1a] sm:$0xf]  ;;  %5730 = vmatpush.msra.mxu0 %v5597_v47  ;;  %v5614_v0 = vld [vmem:[#allocation8 + $0x12f0] sm:$0xff]  ;;  %v5588_v18 = vld [vmem:[#allocation8 + $0x1220] sm:$0xff] }
 0x5f7   : > { %4823 = vst [vmem:[#allocation1 + $0x11] ss:$2 sm:$0xff] %v4812_v53  ;;  %v5615_v61 = vld [vmem:[#allocation8 + $0x12f8] sm:$0xff]  ;;  %v5613_v53 = vld [vmem:[#allocation8 + $0x12e8] sm:$0xff]  ;;  %v5640_v62 = vld [vmem:[#allocation8 + $0x13c0] sm:$0xff] }
 0x5f8   : > { %5339 = vmatpush.msrb.mxu3 %v5126_v28  ;;  %5731 = vmatpush.msra.mxu0 %v5596_v31  ;;  %v5603_v1 = vld [vmem:[#allocation8 + $0x1298] sm:$0xff] }
 0x5f9   : > { %5751 = vmatpush.msra.mxu1 %v5615_v61  ;;  %v5643_v47 = vld [vmem:[#allocation8 + $0x13d8] sm:$0xff]  ;;  %v5602_v61 = vld [vmem:[#allocation8 + $0x1290] sm:$0xff] }
 0x5fa   : > { %5340 = vmatpush.msrb.mxu3 %v5125_v21  ;;  %5732 = vmatpush.msra.mxu0 %v5595_v55  ;;  %v5647_v21 = vld [vmem:[#allocation8 + $0x13f8] sm:$0xff] }
 0x5fb   : > { %5752 = vmatpush.msra.mxu1 %v5614_v0  ;;  %v5663_v31 = vld [vmem:[#allocation8 + $0x1478] sm:$0xff]  ;;  %v5662_v0 = vld [vmem:[#allocation8 + $0x1470] sm:$0xff] }
 0x5fc   : > { %v4887_v11 = vld.sshfl [vmem:[#allocation1] sm:$0xff pattern:$0x75316420]  ;;  %5733 = vmatpush.msra.mxu0 %v5594_v42  ;;  %v5642_v42 = vld [vmem:[#allocation8 + $0x13d0] sm:$0xff] }
 0x5fd   : > { %4901 = vst [vmem:[#allocation1] ss:$2 sm:$0xff] %v4893_v10  ;;  %5249 = vmatmul.f32.vlgmr.msra.gmra.mxu3 %v4887_v11  ;;  %5753 = vmatpush.msra.mxu1 %v5613_v53  ;;  %v5610_v11 = vld [vmem:[#allocation8 + $0x12d0] sm:$0xff]  ;;  %v5621_v53 = vld [vmem:[#allocation8 + $0x1328] sm:$0xff] }
 0x5fe   : > { %4903 = vst [vmem:[#allocation1 + $0x1] ss:$2 sm:$0xff] %v4894_v58  ;;  %v4825_v56 = vld.sshfl [vmem:[#allocation1 + $0x10] sm:$0xff pattern:$0x75316420]  ;;  %5734 = vmatpush.msra.mxu0 %v5593_v37  ;;  %v5630_v10 = vld [vmem:[#allocation8 + $0x1370] sm:$0xff]  ;;  %5797 = vmatpush.msra.mxu3 %v5647_v21 }
 0x5ff   : > { %4842 = vst [vmem:[#allocation1 + $0x10] ss:$2 sm:$0xff] %v4832_v7  ;;  %5183 = vmatmul.f32.gmra.mxu0 %v4825_v56  ;;  %5754 = vmatpush.msra.mxu1 %v5612_v38  ;;  %v5590_v7 = vld [vmem:[#allocation8 + $0x1230] sm:$0xff]  ;;  %v5589_v56 = vld [vmem:[#allocation8 + $0x1228] sm:$0xff]  ;;  %v5616_v21 = vld [vmem:[#allocation8 + $0x1300] sm:$0xff] }
 0x600   : > { %4844 = vst [vmem:[#allocation1 + $0x11] ss:$2 sm:$0xff] %v4833_v5  ;;  %5735 = vmatpush.msra.mxu0 %v5592_v52  ;;  %5775 = vmatpush.msra.mxu2 %v5630_v10  ;;  %v5629_v5 = vld [vmem:[#allocation8 + $0x1368] sm:$0xff]  ;;  %v5619_v10 = vld [vmem:[#allocation8 + $0x1318] sm:$0xff] }
 0x601   : > { %5755 = vmatpush.msra.mxu1 %v5611_v25  ;;  %v5601_v37 = vld [vmem:[#allocation8 + $0x1288] sm:$0xff]  ;;  %v5620_v25 = vld [vmem:[#allocation8 + $0x1320] sm:$0xff] }
 0x602   : > { %5736 = vmatpush.msra.mxu0 %v5591_v46  ;;  %5776 = vmatpush.msra.mxu2 %v5629_v5  ;;  %v5661_v52 = vld [vmem:[#allocation8 + $0x1468] sm:$0xff]  ;;  %v5600_v46 = vld [vmem:[#allocation8 + $0x1280] sm:$0xff]  ;;  %v5638_v5 = vld [vmem:[#allocation8 + $0x13b0] sm:$0xff] }
 0x603   : > { %5756 = vmatpush.msra.mxu1 %v5610_v11 }
 0x604   : > { %5737 = vmatpush.msra.mxu0 %v5590_v7  ;;  %v5660_v7 = vld [vmem:[#allocation8 + $0x1460] sm:$0xff] }
 0x605   : > { %v4908_v33 = vld.sshfl [vmem:[#allocation1] sm:$0xff pattern:$0x75316420]  ;;  %5757 = vmatpush.msra.mxu1 %v5609_v40  ;;  %v5618_v40 = vld [vmem:[#allocation8 + $0x1310] sm:$0xff] }
 0x606   : > { %4923 = vst [vmem:[#allocation1] ss:$2 sm:$0xff] %v4915_v13  ;;  %5738 = vmatpush.msra.mxu0 %v5589_v56  ;;  %v5628_v13 = vld [vmem:[#allocation8 + $0x1360] sm:$0xff]  ;;  %v5679_v56 = vld [vmem:[#allocation8 + $0x14f8] sm:$0xff] }
 0x607   : > { %v4846_v43 = vld.sshfl [vmem:[#allocation1 + $0x10] sm:$0xff pattern:$0x75316420]  ;;  %4925 = vst [vmem:[#allocation1 + $0x1] ss:$2 sm:$0xff] %v4916_v15  ;;  %5272 = vmatmul.f32.vlgmr.msrb.gmra.mxu0 %v4908_v33  ;;  %v5608_v33 = vld [vmem:[#allocation8 + $0x12c0] sm:$0xff]  ;;  %5777 = vmatpush.msra.mxu2 %v5628_v13 }
 0x608   : > { %4863 = vst [vmem:[#allocation1 + $0x10] ss:$2 sm:$0xff] %v4853_v27  ;;  %5206 = vmatmul.f32.gmra.mxu1 %v4846_v43  ;;  %5739 = vmatpush.msra.mxu0 %v5588_v18  ;;  %v5587_v27 = vld [vmem:[#allocation8 + $0x1218] sm:$0xff]  ;;  %v5678_v18 = vld [vmem:[#allocation8 + $0x14f0] sm:$0xff]  ;;  %v5617_v13 = vld [vmem:[#allocation8 + $0x1308] sm:$0xff] }
 0x609   : > { %4865 = vst [vmem:[#allocation1 + $0x11] ss:$2 sm:$0xff] %v4854_v30  ;;  %5758 = vmatpush.msra.mxu1 %v5608_v33  ;;  %v5607_v15 = vld [vmem:[#allocation8 + $0x12b8] sm:$0xff]  ;;  %v5586_v30 = vld [vmem:[#allocation8 + $0x1210] sm:$0xff] }
 0x60a   : > { %v5627_v43 = vld [vmem:[#allocation8 + $0x1358] sm:$0xff]  ;;  %5740 = vmatpush.msra.mxu0 %v5587_v27  ;;  %v5657_v27 = vld [vmem:[#allocation8 + $0x1448] sm:$0xff] }
 0x60b   : > { %5759 = vmatpush.msra.mxu1 %v5607_v15  ;;  %5778 = vmatpush.msra.mxu2 %v5627_v43  ;;  %v5677_v15 = vld [vmem:[#allocation8 + $0x14e8] sm:$0xff] }
 0x60c   : > { %5741 = vmatpush.msra.mxu0 %v5586_v30  ;;  %v5636_v30 = vld [vmem:[#allocation8 + $0x13a0] sm:$0xff] }
 0x60e   : > { %v4930_v6 = vld.sshfl [vmem:[#allocation1] sm:$0xff pattern:$0x75316420] }
 0x60f   : > { %4946 = vst [vmem:[#allocation1 + $0x1] ss:$2 sm:$0xff] %v4937_v39 }
 0x610   : > { %v4867_v20 = vld.sshfl [vmem:[#allocation1 + $0x10] sm:$0xff pattern:$0x75316420]  ;;  %4944 = vst [vmem:[#allocation1] ss:$2 sm:$0xff] %v4936_v24  ;;  %5295 = vmatmul.f32.vlgmr.msrb.gmra.mxu1 %v4930_v6  ;;  %v5606_v6 = vld [vmem:[#allocation8 + $0x12b0] sm:$0xff] }
 0x611   : > { %4884 = vst [vmem:[#allocation1 + $0x10] ss:$2 sm:$0xff] %v4874_v4  ;;  %5229 = vmatmul.f32.gmra.mxu2 %v4867_v20  ;;  %v5626_v24 = vld [vmem:[#allocation8 + $0x1350] sm:$0xff]  ;;  %v5585_v20 = vld [vmem:[#allocation8 + $0x1208] sm:$0xff]  ;;  %5760 = vmatpush.msra.mxu1 %v5606_v6  ;;  %v5656_v6 = vld [vmem:[#allocation8 + $0x1440] sm:$0xff] }
 0x612   : > { %4886 = vst [vmem:[#allocation1 + $0x11] ss:$2 sm:$0xff] %v4875_v60  ;;  %v5646_v4 = vld [vmem:[#allocation8 + $0x13f0] sm:$0xff]  ;;  %5779 = vmatpush.msra.mxu2 %v5626_v24  ;;  %5742 = vmatpush.msra.mxu0 %v5585_v20  ;;  %v5676_v20 = vld [vmem:[#allocation8 + $0x14e0] sm:$0xff] }
 0x613   : > { %5798 = vmatpush.msra.mxu3 %v5646_v4 }
 0x617   : > { %v4951_v50 = vld.sshfl [vmem:[#allocation1] sm:$0xff pattern:$0x75316420] }
 0x618   : > { %4965 = vst [vmem:[#allocation1] ss:$2 sm:$0xff] %v4957_v22 }
 0x619   : > { %v4888_v2 = vld.sshfl [vmem:[#allocation1 + $0x10] sm:$0xff pattern:$0x75316420]  ;;  %5318 = vmatmul.f32.vlgmr.msrb.gmra.mxu2 %v4951_v50  ;;  %4967 = vst [vmem:[#allocation1 + $0x1] ss:$2 sm:$0xff] %v4958_v32 }
 0x61a   : > { %4905 = vst [vmem:[#allocation1 + $0x10] ss:$2 sm:$0xff] %v4895_v57  ;;  %5252 = vmatmul.f32.gmra.mxu3 %v4888_v2  ;;  %v5605_v50 = vld [vmem:[#allocation8 + $0x12a8] sm:$0xff]  ;;  %v5375_v2 = vld [vmem:[#allocation6] sm:$0xf] }
 0x61b   : > { %4907 = vst [vmem:[#allocation1 + $0x11] ss:$2 sm:$0xff] %v4896_v3  ;;  %v5625_v57 = vld [vmem:[#allocation8 + $0x1348] sm:$0xff]  ;;  %5761 = vmatpush.msra.mxu1 %v5605_v50 }
 0x61c   : > { %v5645_v32 = vld [vmem:[#allocation8 + $0x13e8] sm:$0xff]  ;;  %5780 = vmatpush.msra.mxu2 %v5625_v57  ;;  %v5675_v57 = vld [vmem:[#allocation8 + $0x14d8] sm:$0xff] }
 0x61d   : > { %5799 = vmatpush.msra.mxu3 %v5645_v32  ;;  %v5695_v32 = vld [vmem:[#allocation8 + $0x1578] sm:$0xff] }
 0x620   : > { %v4972_v17 = vld.sshfl [vmem:[#allocation1] sm:$0xff pattern:$0x75316420] }
 0x621   : > { %5383 = vst [vmem:[#allocation1] ss:$2 sm:$0xff] %v5375_v2  ;;  %v5634_v2 = vld [vmem:[#allocation8 + $0x1390] sm:$0xff] }
 0x622   : > { %v4909_v14 = vld.sshfl [vmem:[#allocation1 + $0x10] sm:$0xff pattern:$0x75316420]  ;;  %5341 = vmatmul.f32.vlgmr.msrb.gmra.mxu3 %v4972_v17 }
 0x623   : > { %4927 = vst [vmem:[#allocation1 + $0x10] ss:$2 sm:$0xff] %v4917_v23  ;;  %5275 = vmatmul.f32.gmra.mxu0 %v4909_v14  ;;  %v7605_v23 = vld [vmem:[#allocation11 + $0x3] ss:$0 sm:$0xff] }
 0x624   : > { %4929 = vst [vmem:[#allocation1 + $0x11] ss:$2 sm:$0xff] %v4918_v45 }
 0x62b   : > { %v4931_v41 = vld.sshfl [vmem:[#allocation1 + $0x10] sm:$0xff pattern:$0x75316420] }
 0x62c   : > { %5298 = vmatmul.f32.gmra.mxu1 %v4931_v41  ;;  %4948 = vst [vmem:[#allocation1 + $0x10] ss:$2 sm:$0xff] %v4938_v51  ;;  %v5584_v51 = vld [vmem:[#allocation8 + $0x1200] sm:$0xff] }
 0x62d   : > { %4950 = vst [vmem:[#allocation1 + $0x11] ss:$2 sm:$0xff] %v4939_v34  ;;  %v5604_v41 = vld [vmem:[#allocation8 + $0x12a0] sm:$0xff]  ;;  %5743 = vmatpush.msra.mxu0 %v5584_v51 }
 0x62e   : > { %5762 = vmatpush.msra.mxu1 %v5604_v41  ;;  %v5673_v41 = vld [vmem:[#allocation8 + $0x14c8] sm:$0xff] }
 0x62f   : > { %5820 = vmatpush.msrb.mxu0 %v5663_v31 }
 0x630   : > { %5763 = vmatpush.msra.mxu1 %v5603_v1  ;;  %v5396_v1 = vld [vmem:[#allocation6 + $0x1] sm:$0xf] }
 0x631   : > { %5821 = vmatpush.msrb.mxu0 %v5662_v0  ;;  %v5671_v0 = vld [vmem:[#allocation8 + $0x14b8] sm:$0xff] }
 0x632   : > { %5764 = vmatpush.msra.mxu1 %v5602_v61 }
 0x633   : > { %5822 = vmatpush.msrb.mxu0 %v5661_v52 }
 0x634   : > { %v4952_v44 = vld.sshfl [vmem:[#allocation1 + $0x10] sm:$0xff pattern:$0x75316420]  ;;  %5765 = vmatpush.msra.mxu1 %v5601_v37  ;;  %v5711_v37 = vld [vmem:[#allocation8 + $0x15f8] sm:$0xff] }
 0x635   : > { %5321 = vmatmul.f32.gmra.mxu2 %v4952_v44  ;;  %4969 = vst [vmem:[#allocation1 + $0x10] ss:$2 sm:$0xff] %v4959_v63  ;;  %v7607_v44 = vld [vmem:[#allocation13 + $0x3] ss:$0 sm:$0xff]  ;;  %5823 = vmatpush.msrb.mxu0 %v5660_v7 }
 0x636   : > { %4971 = vst [vmem:[#allocation1 + $0x11] ss:$2 sm:$0xff] %v4960_v19  ;;  %v5624_v19 = vld [vmem:[#allocation8 + $0x1340] sm:$0xff]  ;;  %5766 = vmatpush.msra.mxu1 %v5600_v46  ;;  %v5670_v46 = vld [vmem:[#allocation8 + $0x14b0] sm:$0xff] }
 0x637   : > { %5781 = vmatpush.msra.mxu2 %v5624_v19  ;;  %v5693_v19 = vld [vmem:[#allocation8 + $0x1568] sm:$0xff] }
 0x638   : > { %5843 = vmatpush.msrb.mxu1 %v5679_v56 }
 0x63a   : > { %5844 = vmatpush.msrb.mxu1 %v5678_v18 }
 0x63c   : > { %5845 = vmatpush.msrb.mxu1 %v5677_v15  ;;  %v5686_v15 = vld [vmem:[#allocation8 + $0x1530] sm:$0xff] }
 0x63d   : > { %v4973_v48 = vld.sshfl [vmem:[#allocation1 + $0x10] sm:$0xff pattern:$0x75316420] }
 0x63e   : > { %5344 = vmatmul.f32.gmra.mxu3 %v4973_v48  ;;  %v5644_v48 = vld [vmem:[#allocation8 + $0x13e0] sm:$0xff]  ;;  %5846 = vmatpush.msrb.mxu1 %v5676_v20 }
 0x63f   : > { %5800 = vmatpush.msra.mxu3 %v5644_v48  ;;  %v5692_v48 = vld [vmem:[#allocation8 + $0x1560] sm:$0xff] }
 0x640   : > { %5847 = vmatpush.msrb.mxu1 %v5675_v57  ;;  %v5724_v20 = vld [vmem:[#allocation8 + $0x1660] sm:$0xff] }
 0x641   : > { %5801 = vmatpush.msra.mxu3 %v5643_v47  ;;  %v5672_v47 = vld [vmem:[#allocation8 + $0x14c0] sm:$0xff] }
 0x643   : > { %5802 = vmatpush.msra.mxu3 %v5642_v42 }
 0x65c   : > { %v5158_v12 = vpop.f32.mrf.mxu3 }
 0x65f   : > { %v5181_v9 = vpop.f32.mrf.mxu0 }
 0x660   : > { %v5182_v59 = vadd.f32 %v5181_v9, %v5158_v12  ;;  %v5623_v12 = vld [vmem:[#allocation8 + $0x1338] sm:$0xff]  ;;  %v5622_v9 = vld [vmem:[#allocation8 + $0x1330] sm:$0xff] }
 0x661   : > { %5782 = vmatpush.msra.mxu2 %v5623_v12  ;;  %v5652_v12 = vld [vmem:[#allocation8 + $0x1420] sm:$0xff] }
 0x663   : > { %5783 = vmatpush.msra.mxu2 %v5622_v9  ;;  %v5651_v9 = vld [vmem:[#allocation8 + $0x1418] sm:$0xff] }
 0x665   : > { %5784 = vmatpush.msra.mxu2 %v5621_v53  ;;  %v5690_v53 = vld [vmem:[#allocation8 + $0x1550] sm:$0xff] }
 0x667   : > { %5785 = vmatpush.msra.mxu2 %v5620_v25  ;;  %v5689_v25 = vld [vmem:[#allocation8 + $0x1548] sm:$0xff] }
 0x668   : > { %v5204_v36 = vpop.f32.mrf.mxu1 }
 0x669   : > { %v5205_v8 = vadd.f32 %v5204_v36, %v5182_v59  ;;  %v5659_v59 = vld [vmem:[#allocation8 + $0x1458] sm:$0xff]  ;;  %5786 = vmatpush.msra.mxu2 %v5619_v10  ;;  %v5669_v10 = vld [vmem:[#allocation8 + $0x14a8] sm:$0xff] }
 0x66a   : > { %5824 = vmatpush.msrb.mxu0 %v5659_v59  ;;  %v5708_v59 = vld [vmem:[#allocation8 + $0x15e0] sm:$0xff] }
 0x66b   : > { %5787 = vmatpush.msra.mxu2 %v5618_v40 }
 0x66d   : > { %5788 = vmatpush.msra.mxu2 %v5617_v13  ;;  %v5687_v13 = vld [vmem:[#allocation8 + $0x1538] sm:$0xff] }
 0x66f   : > { %5789 = vmatpush.msra.mxu2 %v5616_v21  ;;  %v5706_v21 = vld [vmem:[#allocation8 + $0x15d0] sm:$0xff] }
 0x671   : > { %5866 = vmatpush.msrb.mxu2 %v5695_v32 }
 0x677   : > { %v5227_v35 = vpop.f32.mrf.mxu2 }
 0x678   : > { %v7595_v26 = vpop.f32.mrf.mxu3  ;;  %v5228_v28 = vadd.f32 %v5227_v35, %v5205_v8  ;;  %v5641_v35 = vld [vmem:[#allocation8 + $0x13c8] sm:$0xff]  ;;  %v5658_v8 = vld [vmem:[#allocation8 + $0x1450] sm:$0xff] }
 0x679   : > { %5803 = vmatpush.msra.mxu3 %v5641_v35  ;;  %5825 = vmatpush.msrb.mxu0 %v5658_v8  ;;  %v5710_v35 = vld [vmem:[#allocation8 + $0x15f0] sm:$0xff]  ;;  %v5668_v8 = vld [vmem:[#allocation8 + $0x14a0] sm:$0xff] }
 0x67b   : > { %5804 = vmatpush.msra.mxu3 %v5640_v62  ;;  %5826 = vmatpush.msrb.mxu0 %v5657_v27  ;;  %v5709_v62 = vld [vmem:[#allocation8 + $0x15e8] sm:$0xff]  ;;  %v5727_v27 = vld [vmem:[#allocation8 + $0x1678] sm:$0xff] }
 0x67c   : > { %v7597_v29 = vpop.f32.mrf.mxu0 }
 0x67d   : > { %v5185_v33 = vadd.f32 %v7597_v29, %v7595_v26  ;;  %5827 = vmatpush.msrb.mxu0 %v5656_v6  ;;  %v5685_v6 = vld [vmem:[#allocation8 + $0x1528] sm:$0xff] }
 0x680   : > { %v5250_v54 = vpop.f32.mrf.mxu3 }
 0x681   : > { %v5251_v39 = vadd.f32 %v5250_v54, %v5228_v28  ;;  %v5639_v54 = vld [vmem:[#allocation8 + $0x13b8] sm:$0xff]  ;;  %v5637_v28 = vld [vmem:[#allocation8 + $0x13a8] sm:$0xff] }
 0x682   : > { %5805 = vmatpush.msra.mxu3 %v5639_v54  ;;  %v5688_v54 = vld [vmem:[#allocation8 + $0x1540] sm:$0xff] }
 0x684   : > { %v5273_v60 = vpop.f32.mrf.mxu0  ;;  %5806 = vmatpush.msra.mxu3 %v5638_v5  ;;  %v5417_v5 = vld [vmem:[#allocation6 + $0x2] sm:$0xf] }
 0x685   : > { %v7599_v58 = vpop.f32.mrf.mxu1  ;;  %v5274_v17 = vadd.f32 %v5273_v60, %v5251_v39  ;;  %v5655_v60 = vld [vmem:[#allocation8 + $0x1438] sm:$0xff] }
 0x686   : > { %v5208_v43 = vadd.f32 %v7599_v58, %v5185_v33  ;;  %5807 = vmatpush.msra.mxu3 %v5637_v28  ;;  %v5635_v58 = vld [vmem:[#allocation8 + $0x1398] sm:$0xff]  ;;  %5828 = vmatpush.msrb.mxu0 %v5655_v60 }
 0x687   : > { %v5667_v33 = vld [vmem:[#allocation8 + $0x1498] sm:$0xff] }
 0x688   : > { %5808 = vmatpush.msra.mxu3 %v5636_v30  ;;  %v5707_v28 = vld [vmem:[#allocation8 + $0x15d8] sm:$0xff]  ;;  %v5726_v30 = vld [vmem:[#allocation8 + $0x1670] sm:$0xff] }
 0x68a   : > { %5809 = vmatpush.msra.mxu3 %v5635_v58  ;;  %v5664_v58 = vld [vmem:[#allocation8 + $0x1480] sm:$0xff] }
 0x68c   : > { %5810 = vmatpush.msra.mxu3 %v5634_v2  ;;  %v5683_v2 = vld [vmem:[#allocation8 + $0x1518] sm:$0xff] }
 0x68d   : > { %v5296_v3 = vpop.f32.mrf.mxu1 }
 0x68e   : > { %v5297_v14 = vadd.f32 %v5296_v3, %v5274_v17  ;;  %v5654_v3 = vld [vmem:[#allocation8 + $0x1430] sm:$0xff] }
 0x68f   : > { %v5674_v17 = vld [vmem:[#allocation8 + $0x14d0] sm:$0xff]  ;;  %5829 = vmatpush.msrb.mxu0 %v5654_v3  ;;  %v5723_v3 = vld [vmem:[#allocation8 + $0x1658] sm:$0xff] }
 0x690   : > { %5848 = vmatpush.msrb.mxu1 %v5674_v17  ;;  %v5682_v17 = vld [vmem:[#allocation8 + $0x1510] sm:$0xff] }
 0x692   : > { %5849 = vmatpush.msrb.mxu1 %v5673_v41  ;;  %v5680_v41 = vld [vmem:[#allocation8 + $0x1500] sm:$0xff] }
 0x694   : > { %v7601_v49 = vpop.f32.mrf.mxu2  ;;  %5850 = vmatpush.msrb.mxu1 %v5672_v47  ;;  %v5699_v47 = vld [vmem:[#allocation8 + $0x1598] sm:$0xff] }
 0x695   : > { %v5231_v39 = vadd.f32 %v7601_v49, %v5208_v43  ;;  %v5666_v43 = vld [vmem:[#allocation8 + $0x1490] sm:$0xff] }
 0x696   : > { %5851 = vmatpush.msrb.mxu1 %v5671_v0  ;;  %v5697_v0 = vld [vmem:[#allocation8 + $0x1588] sm:$0xff] }
 0x698   : > { %5852 = vmatpush.msrb.mxu1 %v5670_v46 }
 0x69a   : > { %5853 = vmatpush.msrb.mxu1 %v5669_v10  ;;  %v5713_v10 = vld [vmem:[#allocation8 + $0x1608] sm:$0xff] }
 0x69c   : > { %v5319_v45 = vpop.f32.mrf.mxu2  ;;  %5854 = vmatpush.msrb.mxu1 %v5668_v8 }
 0x69d   : > { %v7603_v22 = vpop.f32.mrf.mxu3  ;;  %v5320_v34 = vadd.f32 %v5319_v45, %v5297_v14  ;;  %v5694_v45 = vld [vmem:[#allocation8 + $0x1570] sm:$0xff]  ;;  %v5633_v14 = vld [vmem:[#allocation8 + $0x1388] sm:$0xff] }
 0x69e   : > { %v5254_v29 = vadd.f32 %v7603_v22, %v5231_v39  ;;  %5867 = vmatpush.msrb.mxu2 %v5694_v45  ;;  %5811 = vmatpush.msra.mxu3 %v5633_v14  ;;  %v5705_v39 = vld [vmem:[#allocation8 + $0x15c8] sm:$0xff]  ;;  %v5702_v45 = vld [vmem:[#allocation8 + $0x15b0] sm:$0xff] }
 0x69f   : > { %5855 = vmatpush.msrb.mxu1 %v5667_v33  ;;  %v5681_v14 = vld [vmem:[#allocation8 + $0x1508] sm:$0xff] }
 0x6a0   : > { %v5276_v4 = vpop.f32.mrf.mxu0  ;;  %5868 = vmatpush.msrb.mxu2 %v5693_v19  ;;  %v5700_v19 = vld [vmem:[#allocation8 + $0x15a0] sm:$0xff] }
 0x6a1   : > { %v5277_v49 = vadd.f32 %v5276_v4, %v5254_v29  ;;  %v5665_v29 = vld [vmem:[#allocation8 + $0x1488] sm:$0xff]  ;;  %5856 = vmatpush.msrb.mxu1 %v5666_v43  ;;  %v5704_v4 = vld [vmem:[#allocation8 + $0x15c0] sm:$0xff] }
 0x6a2   : > { %5869 = vmatpush.msrb.mxu2 %v5692_v48 }
 0x6a3   : > { %5857 = vmatpush.msrb.mxu1 %v5665_v29 }
 0x6a5   : > { %v5342_v63 = vpop.f32.mrf.mxu3  ;;  %5858 = vmatpush.msrb.mxu1 %v5664_v58 }
 0x6a6   : > { %v5343_v16 = vadd.f32 %v5342_v63, %v5320_v34  ;;  %v5653_v34 = vld [vmem:[#allocation8 + $0x1428] sm:$0xff]  ;;  %v5632_v63 = vld [vmem:[#allocation8 + $0x1380] sm:$0xff] }
 0x6a7   : > { %5830 = vmatpush.msrb.mxu0 %v5653_v34  ;;  %5812 = vmatpush.msra.mxu3 %v5632_v63  ;;  %v5701_v34 = vld [vmem:[#allocation8 + $0x15a8] sm:$0xff]  ;;  %v5720_v63 = vld [vmem:[#allocation8 + $0x1640] sm:$0xff] }
 0x6a8   : > { %v5353_v55 = vmul.f32 %v7605_v23, %v5343_v16 }
 0x6a9   : > { %v5299_v50 = vpop.f32.mrf.mxu1  ;;  %5831 = vmatpush.msrb.mxu0 %v5652_v12  ;;  %5889 = vmatpush.msrb.mxu3 %v5711_v37  ;;  %v5696_v37 = vld [vmem:[#allocation8 + $0x1580] sm:$0xff] }
 0x6aa   : > { %v5360_v36 = vadd.f32 %v7607_v44, %v5353_v55  ;;  %v5300_v51 = vadd.f32 %v5299_v50, %v5277_v49  ;;  %v5703_v49 = vld [vmem:[#allocation8 + $0x15b8] sm:$0xff] }
 0x6ab   : > { %5832 = vmatpush.msrb.mxu0 %v5651_v9  ;;  %5890 = vmatpush.msrb.mxu3 %v5710_v35  ;;  %v5698_v9 = vld [vmem:[#allocation8 + $0x1590] sm:$0xff] }
 0x6ac   : > { %v5362_v38 = vmax.f32 %v5360_v36, 0.0  ;;  %v5691_v36 = vld [vmem:[#allocation8 + $0x1558] sm:$0xff] }
 0x6ad   : > { %5870 = vmatpush.msrb.mxu2 %v5691_v36  ;;  %5891 = vmatpush.msrb.mxu3 %v5709_v62  ;;  %v5717_v36 = vld [vmem:[#allocation8 + $0x1628] sm:$0xff] }
 0x6ae   : > { %v5366_v11 = vrot.slane %v5362_v38, 4  ;;  %5371 = vst [vmem:[#allocation6 + $0x9] sm:$0xf] %v5362_v38  ;;  %v5650_v38 = vld [vmem:[#allocation8 + $0x1410] sm:$0xff] }
 0x6af   : > { %5871 = vmatpush.msrb.mxu2 %v5690_v53  ;;  %5833 = vmatpush.msrb.mxu0 %v5650_v38  ;;  %v5716_v53 = vld [vmem:[#allocation8 + $0x1620] sm:$0xff] }
 0x6b0   : > { %5372 = vst [vmem:[#allocation6 + $0x11] sm:$0xf] %v5366_v11  ;;  %v5649_v11 = vld [vmem:[#allocation8 + $0x1408] sm:$0xff]  ;;  %5892 = vmatpush.msrb.mxu3 %v5708_v59 }
 0x6b1   : > { %5872 = vmatpush.msrb.mxu2 %v5689_v25  ;;  %5834 = vmatpush.msrb.mxu0 %v5649_v11  ;;  %v5715_v25 = vld [vmem:[#allocation8 + $0x1618] sm:$0xff]  ;;  %v5714_v11 = vld [vmem:[#allocation8 + $0x1610] sm:$0xff] }
 0x6b2   : > { %5893 = vmatpush.msrb.mxu3 %v5707_v28 }
 0x6b3   : > { %5873 = vmatpush.msrb.mxu2 %v5688_v54  ;;  %v5712_v54 = vld [vmem:[#allocation8 + $0x1600] sm:$0xff] }
 0x6b4   : > { %5894 = vmatpush.msrb.mxu3 %v5706_v21 }
 0x6b5   : > { %v5376_v26 = vld [vmem:[#allocation6 + $0x8] sm:$0xf]  ;;  %5874 = vmatpush.msrb.mxu2 %v5687_v13 }
 0x6b6   : > { %5385 = vst [vmem:[#allocation1 + $0x1] ss:$2 sm:$0xff] %v5376_v26  ;;  %v5397_v31 = vld [vmem:[#allocation6 + $0x9] sm:$0xf]  ;;  %v5725_v26 = vld [vmem:[#allocation8 + $0x1668] sm:$0xff]  ;;  %5895 = vmatpush.msrb.mxu3 %v5705_v39 }
 0x6b7   : > { %v5377_v24 = vld [vmem:[#allocation6 + $0x10] sm:$0xf]  ;;  %v5418_v40 = vld [vmem:[#allocation6 + $0xa] sm:$0xf]  ;;  %5875 = vmatpush.msrb.mxu2 %v5686_v15 }
 0x6b8   : > { %5387 = vst [vmem:[#allocation1 + $0x10] ss:$2 sm:$0xff] %v5377_v24  ;;  %v5322_v22 = vpop.f32.mrf.mxu2  ;;  %v5684_v24 = vld [vmem:[#allocation8 + $0x1520] sm:$0xff]  ;;  %5896 = vmatpush.msrb.mxu3 %v5704_v4  ;;  %v5438_v50 = vld [vmem:[#allocation6 + $0x8] sm:$0xf] }
 0x6b9   : > { %v5323_v16 = vadd.f32 %v5322_v22, %v5300_v51  ;;  %5876 = vmatpush.msrb.mxu2 %v5685_v6  ;;  %v5439_v57 = vld [vmem:[#allocation6 + $0x10] sm:$0xf]  ;;  %v5722_v22 = vld [vmem:[#allocation8 + $0x1650] sm:$0xff]  ;;  %v5721_v51 = vld [vmem:[#allocation8 + $0x1648] sm:$0xff] }
 0x6ba   : > { %5897 = vmatpush.msrb.mxu3 %v5703_v49  ;;  %v5398_v48 = vld [vmem:[#allocation6 + $0x11] sm:$0xf] }
 0x6bb   : > { %5877 = vmatpush.msrb.mxu2 %v5684_v24  ;;  %v5419_v35 = vld [vmem:[#allocation6 + $0x12] sm:$0xf] }
 0x6bc   : > { %5898 = vmatpush.msrb.mxu3 %v5702_v45  ;;  %v5523_v33 = vld [vmem:[#allocation6 + $0x11] sm:$0xf] }
 0x6bd   : > { %v5390_v61 = vld.sshfl [vmem:[#allocation1] sm:$0xff pattern:$0x75316420]  ;;  %5878 = vmatpush.msrb.mxu2 %v5683_v2  ;;  %v5544_v21 = vld [vmem:[#allocation6 + $0x12] sm:$0xf] }
 0x6be   : > { %5744 = vmatmul.f32.vlgmr.msra.gmra.mxu0 %v5390_v61  ;;  %5406 = vst [vmem:[#allocation1 + $0x1] ss:$2 sm:$0xff] %v5397_v31  ;;  %5899 = vmatpush.msrb.mxu3 %v5701_v34  ;;  %v5719_v31 = vld [vmem:[#allocation8 + $0x1638] sm:$0xff]  ;;  %v5460_v61 = vld [vmem:[#allocation6 + $0x11] sm:$0xf] }
 0x6bf   : > { %5404 = vst [vmem:[#allocation1] ss:$2 sm:$0xff] %v5396_v1  ;;  %5879 = vmatpush.msrb.mxu2 %v5682_v17 }
 0x6c0   : > { %5900 = vmatpush.msrb.mxu3 %v5700_v19 }
 0x6c1   : > { %v5345_v55 = vpop.f32.mrf.mxu3  ;;  %5880 = vmatpush.msrb.mxu2 %v5681_v14 }
 0x6c2   : > { %v5346_v42 = vadd.f32 %v5345_v55, %v5323_v16  ;;  %v5459_v16 = vld [vmem:[#allocation6 + $0x9] sm:$0xf]  ;;  %5901 = vmatpush.msrb.mxu3 %v5699_v47 }
 0x6c3   : > { %5881 = vmatpush.msrb.mxu2 %v5680_v41 }
 0x6c4   : > { %v5354_v52 = vmul.f32 %v7605_v23, %v5346_v42  ;;  %v5648_v23 = vld [vmem:[#allocation8 + $0x1400] sm:$0xff]  ;;  %v5718_v42 = vld [vmem:[#allocation8 + $0x1630] sm:$0xff]  ;;  %5902 = vmatpush.msrb.mxu3 %v5698_v9 }
 0x6c5   : > { %5835 = vmatpush.msrb.mxu0 %v5648_v23  ;;  %v5502_v23 = vld [vmem:[#allocation6 + $0x10] sm:$0xf] }
 0x6c6   : > { %v5361_v7 = vadd.f32 %v7607_v44, %v5354_v52  ;;  %v5411_v44 = vld.sshfl [vmem:[#allocation1] sm:$0xff pattern:$0x75316420]  ;;  %5903 = vmatpush.msrb.mxu3 %v5697_v0 }
 0x6c7   : > { %5767 = vmatmul.f32.vlgmr.msra.gmra.mxu1 %v5411_v44  ;;  %5427 = vst [vmem:[#allocation1 + $0x1] ss:$2 sm:$0xff] %v5418_v40  ;;  %5912 = vmatpush.msra.mxu0 %v5727_v27  ;;  %v5480_v52 = vld [vmem:[#allocation6 + $0xa] sm:$0xf] }
 0x6c8   : > { %v5363_v56 = vmax.f32 %v5361_v7, 0.0  ;;  %5425 = vst [vmem:[#allocation1] ss:$2 sm:$0xff] %v5417_v5  ;;  %6082 = vmatpush.msra.mxu1 %v5727_v27  ;;  %5904 = vmatpush.msrb.mxu3 %v5696_v37  ;;  %v5481_v7 = vld [vmem:[#allocation6 + $0x12] sm:$0xf] }
 0x6c9   : > { %5913 = vmatpush.msra.mxu0 %v5726_v30  ;;  %v6184_v37 = vld [vmem:[#allocation13 + $0x4] ss:$0 sm:$0xff] }
 0x6ca   : > { %v5367_v18 = vrot.slane %v5363_v56, 4  ;;  %5373 = vst [vmem:[#allocation6 + $0x19] sm:$0xf] %v5363_v56  ;;  %6083 = vmatpush.msra.mxu1 %v5726_v30 }
 0x6cb   : > { %5914 = vmatpush.msra.mxu0 %v5725_v26 }
 0x6cc   : > { %5374 = vst [vmem:[#allocation6 + $0x21] sm:$0xf] %v5367_v18  ;;  %6084 = vmatpush.msra.mxu1 %v5725_v26  ;;  %v5505_v26 = vld [vmem:[#allocation6 + $0x28] sm:$0xf] }
 0x6cd   : > { %5915 = vmatpush.msra.mxu0 %v5724_v20 }
 0x6ce   : > { %6085 = vmatpush.msra.mxu1 %v5724_v20  ;;  %v5526_v20 = vld [vmem:[#allocation6 + $0x29] sm:$0xf] }
 0x6cf   : > { %v5432_v32 = vld.sshfl [vmem:[#allocation1] sm:$0xff pattern:$0x75316420]  ;;  %5916 = vmatpush.msra.mxu0 %v5723_v3 }
 0x6d0   : > { %5790 = vmatmul.f32.vlgmr.msra.gmra.mxu2 %v5432_v32  ;;  %5446 = vst [vmem:[#allocation1] ss:$2 sm:$0xff] %v5438_v50  ;;  %6086 = vmatpush.msra.mxu1 %v5723_v3  ;;  %v5547_v50 = vld [vmem:[#allocation6 + $0x2a] sm:$0xf] }
 0x6d1   : > { %v5378_v60 = vld [vmem:[#allocation6 + $0x18] sm:$0xf]  ;;  %5448 = vst [vmem:[#allocation1 + $0x1] ss:$2 sm:$0xff] %v5439_v57  ;;  %5917 = vmatpush.msra.mxu0 %v5722_v22 }
 0x6d2   : > { %5389 = vst [vmem:[#allocation1 + $0x11] ss:$2 sm:$0xff] %v5378_v60  ;;  %v5399_v12 = vld [vmem:[#allocation6 + $0x19] sm:$0xf]  ;;  %6087 = vmatpush.msra.mxu1 %v5722_v22 }
 0x6d3   : > { %5918 = vmatpush.msra.mxu0 %v5721_v51  ;;  %v5420_v46 = vld [vmem:[#allocation6 + $0x1a] sm:$0xf]  ;;  %v5441_v40 = vld [vmem:[#allocation6 + $0x20] sm:$0xf] }
 0x6d4   : > { %6088 = vmatpush.msra.mxu1 %v5721_v51  ;;  %v5440_v59 = vld [vmem:[#allocation6 + $0x18] sm:$0xf]  ;;  %v5462_v13 = vld [vmem:[#allocation6 + $0x21] sm:$0xf] }
 0x6d5   : > { %5919 = vmatpush.msra.mxu0 %v5720_v63  ;;  %v5503_v8 = vld [vmem:[#allocation6 + $0x18] sm:$0xf]  ;;  %v5483_v30 = vld [vmem:[#allocation6 + $0x22] sm:$0xf] }
 0x6d6   : > { %6089 = vmatpush.msra.mxu1 %v5720_v63  ;;  %v5461_v18 = vld [vmem:[#allocation6 + $0x19] sm:$0xf]  ;;  %v5504_v29 = vld [vmem:[#allocation6 + $0x20] sm:$0xf] }
 0x6d7   : > { %5920 = vmatpush.msra.mxu0 %v5719_v31  ;;  %v5524_v27 = vld [vmem:[#allocation6 + $0x19] sm:$0xf]  ;;  %v5525_v58 = vld [vmem:[#allocation6 + $0x21] sm:$0xf] }
 0x6d8   : > { %v5453_v55 = vld.sshfl [vmem:[#allocation1] sm:$0xff pattern:$0x75316420]  ;;  %6090 = vmatpush.msra.mxu1 %v5719_v31  ;;  %v5482_v15 = vld [vmem:[#allocation6 + $0x1a] sm:$0xf] }
 0x6d9   : > { %v5391_v1 = vld.sshfl [vmem:[#allocation1 + $0x10] sm:$0xff pattern:$0x75316420]  ;;  %5813 = vmatmul.f32.vlgmr.msra.gmra.mxu3 %v5453_v55  ;;  %5467 = vst [vmem:[#allocation1] ss:$2 sm:$0xff] %v5459_v16  ;;  %5921 = vmatpush.msra.mxu0 %v5718_v42 }
 0x6da   : > { %5747 = vmatmul.f32.gmra.mxu0 %v5391_v1  ;;  %5408 = vst [vmem:[#allocation1 + $0x10] ss:$2 sm:$0xff] %v5398_v48  ;;  %6091 = vmatpush.msra.mxu1 %v5718_v42  ;;  %v5545_v39 = vld [vmem:[#allocation6 + $0x1a] sm:$0xf]  ;;  %v5546_v57 = vld [vmem:[#allocation6 + $0x22] sm:$0xf] }
 0x6db   : > { %5410 = vst [vmem:[#allocation1 + $0x11] ss:$2 sm:$0xff] %v5399_v12  ;;  %5922 = vmatpush.msra.mxu0 %v5717_v36  ;;  %v6183_v42 = vld [vmem:[#allocation11 + $0x4] ss:$0 sm:$0xff] }
 0x6dc   : > { %5469 = vst [vmem:[#allocation1 + $0x1] ss:$2 sm:$0xff] %v5460_v61  ;;  %6092 = vmatpush.msra.mxu1 %v5717_v36 }
 0x6dd   : > { %5923 = vmatpush.msra.mxu0 %v5716_v53 }
 0x6de   : > { %6093 = vmatpush.msra.mxu1 %v5716_v53 }
 0x6df   : > { %5924 = vmatpush.msra.mxu0 %v5715_v25 }
 0x6e0   : > { %6094 = vmatpush.msra.mxu1 %v5715_v25 }
 0x6e1   : > { %5925 = vmatpush.msra.mxu0 %v5714_v11 }
 0x6e2   : > { %v5412_v38 = vld.sshfl [vmem:[#allocation1 + $0x10] sm:$0xff pattern:$0x75316420]  ;;  %6095 = vmatpush.msra.mxu1 %v5714_v11 }
 0x6e3   : > { %5770 = vmatmul.f32.gmra.mxu1 %v5412_v38  ;;  %5429 = vst [vmem:[#allocation1 + $0x10] ss:$2 sm:$0xff] %v5419_v35  ;;  %v5474_v62 = vld.sshfl [vmem:[#allocation1] sm:$0xff pattern:$0x75316420]  ;;  %5926 = vmatpush.msra.mxu0 %v5713_v10 }
 0x6e4   : > { %5431 = vst [vmem:[#allocation1 + $0x11] ss:$2 sm:$0xff] %v5420_v46  ;;  %5836 = vmatmul.f32.vlgmr.msrb.gmra.mxu0 %v5474_v62  ;;  %6096 = vmatpush.msra.mxu1 %v5713_v10 }
 0x6e5   : > { %5488 = vst [vmem:[#allocation1] ss:$2 sm:$0xff] %v5480_v52  ;;  %5927 = vmatpush.msra.mxu0 %v5712_v54 }
 0x6e6   : > { %5490 = vst [vmem:[#allocation1 + $0x1] ss:$2 sm:$0xff] %v5481_v7  ;;  %6097 = vmatpush.msra.mxu1 %v5712_v54 }
 0x6eb   : > { %v5433_v56 = vld.sshfl [vmem:[#allocation1 + $0x10] sm:$0xff pattern:$0x75316420] }
 0x6ec   : > { %5793 = vmatmul.f32.gmra.mxu2 %v5433_v56  ;;  %5450 = vst [vmem:[#allocation1 + $0x10] ss:$2 sm:$0xff] %v5440_v59 }
 0x6ed   : > { %5452 = vst [vmem:[#allocation1 + $0x11] ss:$2 sm:$0xff] %v5441_v40  ;;  %v5495_v5 = vld.sshfl [vmem:[#allocation1] sm:$0xff pattern:$0x75316420] }
 0x6ee   : > { %5859 = vmatmul.f32.vlgmr.msrb.gmra.mxu1 %v5495_v5  ;;  %5510 = vst [vmem:[#allocation1] ss:$2 sm:$0xff] %v5502_v23 }
 0x6ef   : > { %5512 = vst [vmem:[#allocation1 + $0x1] ss:$2 sm:$0xff] %v5503_v8 }
 0x6f4   : > { %v5454_v44 = vld.sshfl [vmem:[#allocation1 + $0x10] sm:$0xff pattern:$0x75316420] }
 0x6f5   : > { %5816 = vmatmul.f32.gmra.mxu3 %v5454_v44  ;;  %5471 = vst [vmem:[#allocation1 + $0x10] ss:$2 sm:$0xff] %v5461_v18 }
 0x6f6   : > { %5473 = vst [vmem:[#allocation1 + $0x11] ss:$2 sm:$0xff] %v5462_v13  ;;  %v5517_v28 = vld.sshfl [vmem:[#allocation1] sm:$0xff pattern:$0x75316420] }
 0x6f7   : > { %5882 = vmatmul.f32.vlgmr.msrb.gmra.mxu2 %v5517_v28  ;;  %5531 = vst [vmem:[#allocation1] ss:$2 sm:$0xff] %v5523_v33 }
 0x6f8   : > { %5533 = vst [vmem:[#allocation1 + $0x1] ss:$2 sm:$0xff] %v5524_v27 }
 0x6fd   : > { %v5475_v43 = vld.sshfl [vmem:[#allocation1 + $0x10] sm:$0xff pattern:$0x75316420] }
 0x6fe   : > { %5839 = vmatmul.f32.gmra.mxu0 %v5475_v43  ;;  %5492 = vst [vmem:[#allocation1 + $0x10] ss:$2 sm:$0xff] %v5482_v15 }
 0x6ff   : > { %5494 = vst [vmem:[#allocation1 + $0x11] ss:$2 sm:$0xff] %v5483_v30  ;;  %v5538_v6 = vld.sshfl [vmem:[#allocation1] sm:$0xff pattern:$0x75316420] }
 0x700   : > { %5905 = vmatmul.f32.vlgmr.msrb.gmra.mxu3 %v5538_v6  ;;  %5552 = vst [vmem:[#allocation1] ss:$2 sm:$0xff] %v5544_v21 }
 0x701   : > { %5554 = vst [vmem:[#allocation1 + $0x1] ss:$2 sm:$0xff] %v5545_v39 }
 0x706   : > { %v5496_v24 = vld.sshfl [vmem:[#allocation1 + $0x10] sm:$0xff pattern:$0x75316420] }
 0x707   : > { %5862 = vmatmul.f32.gmra.mxu1 %v5496_v24  ;;  %5514 = vst [vmem:[#allocation1 + $0x10] ss:$2 sm:$0xff] %v5504_v29 }
 0x708   : > { %v5559_v4 = vld.sshfl [vmem:[#allocation1] sm:$0xff pattern:$0x75316420]  ;;  %5516 = vst [vmem:[#allocation1 + $0x11] ss:$2 sm:$0xff] %v5505_v26 }
 0x709   : > { %5928 = vmatmul.f32.vlgmr.msra.gmra.mxu0 %v5559_v4 }
 0x70f   : > { %v5518_v60 = vld.sshfl [vmem:[#allocation1 + $0x10] sm:$0xff pattern:$0x75316420] }
 0x710   : > { %5885 = vmatmul.f32.gmra.mxu2 %v5518_v60  ;;  %5535 = vst [vmem:[#allocation1 + $0x10] ss:$2 sm:$0xff] %v5525_v58 }
 0x711   : > { %5537 = vst [vmem:[#allocation1 + $0x11] ss:$2 sm:$0xff] %v5526_v20 }
 0x718   : > { %v5539_v32 = vld.sshfl [vmem:[#allocation1 + $0x10] sm:$0xff pattern:$0x75316420] }
 0x719   : > { %5908 = vmatmul.f32.gmra.mxu3 %v5539_v32  ;;  %5556 = vst [vmem:[#allocation1 + $0x10] ss:$2 sm:$0xff] %v5546_v57 }
 0x71a   : > { %5558 = vst [vmem:[#allocation1 + $0x11] ss:$2 sm:$0xff] %v5547_v50 }
 0x721   : > { %v5560_v2 = vld.sshfl [vmem:[#allocation1 + $0x10] sm:$0xff pattern:$0x75316420] }
 0x722   : > { %5931 = vmatmul.f32.vlgmr.msra.gmra.mxu1 %v5560_v2 }
 0x73b   : > { %v5745_v49 = vpop.f32.mrf.mxu0 }
 0x744   : > { %v5768_v17 = vpop.f32.mrf.mxu1 }
 0x745   : > { %v5769_v41 = vadd.f32 %v5768_v17, %v5745_v49 }
 0x753   : > { %v5791_v45 = vpop.f32.mrf.mxu2 }
 0x754   : > { %v5792_v19 = vadd.f32 %v5791_v45, %v5769_v41 }
 0x757   : > { %v5748_v3 = vpop.f32.mrf.mxu0 }
 0x75c   : > { %v5814_v22 = vpop.f32.mrf.mxu3 }
 0x75d   : > { %v5815_v48 = vadd.f32 %v5814_v22, %v5792_v19 }
 0x760   : > { %v5771_v14 = vpop.f32.mrf.mxu1 }
 0x761   : > { %v5837_v34 = vpop.f32.mrf.mxu0  ;;  %v5772_v38 = vadd.f32 %v5771_v14, %v5748_v3 }
 0x762   : > { %v5838_v12 = vadd.f32 %v5837_v34, %v5815_v48 }
 0x76b   : > { %v5860_v1 = vpop.f32.mrf.mxu1 }
 0x76c   : > { %v5861_v31 = vadd.f32 %v5860_v1, %v5838_v12 }
 0x76f   : > { %v5794_v51 = vpop.f32.mrf.mxu2 }
 0x770   : > { %v5795_v46 = vadd.f32 %v5794_v51, %v5772_v38 }
 0x778   : > { %v5817_v63 = vpop.f32.mrf.mxu3 }
 0x779   : > { %v5818_v25 = vadd.f32 %v5817_v63, %v5795_v46 }
 0x77a   : > { %v5883_v47 = vpop.f32.mrf.mxu2 }
 0x77b   : > { %v5840_v16 = vpop.f32.mrf.mxu0  ;;  %v5884_v55 = vadd.f32 %v5883_v47, %v5861_v31 }
 0x77c   : > { %v5841_v7 = vadd.f32 %v5840_v16, %v5818_v25 }
 0x783   : > { %v5906_v61 = vpop.f32.mrf.mxu3 }
 0x784   : > { %v5907_v9 = vadd.f32 %v5906_v61, %v5884_v55  ;;  %v5863_v62 = vpop.f32.mrf.mxu1 }
 0x785   : > { %v5864_v10 = vadd.f32 %v5863_v62, %v5841_v7 }
 0x786   : > { %v5929_v0 = vpop.f32.mrf.mxu0 }
 0x787   : > { %v5930_v36 = vadd.f32 %v5929_v0, %v5907_v9 }
 0x789   : > { %v5940_v53 = vmul.f32 %v6183_v42, %v5930_v36 }
 0x78b   : > { %v5947_v35 = vadd.f32 %v6184_v37, %v5940_v53 }
 0x78d   : > { %v5949_v52 = vmax.f32 %v5947_v35, 0.0 }
 0x78f   : > { %5951 = vst [vmem:[%s240_s12] sm:$0xff] %v5949_v52 }
 0x793   : > { %v5886_v11 = vpop.f32.mrf.mxu2 }
 0x794   : > { %v5887_v54 = vadd.f32 %v5886_v11, %v5864_v10 }
 0x79c   : > { %v5909_v59 = vpop.f32.mrf.mxu3 }
 0x79d   : > { %v5910_v56 = vadd.f32 %v5909_v59, %v5887_v54 }
 0x79f   : > { %v5932_v23 = vpop.f32.mrf.mxu1 }
 0x7a0   : > { %v5933_v40 = vadd.f32 %v5932_v23, %v5910_v56 }
 0x7a2   : > { %v5941_v5 = vmul.f32 %v6183_v42, %v5933_v40 }
 0x7a4   : > { %v5948_v8 = vadd.f32 %v6184_v37, %v5941_v5 }
 0x7a6   : > { %v5950_v18 = vmax.f32 %v5948_v8, 0.0 }
 0x7a8   : > { %5952 = vst [vmem:[%s240_s12 + $0x8] sm:$0xff] %v5950_v18 }
 0x7a9   : > { %6313 = shalt.err (!%p6310_p8)
}
 0x7aa   : > { %s6366_s9 = smov 128   ;;  %s6367_s10 = smov 8  }
 0x7ab   : > { %6110 = dma.vmem_to_hbm [thread:$0]  (%p6431_p5), %s5967_s23, 256, %s5969_s28, %s5954_s29, %s6366_s9, %s6366_s9, %s6367_s10  }
 0x7ac PF: > { %p6132_p9 = scmp.ge.s32.totalorder %s6356_s18, 2  ;;  %s5983_s11 = sand.u32 1, %s6344_s15  }
 0x7ad   : > { %s5984_s12 = scalar_lea.sflag [#allocation10], %s5983_s11 }
 0x7ae   : > { %p6123_p10 = pnand %p6132_p9, %p6435_p6 }
 0x7b0   : > { %p6124_p11 = pneg %p6123_p10 }
 0x7b2   : > { %6339 = dma.done.wait (%p6124_p11), %s5984_s12, 256  }
 0x7b3   : > { %6341 = vsyncadd (%p6124_p11), %s5984_s12, 4294967040  ;;  %p16_p12 = scmp.ge.s32.totalorder %s6418_s21, 4   ;;  %s7727_s15 = smov %s6348_s16 }
 0x7b4   : > { %s7728_s16 = smov %s6352_s17  ;;  %s7729_s17 = smov %s6429_s24 }
 0x7b5   : > { %s7730_s18 = smov %s6418_s21  ;;  %18 = sbr.rel (!%p16_p12) target bundleno = 5 (0x5), region = 187 }
 0x7ba   :  { %5990 = vsyncpa [#allocation9], 1 }
 0x7bb   :  { %5992 = vsyncpa [#allocation9 + $0x1], 1 }
 0x7bc   :  { %5993 = vsyncpa [#allocation12], 1 }
 0x7bd   :  { %5994 = vsyncpa [#allocation10], 1 }
 0x7be   :  { %5996 = vsyncpa [#allocation10 + $0x1], 1 }

</bundles_post_ra>
